<compile_context>
chip_gen: v7x
topology: tpu7x:2x2x1
jax: 0.10.0
libtpu: 0.0.40
codegen_flags: <defaults>
</compile_context>

<pallas_src>
import numpy as np
import jax
import jax.numpy as jnp
from jax import lax
from jax.experimental import pallas as pl
from jax.experimental.pallas import tpu as pltpu

# ----------------------------- small config ---------------------------------
B = 2            # batch
C_IN = 3         # input channels (defaults: pos_emb=False, bottom=False)
CPAD = 8         # input channels zero-padded to 8 per dw-slab
H = W = 16       # input spatial size
Z = 32           # z_dim (small)

H2, W2 = H // 2, W // 2          # 8
H4, W4 = H // 4, W // 4          # 4

RW1, RW2, RW4 = W + 2, W2 + 2, W4 + 2            # padded row widths 18/10/6
NLAY1 = (H + 2) * RW1                            # 324 layout tokens / image
NLAY2 = (H2 + 2) * RW2                           # 100
NLAY4 = (H4 + 2) * RW4                           # 36


def _round8(n):
    return ((n + 7) // 8) * 8


PAD1 = _round8(RW1 + 1)                          # 24
PAD2 = _round8(RW2 + 1)                          # 16
PAD4 = _round8(RW4 + 1)                          # 8
TOT1 = NLAY1 + 2 * PAD1                          # 372
TOT2 = NLAY2 + 2 * PAD2                          # 132
TOT4 = NLAY4 + 2 * PAD4                          # 52


# --------------------------- in-kernel helpers -------------------------------
def _conv3x3_dh(scr_ref, w_ref, nlay, rw, pad, col0, ncol):
    """3x3 'same' conv over the width-padded token layout.

    scr_ref holds, at sublane pad+t, the channels of tokens t-1 / t / t+1 side
    by side along lanes (dw pre-shifted slabs), so the 9-tap conv collapses to
    3 MXU matmuls (one per dh) with K = 3*Cin.  Returns (nlay, Cout) f32."""
    acc = None
    for idx, dh in enumerate((-1, 0, 1)):
        lhs = scr_ref[pl.ds(pad + dh * rw, nlay), pl.ds(col0, ncol)]
        y = jnp.dot(lhs.astype(jnp.bfloat16), w_ref[idx],
                    preferred_element_type=jnp.float32)
        acc = y if acc is None else acc + y
    return acc


def _fill_slabs(scr_ref, val, nlay, pad, col0, cw):
    """Store val (nlay, cw) three times, row-shifted by dw=-1/0/+1, into the
    lane slabs [col0 + j*cw : col0 + (j+1)*cw)."""
    for j in range(3):                           # slab j holds tokens t + (j-1)
        scr_ref[pl.ds(pad + 1 - j, nlay), pl.ds(col0 + j * cw, cw)] = val


def _zero_head_tail(scr_ref, nlay, pad):
    """Zero scratch rows outside the filled slab range so conv reads at layout
    border positions stay finite (their outputs are masked / discarded)."""
    total, width = scr_ref.shape
    scr_ref[pl.ds(0, pad + 1), :] = jnp.zeros((pad + 1, width), jnp.float32)
    tail = total - (pad - 1 + nlay)
    scr_ref[pl.ds(pad - 1 + nlay, tail), :] = jnp.zeros((tail, width),
                                                        jnp.float32)


# ------------------------------- the kernel ----------------------------------
def _encoder_kernel(
    x_ref, m1_ref, m2_ref, m4_ref,
    d12_ref, d24_ref, u42_ref, u21_ref,
    wd1_ref, bd1_ref, wd2_ref, bd2_ref, wd3_ref, bd3_ref,
    wu3_ref, bu3_ref, wu2_ref, bu2_ref, wu1_ref, bu1_ref,
    out_ref,
    cat1, cat2, scr3,
):
    # Scratch head/tail must be finite (reads there feed border outputs only).
    _zero_head_tail(cat1, NLAY1, PAD1)
    _zero_head_tail(cat2, NLAY2, PAD2)
    _zero_head_tail(scr3, NLAY4, PAD4)

    # enc_down_1: Conv(3->Z, s=1) + ReLU
    h = _conv3x3_dh(x_ref, wd1_ref, NLAY1, RW1, PAD1, 0, 3 * CPAD)
    d1 = jnp.maximum(h + bd1_ref[...], 0.0) * m1_ref[...]
    _fill_slabs(cat1, d1, NLAY1, PAD1, 0, Z)

    # enc_down_2: Conv(Z->Z, s=2) + ReLU  == full-res conv + even-pixel select
    t = _conv3x3_dh(cat1, wd2_ref, NLAY1, RW1, PAD1, 0, 3 * Z)
    t = jnp.dot(d12_ref[...], t.astype(jnp.bfloat16),
                preferred_element_type=jnp.float32)
    d2 = jnp.maximum(t + bd2_ref[...], 0.0) * m2_ref[...]
    _fill_slabs(cat2, d2, NLAY2, PAD2, 0, Z)

    # enc_down_3: Conv(Z->Z, s=2) + ReLU
    t = _conv3x3_dh(cat2, wd3_ref, NLAY2, RW2, PAD2, 0, 3 * Z)
    t = jnp.dot(d24_ref[...], t.astype(jnp.bfloat16),
                preferred_element_type=jnp.float32)
    d3 = jnp.maximum(t + bd3_ref[...], 0.0) * m4_ref[...]
    _fill_slabs(scr3, d3, NLAY4, PAD4, 0, Z)

    # enc_up_3: Conv(Z->Z, s=1) + ReLU + bilinear 2x (constant matrix)
    t = _conv3x3_dh(scr3, wu3_ref, NLAY4, RW4, PAD4, 0, 3 * Z)
    t = jnp.maximum(t + bu3_ref[...], 0.0)
    u3 = jnp.dot(u42_ref[...], t.astype(jnp.bfloat16),
                 preferred_element_type=jnp.float32)
    _fill_slabs(cat2, u3, NLAY2, PAD2, 3 * Z, Z)

    # enc_up_2: Conv(cat[u3, d2] -> Z, s=1) + ReLU + bilinear 2x  (fused K=192)
    t = _conv3x3_dh(cat2, wu2_ref, NLAY2, RW2, PAD2, 0, 6 * Z)
    t = jnp.maximum(t + bu2_ref[...], 0.0)
    u2 = jnp.dot(u21_ref[...], t.astype(jnp.bfloat16),
                 preferred_element_type=jnp.float32)
    _fill_slabs(cat1, u2, NLAY1, PAD1, 3 * Z, Z)

    # enc_up_1: Conv(cat[u2, d1] -> Z, s=1), no ReLU  (fused K=192)
    t = _conv3x3_dh(cat1, wu1_ref, NLAY1, RW1, PAD1, 0, 6 * Z)
    out_ref[...] = t + bu1_ref[...]


# --------------------- host-side constant operators --------------------------
def _interior_mask(h, w):
    rw = w + 2
    m = np.zeros(((h + 2) * rw, 1), np.float32)
    for hh in range(h):
        for ww in range(w):
            m[(hh + 1) * rw + (ww + 1), 0] = 1.0
    return m


def _down_select(h, w):
    ho, wo = h // 2, w // 2
    rwi, rwo = w + 2, wo + 2
    d = np.zeros(((ho + 2) * rwo, (h + 2) * rwi), np.float32)
    for hh in range(ho):
        for ww in range(wo):
            d[(hh + 1) * rwo + (ww + 1),
              (2 * hh + 1) * rwi + (2 * ww + 1)] = 1.0
    return d


def _up1d(n):
    # 1-D bilinear x2, align_corners=False (matches nn.Upsample).
    u = np.zeros((2 * n, n), np.float32)
    for o in range(2 * n):
        src = (o + 0.5) / 2.0 - 0.5
        i0 = int(np.floor(src))
        f = src - i0
        u[o, min(max(i0, 0), n - 1)] += 1.0 - f
        u[o, min(max(i0 + 1, 0), n - 1)] += f
    return u


def _up_bilinear(h, w):
    uh, uw = _up1d(h), _up1d(w)
    ho, wo = 2 * h, 2 * w
    rwi, rwo = w + 2, wo + 2
    u = np.zeros(((ho + 2) * rwo, (h + 2) * rwi), np.float32)
    for oh in range(ho):
        for ow in range(wo):
            r = (oh + 1) * rwo + (ow + 1)
            for ih in range(h):
                ch = uh[oh, ih]
                if ch == 0.0:
                    continue
                for iw in range(w):
                    cw = uw[ow, iw]
                    if cw == 0.0:
                        continue
                    u[r, (ih + 1) * rwi + (iw + 1)] = ch * cw
    return u


def build_consts():
    bf = jnp.bfloat16
    return dict(
        m1=jnp.asarray(_interior_mask(H, W)),
        m2=jnp.asarray(_interior_mask(H2, W2)),
        m4=jnp.asarray(_interior_mask(H4, W4)),
        d12=jnp.asarray(_down_select(H, W), dtype=bf),
        d24=jnp.asarray(_down_select(H2, W2), dtype=bf),
        u42=jnp.asarray(_up_bilinear(H4, W4), dtype=bf),
        u21=jnp.asarray(_up_bilinear(H2, W2), dtype=bf),
    )


# ------------------------------ parameters -----------------------------------
def init_params(key):
    ks = iter(jax.random.split(key, 16))

    def conv_w(cout, cin):                       # torch layout (cout, cin, 3, 3)
        return 0.05 * jax.random.normal(next(ks), (cout, cin, 3, 3), jnp.float32)

    def conv_b(cout):
        return 0.05 * jax.random.normal(next(ks), (cout,), jnp.float32)

    return dict(
        w_down1=conv_w(Z, C_IN), b_down1=conv_b(Z),
        w_down2=conv_w(Z, Z), b_down2=conv_b(Z),
        w_down3=conv_w(Z, Z), b_down3=conv_b(Z),
        w_up3=conv_w(Z, Z), b_up3=conv_b(Z),
        w_up2=conv_w(Z, 2 * Z), b_up2=conv_b(Z),
        w_up1=conv_w(Z, 2 * Z), b_up1=conv_b(Z),
    )


def _pack_w_dh(parts):
    """parts: list of (w_torch (cout,cin,3,3), pad_to).  Lane order of the LHS
    is [part0 dw-1 | part0 dw0 | part0 dw+1 | part1 dw-1 | ...].  Returns a
    (3, K, cout) bf16 weight, one K-stacked matrix per dh."""
    per_dh = []
    for dh in range(3):
        rows = []
        for (w, pad_to) in parts:
            cin = w.shape[1]
            for dw in range(3):
                blk = jnp.transpose(w[:, :, dh, dw], (1, 0))     # (cin, cout)
                if pad_to > cin:
                    blk = jnp.pad(blk, ((0, pad_to - cin), (0, 0)))
                rows.append(blk)
        per_dh.append(jnp.concatenate(rows, axis=0))
    return jnp.stack(per_dh, axis=0).astype(jnp.bfloat16)


def kernel_params(tp):
    # Concat-lane order: cat2 = [d2 | u3], cat1 = [d1 | u2]; torch concats were
    # [u3, d2] and [u2, d1], so split the up-conv weights accordingly.
    return dict(
        wd1=_pack_w_dh([(tp["w_down1"], CPAD)]), bd1=tp["b_down1"].reshape(1, Z),
        wd2=_pack_w_dh([(tp["w_down2"], Z)]), bd2=tp["b_down2"].reshape(1, Z),
        wd3=_pack_w_dh([(tp["w_down3"], Z)]), bd3=tp["b_down3"].reshape(1, Z),
        wu3=_pack_w_dh([(tp["w_up3"], Z)]), bu3=tp["b_up3"].reshape(1, Z),
        wu2=_pack_w_dh([(tp["w_up2"][:, Z:], Z), (tp["w_up2"][:, :Z], Z)]),
        bu2=tp["b_up2"].reshape(1, Z),
        wu1=_pack_w_dh([(tp["w_up1"][:, Z:], Z), (tp["w_up1"][:, :Z], Z)]),
        bu1=tp["b_up1"].reshape(1, Z),
    )


# -------------------------------- forward ------------------------------------
def _make_input_slabs(x_nchw):
    """(B,3,H,W) NCHW -> (B, TOT1, 3*CPAD) width-padded, dw-pre-shifted slabs."""
    x = jnp.transpose(x_nchw, (0, 2, 3, 1))                       # (B,H,W,3)
    x = jnp.pad(x, ((0, 0), (1, 1), (1, 1), (0, CPAD - C_IN)))    # (B,H+2,W+2,8)
    tok = x.reshape(B, NLAY1, CPAD)
    buf = jnp.zeros((B, TOT1, 3 * CPAD), jnp.float32)
    for j in range(3):
        buf = buf.at[:, PAD1 + 1 - j: PAD1 + 1 - j + NLAY1,
                     j * CPAD:(j + 1) * CPAD].set(tok)
    return buf


def _const_spec(arr):
    nd = arr.ndim
    return pl.BlockSpec(arr.shape, lambda b, _n=nd: (0,) * _n)


def encoder_forward(x_nchw, kp, consts):
    """x: (B, 3, H, W) NCHW -> feature map (B, Z, H, W) NCHW."""
    xbuf = _make_input_slabs(x_nchw)

    const_ops = [
        consts["m1"], consts["m2"], consts["m4"],
        consts["d12"], consts["d24"], consts["u42"], consts["u21"],
        kp["wd1"], kp["bd1"], kp["wd2"], kp["bd2"], kp["wd3"], kp["bd3"],
        kp["wu3"], kp["bu3"], kp["wu2"], kp["bu2"], kp["wu1"], kp["bu1"],
    ]
    in_specs = ([pl.BlockSpec((None, TOT1, 3 * CPAD), lambda b: (b, 0, 0))]
                + [_const_spec(a) for a in const_ops])

    out = pl.pallas_call(
        _encoder_kernel,
        out_shape=jax.ShapeDtypeStruct((B, NLAY1, Z), jnp.float32),
        grid=(B,),
        in_specs=in_specs,
        out_specs=pl.BlockSpec((None, NLAY1, Z), lambda b: (b, 0, 0)),
        scratch_shapes=[
            pltpu.VMEM((TOT1, 6 * Z), jnp.float32),   # cat1: [d1 | u2] slabs
            pltpu.VMEM((TOT2, 6 * Z), jnp.float32),   # cat2: [d2 | u3] slabs
            pltpu.VMEM((TOT4, 3 * Z), jnp.float32),   # d3 slabs
        ],
        compiler_params=pltpu.CompilerParams(
            dimension_semantics=("parallel",)),       # 2 TCs on v7x, loop else
    )(xbuf, *const_ops)

    out = out.reshape(B, H + 2, W + 2, Z)[:, 1:-1, 1:-1, :]
    return jnp.transpose(out, (0, 3, 1, 2))


# ----------------------- pure-JAX reference (for checking) -------------------
def reference_forward(x_nchw, tp):
    def conv(x, w, b, stride):
        w_hwio = jnp.transpose(w, (2, 3, 1, 0))
        y = lax.conv_general_dilated(
            x, w_hwio, (stride, stride), [(1, 1), (1, 1)],
            dimension_numbers=("NHWC", "HWIO", "NHWC"),
            precision=lax.Precision.HIGHEST)
        return y + b.reshape(1, 1, 1, -1)

    def up2x(x):
        uh = jnp.asarray(_up1d(x.shape[1]))
        uw = jnp.asarray(_up1d(x.shape[2]))
        y = jnp.einsum("pi,biwc->bpwc", uh, x)
        return jnp.einsum("qw,bpwc->bpqc", uw, y)

    x = jnp.transpose(x_nchw, (0, 2, 3, 1))
    d1 = jax.nn.relu(conv(x, tp["w_down1"], tp["b_down1"], 1))
    d2 = jax.nn.relu(conv(d1, tp["w_down2"], tp["b_down2"], 2))
    d3 = jax.nn.relu(conv(d2, tp["w_down3"], tp["b_down3"], 2))
    u3 = up2x(jax.nn.relu(conv(d3, tp["w_up3"], tp["b_up3"], 1)))
    u2 = up2x(jax.nn.relu(conv(jnp.concatenate([u3, d2], -1),
                               tp["w_up2"], tp["b_up2"], 1)))
    fm = conv(jnp.concatenate([u2, d1], -1), tp["w_up1"], tp["b_up1"], 1)
    return jnp.transpose(fm, (0, 3, 1, 2))


# ----------------------------------- main -------------------------------------
if __name__ == "__main__":
    key = jax.random.PRNGKey(0)
    k_params, k_x = jax.random.split(key)

    torch_params = init_params(k_params)
    kparams = kernel_params(torch_params)
    consts = build_consts()
    x = jax.random.normal(k_x, (B, C_IN, H, W), dtype=jnp.float32)

    fwd = jax.jit(lambda xx: encoder_forward(xx, kparams, consts))
    out = jax.block_until_ready(fwd(x))

    assert out.shape == (B, Z, H, W), out.shape
    assert out.dtype == jnp.float32
    assert bool(jnp.all(jnp.isfinite(out)))

    ref = reference_forward(x, torch_params)
    max_err = float(jnp.max(jnp.abs(out - ref)))
    assert max_err < 2e-2, max_err

    print("KERNEL_OK")
</pallas_src>

<mosaic_0001>
module attributes {stable_mosaic.version = 11 : i64} {
  func.func @_encoder_kernel(%arg0: i32, %arg1: memref<1x372x24xf32, #tpu.memory_space<vmem>>, %arg2: memref<324x1xf32, #tpu.memory_space<vmem>>, %arg3: memref<100x1xf32, #tpu.memory_space<vmem>>, %arg4: memref<36x1xf32, #tpu.memory_space<vmem>>, %arg5: memref<100x324xbf16, #tpu.memory_space<vmem>>, %arg6: memref<36x100xbf16, #tpu.memory_space<vmem>>, %arg7: memref<100x36xbf16, #tpu.memory_space<vmem>>, %arg8: memref<324x100xbf16, #tpu.memory_space<vmem>>, %arg9: memref<3x24x32xbf16, #tpu.memory_space<vmem>>, %arg10: memref<1x32xf32, #tpu.memory_space<vmem>>, %arg11: memref<3x96x32xbf16, #tpu.memory_space<vmem>>, %arg12: memref<1x32xf32, #tpu.memory_space<vmem>>, %arg13: memref<3x96x32xbf16, #tpu.memory_space<vmem>>, %arg14: memref<1x32xf32, #tpu.memory_space<vmem>>, %arg15: memref<3x96x32xbf16, #tpu.memory_space<vmem>>, %arg16: memref<1x32xf32, #tpu.memory_space<vmem>>, %arg17: memref<3x192x32xbf16, #tpu.memory_space<vmem>>, %arg18: memref<1x32xf32, #tpu.memory_space<vmem>>, %arg19: memref<3x192x32xbf16, #tpu.memory_space<vmem>>, %arg20: memref<1x32xf32, #tpu.memory_space<vmem>>, %arg21: memref<1x324x32xf32, #tpu.memory_space<vmem>>, %arg22: memref<372x192xf32, #tpu.memory_space<vmem>>, %arg23: memref<132x192xf32, #tpu.memory_space<vmem>>, %arg24: memref<52x96xf32, #tpu.memory_space<vmem>>) attributes {dimension_semantics = [#tpu.dimension_semantics<parallel>], iteration_bounds = array<i64: 2>, scalar_prefetch = 0 : i64, scratch_operands = 3 : i64, tpu.core_type = #tpu.core_type<tc>, window_params = [{transform_indices = @transform_0, window_bounds = array<i64: 1, 372, 24>}, {pipeline_mode = #tpu.pipeline_mode<synchronous>, transform_indices = @transform_1, window_bounds = array<i64: 324, 1>}, {pipeline_mode = #tpu.pipeline_mode<synchronous>, transform_indices = @transform_2, window_bounds = array<i64: 100, 1>}, {pipeline_mode = #tpu.pipeline_mode<synchronous>, transform_indices = @transform_3, window_bounds = array<i64: 36, 1>}, {pipeline_mode = #tpu.pipeline_mode<synchronous>, transform_indices = @transform_4, window_bounds = array<i64: 100, 324>}, {pipeline_mode = #tpu.pipeline_mode<synchronous>, transform_indices = @transform_5, window_bounds = array<i64: 36, 100>}, {pipeline_mode = #tpu.pipeline_mode<synchronous>, transform_indices = @transform_6, window_bounds = array<i64: 100, 36>}, {pipeline_mode = #tpu.pipeline_mode<synchronous>, transform_indices = @transform_7, window_bounds = array<i64: 324, 100>}, {pipeline_mode = #tpu.pipeline_mode<synchronous>, transform_indices = @transform_8, window_bounds = array<i64: 3, 24, 32>}, {pipeline_mode = #tpu.pipeline_mode<synchronous>, transform_indices = @transform_9, window_bounds = array<i64: 1, 32>}, {pipeline_mode = #tpu.pipeline_mode<synchronous>, transform_indices = @transform_10, window_bounds = array<i64: 3, 96, 32>}, {pipeline_mode = #tpu.pipeline_mode<synchronous>, transform_indices = @transform_11, window_bounds = array<i64: 1, 32>}, {pipeline_mode = #tpu.pipeline_mode<synchronous>, transform_indices = @transform_12, window_bounds = array<i64: 3, 96, 32>}, {pipeline_mode = #tpu.pipeline_mode<synchronous>, transform_indices = @transform_13, window_bounds = array<i64: 1, 32>}, {pipeline_mode = #tpu.pipeline_mode<synchronous>, transform_indices = @transform_14, window_bounds = array<i64: 3, 96, 32>}, {pipeline_mode = #tpu.pipeline_mode<synchronous>, transform_indices = @transform_15, window_bounds = array<i64: 1, 32>}, {pipeline_mode = #tpu.pipeline_mode<synchronous>, transform_indices = @transform_16, window_bounds = array<i64: 3, 192, 32>}, {pipeline_mode = #tpu.pipeline_mode<synchronous>, transform_indices = @transform_17, window_bounds = array<i64: 1, 32>}, {pipeline_mode = #tpu.pipeline_mode<synchronous>, transform_indices = @transform_18, window_bounds = array<i64: 3, 192, 32>}, {pipeline_mode = #tpu.pipeline_mode<synchronous>, transform_indices = @transform_19, window_bounds = array<i64: 1, 32>}, {transform_indices = @transform_20, window_bounds = array<i64: 1, 324, 32>}]} {
    %cst = arith.constant 0.000000e+00 : f32
    %0 = vector.broadcast %cst : f32 to vector<25x192xf32>
    %c0 = arith.constant 0 : index
    %c0_0 = arith.constant 0 : index
    %1 = vector.load %arg22[%c0, %c0_0] : memref<372x192xf32, #tpu.memory_space<vmem>>, vector<25x192xf32>
    tpu.vector_store %arg22[%c0, %c0_0], %0 {strides = array<i32>} : memref<372x192xf32, #tpu.memory_space<vmem>>, vector<25x192xf32>,
    %cst_1 = arith.constant 0.000000e+00 : f32
    %2 = vector.broadcast %cst_1 : f32 to vector<25x192xf32>
    %c347 = arith.constant 347 : index
    %c0_2 = arith.constant 0 : index
    %3 = vector.load %arg22[%c347, %c0_2] : memref<372x192xf32, #tpu.memory_space<vmem>>, vector<25x192xf32>
    tpu.vector_store %arg22[%c347, %c0_2], %2 {strides = array<i32>} : memref<372x192xf32, #tpu.memory_space<vmem>>, vector<25x192xf32>,
    %cst_3 = arith.constant 0.000000e+00 : f32
    %4 = vector.broadcast %cst_3 : f32 to vector<17x192xf32>
    %c0_4 = arith.constant 0 : index
    %c0_5 = arith.constant 0 : index
    %5 = vector.load %arg23[%c0_4, %c0_5] : memref<132x192xf32, #tpu.memory_space<vmem>>, vector<17x192xf32>
    tpu.vector_store %arg23[%c0_4, %c0_5], %4 {strides = array<i32>} : memref<132x192xf32, #tpu.memory_space<vmem>>, vector<17x192xf32>,
    %cst_6 = arith.constant 0.000000e+00 : f32
    %6 = vector.broadcast %cst_6 : f32 to vector<17x192xf32>
    %c115 = arith.constant 115 : index
    %c0_7 = arith.constant 0 : index
    %7 = vector.load %arg23[%c115, %c0_7] : memref<132x192xf32, #tpu.memory_space<vmem>>, vector<17x192xf32>
    tpu.vector_store %arg23[%c115, %c0_7], %6 {strides = array<i32>} : memref<132x192xf32, #tpu.memory_space<vmem>>, vector<17x192xf32>,
    %cst_8 = arith.constant 0.000000e+00 : f32
    %8 = vector.broadcast %cst_8 : f32 to vector<9x96xf32>
    %c0_9 = arith.constant 0 : index
    %c0_10 = arith.constant 0 : index
    %9 = vector.load %arg24[%c0_9, %c0_10] : memref<52x96xf32, #tpu.memory_space<vmem>>, vector<9x96xf32>
    tpu.vector_store %arg24[%c0_9, %c0_10], %8 {strides = array<i32>} : memref<52x96xf32, #tpu.memory_space<vmem>>, vector<9x96xf32>,
    %cst_11 = arith.constant 0.000000e+00 : f32
    %10 = vector.broadcast %cst_11 : f32 to vector<9x96xf32>
    %c43 = arith.constant 43 : index
    %c0_12 = arith.constant 0 : index
    %11 = vector.load %arg24[%c43, %c0_12] : memref<52x96xf32, #tpu.memory_space<vmem>>, vector<9x96xf32>
    tpu.vector_store %arg24[%c43, %c0_12], %10 {strides = array<i32>} : memref<52x96xf32, #tpu.memory_space<vmem>>, vector<9x96xf32>,
    %c0_13 = arith.constant 0 : index
    %c6 = arith.constant 6 : index
    %c0_14 = arith.constant 0 : index
    %12 = vector.load %arg1[%c0_13, %c6, %c0_14] : memref<1x372x24xf32, #tpu.memory_space<vmem>>, vector<1x324x24xf32>
    %13 = vector.shape_cast %12 : vector<1x324x24xf32> to vector<324x24xf32>
    %14 = arith.truncf %13 : vector<324x24xf32> to vector<324x24xbf16>
    %c0_15 = arith.constant 0 : index
    %c0_16 = arith.constant 0 : index
    %c0_17 = arith.constant 0 : index
    %15 = vector.load %arg9[%c0_15, %c0_16, %c0_17] : memref<3x24x32xbf16, #tpu.memory_space<vmem>>, vector<1x24x32xbf16>
    %16 = vector.shape_cast %15 : vector<1x24x32xbf16> to vector<24x32xbf16>
    %cst_18 = arith.constant dense<0.000000e+00> : vector<324x32xf32>
    %17 = tpu.matmul %14, %16, %cst_18 {dimension_numbers = #tpu.dot_dimension_numbers<[1], [0], [0], [1], [0, 0, 1, 1], [], []>} : vector<324x24xbf16>, vector<24x32xbf16>, vector<324x32xf32> -> vector<324x32xf32>
    %c0_19 = arith.constant 0 : index
    %c24 = arith.constant 24 : index
    %c0_20 = arith.constant 0 : index
    %18 = vector.load %arg1[%c0_19, %c24, %c0_20] : memref<1x372x24xf32, #tpu.memory_space<vmem>>, vector<1x324x24xf32>
    %19 = vector.shape_cast %18 : vector<1x324x24xf32> to vector<324x24xf32>
    %20 = arith.truncf %19 : vector<324x24xf32> to vector<324x24xbf16>
    %c1 = arith.constant 1 : index
    %c0_21 = arith.constant 0 : index
    %c0_22 = arith.constant 0 : index
    %21 = vector.load %arg9[%c1, %c0_21, %c0_22] : memref<3x24x32xbf16, #tpu.memory_space<vmem>>, vector<1x24x32xbf16>
    %22 = vector.shape_cast %21 : vector<1x24x32xbf16> to vector<24x32xbf16>
    %cst_23 = arith.constant dense<0.000000e+00> : vector<324x32xf32>
    %23 = tpu.matmul %20, %22, %cst_23 {dimension_numbers = #tpu.dot_dimension_numbers<[1], [0], [0], [1], [0, 0, 1, 1], [], []>} : vector<324x24xbf16>, vector<24x32xbf16>, vector<324x32xf32> -> vector<324x32xf32>
    %24 = arith.addf %17, %23 : vector<324x32xf32>
    %c0_24 = arith.constant 0 : index
    %c42 = arith.constant 42 : index
    %c0_25 = arith.constant 0 : index
    %25 = vector.load %arg1[%c0_24, %c42, %c0_25] : memref<1x372x24xf32, #tpu.memory_space<vmem>>, vector<1x324x24xf32>
    %26 = vector.shape_cast %25 : vector<1x324x24xf32> to vector<324x24xf32>
    %27 = arith.truncf %26 : vector<324x24xf32> to vector<324x24xbf16>
    %c2 = arith.constant 2 : index
    %c0_26 = arith.constant 0 : index
    %c0_27 = arith.constant 0 : index
    %28 = vector.load %arg9[%c2, %c0_26, %c0_27] : memref<3x24x32xbf16, #tpu.memory_space<vmem>>, vector<1x24x32xbf16>
    %29 = vector.shape_cast %28 : vector<1x24x32xbf16> to vector<24x32xbf16>
    %cst_28 = arith.constant dense<0.000000e+00> : vector<324x32xf32>
    %30 = tpu.matmul %27, %29, %cst_28 {dimension_numbers = #tpu.dot_dimension_numbers<[1], [0], [0], [1], [0, 0, 1, 1], [], []>} : vector<324x24xbf16>, vector<24x32xbf16>, vector<324x32xf32> -> vector<324x32xf32>
    %31 = arith.addf %24, %30 : vector<324x32xf32>
    %c0_29 = arith.constant 0 : index
    %c0_30 = arith.constant 0 : index
    %32 = vector.load %arg10[%c0_29, %c0_30] : memref<1x32xf32, #tpu.memory_space<vmem>>, vector<1x32xf32>
    %33 = vector.broadcast %32 : vector<1x32xf32> to vector<324x32xf32>
    %34 = arith.addf %31, %33 : vector<324x32xf32>
    %cst_31 = arith.constant 0.000000e+00 : f32
    %35 = vector.broadcast %cst_31 : f32 to vector<324x32xf32>
    %36 = arith.maximumf %34, %35 : vector<324x32xf32>
    %c0_32 = arith.constant 0 : index
    %c0_33 = arith.constant 0 : index
    %37 = vector.load %arg2[%c0_32, %c0_33] : memref<324x1xf32, #tpu.memory_space<vmem>>, vector<324x1xf32>
    %38 = vector.broadcast %37 : vector<324x1xf32> to vector<324x32xf32>
    %39 = arith.mulf %36, %38 : vector<324x32xf32>
    %c25 = arith.constant 25 : index
    %c0_34 = arith.constant 0 : index
    %40 = vector.load %arg22[%c25, %c0_34] : memref<372x192xf32, #tpu.memory_space<vmem>>, vector<324x32xf32>
    tpu.vector_store %arg22[%c25, %c0_34], %39 {strides = array<i32>} : memref<372x192xf32, #tpu.memory_space<vmem>>, vector<324x32xf32>,
    %c24_35 = arith.constant 24 : index
    %c32 = arith.constant 32 : index
    %41 = vector.load %arg22[%c24_35, %c32] : memref<372x192xf32, #tpu.memory_space<vmem>>, vector<324x32xf32>
    tpu.vector_store %arg22[%c24_35, %c32], %39 {strides = array<i32>} : memref<372x192xf32, #tpu.memory_space<vmem>>, vector<324x32xf32>,
    %c23 = arith.constant 23 : index
    %c64 = arith.constant 64 : index
    %42 = vector.load %arg22[%c23, %c64] : memref<372x192xf32, #tpu.memory_space<vmem>>, vector<324x32xf32>
    tpu.vector_store %arg22[%c23, %c64], %39 {strides = array<i32>} : memref<372x192xf32, #tpu.memory_space<vmem>>, vector<324x32xf32>,
    %c6_36 = arith.constant 6 : index
    %c0_37 = arith.constant 0 : index
    %43 = vector.load %arg22[%c6_36, %c0_37] : memref<372x192xf32, #tpu.memory_space<vmem>>, vector<324x96xf32>
    %44 = arith.truncf %43 : vector<324x96xf32> to vector<324x96xbf16>
    %c0_38 = arith.constant 0 : index
    %c0_39 = arith.constant 0 : index
    %c0_40 = arith.constant 0 : index
    %45 = vector.load %arg11[%c0_38, %c0_39, %c0_40] : memref<3x96x32xbf16, #tpu.memory_space<vmem>>, vector<1x96x32xbf16>
    %46 = vector.shape_cast %45 : vector<1x96x32xbf16> to vector<96x32xbf16>
    %cst_41 = arith.constant dense<0.000000e+00> : vector<324x32xf32>
    %47 = tpu.matmul %44, %46, %cst_41 {dimension_numbers = #tpu.dot_dimension_numbers<[1], [0], [0], [1], [0, 0, 1, 1], [], []>} : vector<324x96xbf16>, vector<96x32xbf16>, vector<324x32xf32> -> vector<324x32xf32>
    %c24_42 = arith.constant 24 : index
    %c0_43 = arith.constant 0 : index
    %48 = vector.load %arg22[%c24_42, %c0_43] : memref<372x192xf32, #tpu.memory_space<vmem>>, vector<324x96xf32>
    %49 = arith.truncf %48 : vector<324x96xf32> to vector<324x96xbf16>
    %c1_44 = arith.constant 1 : index
    %c0_45 = arith.constant 0 : index
    %c0_46 = arith.constant 0 : index
    %50 = vector.load %arg11[%c1_44, %c0_45, %c0_46] : memref<3x96x32xbf16, #tpu.memory_space<vmem>>, vector<1x96x32xbf16>
    %51 = vector.shape_cast %50 : vector<1x96x32xbf16> to vector<96x32xbf16>
    %cst_47 = arith.constant dense<0.000000e+00> : vector<324x32xf32>
    %52 = tpu.matmul %49, %51, %cst_47 {dimension_numbers = #tpu.dot_dimension_numbers<[1], [0], [0], [1], [0, 0, 1, 1], [], []>} : vector<324x96xbf16>, vector<96x32xbf16>, vector<324x32xf32> -> vector<324x32xf32>
    %53 = arith.addf %47, %52 : vector<324x32xf32>
    %c42_48 = arith.constant 42 : index
    %c0_49 = arith.constant 0 : index
    %54 = vector.load %arg22[%c42_48, %c0_49] : memref<372x192xf32, #tpu.memory_space<vmem>>, vector<324x96xf32>
    %55 = arith.truncf %54 : vector<324x96xf32> to vector<324x96xbf16>
    %c2_50 = arith.constant 2 : index
    %c0_51 = arith.constant 0 : index
    %c0_52 = arith.constant 0 : index
    %56 = vector.load %arg11[%c2_50, %c0_51, %c0_52] : memref<3x96x32xbf16, #tpu.memory_space<vmem>>, vector<1x96x32xbf16>
    %57 = vector.shape_cast %56 : vector<1x96x32xbf16> to vector<96x32xbf16>
    %cst_53 = arith.constant dense<0.000000e+00> : vector<324x32xf32>
    %58 = tpu.matmul %55, %57, %cst_53 {dimension_numbers = #tpu.dot_dimension_numbers<[1], [0], [0], [1], [0, 0, 1, 1], [], []>} : vector<324x96xbf16>, vector<96x32xbf16>, vector<324x32xf32> -> vector<324x32xf32>
    %59 = arith.addf %53, %58 : vector<324x32xf32>
    %c0_54 = arith.constant 0 : index
    %c0_55 = arith.constant 0 : index
    %60 = vector.load %arg5[%c0_54, %c0_55] : memref<100x324xbf16, #tpu.memory_space<vmem>>, vector<100x324xbf16>
    %61 = arith.truncf %59 : vector<324x32xf32> to vector<324x32xbf16>
    %cst_56 = arith.constant dense<0.000000e+00> : vector<100x32xf32>
    %62 = tpu.matmul %60, %61, %cst_56 {dimension_numbers = #tpu.dot_dimension_numbers<[1], [0], [0], [1], [0, 0, 1, 1], [], []>} : vector<100x324xbf16>, vector<324x32xbf16>, vector<100x32xf32> -> vector<100x32xf32>
    %c0_57 = arith.constant 0 : index
    %c0_58 = arith.constant 0 : index
    %63 = vector.load %arg12[%c0_57, %c0_58] : memref<1x32xf32, #tpu.memory_space<vmem>>, vector<1x32xf32>
    %64 = vector.broadcast %63 : vector<1x32xf32> to vector<100x32xf32>
    %65 = arith.addf %62, %64 : vector<100x32xf32>
    %cst_59 = arith.constant 0.000000e+00 : f32
    %66 = vector.broadcast %cst_59 : f32 to vector<100x32xf32>
    %67 = arith.maximumf %65, %66 : vector<100x32xf32>
    %c0_60 = arith.constant 0 : index
    %c0_61 = arith.constant 0 : index
    %68 = vector.load %arg3[%c0_60, %c0_61] : memref<100x1xf32, #tpu.memory_space<vmem>>, vector<100x1xf32>
    %69 = vector.broadcast %68 : vector<100x1xf32> to vector<100x32xf32>
    %70 = arith.mulf %67, %69 : vector<100x32xf32>
    %c17 = arith.constant 17 : index
    %c0_62 = arith.constant 0 : index
    %71 = vector.load %arg23[%c17, %c0_62] : memref<132x192xf32, #tpu.memory_space<vmem>>, vector<100x32xf32>
    tpu.vector_store %arg23[%c17, %c0_62], %70 {strides = array<i32>} : memref<132x192xf32, #tpu.memory_space<vmem>>, vector<100x32xf32>,
    %c16 = arith.constant 16 : index
    %c32_63 = arith.constant 32 : index
    %72 = vector.load %arg23[%c16, %c32_63] : memref<132x192xf32, #tpu.memory_space<vmem>>, vector<100x32xf32>
    tpu.vector_store %arg23[%c16, %c32_63], %70 {strides = array<i32>} : memref<132x192xf32, #tpu.memory_space<vmem>>, vector<100x32xf32>,
    %c15 = arith.constant 15 : index
    %c64_64 = arith.constant 64 : index
    %73 = vector.load %arg23[%c15, %c64_64] : memref<132x192xf32, #tpu.memory_space<vmem>>, vector<100x32xf32>
    tpu.vector_store %arg23[%c15, %c64_64], %70 {strides = array<i32>} : memref<132x192xf32, #tpu.memory_space<vmem>>, vector<100x32xf32>,
    %c6_65 = arith.constant 6 : index
    %c0_66 = arith.constant 0 : index
    %74 = vector.load %arg23[%c6_65, %c0_66] : memref<132x192xf32, #tpu.memory_space<vmem>>, vector<100x96xf32>
    %75 = arith.truncf %74 : vector<100x96xf32> to vector<100x96xbf16>
    %c0_67 = arith.constant 0 : index
    %c0_68 = arith.constant 0 : index
    %c0_69 = arith.constant 0 : index
    %76 = vector.load %arg13[%c0_67, %c0_68, %c0_69] : memref<3x96x32xbf16, #tpu.memory_space<vmem>>, vector<1x96x32xbf16>
    %77 = vector.shape_cast %76 : vector<1x96x32xbf16> to vector<96x32xbf16>
    %cst_70 = arith.constant dense<0.000000e+00> : vector<100x32xf32>
    %78 = tpu.matmul %75, %77, %cst_70 {dimension_numbers = #tpu.dot_dimension_numbers<[1], [0], [0], [1], [0, 0, 1, 1], [], []>} : vector<100x96xbf16>, vector<96x32xbf16>, vector<100x32xf32> -> vector<100x32xf32>
    %c16_71 = arith.constant 16 : index
    %c0_72 = arith.constant 0 : index
    %79 = vector.load %arg23[%c16_71, %c0_72] : memref<132x192xf32, #tpu.memory_space<vmem>>, vector<100x96xf32>
    %80 = arith.truncf %79 : vector<100x96xf32> to vector<100x96xbf16>
    %c1_73 = arith.constant 1 : index
    %c0_74 = arith.constant 0 : index
    %c0_75 = arith.constant 0 : index
    %81 = vector.load %arg13[%c1_73, %c0_74, %c0_75] : memref<3x96x32xbf16, #tpu.memory_space<vmem>>, vector<1x96x32xbf16>
    %82 = vector.shape_cast %81 : vector<1x96x32xbf16> to vector<96x32xbf16>
    %cst_76 = arith.constant dense<0.000000e+00> : vector<100x32xf32>
    %83 = tpu.matmul %80, %82, %cst_76 {dimension_numbers = #tpu.dot_dimension_numbers<[1], [0], [0], [1], [0, 0, 1, 1], [], []>} : vector<100x96xbf16>, vector<96x32xbf16>, vector<100x32xf32> -> vector<100x32xf32>
    %84 = arith.addf %78, %83 : vector<100x32xf32>
    %c26 = arith.constant 26 : index
    %c0_77 = arith.constant 0 : index
    %85 = vector.load %arg23[%c26, %c0_77] : memref<132x192xf32, #tpu.memory_space<vmem>>, vector<100x96xf32>
    %86 = arith.truncf %85 : vector<100x96xf32> to vector<100x96xbf16>
    %c2_78 = arith.constant 2 : index
    %c0_79 = arith.constant 0 : index
    %c0_80 = arith.constant 0 : index
    %87 = vector.load %arg13[%c2_78, %c0_79, %c0_80] : memref<3x96x32xbf16, #tpu.memory_space<vmem>>, vector<1x96x32xbf16>
    %88 = vector.shape_cast %87 : vector<1x96x32xbf16> to vector<96x32xbf16>
    %cst_81 = arith.constant dense<0.000000e+00> : vector<100x32xf32>
    %89 = tpu.matmul %86, %88, %cst_81 {dimension_numbers = #tpu.dot_dimension_numbers<[1], [0], [0], [1], [0, 0, 1, 1], [], []>} : vector<100x96xbf16>, vector<96x32xbf16>, vector<100x32xf32> -> vector<100x32xf32>
    %90 = arith.addf %84, %89 : vector<100x32xf32>
    %c0_82 = arith.constant 0 : index
    %c0_83 = arith.constant 0 : index
    %91 = vector.load %arg6[%c0_82, %c0_83] : memref<36x100xbf16, #tpu.memory_space<vmem>>, vector<36x100xbf16>
    %92 = arith.truncf %90 : vector<100x32xf32> to vector<100x32xbf16>
    %cst_84 = arith.constant dense<0.000000e+00> : vector<36x32xf32>
    %93 = tpu.matmul %91, %92, %cst_84 {dimension_numbers = #tpu.dot_dimension_numbers<[1], [0], [0], [1], [0, 0, 1, 1], [], []>} : vector<36x100xbf16>, vector<100x32xbf16>, vector<36x32xf32> -> vector<36x32xf32>
    %c0_85 = arith.constant 0 : index
    %c0_86 = arith.constant 0 : index
    %94 = vector.load %arg14[%c0_85, %c0_86] : memref<1x32xf32, #tpu.memory_space<vmem>>, vector<1x32xf32>
    %95 = vector.broadcast %94 : vector<1x32xf32> to vector<36x32xf32>
    %96 = arith.addf %93, %95 : vector<36x32xf32>
    %cst_87 = arith.constant 0.000000e+00 : f32
    %97 = vector.broadcast %cst_87 : f32 to vector<36x32xf32>
    %98 = arith.maximumf %96, %97 : vector<36x32xf32>
    %c0_88 = arith.constant 0 : index
    %c0_89 = arith.constant 0 : index
    %99 = vector.load %arg4[%c0_88, %c0_89] : memref<36x1xf32, #tpu.memory_space<vmem>>, vector<36x1xf32>
    %100 = vector.broadcast %99 : vector<36x1xf32> to vector<36x32xf32>
    %101 = arith.mulf %98, %100 : vector<36x32xf32>
    %c9 = arith.constant 9 : index
    %c0_90 = arith.constant 0 : index
    %102 = vector.load %arg24[%c9, %c0_90] : memref<52x96xf32, #tpu.memory_space<vmem>>, vector<36x32xf32>
    tpu.vector_store %arg24[%c9, %c0_90], %101 {strides = array<i32>} : memref<52x96xf32, #tpu.memory_space<vmem>>, vector<36x32xf32>,
    %c8 = arith.constant 8 : index
    %c32_91 = arith.constant 32 : index
    %103 = vector.load %arg24[%c8, %c32_91] : memref<52x96xf32, #tpu.memory_space<vmem>>, vector<36x32xf32>
    tpu.vector_store %arg24[%c8, %c32_91], %101 {strides = array<i32>} : memref<52x96xf32, #tpu.memory_space<vmem>>, vector<36x32xf32>,
    %c7 = arith.constant 7 : index
    %c64_92 = arith.constant 64 : index
    %104 = vector.load %arg24[%c7, %c64_92] : memref<52x96xf32, #tpu.memory_space<vmem>>, vector<36x32xf32>
    tpu.vector_store %arg24[%c7, %c64_92], %101 {strides = array<i32>} : memref<52x96xf32, #tpu.memory_space<vmem>>, vector<36x32xf32>,
    %c2_93 = arith.constant 2 : index
    %c0_94 = arith.constant 0 : index
    %105 = vector.load %arg24[%c2_93, %c0_94] : memref<52x96xf32, #tpu.memory_space<vmem>>, vector<36x96xf32>
    %106 = arith.truncf %105 : vector<36x96xf32> to vector<36x96xbf16>
    %c0_95 = arith.constant 0 : index
    %c0_96 = arith.constant 0 : index
    %c0_97 = arith.constant 0 : index
    %107 = vector.load %arg15[%c0_95, %c0_96, %c0_97] : memref<3x96x32xbf16, #tpu.memory_space<vmem>>, vector<1x96x32xbf16>
    %108 = vector.shape_cast %107 : vector<1x96x32xbf16> to vector<96x32xbf16>
    %cst_98 = arith.constant dense<0.000000e+00> : vector<36x32xf32>
    %109 = tpu.matmul %106, %108, %cst_98 {dimension_numbers = #tpu.dot_dimension_numbers<[1], [0], [0], [1], [0, 0, 1, 1], [], []>} : vector<36x96xbf16>, vector<96x32xbf16>, vector<36x32xf32> -> vector<36x32xf32>
    %c8_99 = arith.constant 8 : index
    %c0_100 = arith.constant 0 : index
    %110 = vector.load %arg24[%c8_99, %c0_100] : memref<52x96xf32, #tpu.memory_space<vmem>>, vector<36x96xf32>
    %111 = arith.truncf %110 : vector<36x96xf32> to vector<36x96xbf16>
    %c1_101 = arith.constant 1 : index
    %c0_102 = arith.constant 0 : index
    %c0_103 = arith.constant 0 : index
    %112 = vector.load %arg15[%c1_101, %c0_102, %c0_103] : memref<3x96x32xbf16, #tpu.memory_space<vmem>>, vector<1x96x32xbf16>
    %113 = vector.shape_cast %112 : vector<1x96x32xbf16> to vector<96x32xbf16>
    %cst_104 = arith.constant dense<0.000000e+00> : vector<36x32xf32>
    %114 = tpu.matmul %111, %113, %cst_104 {dimension_numbers = #tpu.dot_dimension_numbers<[1], [0], [0], [1], [0, 0, 1, 1], [], []>} : vector<36x96xbf16>, vector<96x32xbf16>, vector<36x32xf32> -> vector<36x32xf32>
    %115 = arith.addf %109, %114 : vector<36x32xf32>
    %c14 = arith.constant 14 : index
    %c0_105 = arith.constant 0 : index
    %116 = vector.load %arg24[%c14, %c0_105] : memref<52x96xf32, #tpu.memory_space<vmem>>, vector<36x96xf32>
    %117 = arith.truncf %116 : vector<36x96xf32> to vector<36x96xbf16>
    %c2_106 = arith.constant 2 : index
    %c0_107 = arith.constant 0 : index
    %c0_108 = arith.constant 0 : index
    %118 = vector.load %arg15[%c2_106, %c0_107, %c0_108] : memref<3x96x32xbf16, #tpu.memory_space<vmem>>, vector<1x96x32xbf16>
    %119 = vector.shape_cast %118 : vector<1x96x32xbf16> to vector<96x32xbf16>
    %cst_109 = arith.constant dense<0.000000e+00> : vector<36x32xf32>
    %120 = tpu.matmul %117, %119, %cst_109 {dimension_numbers = #tpu.dot_dimension_numbers<[1], [0], [0], [1], [0, 0, 1, 1], [], []>} : vector<36x96xbf16>, vector<96x32xbf16>, vector<36x32xf32> -> vector<36x32xf32>
    %121 = arith.addf %115, %120 : vector<36x32xf32>
    %c0_110 = arith.constant 0 : index
    %c0_111 = arith.constant 0 : index
    %122 = vector.load %arg16[%c0_110, %c0_111] : memref<1x32xf32, #tpu.memory_space<vmem>>, vector<1x32xf32>
    %123 = vector.broadcast %122 : vector<1x32xf32> to vector<36x32xf32>
    %124 = arith.addf %121, %123 : vector<36x32xf32>
    %cst_112 = arith.constant 0.000000e+00 : f32
    %125 = vector.broadcast %cst_112 : f32 to vector<36x32xf32>
    %126 = arith.maximumf %124, %125 : vector<36x32xf32>
    %c0_113 = arith.constant 0 : index
    %c0_114 = arith.constant 0 : index
    %127 = vector.load %arg7[%c0_113, %c0_114] : memref<100x36xbf16, #tpu.memory_space<vmem>>, vector<100x36xbf16>
    %128 = arith.truncf %126 : vector<36x32xf32> to vector<36x32xbf16>
    %cst_115 = arith.constant dense<0.000000e+00> : vector<100x32xf32>
    %129 = tpu.matmul %127, %128, %cst_115 {dimension_numbers = #tpu.dot_dimension_numbers<[1], [0], [0], [1], [0, 0, 1, 1], [], []>} : vector<100x36xbf16>, vector<36x32xbf16>, vector<100x32xf32> -> vector<100x32xf32>
    %c17_116 = arith.constant 17 : index
    %c96 = arith.constant 96 : index
    %130 = vector.load %arg23[%c17_116, %c96] : memref<132x192xf32, #tpu.memory_space<vmem>>, vector<100x32xf32>
    tpu.vector_store %arg23[%c17_116, %c96], %129 {strides = array<i32>} : memref<132x192xf32, #tpu.memory_space<vmem>>, vector<100x32xf32>,
    %c16_117 = arith.constant 16 : index
    %c128 = arith.constant 128 : index
    %131 = vector.load %arg23[%c16_117, %c128] : memref<132x192xf32, #tpu.memory_space<vmem>>, vector<100x32xf32>
    tpu.vector_store %arg23[%c16_117, %c128], %129 {strides = array<i32>} : memref<132x192xf32, #tpu.memory_space<vmem>>, vector<100x32xf32>,
    %c15_118 = arith.constant 15 : index
    %c160 = arith.constant 160 : index
    %132 = vector.load %arg23[%c15_118, %c160] : memref<132x192xf32, #tpu.memory_space<vmem>>, vector<100x32xf32>
    tpu.vector_store %arg23[%c15_118, %c160], %129 {strides = array<i32>} : memref<132x192xf32, #tpu.memory_space<vmem>>, vector<100x32xf32>,
    %c6_119 = arith.constant 6 : index
    %c0_120 = arith.constant 0 : index
    %133 = vector.load %arg23[%c6_119, %c0_120] : memref<132x192xf32, #tpu.memory_space<vmem>>, vector<100x192xf32>
    %134 = arith.truncf %133 : vector<100x192xf32> to vector<100x192xbf16>
    %c0_121 = arith.constant 0 : index
    %c0_122 = arith.constant 0 : index
    %c0_123 = arith.constant 0 : index
    %135 = vector.load %arg17[%c0_121, %c0_122, %c0_123] : memref<3x192x32xbf16, #tpu.memory_space<vmem>>, vector<1x192x32xbf16>
    %136 = vector.shape_cast %135 : vector<1x192x32xbf16> to vector<192x32xbf16>
    %cst_124 = arith.constant dense<0.000000e+00> : vector<100x32xf32>
    %137 = tpu.matmul %134, %136, %cst_124 {dimension_numbers = #tpu.dot_dimension_numbers<[1], [0], [0], [1], [0, 0, 1, 1], [], []>} : vector<100x192xbf16>, vector<192x32xbf16>, vector<100x32xf32> -> vector<100x32xf32>
    %c16_125 = arith.constant 16 : index
    %c0_126 = arith.constant 0 : index
    %138 = vector.load %arg23[%c16_125, %c0_126] : memref<132x192xf32, #tpu.memory_space<vmem>>, vector<100x192xf32>
    %139 = arith.truncf %138 : vector<100x192xf32> to vector<100x192xbf16>
    %c1_127 = arith.constant 1 : index
    %c0_128 = arith.constant 0 : index
    %c0_129 = arith.constant 0 : index
    %140 = vector.load %arg17[%c1_127, %c0_128, %c0_129] : memref<3x192x32xbf16, #tpu.memory_space<vmem>>, vector<1x192x32xbf16>
    %141 = vector.shape_cast %140 : vector<1x192x32xbf16> to vector<192x32xbf16>
    %cst_130 = arith.constant dense<0.000000e+00> : vector<100x32xf32>
    %142 = tpu.matmul %139, %141, %cst_130 {dimension_numbers = #tpu.dot_dimension_numbers<[1], [0], [0], [1], [0, 0, 1, 1], [], []>} : vector<100x192xbf16>, vector<192x32xbf16>, vector<100x32xf32> -> vector<100x32xf32>
    %143 = arith.addf %137, %142 : vector<100x32xf32>
    %c26_131 = arith.constant 26 : index
    %c0_132 = arith.constant 0 : index
    %144 = vector.load %arg23[%c26_131, %c0_132] : memref<132x192xf32, #tpu.memory_space<vmem>>, vector<100x192xf32>
    %145 = arith.truncf %144 : vector<100x192xf32> to vector<100x192xbf16>
    %c2_133 = arith.constant 2 : index
    %c0_134 = arith.constant 0 : index
    %c0_135 = arith.constant 0 : index
    %146 = vector.load %arg17[%c2_133, %c0_134, %c0_135] : memref<3x192x32xbf16, #tpu.memory_space<vmem>>, vector<1x192x32xbf16>
    %147 = vector.shape_cast %146 : vector<1x192x32xbf16> to vector<192x32xbf16>
    %cst_136 = arith.constant dense<0.000000e+00> : vector<100x32xf32>
    %148 = tpu.matmul %145, %147, %cst_136 {dimension_numbers = #tpu.dot_dimension_numbers<[1], [0], [0], [1], [0, 0, 1, 1], [], []>} : vector<100x192xbf16>, vector<192x32xbf16>, vector<100x32xf32> -> vector<100x32xf32>
    %149 = arith.addf %143, %148 : vector<100x32xf32>
    %c0_137 = arith.constant 0 : index
    %c0_138 = arith.constant 0 : index
    %150 = vector.load %arg18[%c0_137, %c0_138] : memref<1x32xf32, #tpu.memory_space<vmem>>, vector<1x32xf32>
    %151 = vector.broadcast %150 : vector<1x32xf32> to vector<100x32xf32>
    %152 = arith.addf %149, %151 : vector<100x32xf32>
    %cst_139 = arith.constant 0.000000e+00 : f32
    %153 = vector.broadcast %cst_139 : f32 to vector<100x32xf32>
    %154 = arith.maximumf %152, %153 : vector<100x32xf32>
    %c0_140 = arith.constant 0 : index
    %c0_141 = arith.constant 0 : index
    %155 = vector.load %arg8[%c0_140, %c0_141] : memref<324x100xbf16, #tpu.memory_space<vmem>>, vector<324x100xbf16>
    %156 = arith.truncf %154 : vector<100x32xf32> to vector<100x32xbf16>
    %cst_142 = arith.constant dense<0.000000e+00> : vector<324x32xf32>
    %157 = tpu.matmul %155, %156, %cst_142 {dimension_numbers = #tpu.dot_dimension_numbers<[1], [0], [0], [1], [0, 0, 1, 1], [], []>} : vector<324x100xbf16>, vector<100x32xbf16>, vector<324x32xf32> -> vector<324x32xf32>
    %c25_143 = arith.constant 25 : index
    %c96_144 = arith.constant 96 : index
    %158 = vector.load %arg22[%c25_143, %c96_144] : memref<372x192xf32, #tpu.memory_space<vmem>>, vector<324x32xf32>
    tpu.vector_store %arg22[%c25_143, %c96_144], %157 {strides = array<i32>} : memref<372x192xf32, #tpu.memory_space<vmem>>, vector<324x32xf32>,
    %c24_145 = arith.constant 24 : index
    %c128_146 = arith.constant 128 : index
    %159 = vector.load %arg22[%c24_145, %c128_146] : memref<372x192xf32, #tpu.memory_space<vmem>>, vector<324x32xf32>
    tpu.vector_store %arg22[%c24_145, %c128_146], %157 {strides = array<i32>} : memref<372x192xf32, #tpu.memory_space<vmem>>, vector<324x32xf32>,
    %c23_147 = arith.constant 23 : index
    %c160_148 = arith.constant 160 : index
    %160 = vector.load %arg22[%c23_147, %c160_148] : memref<372x192xf32, #tpu.memory_space<vmem>>, vector<324x32xf32>
    tpu.vector_store %arg22[%c23_147, %c160_148], %157 {strides = array<i32>} : memref<372x192xf32, #tpu.memory_space<vmem>>, vector<324x32xf32>,
    %c6_149 = arith.constant 6 : index
    %c0_150 = arith.constant 0 : index
    %161 = vector.load %arg22[%c6_149, %c0_150] : memref<372x192xf32, #tpu.memory_space<vmem>>, vector<324x192xf32>
    %162 = arith.truncf %161 : vector<324x192xf32> to vector<324x192xbf16>
    %c0_151 = arith.constant 0 : index
    %c0_152 = arith.constant 0 : index
    %c0_153 = arith.constant 0 : index
    %163 = vector.load %arg19[%c0_151, %c0_152, %c0_153] : memref<3x192x32xbf16, #tpu.memory_space<vmem>>, vector<1x192x32xbf16>
    %164 = vector.shape_cast %163 : vector<1x192x32xbf16> to vector<192x32xbf16>
    %cst_154 = arith.constant dense<0.000000e+00> : vector<324x32xf32>
    %165 = tpu.matmul %162, %164, %cst_154 {dimension_numbers = #tpu.dot_dimension_numbers<[1], [0], [0], [1], [0, 0, 1, 1], [], []>} : vector<324x192xbf16>, vector<192x32xbf16>, vector<324x32xf32> -> vector<324x32xf32>
    %c24_155 = arith.constant 24 : index
    %c0_156 = arith.constant 0 : index
    %166 = vector.load %arg22[%c24_155, %c0_156] : memref<372x192xf32, #tpu.memory_space<vmem>>, vector<324x192xf32>
    %167 = arith.truncf %166 : vector<324x192xf32> to vector<324x192xbf16>
    %c1_157 = arith.constant 1 : index
    %c0_158 = arith.constant 0 : index
    %c0_159 = arith.constant 0 : index
    %168 = vector.load %arg19[%c1_157, %c0_158, %c0_159] : memref<3x192x32xbf16, #tpu.memory_space<vmem>>, vector<1x192x32xbf16>
    %169 = vector.shape_cast %168 : vector<1x192x32xbf16> to vector<192x32xbf16>
    %cst_160 = arith.constant dense<0.000000e+00> : vector<324x32xf32>
    %170 = tpu.matmul %167, %169, %cst_160 {dimension_numbers = #tpu.dot_dimension_numbers<[1], [0], [0], [1], [0, 0, 1, 1], [], []>} : vector<324x192xbf16>, vector<192x32xbf16>, vector<324x32xf32> -> vector<324x32xf32>
    %171 = arith.addf %165, %170 : vector<324x32xf32>
    %c42_161 = arith.constant 42 : index
    %c0_162 = arith.constant 0 : index
    %172 = vector.load %arg22[%c42_161, %c0_162] : memref<372x192xf32, #tpu.memory_space<vmem>>, vector<324x192xf32>
    %173 = arith.truncf %172 : vector<324x192xf32> to vector<324x192xbf16>
    %c2_163 = arith.constant 2 : index
    %c0_164 = arith.constant 0 : index
    %c0_165 = arith.constant 0 : index
    %174 = vector.load %arg19[%c2_163, %c0_164, %c0_165] : memref<3x192x32xbf16, #tpu.memory_space<vmem>>, vector<1x192x32xbf16>
    %175 = vector.shape_cast %174 : vector<1x192x32xbf16> to vector<192x32xbf16>
    %cst_166 = arith.constant dense<0.000000e+00> : vector<324x32xf32>
    %176 = tpu.matmul %173, %175, %cst_166 {dimension_numbers = #tpu.dot_dimension_numbers<[1], [0], [0], [1], [0, 0, 1, 1], [], []>} : vector<324x192xbf16>, vector<192x32xbf16>, vector<324x32xf32> -> vector<324x32xf32>
    %177 = arith.addf %171, %176 : vector<324x32xf32>
    %c0_167 = arith.constant 0 : index
    %c0_168 = arith.constant 0 : index
    %178 = vector.load %arg20[%c0_167, %c0_168] : memref<1x32xf32, #tpu.memory_space<vmem>>, vector<1x32xf32>
    %179 = vector.broadcast %178 : vector<1x32xf32> to vector<324x32xf32>
    %180 = arith.addf %177, %179 : vector<324x32xf32>
    %c0_169 = arith.constant 0 : index
    %c0_170 = arith.constant 0 : index
    %c0_171 = arith.constant 0 : index
    %181 = vector.load %arg21[%c0_169, %c0_170, %c0_171] : memref<1x324x32xf32, #tpu.memory_space<vmem>>, vector<1x324x32xf32>
    %182 = vector.shape_cast %181 : vector<1x324x32xf32> to vector<324x32xf32>
    %183 = vector.shape_cast %180 : vector<324x32xf32> to vector<1x324x32xf32>
    tpu.vector_store %arg21[%c0_169, %c0_170, %c0_171], %183 {strides = array<i32>} : memref<1x324x32xf32, #tpu.memory_space<vmem>>, vector<1x324x32xf32>,
    return
  }
  func.func @transform_0(%arg0: i32) -> (i32, i32, i32) {
    %c0_i32 = arith.constant 0 : i32
    %c0_i32_0 = arith.constant 0 : i32
    %c0_i32_1 = arith.constant 0 : i32
    return %arg0, %c0_i32, %c0_i32_0 : i32, i32, i32
  }
  func.func @transform_1(%arg0: i32) -> (i32, i32) {
    %c0_i32 = arith.constant 0 : i32
    %c0_i32_0 = arith.constant 0 : i32
    %c0_i32_1 = arith.constant 0 : i32
    return %c0_i32, %c0_i32_0 : i32, i32
  }
  func.func @transform_2(%arg0: i32) -> (i32, i32) {
    %c0_i32 = arith.constant 0 : i32
    %c0_i32_0 = arith.constant 0 : i32
    %c0_i32_1 = arith.constant 0 : i32
    return %c0_i32, %c0_i32_0 : i32, i32
  }
  func.func @transform_3(%arg0: i32) -> (i32, i32) {
    %c0_i32 = arith.constant 0 : i32
    %c0_i32_0 = arith.constant 0 : i32
    %c0_i32_1 = arith.constant 0 : i32
    return %c0_i32, %c0_i32_0 : i32, i32
  }
  func.func @transform_4(%arg0: i32) -> (i32, i32) {
    %c0_i32 = arith.constant 0 : i32
    %c0_i32_0 = arith.constant 0 : i32
    %c0_i32_1 = arith.constant 0 : i32
    return %c0_i32, %c0_i32_0 : i32, i32
  }
  func.func @transform_5(%arg0: i32) -> (i32, i32) {
    %c0_i32 = arith.constant 0 : i32
    %c0_i32_0 = arith.constant 0 : i32
    %c0_i32_1 = arith.constant 0 : i32
    return %c0_i32, %c0_i32_0 : i32, i32
  }
  func.func @transform_6(%arg0: i32) -> (i32, i32) {
    %c0_i32 = arith.constant 0 : i32
    %c0_i32_0 = arith.constant 0 : i32
    %c0_i32_1 = arith.constant 0 : i32
    return %c0_i32, %c0_i32_0 : i32, i32
  }
  func.func @transform_7(%arg0: i32) -> (i32, i32) {
    %c0_i32 = arith.constant 0 : i32
    %c0_i32_0 = arith.constant 0 : i32
    %c0_i32_1 = arith.constant 0 : i32
    return %c0_i32, %c0_i32_0 : i32, i32
  }
  func.func @transform_8(%arg0: i32) -> (i32, i32, i32) {
    %c0_i32 = arith.constant 0 : i32
    %c0_i32_0 = arith.constant 0 : i32
    %c0_i32_1 = arith.constant 0 : i32
    %c0_i32_2 = arith.constant 0 : i32
    return %c0_i32, %c0_i32_0, %c0_i32_1 : i32, i32, i32
  }
  func.func @transform_9(%arg0: i32) -> (i32, i32) {
    %c0_i32 = arith.constant 0 : i32
    %c0_i32_0 = arith.constant 0 : i32
    %c0_i32_1 = arith.constant 0 : i32
    return %c0_i32, %c0_i32_0 : i32, i32
  }
  func.func @transform_10(%arg0: i32) -> (i32, i32, i32) {
    %c0_i32 = arith.constant 0 : i32
    %c0_i32_0 = arith.constant 0 : i32
    %c0_i32_1 = arith.constant 0 : i32
    %c0_i32_2 = arith.constant 0 : i32
    return %c0_i32, %c0_i32_0, %c0_i32_1 : i32, i32, i32
  }
  func.func @transform_11(%arg0: i32) -> (i32, i32) {
    %c0_i32 = arith.constant 0 : i32
    %c0_i32_0 = arith.constant 0 : i32
    %c0_i32_1 = arith.constant 0 : i32
    return %c0_i32, %c0_i32_0 : i32, i32
  }
  func.func @transform_12(%arg0: i32) -> (i32, i32, i32) {
    %c0_i32 = arith.constant 0 : i32
    %c0_i32_0 = arith.constant 0 : i32
    %c0_i32_1 = arith.constant 0 : i32
    %c0_i32_2 = arith.constant 0 : i32
    return %c0_i32, %c0_i32_0, %c0_i32_1 : i32, i32, i32
  }
  func.func @transform_13(%arg0: i32) -> (i32, i32) {
    %c0_i32 = arith.constant 0 : i32
    %c0_i32_0 = arith.constant 0 : i32
    %c0_i32_1 = arith.constant 0 : i32
    return %c0_i32, %c0_i32_0 : i32, i32
  }
  func.func @transform_14(%arg0: i32) -> (i32, i32, i32) {
    %c0_i32 = arith.constant 0 : i32
    %c0_i32_0 = arith.constant 0 : i32
    %c0_i32_1 = arith.constant 0 : i32
    %c0_i32_2 = arith.constant 0 : i32
    return %c0_i32, %c0_i32_0, %c0_i32_1 : i32, i32, i32
  }
  func.func @transform_15(%arg0: i32) -> (i32, i32) {
    %c0_i32 = arith.constant 0 : i32
    %c0_i32_0 = arith.constant 0 : i32
    %c0_i32_1 = arith.constant 0 : i32
    return %c0_i32, %c0_i32_0 : i32, i32
  }
  func.func @transform_16(%arg0: i32) -> (i32, i32, i32) {
    %c0_i32 = arith.constant 0 : i32
    %c0_i32_0 = arith.constant 0 : i32
    %c0_i32_1 = arith.constant 0 : i32
    %c0_i32_2 = arith.constant 0 : i32
    return %c0_i32, %c0_i32_0, %c0_i32_1 : i32, i32, i32
  }
  func.func @transform_17(%arg0: i32) -> (i32, i32) {
    %c0_i32 = arith.constant 0 : i32
    %c0_i32_0 = arith.constant 0 : i32
    %c0_i32_1 = arith.constant 0 : i32
    return %c0_i32, %c0_i32_0 : i32, i32
  }
  func.func @transform_18(%arg0: i32) -> (i32, i32, i32) {
    %c0_i32 = arith.constant 0 : i32
    %c0_i32_0 = arith.constant 0 : i32
    %c0_i32_1 = arith.constant 0 : i32
    %c0_i32_2 = arith.constant 0 : i32
    return %c0_i32, %c0_i32_0, %c0_i32_1 : i32, i32, i32
  }
  func.func @transform_19(%arg0: i32) -> (i32, i32) {
    %c0_i32 = arith.constant 0 : i32
    %c0_i32_0 = arith.constant 0 : i32
    %c0_i32_1 = arith.constant 0 : i32
    return %c0_i32, %c0_i32_0 : i32, i32
  }
  func.func @transform_20(%arg0: i32) -> (i32, i32, i32) {
    %c0_i32 = arith.constant 0 : i32
    %c0_i32_0 = arith.constant 0 : i32
    %c0_i32_1 = arith.constant 0 : i32
    return %arg0, %c0_i32, %c0_i32_0 : i32, i32, i32
  }
}

</mosaic_0001>

<bundles_post_ra>
// kernel: _lambda_.1
= control target key start
LH: loop header
LB: loop body
LE: loop exit
PB: predicated region body
PF: predicated region fallthrough
CT: control target
= control target key end

     0   :  { %s16399_s0 = inlined_call_operand.vmem [shape: f32[2,372,24], index: 0, kind: input, shape index: {}]   ;;  %s16400_s1 = inlined_call_operand.vmem [shape: f32[324,1], index: 1, kind: input, shape index: {}]   ;;  %s16401_s2 = inlined_call_operand.vmem [shape: f32[100,1], index: 2, kind: input, shape index: {}]   ;;  %s16402_s3 = inlined_call_operand.vmem [shape: f32[36,1], index: 3, kind: input, shape index: {}]   ;;  %s16403_s4 = inlined_call_operand.vmem [shape: bf16[100,324], index: 4, kind: input, shape index: {}]   ;;  %s16404_s5 = inlined_call_operand.vmem [shape: bf16[36,100], index: 5, kind: input, shape index: {}]   ;;  %s16405_s6 = inlined_call_operand.vmem [shape: bf16[100,36], index: 6, kind: input, shape index: {}]   ;;  %s16406_s7 = inlined_call_operand.vmem [shape: bf16[324,100], index: 7, kind: input, shape index: {}]   ;;  %s16407_s8 = inlined_call_operand.vmem [shape: bf16[3,24,32], index: 8, kind: input, shape index: {}]   ;;  %s16408_s9 = inlined_call_operand.vmem [shape: f32[1,32], index: 9, kind: input, shape index: {}]   ;;  %s16409_s10 = inlined_call_operand.vmem [shape: bf16[3,96,32], index: 10, kind: input, shape index: {}]   ;;  %s16410_s11 = inlined_call_operand.vmem [shape: f32[1,32], index: 11, kind: input, shape index: {}]   ;;  %s16411_s12 = inlined_call_operand.vmem [shape: bf16[3,96,32], index: 12, kind: input, shape index: {}]   ;;  %s16412_s13 = inlined_call_operand.vmem [shape: f32[1,32], index: 13, kind: input, shape index: {}]   ;;  %s16413_s14 = inlined_call_operand.vmem [shape: bf16[3,96,32], index: 14, kind: input, shape index: {}]   ;;  %s16414_s15 = inlined_call_operand.vmem [shape: f32[1,32], index: 15, kind: input, shape index: {}]   ;;  %s16415_s16 = inlined_call_operand.vmem [shape: bf16[3,192,32], index: 16, kind: input, shape index: {}]   ;;  %s16416_s17 = inlined_call_operand.vmem [shape: f32[1,32], index: 17, kind: input, shape index: {}]   ;;  %s16417_s18 = inlined_call_operand.vmem [shape: bf16[3,192,32], index: 18, kind: input, shape index: {}]   ;;  %s16418_s19 = inlined_call_operand.vmem [shape: f32[1,32], index: 19, kind: input, shape index: {}]   ;;  %s16419_s20 = inlined_call_operand.vmem [shape: f32[2,324,32], index: 20, kind: output, shape index: {}]  }
   0x1   :  { %16434 = sst [smem:[#allocation36_spill]] %s16399_s0 }
   0x2   :  { %16435 = sst [smem:[#allocation37_spill]] %s16400_s1  ;;  %s12329_s1 = smov 0  }
   0x3   :  { %16436 = sst [smem:[#allocation38_spill]] %s16401_s2 }
   0x4   :  { %16437 = sst [smem:[#allocation39_spill]] %s16402_s3 }
   0x5   :  { %16438 = sst [smem:[#allocation40_spill]] %s16403_s4 }
   0x6 LB: > { %s9839_s22 = sadd.s32 4294967295, %s12216_s1   ;;  %p9843_p0 = scmp.ge.s32.totalorder %s12216_s1, 1  ;;  %s12216_s1 = sphi %s12329_s1, %s30_s1  }
   0x7   : > { %p562_p1 = scmp.lt.s32.totalorder %s12216_s1, 3 }
   0x9   : > { %p563_p2 = pnand %p9843_p0, %p562_p1 }
   0xb   : > { %566 = sbr.rel (%p563_p2) target bundleno = 4292 (0x10c4), region = 100 }
  0x12   : > { %v12218_v0 = vmov 0.0   ;;  %v12010_v1 = vld [vmem:[%s16407_s8 + $0xc] sm:$0xff]   ;;  %v12011_v2 = vld [vmem:[%s16407_s8 + $0x14] ss:$0 sps:$4 sm:$0xff]   ;;  %vm873_vm0 = vcmask 1043456   ;;  %p620_p3 = scmp.lt.s32.totalorder %s9839_s22, 1 }
  0x13   : > { %10824 = vmatprep.subr.bf16.mxu0 %v12218_v0  ;;  %631 = vst [vmem:[#allocation2] sm:$0xff] %v12218_v0  ;;  %636 = vst [vmem:[#allocation2 + $0x20] sm:$0xff] %v12218_v0  ;;  %11764 = vmatprep.subr.bf16.mxu1 %v12218_v0  ;;  %v12012_v3 = vld [vmem:[%s16407_s8] sm:$0xff]   ;;  %v875_v4 = vsel %vm873_vm0, %v12011_v2, 0  ;;  %vm12219_vm1 = vmmov 0   ;;  %s16439_s0 = sld [smem:[#allocation36_spill]] }
  0x14   : > { %638 = vst [vmem:[#allocation2 + $0x30] sm:$0x1] %v12218_v0  ;;  %641 = vst [vmem:[#allocation2 + $0x2b0] sm:$0xf8] %v12218_v0  ;;  %10825 = vmatpush3.bf16.msra.mxu0 %v12010_v1  ;;  %10828 = vmatprep.mubr.msk.bf16.mxu0 %vm12219_vm1, %v12218_v0  ;;  %s16516_s22 = smov (!%p620_p3, %s9839_s22), 1  ;;  %vm809_vm2 = vcmask 195584  }
  0x15   : > { %646 = vst [vmem:[#allocation2 + $0x2d0] sm:$0xff] %v12218_v0  ;;  %651 = vst [vmem:[#allocation3] sm:$0xff] %v12218_v0  ;;  %10826 = vmatprep.subr.bf16.mxu0 %v12218_v0  ;;  %11766 = vmatpush3.bf16.msra.mxu1 %v12012_v3  ;;  %v12013_v5 = vld [vmem:[%s16407_s8 + $0x8] ss:$0 sps:$4 sm:$0xff]   ;;  %s11992_s4 = smul.u32 376, %s16516_s22  ;;  %v16424_v2 = vmov 0  }
  0x16   : > { %653 = vst [vmem:[#allocation3 + $0x10] sm:$0xff] %v12218_v0  ;;  %655 = vst [vmem:[#allocation3 + $0x20] sm:$0x1] %v12218_v0  ;;  %11765 = vmatprep.subr.bf16.mxu1 %v12218_v0  ;;  %10924 = vmatprep.mubr.msk.bf16.mxu1 %vm12219_vm1, %v12218_v0  ;;  %v1150_v6 = vsel %vm873_vm0, %v12013_v5, 0  ;;  %s16440_s2 = sld [smem:[#allocation37_spill]]  ;;  %vm2274_vm3 = vcmask 261121  }
  0x17   : > { %657 = vst [vmem:[#allocation3 + $0xe0] sm:$0xf8] %v12218_v0  ;;  %659 = vst [vmem:[#allocation3 + $0xf0] sm:$0xff] %v12218_v0  ;;  %12008 = vset.pattern.permute.xlu0 %v16424_v2  ;;  %12009 = vset.pattern.permute.xlu1 %v16424_v2  ;;  %s16428_s27 = smov 32   ;;  %vm2484_vm4 = vcmask 1046528   ;;  %vm2151_vm5 = vcmask 1040384  }
  0x18   : > { %10827 = vmatpush3.bf16.msra.mxu0 %v875_v4  ;;  %vm2276_vm6 = vcmask 261120   ;;  %vm663_vm7 = vcmask 785408   ;;  %vm2441_vm8 = vcmask 523520   ;;  %vm2694_vm9 = vcmask 785920   ;;  %s16441_s3 = sld [smem:[#allocation38_spill]]  ;;  %s16448_s23 = sld [smem:[#allocation40_spill]] }
  0x19   : > { %s12375_s21 = scalar_lea.vmem %s16439_s0, %s11992_s4  ;;  %11767 = vmatpush3.bf16.msra.mxu1 %v1150_v6  ;;  %10912 = vmatprep.subr.bf16.mxu0 %v12218_v0  ;;  %s12222_s4 = smov 64   ;;  %vm2316_vm10 = vcmask 258048   ;;  %vm2482_vm11 = vcmask 519424   ;;  %vm2692_vm12 = vcmask 785927   ;;  %vm2735_vm13 = vcmask 780800  }
  0x1a   : > { %v734_v7 = vld [vmem:[%s12375_s21 + $0x18] sm:$0xff]  ;;  %v735_v8 = vld [vmem:[%s12375_s21 + $0x20] sm:$0xff]  ;;  %11088 = vmatprep.subr.bf16.mxu1 %v12218_v0  ;;  %v674_v11 = vld [vmem:[%s12375_s21 + $0x2e] sm:$0xff]  ;;  %vm3169_vm14 = vcmask 1044480   ;;  %vm4164_vm15 = vcmask 1041408   ;;  %s16449_s30 = sld [smem:[#allocation39_spill]] }
  0x1b   : > { %v775_v9 = vpack.c.bf16 %v735_v8, %v734_v7  ;;  %v673_v10 = vld [vmem:[%s12375_s21 + $0x26] sm:$0xff]  ;;  %v737_v14 = vld [vmem:[%s12375_s21 + $0x30] sm:$0xff]  ;;  %v676_v16 = vld [vmem:[%s12375_s21 + $0x3e] sm:$0xff]  ;;  %s16430_s28 = smov 96   ;;  %s16452_s29 = smov 96  }
  0x1c   : > { %v712_v12 = vpack.c.bf16 %v674_v11, %v673_v10  ;;  %v736_v13 = vld [vmem:[%s12375_s21 + $0x28] sm:$0xff]  ;;  %v675_v15 = vld [vmem:[%s12375_s21 + $0x36] sm:$0xff]  ;;  %v739_v20 = vld [vmem:[%s12375_s21 + $0x40] sm:$0xff]  ;;  %s11993_s25 = smul.u32 328, %s16516_s22 }
  0x1d   : > { %10829 = vmatmul.mubr.msk.bf16.vlgmr.msra.gmra.mrb[0].mxu0 %vm809_vm2, %v775_v9  ;;  %v776_v17 = vpack.c.bf16 %v737_v14, %v736_v13  ;;  %v713_v18 = vpack.c.bf16 %v676_v16, %v675_v15  ;;  %v738_v19 = vld [vmem:[%s12375_s21 + $0x38] sm:$0xff]  ;;  %v677_v21 = vld [vmem:[%s12375_s21 + $0x46] sm:$0xff]  ;;  %v678_v22 = vld [vmem:[%s12375_s21 + $0x4e] sm:$0xff] }
  0x1e   : > { %10832 = vmatprep.mubr.msk.bf16.mxu0 %vm12219_vm1, %v12218_v0  ;;  %10913 = vmatpush3.bf16.msra.mxu0 %v12012_v3  ;;  %v777_v23 = vpack.c.bf16 %v739_v20, %v738_v19  ;;  %v714_v24 = vpack.c.bf16 %v678_v22, %v677_v21  ;;  %v740_v25 = vld [vmem:[%s12375_s21 + $0x48] sm:$0xff]  ;;  %v741_v26 = vld [vmem:[%s12375_s21 + $0x50] sm:$0xff]  ;;  %v680_v28 = vld [vmem:[%s12375_s21 + $0x5e] sm:$0xff] }
  0x1f   : > { %10925 = vmatmul.mubr.msk.bf16.vlgmr.msra.gmra.mrb[0].mxu1 %vm809_vm2, %v712_v12  ;;  %10914 = vmatprep.subr.bf16.mxu0 %v12218_v0  ;;  %v679_v27 = vld [vmem:[%s12375_s21 + $0x56] sm:$0xff]  ;;  %v778_v29 = vpack.c.bf16 %v741_v26, %v740_v25  ;;  %v743_v32 = vld [vmem:[%s12375_s21 + $0x60] sm:$0xff]  ;;  %v682_v34 = vld [vmem:[%s12375_s21 + $0x6e] sm:$0xff] }
  0x20   : > { %10928 = vmatprep.mubr.msk.bf16.mxu1 %vm12219_vm1, %v12218_v0  ;;  %v715_v30 = vpack.c.bf16 %v680_v28, %v679_v27  ;;  %v742_v31 = vld [vmem:[%s12375_s21 + $0x58] sm:$0xff]  ;;  %v681_v33 = vld [vmem:[%s12375_s21 + $0x66] sm:$0xff]  ;;  %v745_v38 = vld [vmem:[%s12375_s21 + $0x70] sm:$0xff] }
  0x21   : > { %v779_v35 = vpack.c.bf16 %v743_v32, %v742_v31  ;;  %v716_v36 = vpack.c.bf16 %v682_v34, %v681_v33  ;;  %v744_v37 = vld [vmem:[%s12375_s21 + $0x68] sm:$0xff]  ;;  %v683_v39 = vld [vmem:[%s12375_s21 + $0x76] sm:$0xff]  ;;  %v684_v40 = vld [vmem:[%s12375_s21 + $0x7e] sm:$0xff] }
  0x22   : > { %10915 = vmatpush3.bf16.msra.mxu0 %v1150_v6  ;;  %v780_v41 = vpack.c.bf16 %v745_v38, %v744_v37  ;;  %v717_v42 = vpack.c.bf16 %v684_v40, %v683_v39  ;;  %v746_v43 = vld [vmem:[%s12375_s21 + $0x78] sm:$0xff]  ;;  %v747_v44 = vld [vmem:[%s12375_s21 + $0x80] sm:$0xff]  ;;  %v686_v46 = vld [vmem:[%s12375_s21 + $0x8e] sm:$0xff] }
  0x23   : > { %11000 = vmatprep.subr.bf16.mxu0 %v12218_v0  ;;  %v685_v45 = vld [vmem:[%s12375_s21 + $0x86] sm:$0xff]  ;;  %v781_v47 = vpack.c.bf16 %v747_v44, %v746_v43  ;;  %v749_v50 = vld [vmem:[%s12375_s21 + $0x90] sm:$0xff]  ;;  %v688_v52 = vld [vmem:[%s12375_s21 + $0x9e] sm:$0xff] }
  0x24   : > { %v718_v48 = vpack.c.bf16 %v686_v46, %v685_v45  ;;  %v748_v49 = vld [vmem:[%s12375_s21 + $0x88] sm:$0xff]  ;;  %v687_v51 = vld [vmem:[%s12375_s21 + $0x96] sm:$0xff]  ;;  %v751_v56 = vld [vmem:[%s12375_s21 + $0xa0] sm:$0xff] }
  0x25   : > { %10833 = vmatmul.mubr.msk.bf16.gmra.mrb[4].mxu0 %vm809_vm2, %v776_v17  ;;  %v782_v53 = vpack.c.bf16 %v749_v50, %v748_v49  ;;  %v719_v54 = vpack.c.bf16 %v688_v52, %v687_v51  ;;  %v750_v55 = vld [vmem:[%s12375_s21 + $0x98] sm:$0xff]  ;;  %v689_v57 = vld [vmem:[%s12375_s21 + $0xa6] sm:$0xff]  ;;  %v690_v58 = vld [vmem:[%s12375_s21 + $0xae] sm:$0xff] }
  0x26   : > { %10836 = vmatprep.mubr.msk.bf16.mxu0 %vm12219_vm1, %v12218_v0  ;;  %v783_v59 = vpack.c.bf16 %v751_v56, %v750_v55  ;;  %v720_v60 = vpack.c.bf16 %v690_v58, %v689_v57  ;;  %v752_v61 = vld [vmem:[%s12375_s21 + $0xa8] sm:$0xff]  ;;  %v753_v62 = vld [vmem:[%s12375_s21 + $0xb0] sm:$0xff]  ;;  %v692_v1 = vld [vmem:[%s12375_s21 + $0xbe] sm:$0xff] }
  0x27   : > { %10929 = vmatmul.mubr.msk.bf16.gmra.mrb[4].mxu1 %vm809_vm2, %v713_v18  ;;  %v691_v63 = vld [vmem:[%s12375_s21 + $0xb6] sm:$0xff]  ;;  %v1823_v3 = vld [vmem:[%s16440_s2] sm:$0xff]  ;;  %v784_v4 = vpack.c.bf16 %v753_v62, %v752_v61  ;;  %v1824_v9 = vld [vmem:[%s16440_s2 + $0x8] sm:$0xff] }
  0x28   : > { %10932 = vmatprep.mubr.msk.bf16.mxu1 %vm12219_vm1, %v12218_v0  ;;  %1866 = vperm.xlu0 %12008, %v1823_v3   ;;  %v721_v5 = vpack.c.bf16 %v692_v1, %v691_v63  ;;  %v754_v6 = vld [vmem:[%s12375_s21 + $0xb8] sm:$0xff]  ;;  %v755_v7 = vld [vmem:[%s12375_s21 + $0xc0] sm:$0xff]  ;;  %v1825_v8 = vld [vmem:[%s16440_s2 + $0x10] sm:$0xff] }
  0x29   : > { %v693_v10 = vld [vmem:[%s12375_s21 + $0xc6] sm:$0xff]  ;;  %v694_v11 = vld [vmem:[%s12375_s21 + $0xce] sm:$0xff]  ;;  %1876 = vperm.xlu1 %12009, %v1825_v8   ;;  %v1826_v12 = vld [vmem:[%s16440_s2 + $0x18] sm:$0xff]  ;;  %v785_v14 = vpack.c.bf16 %v755_v7, %v754_v6 }
  0x2a   : > { %v1827_v13 = vld [vmem:[%s16440_s2 + $0x20] sm:$0xff]  ;;  %v722_v15 = vpack.c.bf16 %v694_v11, %v693_v10  ;;  %v756_v16 = vld [vmem:[%s12375_s21 + $0xc8] sm:$0xff]  ;;  %v757_v17 = vld [vmem:[%s12375_s21 + $0xd0] sm:$0xff] }
  0x2b   : > { %v695_v18 = vld [vmem:[%s12375_s21 + $0xd6] sm:$0xff]  ;;  %v696_v19 = vld [vmem:[%s12375_s21 + $0xde] sm:$0xff]  ;;  %v1828_v20 = vld [vmem:[%s16440_s2 + $0x28] sm:$0xff]  ;;  %v786_v22 = vpack.c.bf16 %v757_v17, %v756_v16 }
  0x2c   : > { %1871 = vperm.xlu0 %12008, %v1824_v9   ;;  %v1829_v21 = vld [vmem:[%s16440_s2 + $0x30] sm:$0xff]  ;;  %v1831_v25 = vld [vmem:[%s16440_s2 + $0x40] sm:$0xff]  ;;  %v758_v26 = vld [vmem:[%s12375_s21 + $0xd8] sm:$0xff] }
  0x2d   : > { %10837 = vmatmul.mubr.msk.bf16.gmra.mrb[8].mxu0 %vm809_vm2, %v777_v23  ;;  %1881 = vperm.xlu1 %12009, %v1826_v12   ;;  %v723_v23 = vpack.c.bf16 %v696_v19, %v695_v18  ;;  %v759_v27 = vld [vmem:[%s12375_s21 + $0xe0] sm:$0xff]  ;;  %v1833_v31 = vld [vmem:[%s16440_s2 + $0x50] sm:$0xff]  ;;  %v1834_v34 = vld [vmem:[%s16440_s2 + $0x58] sm:$0xff] }
  0x2e   : > { %10840 = vmatprep.mubr.msk.bf16.mxu0 %vm12219_vm1, %v12218_v0  ;;  %v697_v28 = vld [vmem:[%s12375_s21 + $0xe6] sm:$0xff]  ;;  %v787_v32 = vpack.c.bf16 %v759_v27, %v758_v26  ;;  %v761_v37 = vld [vmem:[%s12375_s21 + $0xf0] sm:$0xff]  ;;  %v700_v39 = vld [vmem:[%s12375_s21 + $0xfe] sm:$0xff] }
  0x2f   : > { %10933 = vmatmul.mubr.msk.bf16.gmra.mrb[8].mxu1 %vm809_vm2, %v714_v24  ;;  %v1830_v24 = vld [vmem:[%s16440_s2 + $0x38] sm:$0xff]  ;;  %v1836_v40 = vld [vmem:[%s16440_s2 + $0x68] sm:$0xff]  ;;  %v1839_v45 = vld [vmem:[%s16440_s2 + $0x80] sm:$0xff] }
  0x30   : > { %10936 = vmatprep.mubr.msk.bf16.mxu1 %vm12219_vm1, %v12218_v0  ;;  %1886 = vperm.xlu0 %12008, %v1827_v13   ;;  %v699_v38 = vld [vmem:[%s12375_s21 + $0xf6] sm:$0xff]  ;;  %v702_v49 = vld [vmem:[%s12375_s21 + $0x10e] sm:$0xff]  ;;  %v1843_v55 = vld [vmem:[%s16440_s2 + $0xa0] sm:$0xff] }
  0x31   : > { %1891 = vperm.xlu1 %12009, %v1828_v20   ;;  %v725_v43 = vpack.c.bf16 %v700_v39, %v699_v38  ;;  %v1838_v44 = vld [vmem:[%s16440_s2 + $0x78] sm:$0xff]  ;;  %v1840_v50 = vld [vmem:[%s16440_s2 + $0x88] sm:$0xff]  ;;  %v1841_v51 = vld [vmem:[%s16440_s2 + $0x90] sm:$0xff] }
  0x32   : > { %v762_v46 = vld [vmem:[%s12375_s21 + $0xf8] sm:$0xff]  ;;  %v764_v56 = vld [vmem:[%s12375_s21 + $0x108] sm:$0xff]  ;;  %v765_v57 = vld [vmem:[%s12375_s21 + $0x110] sm:$0xff] }
  0x33   : > { %v703_v58 = vld [vmem:[%s12375_s21 + $0x116] sm:$0xff]  ;;  %v790_v62 = vpack.c.bf16 %v765_v57, %v764_v56  ;;  %v705_v6 = vld [vmem:[%s12375_s21 + $0x126] sm:$0xff]  ;;  %v706_v7 = vld [vmem:[%s12375_s21 + $0x12e] sm:$0xff] }
  0x34   : > { %1896 = vperm.xlu0 %12008, %v1829_v21   ;;  %v1845_v61 = vld [vmem:[%s16440_s2 + $0xb0] sm:$0xff]  ;;  %v1846_v1 = vld [vmem:[%s16440_s2 + $0xb8] sm:$0xff]  ;;  %v1848_v8 = vld [vmem:[%s16440_s2 + $0xc8] sm:$0xff]  ;;  %v728_v11 = vpack.c.bf16 %v706_v7, %v705_v6 }
  0x35   : > { %10841 = vmatmul.mubr.msk.bf16.gmra.mrb[12].mxu0 %vm809_vm2, %v778_v29  ;;  %1901 = vperm.xlu1 %12009, %v1830_v24   ;;  %v698_v29 = vld [vmem:[%s12375_s21 + $0xee] sm:$0xff]  ;;  %v766_v3 = vld [vmem:[%s12375_s21 + $0x118] sm:$0xff]  ;;  %v1851_v13 = vld [vmem:[%s16440_s2 + $0xe0] sm:$0xff] }
  0x36   : > { %10844 = vmatprep.mubr.msk.bf16.mxu0 %vm12219_vm1, %v12218_v0  ;;  %v724_v33 = vpack.c.bf16 %v698_v29, %v697_v28  ;;  %v1849_v9 = vld [vmem:[%s16440_s2 + $0xd0] sm:$0xff]  ;;  %v1850_v12 = vld [vmem:[%s16440_s2 + $0xd8] sm:$0xff]  ;;  %v1852_v18 = vld [vmem:[%s16440_s2 + $0xe8] sm:$0xff] }
  0x37   : > { %10937 = vmatmul.mubr.msk.bf16.gmra.mrb[12].mxu1 %vm809_vm2, %v715_v30  ;;  %v1832_v30 = vld [vmem:[%s16440_s2 + $0x48] sm:$0xff]  ;;  %v707_v16 = vld [vmem:[%s12375_s21 + $0x136] sm:$0xff]  ;;  %v708_v17 = vld [vmem:[%s12375_s21 + $0x13e] sm:$0xff] }
  0x38   : > { %10940 = vmatprep.mubr.msk.bf16.mxu1 %vm12219_vm1, %v12218_v0  ;;  %1906 = vperm.xlu0 %12008, %v1831_v25   ;;  %v1853_v19 = vld [vmem:[%s16440_s2 + $0xf0] sm:$0xff]  ;;  %v729_v21 = vpack.c.bf16 %v708_v17, %v707_v16  ;;  %v770_v24 = vld [vmem:[%s12375_s21 + $0x138] sm:$0xff]  ;;  %v771_v25 = vld [vmem:[%s12375_s21 + $0x140] sm:$0xff] }
  0x39   : > { %1911 = vperm.xlu1 %12009, %v1832_v30   ;;  %v709_v26 = vld [vmem:[%s12375_s21 + $0x146] sm:$0xf]  ;;  %v1857_v28 = vld [vmem:[%s16440_s2 + $0x110] sm:$0xff]  ;;  %v793_v29 = vpack.c.bf16 %v771_v25, %v770_v24  ;;  %v1862_v38 = vld [vmem:[%s16440_s2 + $0x138] sm:$0xff] }
  0x3a   : > { %v1856_v27 = vld [vmem:[%s16440_s2 + $0x108] sm:$0xff]  ;;  %v730_v30 = vpack.c.bf16 %v709_v26, %v709_v26  ;;  %v774_v39 = vld [vmem:[%s12375_s21 + $0x158] sm:$0xf] }
  0x3b   : > { %v1356_v56 = vld [vmem:[%s12375_s21 + $0x4a] sm:$0xff]  ;;  %v1357_v57 = vld [vmem:[%s12375_s21 + $0x52] sm:$0xff] }
  0x3c   : > { %1916 = vperm.xlu0 %12008, %v1833_v31   ;;  %v1858_v31 = vld [vmem:[%s16440_s2 + $0x118] sm:$0xff] }
  0x3d   : > { %10845 = vmatmul.mubr.msk.bf16.gmra.mrb[16].mxu0 %vm809_vm2, %v779_v35  ;;  %v1835_v35 = vld [vmem:[%s16440_s2 + $0x60] sm:$0xff]  ;;  %1921 = vperm.xlu1 %12009, %v1834_v34   ;;  %v773_v34 = vld [vmem:[%s12375_s21 + $0x150] sm:$0xff] }
  0x3e   : > { %10848 = vmatprep.mubr.msk.bf16.mxu0 %vm12219_vm1, %v12218_v0 }
  0x3f   : > { %10941 = vmatmul.mubr.msk.bf16.gmra.mrb[16].mxu1 %vm809_vm2, %v716_v36  ;;  %v760_v36 = vld [vmem:[%s12375_s21 + $0xe8] sm:$0xff] }
  0x40   : > { %10944 = vmatprep.mubr.msk.bf16.mxu1 %vm12219_vm1, %v12218_v0  ;;  %1926 = vperm.xlu0 %12008, %v1835_v35   ;;  %v1860_v35 = vld [vmem:[%s16440_s2 + $0x128] sm:$0xff] }
  0x41   : > { %1931 = vperm.xlu1 %12009, %v1836_v40   ;;  %v795_v40 = vpack.c.bf16 %v774_v39, %v774_v39 }
  0x45   : > { %10849 = vmatmul.mubr.msk.bf16.gmra.mrb[20].mxu0 %vm809_vm2, %v780_v41  ;;  %v1837_v41 = vld [vmem:[%s16440_s2 + $0x70] sm:$0xff]  ;;  %1941 = vperm.xlu1 %12009, %v1838_v44   ;;  %v12014_v44 = vld [vmem:[%s16407_s8 + $0x18] sm:$0xff]  }
  0x46   : > { %10852 = vmatprep.mubr.msk.bf16.mxu0 %vm12219_vm1, %v12218_v0  ;;  %1936 = vperm.xlu0 %12008, %v1837_v41   ;;  %v669_v41 = vld [vmem:[%s12375_s21 + $0x6] sm:$0xff] }
  0x47   : > { %10945 = vmatmul.mubr.msk.bf16.gmra.mrb[20].mxu1 %vm809_vm2, %v717_v42  ;;  %v788_v42 = vpack.c.bf16 %v761_v37, %v760_v36  ;;  %v1861_v36 = vld [vmem:[%s16440_s2 + $0x130] sm:$0xff] }
  0x48   : > { %10948 = vmatprep.mubr.msk.bf16.mxu1 %vm12219_vm1, %v12218_v0 }
  0x49   : > { %1951 = vperm.xlu1 %12009, %v1840_v50   ;;  %v1352_v50 = vld [vmem:[%s12375_s21 + $0x2a] sm:$0xff] }
  0x4a   : > { %1946 = vperm.xlu0 %12008, %v1839_v45   ;;  %v12015_v45 = vld [vmem:[%s16407_s8 + $0x20] ss:$0 sps:$4 sm:$0xff]  }
  0x4d   : > { %10853 = vmatmul.mubr.msk.bf16.gmra.mrb[24].mxu0 %vm809_vm2, %v781_v47  ;;  %v763_v47 = vld [vmem:[%s12375_s21 + $0x100] sm:$0xff] }
  0x4e   : > { %10856 = vmatprep.mubr.msk.bf16.mxu0 %vm12219_vm1, %v12218_v0  ;;  %v789_v52 = vpack.c.bf16 %v763_v47, %v762_v46  ;;  %1956 = vperm.xlu0 %12008, %v1841_v51   ;;  %v671_v46 = vld [vmem:[%s12375_s21 + $0x16] sm:$0xff]  ;;  %v672_v47 = vld [vmem:[%s12375_s21 + $0x1e] sm:$0xff] }
  0x4f   : > { %10949 = vmatmul.mubr.msk.bf16.gmra.mrb[24].mxu1 %vm809_vm2, %v718_v48  ;;  %v701_v48 = vld [vmem:[%s12375_s21 + $0x106] sm:$0xff]  ;;  %v1353_v51 = vld [vmem:[%s12375_s21 + $0x32] sm:$0xff] }
  0x50   : > { %10952 = vmatprep.mubr.msk.bf16.mxu1 %vm12219_vm1, %v12218_v0 }
  0x52   : > { %1966 = vperm.xlu0 %12008, %v1843_v55  }
  0x55   : > { %10857 = vmatmul.mubr.msk.bf16.gmra.mrb[28].mxu0 %vm809_vm2, %v782_v53  ;;  %v726_v53 = vpack.c.bf16 %v702_v49, %v701_v48  ;;  %v1491_v48 = vsel %vm873_vm0, %v12015_v45, 0  ;;  %v711_v49 = vpack.c.bf16 %v672_v47, %v671_v46  ;;  %vm4142_vm0 = vcmask 556032  }
  0x56   : > { %10860 = vmatprep.mubr.msk.bf16.mxu0 %vm12219_vm1, %v12218_v0  ;;  %1976 = vperm.xlu0 %12008, %v1845_v61  }
  0x57   : > { %10953 = vmatmul.mubr.msk.bf16.gmra.mrb[28].mxu1 %vm809_vm2, %v719_v54  ;;  %v1842_v54 = vld [vmem:[%s16440_s2 + $0x98] sm:$0xff] }
  0x58   : > { %10956 = vmatprep.mubr.msk.bf16.mxu1 %vm12219_vm1, %v12218_v0  ;;  %1961 = vperm.xlu1 %12009, %v1842_v54   ;;  %v1355_v54 = vld [vmem:[%s12375_s21 + $0x42] sm:$0xff] }
  0x5d   : > { %10861 = vmatmul.mubr.msk.bf16.gmra.mrb[32].mxu0 %vm809_vm2, %v783_v59  ;;  %v704_v59 = vld [vmem:[%s12375_s21 + $0x11e] sm:$0xff] }
  0x5e   : > { %10864 = vmatprep.mubr.msk.bf16.mxu0 %vm12219_vm1, %v12218_v0  ;;  %v727_v63 = vpack.c.bf16 %v704_v59, %v703_v58  ;;  %v1395_v58 = vpack.c.bf16 %v1357_v57, %v1356_v56  ;;  %v1358_v59 = vld [vmem:[%s12375_s21 + $0x5a] sm:$0xff] }
  0x5f   : > { %10957 = vmatmul.mubr.msk.bf16.gmra.mrb[32].mxu1 %vm809_vm2, %v720_v60  ;;  %v1844_v60 = vld [vmem:[%s16440_s2 + $0xa8] sm:$0xff] }
  0x60   : > { %10960 = vmatprep.mubr.msk.bf16.mxu1 %vm12219_vm1, %v12218_v0  ;;  %1971 = vperm.xlu1 %12009, %v1844_v60   ;;  %v1359_v60 = vld [vmem:[%s12375_s21 + $0x62] sm:$0xff] }
  0x61   : > { %v1396_v61 = vpack.c.bf16 %v1359_v60, %v1358_v59 }
  0x64   : > { %1981 = vperm.xlu1 %12009, %v1846_v1  }
  0x65   : > { %10865 = vmatmul.mubr.msk.bf16.gmra.mrb[36].mxu0 %vm809_vm2, %v784_v4  ;;  %v767_v4 = vld [vmem:[%s12375_s21 + $0x120] sm:$0xff] }
  0x66   : > { %10868 = vmatprep.mubr.msk.bf16.mxu0 %vm12219_vm1, %v12218_v0  ;;  %v791_v10 = vpack.c.bf16 %v767_v4, %v766_v3 }
  0x67   : > { %10961 = vmatmul.mubr.msk.bf16.gmra.mrb[36].mxu1 %vm809_vm2, %v721_v5  ;;  %v12615_v5 = vld [vmem:[#allocation2] sm:$0xff] }
  0x68   : > { %10964 = vmatprep.mubr.msk.bf16.mxu1 %vm12219_vm1, %v12218_v0  ;;  %1991 = vperm.xlu1 %12009, %v1848_v8  }
  0x6c   : > { %2001 = vperm.xlu1 %12009, %v1850_v12   ;;  %v1363_v12 = vld [vmem:[%s12375_s21 + $0x82] sm:$0xff] }
  0x6d   : > { %10869 = vmatmul.mubr.msk.bf16.gmra.mrb[40].mxu0 %vm809_vm2, %v785_v14  ;;  %v768_v14 = vld [vmem:[%s12375_s21 + $0x128] sm:$0xff] }
  0x6e   : > { %10872 = vmatprep.mubr.msk.bf16.mxu0 %vm12219_vm1, %v12218_v0 }
  0x6f   : > { %10965 = vmatmul.mubr.msk.bf16.gmra.mrb[40].mxu1 %vm809_vm2, %v722_v15  ;;  %v769_v15 = vld [vmem:[%s12375_s21 + $0x130] sm:$0xff] }
  0x70   : > { %10968 = vmatprep.mubr.msk.bf16.mxu1 %vm12219_vm1, %v12218_v0  ;;  %v792_v20 = vpack.c.bf16 %v769_v15, %v768_v14  ;;  %2011 = vperm.xlu1 %12009, %v1852_v18  }
  0x75   : > { %10873 = vmatmul.mubr.msk.bf16.gmra.mrb[44].mxu0 %vm809_vm2, %v786_v22  ;;  %v1854_v22 = vld [vmem:[%s16440_s2 + $0xf8] sm:$0xff] }
  0x76   : > { %10876 = vmatprep.mubr.msk.bf16.mxu0 %vm12219_vm1, %v12218_v0  ;;  %2021 = vperm.xlu1 %12009, %v1854_v22   ;;  %v1364_v22 = vld [vmem:[%s12375_s21 + $0x8a] sm:$0xff] }
  0x77   : > { %10969 = vmatmul.mubr.msk.bf16.gmra.mrb[44].mxu1 %vm809_vm2, %v723_v23  ;;  %v1855_v23 = vld [vmem:[%s16440_s2 + $0x100] sm:$0xff] }
  0x78   : > { %10972 = vmatprep.mubr.msk.bf16.mxu1 %vm12219_vm1, %v12218_v0 }
  0x7a   : > { %2031 = vperm.xlu1 %12009, %v1856_v27  }
  0x7d   : > { %10877 = vmatmul.mubr.msk.bf16.gmra.mrb[48].mxu0 %vm809_vm2, %v787_v32  ;;  %v1859_v32 = vld [vmem:[%s16440_s2 + $0x120] sm:$0xff] }
  0x7e   : > { %10880 = vmatprep.mubr.msk.bf16.mxu0 %vm12219_vm1, %v12218_v0  ;;  %2041 = vperm.xlu1 %12009, %v1858_v31  }
  0x7f   : > { %10973 = vmatmul.mubr.msk.bf16.gmra.mrb[48].mxu1 %vm809_vm2, %v724_v33  ;;  %v772_v33 = vld [vmem:[%s12375_s21 + $0x148] sm:$0xff] }
  0x80   : > { %10976 = vmatprep.mubr.msk.bf16.mxu1 %vm12219_vm1, %v12218_v0  ;;  %v794_v37 = vpack.c.bf16 %v773_v34, %v772_v33 }
  0x82   : > { %2051 = vperm.xlu1 %12009, %v1860_v35   ;;  %v1366_v35 = vld [vmem:[%s12375_s21 + $0x9a] sm:$0xff] }
  0x85   : > { %10881 = vmatmul.mubr.msk.bf16.gmra.mrb[52].mxu0 %vm809_vm2, %v788_v42  ;;  %v670_v42 = vld [vmem:[%s12375_s21 + $0xe] sm:$0xff] }
  0x86   : > { %10884 = vmatprep.mubr.msk.bf16.mxu0 %vm12219_vm1, %v12218_v0  ;;  %2061 = vperm.xlu1 %12009, %v1862_v38  }
  0x87   : > { %10977 = vmatmul.mubr.msk.bf16.gmra.mrb[52].mxu1 %vm809_vm2, %v725_v43  ;;  %v710_v43 = vpack.c.bf16 %v670_v42, %v669_v41 }
  0x88   : > { %10980 = vmatprep.mubr.msk.bf16.mxu1 %vm12219_vm1, %v12218_v0 }
  0x8d   : > { %10885 = vmatmul.mubr.msk.bf16.gmra.mrb[56].mxu0 %vm809_vm2, %v789_v52  ;;  %v1393_v52 = vpack.c.bf16 %v1353_v51, %v1352_v50 }
  0x8e   : > { %10888 = vmatprep.mubr.msk.bf16.mxu0 %vm12219_vm1, %v12218_v0 }
  0x8f   : > { %10981 = vmatmul.mubr.msk.bf16.gmra.mrb[56].mxu1 %vm809_vm2, %v726_v53  ;;  %v1354_v53 = vld [vmem:[%s12375_s21 + $0x3a] sm:$0xff] }
  0x90   : > { %10984 = vmatprep.mubr.msk.bf16.mxu1 %vm12219_vm1, %v12218_v0  ;;  %v1847_v0 = vld [vmem:[%s16440_s2 + $0xc0] sm:$0xff]  ;;  %v1394_v55 = vpack.c.bf16 %v1355_v54, %v1354_v53 }
  0x91   : > { %1986 = vperm.xlu0 %12008, %v1847_v0  }
  0x95   : > { %10889 = vmatmul.mubr.msk.bf16.gmra.mrb[60].mxu0 %vm809_vm2, %v790_v62  ;;  %1996 = vperm.xlu0 %12008, %v1849_v9   ;;  %v1360_v62 = vld [vmem:[%s12375_s21 + $0x6a] sm:$0xff] }
  0x96   : > { %10892 = vmatprep.mubr.msk.bf16.mxu0 %vm12219_vm1, %v12615_v5 }
  0x97   : > { %10985 = vmatmul.mubr.msk.bf16.gmra.mrb[60].mxu1 %vm809_vm2, %v727_v63  ;;  %v1361_v63 = vld [vmem:[%s12375_s21 + $0x72] sm:$0xff] }
  0x98   : > { %10988 = vmatprep.mubr.msk.bf16.mxu1 %vm12219_vm1, %v12615_v5  ;;  %v1397_v3 = vpack.c.bf16 %v1361_v63, %v1360_v62  ;;  %v1371_v62 = vld [vmem:[%s12375_s21 + $0xc2] sm:$0xff] }
  0x99   : > { %2006 = vperm.xlu0 %12008, %v1851_v13  }
  0x9d   : > { %10893 = vmatmul.mubr.msk.bf16.gmra.mrb[64].mxu0 %vm809_vm2, %v791_v10  ;;  %2016 = vperm.xlu0 %12008, %v1853_v19  }
  0x9e   : > { %10896 = vmatprep.mubr.msk.bf16.mxu0 %vm12219_vm1, %v12615_v5 }
  0x9f   : > { %10989 = vmatmul.mubr.msk.bf16.gmra.mrb[64].mxu1 %vm809_vm2, %v728_v11  ;;  %v1362_v11 = vld [vmem:[%s12375_s21 + $0x7a] sm:$0xff] }
  0xa0   : > { %10992 = vmatprep.mubr.msk.bf16.mxu1 %vm12219_vm1, %v12615_v5  ;;  %v1398_v15 = vpack.c.bf16 %v1363_v12, %v1362_v11 }
  0xa1   : > { %2026 = vperm.xlu0 %12008, %v1855_v23   ;;  %v1365_v23 = vld [vmem:[%s12375_s21 + $0x92] sm:$0xff] }
  0xa2   : > { %v1399_v27 = vpack.c.bf16 %v1365_v23, %v1364_v22 }
  0xa5   : > { %10897 = vmatmul.mubr.msk.bf16.gmra.mrb[68].mxu0 %vm809_vm2, %v792_v20  ;;  %2036 = vperm.xlu0 %12008, %v1857_v28  }
  0xa6   : > { %10900 = vmatprep.mubr.msk.bf16.mxu0 %vm12219_vm1, %v12615_v5 }
  0xa7   : > { %10993 = vmatmul.mubr.msk.bf16.gmra.mrb[68].mxu1 %vm809_vm2, %v729_v21 }
  0xa8   : > { %10996 = vmatprep.mubr.msk.bf16.mxu1 %vm12219_vm1, %v12615_v5 }
  0xa9   : > { %2046 = vperm.xlu0 %12008, %v1859_v32  }
  0xad   : > { %10901 = vmatmul.mubr.msk.bf16.gmra.mrb[72].mxu0 %vm809_vm2, %v793_v29  ;;  %2056 = vperm.xlu0 %12008, %v1861_v36   ;;  %v1367_v36 = vld [vmem:[%s12375_s21 + $0xa2] sm:$0xff] }
  0xae   : > { %10904 = vmatprep.mubr.msk.bf16.mxu0 %vm12219_vm1, %v12615_v5 }
  0xaf   : > { %10997 = vmatmul.mubr.msk.bf16.gmra.mrb[72].mxu1 %vm809_vm2, %v730_v30 }
  0xb0   : > { %11100 = vmatprep.mubr.msk.bf16.mxu1 %vm12219_vm1, %v12615_v5 }
  0xb5   : > { %10905 = vmatmul.mubr.msk.bf16.gmra.mrb[76].mxu0 %vm809_vm2, %v794_v37 }
  0xb6   : > { %10908 = vmatprep.mubr.msk.bf16.mxu0 %vm12219_vm1, %v12615_v5 }
  0xbd   : > { %10909 = vmatmul.mubr.msk.bf16.gmra.mrb[80].mxu0 %vm809_vm2, %v795_v40  ;;  %v1400_v40 = vpack.c.bf16 %v1367_v36, %v1366_v35 }
  0xbe   : > { %10916 = vmatprep.mubr.msk.bf16.mxu0 %vm12219_vm1, %v12615_v5 }
  0xc5   : > { %10917 = vmatmul.mubr.msk.bf16.vlgmr.msra.gmra.mrb[84].mxu0 %vm809_vm2, %v710_v43 }
  0xc6   : > { %10920 = vmatprep.mubr.msk.bf16.mxu0 %vm12219_vm1, %v12615_v5  ;;  %11001 = vmatpush3.bf16.msra.mxu0 %v12014_v44 }
  0xc7   : > { %11002 = vmatprep.subr.bf16.mxu0 %v12615_v5 }
  0xca   : > { %11003 = vmatpush3.bf16.msra.mxu0 %v1491_v48  ;;  %v1368_v48 = vld [vmem:[%s12375_s21 + $0xaa] sm:$0xff] }
  0xcd   : > { %10921 = vmatmul.mubr.msk.bf16.gmra.mrb[88].mxu0 %vm809_vm2, %v711_v49  ;;  %v1369_v49 = vld [vmem:[%s12375_s21 + $0xb2] sm:$0xff] }
  0xce   : > { %11004 = vmatprep.mubr.msk.bf16.mxu0 %vm12219_vm1, %v12615_v5  ;;  %v1401_v53 = vpack.c.bf16 %v1369_v49, %v1368_v48 }
  0xd5   : > { %11005 = vmatmul.mubr.msk.bf16.vlgmr.msra.gmra.mrb[92].mxu0 %vm809_vm2, %v1393_v52 }
  0xd6   : > { %11008 = vmatprep.mubr.msk.bf16.mxu0 %vm12219_vm1, %v12615_v5 }
  0xdd   : > { %11009 = vmatmul.mubr.msk.bf16.gmra.mrb[96].mxu0 %vm809_vm2, %v1394_v55 }
  0xde   : > { %11012 = vmatprep.mubr.msk.bf16.mxu0 %vm12219_vm1, %v12615_v5 }
  0xe5   : > { %11013 = vmatmul.mubr.msk.bf16.gmra.mrb[100].mxu0 %vm809_vm2, %v1395_v58 }
  0xe6   : > { %11016 = vmatprep.mubr.msk.bf16.mxu0 %vm12219_vm1, %v12615_v5 }
  0xed   : > { %11017 = vmatmul.mubr.msk.bf16.gmra.mrb[104].mxu0 %vm809_vm2, %v1396_v61  ;;  %v1370_v61 = vld [vmem:[%s12375_s21 + $0xba] sm:$0xff] }
  0xee   : > { %11020 = vmatprep.mubr.msk.bf16.mxu0 %vm12219_vm1, %v12615_v5 }
  0xf0   : > { %v12743_v1 = vpop.f32.mrb[0].mxu0 }
  0xf1   : > { %v10830_v0 = vpop.f32.mrb[1].mxu0 }
  0xf2   : > { %v12745_v4 = vpop.f32.mrb[2].mxu0  ;;  %v1202_v6 = vpop.f32.mrb[0].mxu1 }
  0xf3   : > { %v10831_v7 = vpop.f32.mrb[3].mxu0  ;;  %v10926_v8 = vpop.f32.mrb[1].mxu1 }
  0xf4   : > { %v1205_v9 = vpop.f32.mrb[2].mxu1 }
  0xf5   : > { %11021 = vmatmul.mubr.msk.bf16.gmra.mrb[108].mxu0 %vm809_vm2, %v1397_v3  ;;  %v10927_v10 = vpop.f32.mrb[3].mxu1 }
  0xf6   : > { %11024 = vmatprep.mubr.msk.bf16.mxu0 %vm12219_vm1, %v12615_v5 }
  0xf8   : > { %v12752_v13 = vpop.f32.mrb[4].mxu0 }
  0xf9   : > { %v10834_v14 = vpop.f32.mrb[5].mxu0 }
  0xfa   : > { %v12754_v16 = vpop.f32.mrb[6].mxu0  ;;  %v1210_v17 = vpop.f32.mrb[4].mxu1 }
  0xfb   : > { %v10835_v18 = vpop.f32.mrb[7].mxu0  ;;  %v10930_v19 = vpop.f32.mrb[5].mxu1 }
  0xfc   : > { %v1213_v20 = vpop.f32.mrb[6].mxu1 }
  0xfd   : > { %11025 = vmatmul.mubr.msk.bf16.gmra.mrb[112].mxu0 %vm809_vm2, %v1398_v15  ;;  %v10931_v21 = vpop.f32.mrb[7].mxu1  ;;  %v1372_v15 = vld [vmem:[%s12375_s21 + $0xca] sm:$0xff] }
  0xfe   : > { %11028 = vmatprep.mubr.msk.bf16.mxu0 %vm12219_vm1, %v12615_v5 }
 0x100   : > { %v927_v24 = vpop.f32.mrb[8].mxu0 }
 0x101   : > { %v12761_v25 = vadd.f32 %v1202_v6, %v927_v24  ;;  %v10838_v26 = vpop.f32.mrb[9].mxu0  ;;  %v1402_v6 = vpack.c.bf16 %v1371_v62, %v1370_v61  ;;  %v1378_v61 = vld [vmem:[%s12375_s21 + $0xfa] sm:$0xff]  ;;  %v1379_v62 = vld [vmem:[%s12375_s21 + $0x102] sm:$0xff] }
 0x102   : > { %v930_v28 = vpop.f32.mrb[10].mxu0  ;;  %v1218_v29 = vpop.f32.mrb[8].mxu1 }
 0x103   : > { %v12763_v30 = vadd.f32 %v1205_v9, %v930_v28  ;;  %v10839_v31 = vpop.f32.mrb[11].mxu0  ;;  %v10934_v32 = vpop.f32.mrb[9].mxu1 }
 0x104   : > { %v1221_v33 = vpop.f32.mrb[10].mxu1  ;;  %v1374_v31 = vld [vmem:[%s12375_s21 + $0xda] sm:$0xff]  ;;  %v1375_v32 = vld [vmem:[%s12375_s21 + $0xe2] sm:$0xff] }
 0x105   : > { %11029 = vmatmul.mubr.msk.bf16.gmra.mrb[116].mxu0 %vm809_vm2, %v1399_v27  ;;  %v10935_v34 = vpop.f32.mrb[11].mxu1  ;;  %v1404_v36 = vpack.c.bf16 %v1375_v32, %v1374_v31 }
 0x106   : > { %11032 = vmatprep.mubr.msk.bf16.mxu0 %vm12219_vm1, %v12615_v5 }
 0x108   : > { %v935_v37 = vpop.f32.mrb[12].mxu0 }
 0x109   : > { %v12770_v38 = vadd.f32 %v1210_v17, %v935_v37  ;;  %v10842_v39 = vpop.f32.mrb[13].mxu0  ;;  %v1373_v17 = vld [vmem:[%s12375_s21 + $0xd2] sm:$0xff] }
 0x10a   : > { %v938_v41 = vpop.f32.mrb[14].mxu0  ;;  %v1226_v42 = vpop.f32.mrb[12].mxu1  ;;  %v1403_v21 = vpack.c.bf16 %v1373_v17, %v1372_v15 }
 0x10b   : > { %v12772_v43 = vadd.f32 %v1213_v20, %v938_v41  ;;  %v10843_v44 = vpop.f32.mrb[15].mxu0  ;;  %v10938_v45 = vpop.f32.mrb[13].mxu1 }
 0x10c   : > { %v1229_v46 = vpop.f32.mrb[14].mxu1 }
 0x10d   : > { %11033 = vmatmul.mubr.msk.bf16.gmra.mrb[120].mxu0 %vm809_vm2, %v1400_v40  ;;  %v10939_v47 = vpop.f32.mrb[15].mxu1 }
 0x10e   : > { %11036 = vmatprep.mubr.msk.bf16.mxu0 %vm12219_vm1, %v12615_v5  ;;  %v1377_v47 = vld [vmem:[%s12375_s21 + $0xf2] sm:$0xff] }
 0x110   : > { %v943_v50 = vpop.f32.mrb[16].mxu0 }
 0x111   : > { %v12779_v51 = vadd.f32 %v1218_v29, %v943_v50  ;;  %v10846_v52 = vpop.f32.mrb[17].mxu0 }
 0x112   : > { %v946_v54 = vpop.f32.mrb[18].mxu0  ;;  %v1234_v55 = vpop.f32.mrb[16].mxu1 }
 0x113   : > { %v12781_v56 = vadd.f32 %v1221_v33, %v946_v54  ;;  %v10847_v57 = vpop.f32.mrb[19].mxu0  ;;  %v10942_v58 = vpop.f32.mrb[17].mxu1 }
 0x114   : > { %v1237_v59 = vpop.f32.mrb[18].mxu1 }
 0x115   : > { %11037 = vmatmul.mubr.msk.bf16.gmra.mrb[124].mxu0 %vm809_vm2, %v1401_v53  ;;  %v10943_v60 = vpop.f32.mrb[19].mxu1 }
 0x116   : > { %11040 = vmatprep.mubr.msk.bf16.mxu0 %vm12219_vm1, %v12615_v5 }
 0x118   : > { %v951_v63 = vpop.f32.mrb[20].mxu0 }
 0x119   : > { %v12788_v0 = vadd.f32 %v1226_v42, %v951_v63  ;;  %v10850_v3 = vpop.f32.mrb[21].mxu0 }
 0x11a   : > { %v954_v7 = vpop.f32.mrb[22].mxu0  ;;  %v1242_v8 = vpop.f32.mrb[20].mxu1 }
 0x11b   : > { %v12790_v9 = vadd.f32 %v1229_v46, %v954_v7  ;;  %v10851_v10 = vpop.f32.mrb[23].mxu0  ;;  %v10946_v11 = vpop.f32.mrb[21].mxu1  ;;  %v1376_v46 = vld [vmem:[%s12375_s21 + $0xea] sm:$0xff]  ;;  %v1406_v7 = vpack.c.bf16 %v1379_v62, %v1378_v61 }
 0x11c   : > { %v1245_v12 = vpop.f32.mrb[22].mxu1  ;;  %v1405_v52 = vpack.c.bf16 %v1377_v47, %v1376_v46 }
 0x11d   : > { %11041 = vmatmul.mubr.msk.bf16.gmra.mrb[128].mxu0 %vm809_vm2, %v1402_v6  ;;  %v10947_v14 = vpop.f32.mrb[23].mxu1 }
 0x11e   : > { %11044 = vmatprep.mubr.msk.bf16.mxu0 %vm12219_vm1, %v12615_v5 }
 0x120   : > { %v959_v18 = vpop.f32.mrb[24].mxu0 }
 0x121   : > { %v12797_v19 = vadd.f32 %v1234_v55, %v959_v18  ;;  %v10854_v20 = vpop.f32.mrb[25].mxu0  ;;  %v1380_v18 = vld [vmem:[%s12375_s21 + $0x10a] sm:$0xff] }
 0x122   : > { %v962_v22 = vpop.f32.mrb[26].mxu0  ;;  %v1250_v23 = vpop.f32.mrb[24].mxu1  ;;  %v1381_v20 = vld [vmem:[%s12375_s21 + $0x112] sm:$0xff] }
 0x123   : > { %v12799_v24 = vadd.f32 %v1237_v59, %v962_v22  ;;  %v10855_v26 = vpop.f32.mrb[27].mxu0  ;;  %v10950_v27 = vpop.f32.mrb[25].mxu1 }
 0x124   : > { %v1253_v28 = vpop.f32.mrb[26].mxu1  ;;  %v1407_v26 = vpack.c.bf16 %v1381_v20, %v1380_v18 }
 0x125   : > { %11045 = vmatmul.mubr.msk.bf16.gmra.mrb[132].mxu0 %vm809_vm2, %v1403_v21  ;;  %v10951_v29 = vpop.f32.mrb[27].mxu1 }
 0x126   : > { %11048 = vmatprep.mubr.msk.bf16.mxu0 %vm12219_vm1, %v12615_v5 }
 0x128   : > { %v967_v33 = vpop.f32.mrb[28].mxu0 }
 0x129   : > { %v12806_v34 = vadd.f32 %v1242_v8, %v967_v33  ;;  %v10858_v35 = vpop.f32.mrb[29].mxu0 }
 0x12a   : > { %v970_v37 = vpop.f32.mrb[30].mxu0  ;;  %v1258_v39 = vpop.f32.mrb[28].mxu1 }
 0x12b   : > { %v12808_v40 = vadd.f32 %v1245_v12, %v970_v37  ;;  %v10859_v41 = vpop.f32.mrb[31].mxu0  ;;  %v10954_v42 = vpop.f32.mrb[29].mxu1  ;;  %v1383_v37 = vld [vmem:[%s12375_s21 + $0x122] sm:$0xff] }
 0x12c   : > { %v1261_v44 = vpop.f32.mrb[30].mxu1 }
 0x12d   : > { %11049 = vmatmul.mubr.msk.bf16.gmra.mrb[136].mxu0 %vm809_vm2, %v1404_v36  ;;  %v10955_v45 = vpop.f32.mrb[31].mxu1  ;;  %v1382_v36 = vld [vmem:[%s12375_s21 + $0x11a] sm:$0xff] }
 0x12e   : > { %11052 = vmatprep.mubr.msk.bf16.mxu0 %vm12219_vm1, %v12615_v5 }
 0x130   : > { %v975_v48 = vpop.f32.mrb[32].mxu0 }
 0x131   : > { %v12815_v49 = vadd.f32 %v1250_v23, %v975_v48  ;;  %v10862_v50 = vpop.f32.mrb[33].mxu0 }
 0x132   : > { %v978_v53 = vpop.f32.mrb[34].mxu0  ;;  %v1266_v54 = vpop.f32.mrb[32].mxu1 }
 0x133   : > { %v12817_v55 = vadd.f32 %v1253_v28, %v978_v53  ;;  %v10863_v57 = vpop.f32.mrb[35].mxu0  ;;  %v10958_v58 = vpop.f32.mrb[33].mxu1 }
 0x134   : > { %v1269_v59 = vpop.f32.mrb[34].mxu1  ;;  %v1385_v57 = vld [vmem:[%s12375_s21 + $0x132] sm:$0xff] }
 0x135   : > { %11053 = vmatmul.mubr.msk.bf16.gmra.mrb[140].mxu0 %vm809_vm2, %v1405_v52  ;;  %v10959_v60 = vpop.f32.mrb[35].mxu1 }
 0x136   : > { %11056 = vmatprep.mubr.msk.bf16.mxu0 %vm12219_vm1, %v12615_v5 }
 0x138   : > { %v983_v63 = vpop.f32.mrb[36].mxu0 }
 0x139   : > { %v12824_v3 = vadd.f32 %v1258_v39, %v983_v63  ;;  %v10866_v6 = vpop.f32.mrb[37].mxu0 }
 0x13a   : > { %v986_v8 = vpop.f32.mrb[38].mxu0  ;;  %v1274_v10 = vpop.f32.mrb[36].mxu1 }
 0x13b   : > { %v12826_v11 = vadd.f32 %v1261_v44, %v986_v8  ;;  %v10867_v12 = vpop.f32.mrb[39].mxu0  ;;  %v10962_v14 = vpop.f32.mrb[37].mxu1  ;;  %v1408_v44 = vpack.c.bf16 %v1383_v37, %v1382_v36  ;;  %v1389_v36 = vld [vmem:[%s12375_s21 + $0x152] sm:$0xff] }
 0x13c   : > { %v1277_v15 = vpop.f32.mrb[38].mxu1  ;;  %v1386_v14 = vld [vmem:[%s12375_s21 + $0x13a] sm:$0xff] }
 0x13d   : > { %11057 = vmatmul.mubr.msk.bf16.gmra.mrb[144].mxu0 %vm809_vm2, %v1406_v7  ;;  %v10963_v17 = vpop.f32.mrb[39].mxu1 }
 0x13e   : > { %11060 = vmatprep.mubr.msk.bf16.mxu0 %vm12219_vm1, %v12615_v5 }
 0x140   : > { %v991_v21 = vpop.f32.mrb[40].mxu0 }
 0x141   : > { %v12833_v22 = vadd.f32 %v1266_v54, %v991_v21  ;;  %v10870_v23 = vpop.f32.mrb[41].mxu0  ;;  %v1384_v54 = vld [vmem:[%s12375_s21 + $0x12a] sm:$0xff] }
 0x142   : > { %v994_v27 = vpop.f32.mrb[42].mxu0  ;;  %v1282_v28 = vpop.f32.mrb[40].mxu1  ;;  %v1409_v61 = vpack.c.bf16 %v1385_v57, %v1384_v54  ;;  %v1390_v57 = vld [vmem:[%s12375_s21 + $0x15a] sm:$0xff] }
 0x143   : > { %v12835_v29 = vadd.f32 %v1269_v59, %v994_v27  ;;  %v10871_v31 = vpop.f32.mrb[43].mxu0  ;;  %v10966_v32 = vpop.f32.mrb[41].mxu1 }
 0x144   : > { %v1285_v33 = vpop.f32.mrb[42].mxu1 }
 0x145   : > { %11061 = vmatmul.mubr.msk.bf16.gmra.mrb[148].mxu0 %vm809_vm2, %v1407_v26  ;;  %v10967_v35 = vpop.f32.mrb[43].mxu1 }
 0x146   : > { %11064 = vmatprep.mubr.msk.bf16.mxu0 %vm12219_vm1, %v12615_v5  ;;  %v1388_v35 = vld [vmem:[%s12375_s21 + $0x14a] sm:$0xff] }
 0x148   : > { %v999_v39 = vpop.f32.mrb[44].mxu0 }
 0x149   : > { %v12842_v41 = vadd.f32 %v1274_v10, %v999_v39  ;;  %v10874_v42 = vpop.f32.mrb[45].mxu0 }
 0x14a   : > { %v1002_v45 = vpop.f32.mrb[46].mxu0  ;;  %v1290_v46 = vpop.f32.mrb[44].mxu1 }
 0x14b   : > { %v12844_v47 = vadd.f32 %v1277_v15, %v1002_v45  ;;  %v10875_v48 = vpop.f32.mrb[47].mxu0  ;;  %v10970_v50 = vpop.f32.mrb[45].mxu1  ;;  %v1387_v15 = vld [vmem:[%s12375_s21 + $0x142] sm:$0xff] }
 0x14c   : > { %v1293_v52 = vpop.f32.mrb[46].mxu1  ;;  %v1410_v21 = vpack.c.bf16 %v1387_v15, %v1386_v14 }
 0x14d   : > { %11065 = vmatmul.mubr.msk.bf16.gmra.mrb[152].mxu0 %vm809_vm2, %v1408_v44  ;;  %v10971_v53 = vpop.f32.mrb[47].mxu1  ;;  %v1411_v44 = vpack.c.bf16 %v1389_v36, %v1388_v35 }
 0x14e   : > { %11068 = vmatprep.mubr.msk.bf16.mxu0 %vm12219_vm1, %v12615_v5 }
 0x150   : > { %v1007_v58 = vpop.f32.mrb[48].mxu0 }
 0x151   : > { %v12851_v59 = vadd.f32 %v1282_v28, %v1007_v58  ;;  %v10878_v60 = vpop.f32.mrb[49].mxu0  ;;  %v1391_v58 = vld [vmem:[%s12375_s21 + $0x162] sm:$0xff] }
 0x152   : > { %v1010_v62 = vpop.f32.mrb[50].mxu0  ;;  %v1298_v63 = vpop.f32.mrb[48].mxu1 }
 0x153   : > { %v12853_v6 = vadd.f32 %v1285_v33, %v1010_v62  ;;  %v10879_v7 = vpop.f32.mrb[51].mxu0  ;;  %v10974_v8 = vpop.f32.mrb[49].mxu1 }
 0x154   : > { %v1301_v10 = vpop.f32.mrb[50].mxu1 }
 0x155   : > { %11069 = vmatmul.mubr.msk.bf16.gmra.mrb[156].mxu0 %vm809_vm2, %v1409_v61  ;;  %v10975_v12 = vpop.f32.mrb[51].mxu1 }
 0x156   : > { %11072 = vmatprep.mubr.msk.bf16.mxu0 %vm12219_vm1, %v12615_v5 }
 0x158   : > { %v1015_v17 = vpop.f32.mrb[52].mxu0 }
 0x159   : > { %v12860_v18 = vadd.f32 %v1290_v46, %v1015_v17  ;;  %v10882_v20 = vpop.f32.mrb[53].mxu0 }
 0x15a   : > { %v1018_v23 = vpop.f32.mrb[54].mxu0  ;;  %v1306_v26 = vpop.f32.mrb[52].mxu1  ;;  %v1392_v20 = vld [vmem:[%s12375_s21 + $0x16a] sm:$0xf] }
 0x15b   : > { %v12862_v27 = vadd.f32 %v1293_v52, %v1018_v23  ;;  %v10883_v28 = vpop.f32.mrb[55].mxu0  ;;  %v10978_v31 = vpop.f32.mrb[53].mxu1 }
 0x15c   : > { %v1309_v32 = vpop.f32.mrb[54].mxu1  ;;  %v1413_v28 = vpack.c.bf16 %v1392_v20, %v1392_v20 }
 0x15d   : > { %11073 = vmatmul.mubr.msk.bf16.gmra.mrb[160].mxu0 %vm809_vm2, %v1410_v21  ;;  %v10979_v33 = vpop.f32.mrb[55].mxu1 }
 0x15e   : > { %11076 = vmatprep.mubr.msk.bf16.mxu0 %vm12219_vm1, %v12615_v5 }
 0x160   : > { %v1023_v37 = vpop.f32.mrb[56].mxu0 }
 0x161   : > { %v12869_v39 = vadd.f32 %v1298_v63, %v1023_v37  ;;  %v10886_v42 = vpop.f32.mrb[57].mxu0  ;;  %v1412_v63 = vpack.c.bf16 %v1391_v58, %v1390_v57 }
 0x162   : > { %v1026_v45 = vpop.f32.mrb[58].mxu0  ;;  %v1314_v46 = vpop.f32.mrb[56].mxu1 }
 0x163   : > { %v12871_v48 = vadd.f32 %v1301_v10, %v1026_v45  ;;  %v10887_v50 = vpop.f32.mrb[59].mxu0  ;;  %v10982_v52 = vpop.f32.mrb[57].mxu1 }
 0x164   : > { %v1317_v53 = vpop.f32.mrb[58].mxu1 }
 0x165   : > { %11077 = vmatmul.mubr.msk.bf16.gmra.mrb[164].mxu0 %vm809_vm2, %v1411_v44  ;;  %v10983_v54 = vpop.f32.mrb[59].mxu1 }
 0x166   : > { %11080 = vmatprep.mubr.msk.bf16.mxu0 %vm12219_vm1, %v12615_v5 }
 0x168   : > { %v1031_v60 = vpop.f32.mrb[60].mxu0 }
 0x169   : > { %v12878_v61 = vadd.f32 %v1306_v26, %v1031_v60  ;;  %v10890_v62 = vpop.f32.mrb[61].mxu0 }
 0x16a   : > { %v1034_v7 = vpop.f32.mrb[62].mxu0  ;;  %v1322_v8 = vpop.f32.mrb[60].mxu1 }
 0x16b   : > { %v12880_v10 = vadd.f32 %v1309_v32, %v1034_v7  ;;  %v10891_v12 = vpop.f32.mrb[63].mxu0  ;;  %v10986_v14 = vpop.f32.mrb[61].mxu1 }
 0x16c   : > { %v1325_v15 = vpop.f32.mrb[62].mxu1 }
 0x16d   : > { %11081 = vmatmul.mubr.msk.bf16.gmra.mrb[168].mxu0 %vm809_vm2, %v1412_v63  ;;  %v10987_v17 = vpop.f32.mrb[63].mxu1 }
 0x16e   : > { %11084 = vmatprep.mubr.msk.bf16.mxu0 %vm12219_vm1, %v12615_v5 }
 0x170   : > { %v1039_v21 = vpop.f32.mrb[64].mxu0 }
 0x171   : > { %v12886_v23 = vadd.f32 %v1314_v46, %v1039_v21  ;;  %v10894_v26 = vpop.f32.mrb[65].mxu0 }
 0x172   : > { %v1042_v31 = vpop.f32.mrb[66].mxu0  ;;  %v1330_v33 = vpop.f32.mrb[64].mxu1 }
 0x173   : > { %v12888_v35 = vadd.f32 %v1317_v53, %v1042_v31  ;;  %v10895_v32 = vpop.f32.mrb[67].mxu0  ;;  %v10990_v36 = vpop.f32.mrb[65].mxu1 }
 0x174   : > { %v1333_v37 = vpop.f32.mrb[66].mxu1 }
 0x175   : > { %11085 = vmatmul.mubr.msk.bf16.gmra.mrb[172].mxu0 %vm809_vm2, %v1413_v28  ;;  %v10991_v42 = vpop.f32.mrb[67].mxu1  ;;  %vm5248_vm2 = vcmask 818176  }
 0x178   : > { %v1047_v44 = vpop.f32.mrb[68].mxu0 }
 0x179   : > { %v12891_v45 = vadd.f32 %v1322_v8, %v1047_v44  ;;  %v10898_v50 = vpop.f32.mrb[69].mxu0 }
 0x17a   : > { %v1050_v52 = vpop.f32.mrb[70].mxu0  ;;  %v1338_v54 = vpop.f32.mrb[68].mxu1 }
 0x17b   : > { %v12893_v46 = vadd.f32 %v1325_v15, %v1050_v52  ;;  %v10899_v57 = vpop.f32.mrb[71].mxu0  ;;  %v10994_v58 = vpop.f32.mrb[69].mxu1 }
 0x17c   : > { %v1341_v60 = vpop.f32.mrb[70].mxu1 }
 0x17d   : > { %v10995_v62 = vpop.f32.mrb[71].mxu1 }
 0x180   : > { %v1055_v53 = vpop.f32.mrb[72].mxu0 }
 0x181   : > { %v12895_v63 = vadd.f32 %v1330_v33, %v1055_v53  ;;  %v10902_v7 = vpop.f32.mrb[73].mxu0 }
 0x182   : > { %v1058_v12 = vpop.f32.mrb[74].mxu0  ;;  %v1346_v14 = vpop.f32.mrb[72].mxu1 }
 0x183   : > { %v12897_v17 = vadd.f32 %v1333_v37, %v1058_v12  ;;  %v10903_v20 = vpop.f32.mrb[75].mxu0  ;;  %v10998_v8 = vpop.f32.mrb[73].mxu1 }
 0x184   : > { %v1349_v21 = vpop.f32.mrb[74].mxu1 }
 0x185   : > { %v10999_v26 = vpop.f32.mrb[75].mxu1 }
 0x186   : > { %v12016_v26 = vld [vmem:[%s16409_s10 + $0x30] sm:$0xff]  }
 0x187   : > { %11089 = vmatpush3.bf16.msra.mxu1 %v12016_v26 }
 0x188   : > { %v1063_v28 = vpop.f32.mrb[76].mxu0  ;;  %11090 = vmatprep.subr.bf16.mxu1 %v12615_v5 }
 0x189   : > { %v12899_v31 = vadd.f32 %v1338_v54, %v1063_v28  ;;  %v10906_v15 = vpop.f32.mrb[77].mxu0 }
 0x18a   : > { %v1066_v32 = vpop.f32.mrb[78].mxu0  ;;  %v1867_v15 = vpop.permute.xlu0 %1866 }
 0x18b   : > { %v12901_v36 = vadd.f32 %v1341_v60, %v1066_v32  ;;  %v10907_v42 = vpop.f32.mrb[79].mxu0 }
 0x190   : > { %v1071_v44 = vpop.f32.mrb[80].mxu0 }
 0x191   : > { %v12903_v33 = vadd.f32 %v1346_v14, %v1071_v44  ;;  %v10910_v50 = vpop.f32.mrb[81].mxu0 }
 0x192   : > { %v1074_v52 = vpop.f32.mrb[82].mxu0 }
 0x193   : > { %v10911_v57 = vpop.f32.mrb[83].mxu0  ;;  %v12018_v52 = vld [vmem:[%s16409_s10 + $0x40] sm:$0xff]  }
 0x194   : > { %v1877_v57 = vpop.permute.xlu1 %1876 }
 0x198   : > { %v1186_v37 = vpop.f32.mrb[84].mxu0 }
 0x199   : > { %v1187_v58 = vadd.f32 %v1186_v37, %v12743_v1  ;;  %v10918_v62 = vpop.f32.mrb[85].mxu0 }
 0x19a   : > { %v1189_v53 = vpop.f32.mrb[86].mxu0 }
 0x19b   : > { %v1190_v7 = vadd.f32 %v1189_v53, %v12745_v4  ;;  %v10919_v54 = vpop.f32.mrb[87].mxu0  ;;  %v12916_v4 = vld [vmem:[%s16408_s9] ss:$0 sm:$0xff] }
 0x19c   : > { %v1872_v54 = vpop.permute.xlu0 %1871 }
 0x1a0   : > { %v1194_v12 = vpop.f32.mrb[88].mxu0 }
 0x1a1   : > { %v1195_v20 = vadd.f32 %v1194_v12, %v12752_v13  ;;  %v10922_v60 = vpop.f32.mrb[89].mxu0  ;;  %v12017_v13 = vld [vmem:[%s16409_s10 + $0x38] sm:$0xff]  }
 0x1a2   : > { %v1197_v8 = vpop.f32.mrb[90].mxu0  ;;  %11091 = vmatpush3.bf16.msra.mxu1 %v12017_v13  ;;  %v1882_v13 = vpop.permute.xlu1 %1881 }
 0x1a3   : > { %v1198_v21 = vadd.f32 %v1197_v8, %v12754_v16  ;;  %v10923_v14 = vpop.f32.mrb[91].mxu0  ;;  %11092 = vmatprep.subr.bf16.mxu1 %v12615_v5 }
 0x1a6   : > { %11093 = vmatpush3.bf16.msra.mxu1 %v12018_v52 }
 0x1a7   : > { %11094 = vmatprep.subr.bf16.mxu1 %v12615_v5 }
 0x1a8   : > { %v1527_v1 = vpop.f32.mrb[92].mxu0 }
 0x1a9   : > { %v1693_v28 = vadd.f32 %v1527_v1, %v1187_v58  ;;  %v11006_v16 = vpop.f32.mrb[93].mxu0 }
 0x1aa   : > { %v1530_v32 = vpop.f32.mrb[94].mxu0 }
 0x1ab   : > { %v1741_v42 = vadd.f32 %v12916_v4, %v1693_v28  ;;  %v1694_v44 = vadd.f32 %v1530_v32, %v1190_v7  ;;  %v11007_v50 = vpop.f32.mrb[95].mxu0  ;;  %v12019_v7 = vld [vmem:[%s16409_s10 + $0x48] sm:$0xff]  }
 0x1ac   : > { %11095 = vmatpush3.bf16.msra.mxu1 %v12019_v7  ;;  %v1892_v7 = vpop.permute.xlu1 %1891 }
 0x1ad   : > { %v1742_v37 = vadd.f32 %v12916_v4, %v1694_v44  ;;  %v1782_v62 = vmax.f32 %v1741_v42, 0.0  ;;  %v12201_v42 = vld [vmem:[#allocation2] sm:$0xff]  ;;  %v12020_v44 = vld [vmem:[%s16409_s10 + $0x50] sm:$0xff]  }
 0x1ae   : > { %11096 = vmatprep.subr.bf16.mxu1 %v12201_v42  ;;  %664 = vst.msk [vmem:[#allocation4] sm:$0xff] %vm663_vm7, %v12201_v42  ;;  %667 = vst.msk [vmem:[#allocation4 + $0x2b] sm:$0xff] %vm663_vm7, %v12201_v42 }
 0x1af   : > { %v12927_v58 = vmul.f32 %v1867_v15, %v1782_v62  ;;  %v1783_v53 = vmax.f32 %v1742_v37, 0.0 }
 0x1b0   : > { %v1535_v12 = vpop.f32.mrb[96].mxu0  ;;  %11097 = vmatpush3.bf16.msra.mxu1 %v12020_v44 }
 0x1b1   : > { %v1695_v60 = vadd.f32 %v1535_v12, %v1195_v20  ;;  %2318 = vrot.lane.b32.xlu1 %v12927_v58, %s16428_s27  ;;  %v2152_v8 = vrot.slane %v12927_v58, 7  ;;  %v11010_v14 = vpop.f32.mrb[97].mxu0  ;;  %v2070_v26 = vmul.f32 %v1872_v54, %v1783_v53  ;;  %v2485_v5 = vrot.slane %v12927_v58, 1  ;;  %11098 = vmatprep.subr.bf16.mxu1 %v12201_v42  ;;  %v12021_v12 = vld [vmem:[%s16409_s10 + $0x58] sm:$0xff]   ;;  %v4357_v58 = vld [vmem:[%s16441_s3] sm:$0xff] }
 0x1b2   : > { %v1538_v1 = vpop.f32.mrb[98].mxu0 }
 0x1b3   : > { %v1743_v28 = vadd.f32 %v12916_v4, %v1695_v60  ;;  %v1696_v16 = vadd.f32 %v1538_v1, %v1198_v21  ;;  %2320 = vrot.lane.b32.xlu0 %v2070_v26, %s16428_s27  ;;  %v2153_v20 = vrot.slane %v2070_v26, 7  ;;  %v11011_v15 = vpop.f32.mrb[99].mxu0  ;;  %v2486_v32 = vrot.slane %v2070_v26, 1  ;;  %2275 = vst.msk [vmem:[#allocation2 + $0x30] sm:$0xfe] %vm2274_vm3, %v2152_v8 }
 0x1b4   : > { %11099 = vmatpush3.bf16.msra.mxu1 %v12021_v12 }
 0x1b5   : > { %v1744_v50 = vadd.f32 %v12916_v4, %v1696_v16  ;;  %v2487_v52 = vsel %vm2484_vm4, %v2485_v5, %v2486_v32  ;;  %v1784_v21 = vmax.f32 %v1743_v28, 0.0  ;;  %v2154_v37 = vsel %vm2151_vm5, %v2152_v8, %v2153_v20  ;;  %v1887_v16 = vpop.permute.xlu0 %1886  ;;  %11184 = vmatprep.subr.bf16.mxu1 %v12201_v42 }
 0x1b6   : > { %2568 = vrot.lane.b32.xlu1 %v2487_v52, %s12222_s4  ;;  %2277 = vst.msk [vmem:[#allocation2 + $0x40] sm:$0xff] %vm2276_vm6, %v2154_v37 }
 0x1b7   : > { %v2071_v62 = vmul.f32 %v1877_v57, %v1784_v21  ;;  %v1785_v53 = vmax.f32 %v1744_v50, 0.0 }
 0x1b8   : > { %v1543_v54 = vpop.f32.mrb[100].mxu0 }
 0x1b9   : > { %v1697_v60 = vadd.f32 %v1543_v54, %v12761_v25  ;;  %v11014_v14 = vpop.f32.mrb[101].mxu0  ;;  %v2155_v26 = vrot.slane %v2071_v62, 7  ;;  %v2072_v8 = vmul.f32 %v1882_v13, %v1785_v53  ;;  %v2488_v1 = vrot.slane %v2071_v62, 1  ;;  %v1897_v12 = vpop.permute.xlu0 %1896 }
 0x1ba   : > { %2322 = vrot.lane.b32.xlu1 %v2071_v62, %s16428_s27  ;;  %v1546_v28 = vpop.f32.mrb[102].mxu0 }
 0x1bb   : > { %v1745_v57 = vadd.f32 %v12916_v4, %v1697_v60  ;;  %v1698_v15 = vadd.f32 %v1546_v28, %v12763_v30  ;;  %2324 = vrot.lane.b32.xlu0 %v2072_v8, %s16428_s27  ;;  %v2157_v44 = vrot.slane %v2072_v8, 7  ;;  %v11015_v50 = vpop.f32.mrb[103].mxu0  ;;  %v2490_v52 = vrot.slane %v2072_v8, 1 }
 0x1bc   : > { %v2489_v25 = vsel %vm2484_vm4, %v2486_v32, %v2488_v1  ;;  %v2156_v13 = vsel %vm2151_vm5, %v2153_v20, %v2155_v26  ;;  %v1902_v32 = vpop.permute.xlu1 %1901 }
 0x1bd   : > { %v1746_v21 = vadd.f32 %v12916_v4, %v1698_v15  ;;  %v2491_v37 = vsel %vm2484_vm4, %v2488_v1, %v2490_v52  ;;  %v1786_v62 = vmax.f32 %v1745_v57, 0.0  ;;  %2278 = vst.msk [vmem:[#allocation2 + $0x50] sm:$0xff] %vm2276_vm6, %v2156_v13  ;;  %v2158_v30 = vsel %vm2151_vm5, %v2155_v26, %v2157_v44 }
 0x1be   : > { %2572 = vrot.lane.b32.xlu1 %v2491_v37, %s12222_s4  ;;  %2279 = vst.msk [vmem:[#allocation2 + $0x60] sm:$0xff] %vm2276_vm6, %v2158_v30 }
 0x1bf   : > { %2570 = vrot.lane.b32.xlu0 %v2489_v25, %s12222_s4  ;;  %v2073_v20 = vmul.f32 %v1887_v16, %v1786_v62  ;;  %v1787_v53 = vmax.f32 %v1746_v21, 0.0 }
 0x1c0   : > { %v1551_v54 = vpop.f32.mrb[104].mxu0  ;;  %v1912_v13 = vpop.permute.xlu1 %1911 }
 0x1c1   : > { %v1699_v60 = vadd.f32 %v1551_v54, %v12770_v38  ;;  %v11018_v14 = vpop.f32.mrb[105].mxu0  ;;  %v2159_v8 = vrot.slane %v2073_v20, 7  ;;  %v2074_v26 = vmul.f32 %v1892_v7, %v1787_v53  ;;  %v2492_v1 = vrot.slane %v2073_v20, 1 }
 0x1c2   : > { %2326 = vrot.lane.b32.xlu1 %v2073_v20, %s16428_s27  ;;  %v1554_v42 = vpop.f32.mrb[106].mxu0 }
 0x1c3   : > { %v1747_v28 = vadd.f32 %v12916_v4, %v1699_v60  ;;  %v1700_v57 = vadd.f32 %v1554_v42, %v12772_v43  ;;  %2328 = vrot.lane.b32.xlu0 %v2074_v26, %s16428_s27  ;;  %v2161_v15 = vrot.slane %v2074_v26, 7  ;;  %v11019_v16 = vpop.f32.mrb[107].mxu0  ;;  %v2494_v50 = vrot.slane %v2074_v26, 1  ;;  %v1907_v43 = vpop.permute.xlu0 %1906 }
 0x1c4   : > { %v2493_v25 = vsel %vm2484_vm4, %v2490_v52, %v2492_v1  ;;  %v2160_v38 = vsel %vm2151_vm5, %v2157_v44, %v2159_v8 }
 0x1c5   : > { %v1748_v7 = vadd.f32 %v12916_v4, %v1700_v57  ;;  %v2495_v21 = vsel %vm2484_vm4, %v2492_v1, %v2494_v50  ;;  %v1788_v37 = vmax.f32 %v1747_v28, 0.0  ;;  %2280 = vst.msk [vmem:[#allocation2 + $0x70] sm:$0xff] %vm2276_vm6, %v2160_v38  ;;  %v2162_v62 = vsel %vm2151_vm5, %v2159_v8, %v2161_v15  ;;  %v1922_v8 = vpop.permute.xlu1 %1921 }
 0x1c6   : > { %2576 = vrot.lane.b32.xlu1 %v2495_v21, %s12222_s4  ;;  %2281 = vst.msk [vmem:[#allocation2 + $0x80] sm:$0xff] %vm2276_vm6, %v2162_v62 }
 0x1c7   : > { %2574 = vrot.lane.b32.xlu0 %v2493_v25, %s12222_s4  ;;  %v2075_v52 = vmul.f32 %v1897_v12, %v1788_v37  ;;  %v1789_v30 = vmax.f32 %v1748_v7, 0.0  ;;  %v1917_v25 = vpop.permute.xlu0 %1916 }
 0x1c8   : > { %v1559_v44 = vpop.f32.mrb[108].mxu0 }
 0x1c9   : > { %v1701_v20 = vadd.f32 %v1559_v44, %v12779_v51  ;;  %v11022_v53 = vpop.f32.mrb[109].mxu0  ;;  %v2163_v54 = vrot.slane %v2075_v52, 7  ;;  %v2076_v60 = vmul.f32 %v1902_v32, %v1789_v30  ;;  %v2496_v14 = vrot.slane %v2075_v52, 1 }
 0x1ca   : > { %2330 = vrot.lane.b32.xlu1 %v2075_v52, %s16428_s27  ;;  %v1562_v26 = vpop.f32.mrb[110].mxu0 }
 0x1cb   : > { %v1749_v1 = vadd.f32 %v12916_v4, %v1701_v20  ;;  %v1702_v42 = vadd.f32 %v1562_v26, %v12781_v56  ;;  %2332 = vrot.lane.b32.xlu0 %v2076_v60, %s16428_s27  ;;  %v2165_v28 = vrot.slane %v2076_v60, 7  ;;  %v11023_v12 = vpop.f32.mrb[111].mxu0  ;;  %v2498_v57 = vrot.slane %v2076_v60, 1 }
 0x1cc   : > { %v2497_v16 = vsel %vm2484_vm4, %v2494_v50, %v2496_v14  ;;  %v2164_v51 = vsel %vm2151_vm5, %v2161_v15, %v2163_v54  ;;  %v1932_v15 = vpop.permute.xlu1 %1931 }
 0x1cd   : > { %v1750_v32 = vadd.f32 %v12916_v4, %v1702_v42  ;;  %v2499_v38 = vsel %vm2484_vm4, %v2496_v14, %v2498_v57  ;;  %v1790_v7 = vmax.f32 %v1749_v1, 0.0  ;;  %2282 = vst.msk [vmem:[#allocation2 + $0x90] sm:$0xff] %vm2276_vm6, %v2164_v51  ;;  %v2166_v21 = vsel %vm2151_vm5, %v2163_v54, %v2165_v28  ;;  %v1927_v54 = vpop.permute.xlu0 %1926 }
 0x1ce   : > { %2580 = vrot.lane.b32.xlu1 %v2499_v38, %s12222_s4  ;;  %2283 = vst.msk [vmem:[#allocation2 + $0xa0] sm:$0xff] %vm2276_vm6, %v2166_v21 }
 0x1cf   : > { %2578 = vrot.lane.b32.xlu0 %v2497_v16, %s12222_s4  ;;  %v2077_v56 = vmul.f32 %v1907_v43, %v1790_v7  ;;  %v1791_v50 = vmax.f32 %v1750_v32, 0.0 }
 0x1d0   : > { %v1567_v37 = vpop.f32.mrb[112].mxu0 }
 0x1d1   : > { %v1703_v62 = vadd.f32 %v1567_v37, %v12788_v0  ;;  %v11026_v52 = vpop.f32.mrb[113].mxu0  ;;  %v2167_v30 = vrot.slane %v2077_v56, 7  ;;  %v2078_v44 = vmul.f32 %v1912_v13, %v1791_v50  ;;  %v2500_v20 = vrot.slane %v2077_v56, 1  ;;  %v1937_v38 = vpop.permute.xlu0 %1936 }
 0x1d2   : > { %2334 = vrot.lane.b32.xlu1 %v2077_v56, %s16428_s27  ;;  %v1570_v53 = vpop.f32.mrb[114].mxu0 }
 0x1d3   : > { %v1751_v60 = vadd.f32 %v12916_v4, %v1703_v62  ;;  %v1704_v14 = vadd.f32 %v1570_v53, %v12790_v9  ;;  %2336 = vrot.lane.b32.xlu0 %v2078_v44, %s16428_s27  ;;  %v2169_v43 = vrot.slane %v2078_v44, 7  ;;  %v11027_v26 = vpop.f32.mrb[115].mxu0  ;;  %v2502_v1 = vrot.slane %v2078_v44, 1  ;;  %v13010_v9 = vpop.permute.xlu1 %1941 }
 0x1d4   : > { %v2501_v42 = vsel %vm2484_vm4, %v2498_v57, %v2500_v20  ;;  %v2168_v0 = vsel %vm2151_vm5, %v2165_v28, %v2167_v30 }
 0x1d5   : > { %v1752_v13 = vadd.f32 %v12916_v4, %v1704_v14  ;;  %v2503_v12 = vsel %vm2484_vm4, %v2500_v20, %v2502_v1  ;;  %v1792_v16 = vmax.f32 %v1751_v60, 0.0  ;;  %2284 = vst.msk [vmem:[#allocation2 + $0xb0] sm:$0xff] %vm2276_vm6, %v2168_v0  ;;  %v2170_v51 = vsel %vm2151_vm5, %v2167_v30, %v2169_v43 }
 0x1d6   : > { %2584 = vrot.lane.b32.xlu1 %v2503_v12, %s12222_s4  ;;  %2285 = vst.msk [vmem:[#allocation2 + $0xc0] sm:$0xff] %vm2276_vm6, %v2170_v51 }
 0x1d7   : > { %2582 = vrot.lane.b32.xlu0 %v2501_v42, %s12222_s4  ;;  %v2079_v57 = vmul.f32 %v1917_v25, %v1792_v16  ;;  %v1793_v32 = vmax.f32 %v1752_v13, 0.0  ;;  %v13020_v60 = vpop.permute.xlu1 %1951  ;;  %v1947_v42 = vpop.permute.xlu0 %1946 }
 0x1d8   : > { %v1575_v28 = vpop.f32.mrb[116].mxu0 }
 0x1d9   : > { %v1705_v7 = vadd.f32 %v1575_v28, %v12797_v19  ;;  %v11030_v21 = vpop.f32.mrb[117].mxu0  ;;  %v2171_v56 = vrot.slane %v2079_v57, 7  ;;  %v2080_v50 = vmul.f32 %v1922_v8, %v1793_v32  ;;  %v2504_v37 = vrot.slane %v2079_v57, 1 }
 0x1da   : > { %2338 = vrot.lane.b32.xlu1 %v2079_v57, %s16428_s27  ;;  %v1578_v62 = vpop.f32.mrb[118].mxu0 }
 0x1db   : > { %v1753_v52 = vadd.f32 %v12916_v4, %v1705_v7  ;;  %v1706_v30 = vadd.f32 %v1578_v62, %v12799_v24  ;;  %2340 = vrot.lane.b32.xlu0 %v2080_v50, %s16428_s27  ;;  %v2173_v44 = vrot.slane %v2080_v50, 7  ;;  %v11031_v25 = vpop.f32.mrb[119].mxu0  ;;  %v2506_v20 = vrot.slane %v2080_v50, 1  ;;  %v13031_v28 = vpop.permute.xlu1 %1961 }
 0x1dc   : > { %v2505_v53 = vsel %vm2484_vm4, %v2502_v1, %v2504_v37  ;;  %v2172_v19 = vsel %vm2151_vm5, %v2169_v43, %v2171_v56 }
 0x1dd   : > { %v1754_v8 = vadd.f32 %v12916_v4, %v1706_v30  ;;  %v2507_v14 = vsel %vm2484_vm4, %v2504_v37, %v2506_v20  ;;  %v1794_v26 = vmax.f32 %v1753_v52, 0.0  ;;  %2286 = vst.msk [vmem:[#allocation2 + $0xd0] sm:$0xff] %vm2276_vm6, %v2172_v19  ;;  %v2174_v24 = vsel %vm2151_vm5, %v2171_v56, %v2173_v44 }
 0x1de   : > { %2588 = vrot.lane.b32.xlu1 %v2507_v14, %s12222_s4  ;;  %2287 = vst.msk [vmem:[#allocation2 + $0xe0] sm:$0xff] %vm2276_vm6, %v2174_v24 }
 0x1df   : > { %2586 = vrot.lane.b32.xlu0 %v2505_v53, %s12222_s4  ;;  %v2081_v1 = vmul.f32 %v1927_v54, %v1794_v26  ;;  %v1795_v43 = vmax.f32 %v1754_v8, 0.0  ;;  %v13047_v53 = vpop.permute.xlu1 %1971 }
 0x1e0   : > { %v1583_v0 = vpop.f32.mrb[120].mxu0 }
 0x1e1   : > { %v1707_v13 = vadd.f32 %v1583_v0, %v12806_v34  ;;  %v11034_v12 = vpop.f32.mrb[121].mxu0  ;;  %v2175_v16 = vrot.slane %v2081_v1, 7  ;;  %v2082_v51 = vmul.f32 %v1932_v15, %v1795_v43  ;;  %v2508_v57 = vrot.slane %v2081_v1, 1  ;;  %v13038_v15 = vpop.permute.xlu0 %1956 }
 0x1e2   : > { %2342 = vrot.lane.b32.xlu1 %v2081_v1, %s16428_s27  ;;  %v1586_v32 = vpop.f32.mrb[122].mxu0 }
 0x1e3   : > { %v1755_v7 = vadd.f32 %v12916_v4, %v1707_v13  ;;  %v1708_v21 = vadd.f32 %v1586_v32, %v12808_v40  ;;  %2344 = vrot.lane.b32.xlu0 %v2082_v51, %s16428_s27  ;;  %v2177_v54 = vrot.slane %v2082_v51, 7  ;;  %v11035_v56 = vpop.f32.mrb[123].mxu0  ;;  %v2510_v50 = vrot.slane %v2082_v51, 1 }
 0x1e4   : > { %v2509_v34 = vsel %vm2484_vm4, %v2506_v20, %v2508_v57  ;;  %v2176_v37 = vsel %vm2151_vm5, %v2173_v44, %v2175_v16 }
 0x1e5   : > { %v1756_v62 = vadd.f32 %v12916_v4, %v1708_v21  ;;  %v2511_v52 = vsel %vm2484_vm4, %v2508_v57, %v2510_v50  ;;  %v1796_v30 = vmax.f32 %v1755_v7, 0.0  ;;  %2288 = vst.msk [vmem:[#allocation2 + $0xf0] sm:$0xff] %vm2276_vm6, %v2176_v37  ;;  %v2178_v40 = vsel %vm2151_vm5, %v2175_v16, %v2177_v54  ;;  %v13052_v43 = vpop.permute.xlu0 %1966 }
 0x1e6   : > { %2592 = vrot.lane.b32.xlu1 %v2511_v52, %s12222_s4  ;;  %2289 = vst.msk [vmem:[#allocation2 + $0x100] sm:$0xff] %vm2276_vm6, %v2178_v40 }
 0x1e7   : > { %2590 = vrot.lane.b32.xlu0 %v2509_v34, %s12222_s4  ;;  %v2083_v25 = vmul.f32 %v1937_v38, %v1796_v30  ;;  %v1797_v20 = vmax.f32 %v1756_v62, 0.0 }
 0x1e8   : > { %v1591_v44 = vpop.f32.mrb[124].mxu0 }
 0x1e9   : > { %v1709_v19 = vadd.f32 %v1591_v44, %v12815_v49  ;;  %v11038_v8 = vpop.f32.mrb[125].mxu0  ;;  %v2179_v14 = vrot.slane %v2083_v25, 7  ;;  %v2084_v26 = vmul.f32 %v13010_v9, %v1797_v20  ;;  %v2512_v24 = vrot.slane %v2083_v25, 1 }
 0x1ea   : > { %2346 = vrot.lane.b32.xlu1 %v2083_v25, %s16428_s27  ;;  %v1594_v1 = vpop.f32.mrb[126].mxu0 }
 0x1eb   : > { %v1757_v0 = vadd.f32 %v12916_v4, %v1709_v19  ;;  %v1710_v38 = vadd.f32 %v1594_v1, %v12817_v55  ;;  %2348 = vrot.lane.b32.xlu0 %v2084_v26, %s16428_s27  ;;  %v2181_v13 = vrot.slane %v2084_v26, 7  ;;  %v11039_v12 = vpop.f32.mrb[127].mxu0  ;;  %v2514_v16 = vrot.slane %v2084_v26, 1  ;;  %v13065_v55 = vpop.permute.xlu1 %1981 }
 0x1ec   : > { %v2513_v49 = vsel %vm2484_vm4, %v2510_v50, %v2512_v24  ;;  %v2180_v51 = vsel %vm2151_vm5, %v2177_v54, %v2179_v14  ;;  %v13068_v50 = vpop.permute.xlu0 %1976 }
 0x1ed   : > { %v1758_v9 = vadd.f32 %v12916_v4, %v1710_v38  ;;  %v2515_v57 = vsel %vm2484_vm4, %v2512_v24, %v2514_v16  ;;  %v1798_v32 = vmax.f32 %v1757_v0, 0.0  ;;  %2290 = vst.msk [vmem:[#allocation2 + $0x110] sm:$0xff] %vm2276_vm6, %v2180_v51  ;;  %v2182_v7 = vsel %vm2151_vm5, %v2179_v14, %v2181_v13 }
 0x1ee   : > { %2596 = vrot.lane.b32.xlu1 %v2515_v57, %s12222_s4  ;;  %2291 = vst.msk [vmem:[#allocation2 + $0x120] sm:$0xff] %vm2276_vm6, %v2182_v7 }
 0x1ef   : > { %2594 = vrot.lane.b32.xlu0 %v2513_v49, %s12222_s4  ;;  %v2085_v21 = vmul.f32 %v1947_v42, %v1798_v32  ;;  %v1799_v56 = vmax.f32 %v1758_v9, 0.0  ;;  %v13078_v14 = vpop.permute.xlu1 %1991 }
 0x1f0   : > { %v1599_v54 = vpop.f32.mrb[128].mxu0  ;;  %v13086_v1 = vpop.permute.xlu0 %1986 }
 0x1f1   : > { %v1711_v34 = vadd.f32 %v1599_v54, %v12824_v3  ;;  %v11042_v37 = vpop.f32.mrb[129].mxu0  ;;  %v2183_v62 = vrot.slane %v2085_v21, 7  ;;  %v2086_v52 = vmul.f32 %v13020_v60, %v1799_v56  ;;  %v2516_v30 = vrot.slane %v2085_v21, 1 }
 0x1f2   : > { %2350 = vrot.lane.b32.xlu1 %v2085_v21, %s16428_s27  ;;  %v1602_v40 = vpop.f32.mrb[130].mxu0 }
 0x1f3   : > { %v1759_v25 = vadd.f32 %v12916_v4, %v1711_v34  ;;  %v1712_v20 = vadd.f32 %v1602_v40, %v12826_v11  ;;  %2352 = vrot.lane.b32.xlu0 %v2086_v52, %s16428_s27  ;;  %v2185_v42 = vrot.slane %v2086_v52, 7  ;;  %v11043_v44 = vpop.f32.mrb[131].mxu0  ;;  %v2518_v19 = vrot.slane %v2086_v52, 1  ;;  %v13093_v32 = vpop.permute.xlu1 %2001 }
 0x1f4   : > { %v2517_v8 = vsel %vm2484_vm4, %v2514_v16, %v2516_v30  ;;  %v2184_v3 = vsel %vm2151_vm5, %v2181_v13, %v2183_v62 }
 0x1f5   : > { %v1760_v60 = vadd.f32 %v12916_v4, %v1712_v20  ;;  %v2519_v26 = vsel %vm2484_vm4, %v2516_v30, %v2518_v19  ;;  %v1800_v24 = vmax.f32 %v1759_v25, 0.0  ;;  %2292 = vst.msk [vmem:[#allocation2 + $0x130] sm:$0xff] %vm2276_vm6, %v2184_v3  ;;  %v2186_v11 = vsel %vm2151_vm5, %v2183_v62, %v2185_v42 }
 0x1f6   : > { %2600 = vrot.lane.b32.xlu1 %v2519_v26, %s12222_s4  ;;  %2293 = vst.msk [vmem:[#allocation2 + $0x140] sm:$0xff] %vm2276_vm6, %v2186_v11 }
 0x1f7   : > { %2598 = vrot.lane.b32.xlu0 %v2517_v8, %s12222_s4  ;;  %v2087_v0 = vmul.f32 %v13038_v15, %v1800_v24  ;;  %v1801_v38 = vmax.f32 %v1760_v60, 0.0  ;;  %v13110_v20 = vpop.permute.xlu1 %2011 }
 0x1f8   : > { %v1607_v13 = vpop.f32.mrb[132].mxu0 }
 0x1f9   : > { %v1713_v12 = vadd.f32 %v1607_v13, %v12833_v22  ;;  %v11046_v16 = vpop.f32.mrb[133].mxu0  ;;  %v2187_v49 = vrot.slane %v2087_v0, 7  ;;  %v2088_v51 = vmul.f32 %v13031_v28, %v1801_v38  ;;  %v2520_v9 = vrot.slane %v2087_v0, 1  ;;  %v13100_v28 = vpop.permute.xlu0 %1996 }
 0x1fa   : > { %2354 = vrot.lane.b32.xlu1 %v2087_v0, %s16428_s27  ;;  %v1610_v57 = vpop.f32.mrb[134].mxu0 }
 0x1fb   : > { %v1761_v7 = vadd.f32 %v12916_v4, %v1713_v12  ;;  %v1714_v21 = vadd.f32 %v1610_v57, %v12835_v29  ;;  %2356 = vrot.lane.b32.xlu0 %v2088_v51, %s16428_s27  ;;  %v2189_v15 = vrot.slane %v2088_v51, 7  ;;  %v11047_v56 = vpop.f32.mrb[135].mxu0  ;;  %v2522_v54 = vrot.slane %v2088_v51, 1 }
 0x1fc   : > { %v2521_v22 = vsel %vm2484_vm4, %v2518_v19, %v2520_v9  ;;  %v2188_v34 = vsel %vm2151_vm5, %v2185_v42, %v2187_v49 }
 0x1fd   : > { %v1762_v37 = vadd.f32 %v12916_v4, %v1714_v21  ;;  %v2523_v62 = vsel %vm2484_vm4, %v2520_v9, %v2522_v54  ;;  %v1802_v52 = vmax.f32 %v1761_v7, 0.0  ;;  %2294 = vst.msk [vmem:[#allocation2 + $0x150] sm:$0xff] %vm2276_vm6, %v2188_v34  ;;  %v2190_v29 = vsel %vm2151_vm5, %v2187_v49, %v2189_v15  ;;  %v13115_v26 = vpop.permute.xlu0 %2006  ;;  %v1863_v7 = vld [vmem:[%s16440_s2 + $0x140] sm:$0xf] }
 0x1fe   : > { %2604 = vrot.lane.b32.xlu1 %v2523_v62, %s12222_s4  ;;  %2295 = vst.msk [vmem:[#allocation2 + $0x160] sm:$0xff] %vm2276_vm6, %v2190_v29 }
 0x1ff   : > { %2602 = vrot.lane.b32.xlu0 %v2521_v22, %s12222_s4  ;;  %v2089_v30 = vmul.f32 %v13052_v43, %v1802_v52  ;;  %v1803_v40 = vmax.f32 %v1762_v37, 0.0 }
 0x200   : > { %v1615_v25 = vpop.f32.mrb[136].mxu0 }
 0x201   : > { %v1715_v42 = vadd.f32 %v1615_v25, %v12842_v41  ;;  %v11050_v44 = vpop.f32.mrb[137].mxu0  ;;  %v2191_v19 = vrot.slane %v2089_v30, 7  ;;  %v2090_v8 = vmul.f32 %v13047_v53, %v1803_v40  ;;  %v2524_v3 = vrot.slane %v2089_v30, 1  ;;  %v13135_v21 = vpop.permute.xlu0 %2016 }
 0x202   : > { %2358 = vrot.lane.b32.xlu1 %v2089_v30, %s16428_s27  ;;  %v1618_v60 = vpop.f32.mrb[138].mxu0 }
 0x203   : > { %v1763_v24 = vadd.f32 %v12916_v4, %v1715_v42  ;;  %v1716_v43 = vadd.f32 %v1618_v60, %v12844_v47  ;;  %2360 = vrot.lane.b32.xlu0 %v2090_v8, %s16428_s27  ;;  %v2193_v11 = vrot.slane %v2090_v8, 7  ;;  %v2526_v0 = vrot.slane %v2090_v8, 1  ;;  %v11051_v38 = vpop.f32.mrb[139].mxu0  ;;  %v13128_v47 = vpop.permute.xlu1 %2021 }
 0x204   : > { %v2525_v41 = vsel %vm2484_vm4, %v2522_v54, %v2524_v3  ;;  %v2192_v13 = vsel %vm2151_vm5, %v2189_v15, %v2191_v19 }
 0x205   : > { %v1764_v53 = vadd.f32 %v12916_v4, %v1716_v43  ;;  %v2527_v12 = vsel %vm2484_vm4, %v2524_v3, %v2526_v0  ;;  %v1804_v16 = vmax.f32 %v1763_v24, 0.0  ;;  %2296 = vst.msk [vmem:[#allocation2 + $0x170] sm:$0xff] %vm2276_vm6, %v2192_v13  ;;  %v2194_v49 = vsel %vm2151_vm5, %v2191_v19, %v2193_v11  ;;  %v13151_v19 = vpop.permute.xlu0 %2026 }
 0x206   : > { %2608 = vrot.lane.b32.xlu1 %v2527_v12, %s12222_s4  ;;  %2297 = vst.msk [vmem:[#allocation2 + $0x180] sm:$0xff] %vm2276_vm6, %v2194_v49 }
 0x207   : > { %v1805_v51 = vmax.f32 %v1764_v53, 0.0  ;;  %2606 = vrot.lane.b32.xlu0 %v2525_v41, %s12222_s4  ;;  %v2091_v9 = vmul.f32 %v13068_v50, %v1804_v16  ;;  %v13144_v25 = vpop.permute.xlu1 %2031 }
 0x208   : > { %v1623_v57 = vpop.f32.mrb[140].mxu0 }
 0x209   : > { %v2092_v15 = vmul.f32 %v13065_v55, %v1805_v51  ;;  %v1717_v56 = vadd.f32 %v1623_v57, %v12851_v59  ;;  %v11054_v54 = vpop.f32.mrb[141].mxu0  ;;  %v2195_v22 = vrot.slane %v2091_v9, 7  ;;  %v2528_v34 = vrot.slane %v2091_v9, 1  ;;  %v13166_v51 = vpop.permute.xlu0 %2036 }
 0x20a   : > { %2362 = vrot.lane.b32.xlu1 %v2091_v9, %s16428_s27  ;;  %v1626_v37 = vpop.f32.mrb[142].mxu0 }
 0x20b   : > { %v1765_v62 = vadd.f32 %v12916_v4, %v1717_v56  ;;  %v1718_v50 = vadd.f32 %v1626_v37, %v12853_v6  ;;  %2066 = vperm.xlu0 %12008, %v1863_v7   ;;  %v2530_v52 = vrot.slane %v2092_v15, 1  ;;  %v2529_v29 = vsel %vm2484_vm4, %v2526_v0, %v2528_v34  ;;  %v11055_v30 = vpop.f32.mrb[143].mxu0  ;;  %v13159_v13 = vpop.permute.xlu1 %2041 }
 0x20c   : > { %v2196_v40 = vsel %vm2151_vm5, %v2193_v11, %v2195_v22  ;;  %v2197_v55 = vrot.slane %v2092_v15, 7 }
 0x20d   : > { %v1766_v59 = vadd.f32 %v12916_v4, %v1718_v50  ;;  %v2531_v42 = vsel %vm2484_vm4, %v2528_v34, %v2530_v52  ;;  %v1806_v44 = vmax.f32 %v1765_v62, 0.0  ;;  %2298 = vst.msk [vmem:[#allocation2 + $0x190] sm:$0xff] %vm2276_vm6, %v2196_v40  ;;  %v13181_v30 = vpop.permute.xlu0 %2046 }
 0x20e   : > { %2612 = vrot.lane.b32.xlu1 %v2531_v42, %s12222_s4  ;;  %v2198_v6 = vsel %vm2151_vm5, %v2195_v22, %v2197_v55 }
 0x20f   : > { %v1807_v8 = vmax.f32 %v1766_v59, 0.0  ;;  %2610 = vrot.lane.b32.xlu0 %v2529_v29, %s12222_s4  ;;  %v2093_v3 = vmul.f32 %v13086_v1, %v1806_v44  ;;  %2299 = vst.msk [vmem:[#allocation2 + $0x1a0] sm:$0xff] %vm2276_vm6, %v2198_v6  ;;  %v13176_v22 = vpop.permute.xlu1 %2051 }
 0x210   : > { %v1631_v60 = vpop.f32.mrb[144].mxu0 }
 0x211   : > { %v2094_v24 = vmul.f32 %v13078_v14, %v1807_v8  ;;  %v1719_v43 = vadd.f32 %v1631_v60, %v12860_v18  ;;  %v11058_v11 = vpop.f32.mrb[145].mxu0  ;;  %v2199_v0 = vrot.slane %v2093_v3, 7  ;;  %v2532_v38 = vrot.slane %v2093_v3, 1 }
 0x212   : > { %2366 = vrot.lane.b32.xlu1 %v2093_v3, %s16428_s27  ;;  %v1634_v41 = vpop.f32.mrb[146].mxu0  ;;  %v13198_v11 = vpop.permute.xlu0 %2056 }
 0x213   : > { %v1767_v53 = vadd.f32 %v12916_v4, %v1719_v43  ;;  %v1720_v12 = vadd.f32 %v1634_v41, %v12862_v27  ;;  %2364 = vrot.lane.b32.xlu0 %v2092_v15, %s16428_s27  ;;  %v2534_v1 = vrot.slane %v2094_v24, 1  ;;  %v2533_v16 = vsel %vm2484_vm4, %v2530_v52, %v2532_v38  ;;  %v11059_v14 = vpop.f32.mrb[147].mxu0  ;;  %v13193_v3 = vpop.permute.xlu1 %2061 }
 0x214   : > { %v2200_v18 = vsel %vm2151_vm5, %v2197_v55, %v2199_v0  ;;  %v2201_v49 = vrot.slane %v2094_v24, 7 }
 0x215   : > { %v1768_v9 = vadd.f32 %v12916_v4, %v1720_v12  ;;  %v2535_v57 = vsel %vm2484_vm4, %v2532_v38, %v2534_v1  ;;  %v1808_v7 = vmax.f32 %v1767_v53, 0.0  ;;  %2300 = vst.msk [vmem:[#allocation2 + $0x1b0] sm:$0xff] %vm2276_vm6, %v2200_v18 }
 0x216   : > { %2616 = vrot.lane.b32.xlu1 %v2535_v57, %s12222_s4  ;;  %v2202_v27 = vsel %vm2151_vm5, %v2199_v0, %v2201_v49 }
 0x217   : > { %v1809_v15 = vmax.f32 %v1768_v9, 0.0  ;;  %2614 = vrot.lane.b32.xlu0 %v2533_v16, %s12222_s4  ;;  %v2095_v56 = vmul.f32 %v13100_v28, %v1808_v7  ;;  %2301 = vst.msk [vmem:[#allocation2 + $0x1c0] sm:$0xff] %vm2276_vm6, %v2202_v27 }
 0x218   : > { %v1639_v54 = vpop.f32.mrb[148].mxu0 }
 0x219   : > { %v2096_v34 = vmul.f32 %v13093_v32, %v1809_v15  ;;  %v1721_v37 = vadd.f32 %v1639_v54, %v12869_v39  ;;  %v11062_v62 = vpop.f32.mrb[149].mxu0  ;;  %v2203_v50 = vrot.slane %v2095_v56, 7  ;;  %v2536_v52 = vrot.slane %v2095_v56, 1 }
 0x21a   : > { %2370 = vrot.lane.b32.xlu1 %v2095_v56, %s16428_s27  ;;  %v1642_v29 = vpop.f32.mrb[150].mxu0 }
 0x21b   : > { %v1769_v40 = vadd.f32 %v12916_v4, %v1721_v37  ;;  %v1722_v28 = vadd.f32 %v1642_v29, %v12871_v48  ;;  %2368 = vrot.lane.b32.xlu0 %v2094_v24, %s16428_s27  ;;  %v2538_v55 = vrot.slane %v2096_v34, 1  ;;  %v2537_v59 = vsel %vm2484_vm4, %v2534_v1, %v2536_v52  ;;  %v11063_v32 = vpop.f32.mrb[151].mxu0 }
 0x21c   : > { %v2204_v39 = vsel %vm2151_vm5, %v2201_v49, %v2203_v50  ;;  %v2205_v42 = vrot.slane %v2096_v34, 7 }
 0x21d   : > { %v1770_v44 = vadd.f32 %v12916_v4, %v1722_v28  ;;  %v2539_v6 = vsel %vm2484_vm4, %v2536_v52, %v2538_v55  ;;  %v1810_v8 = vmax.f32 %v1769_v40, 0.0  ;;  %2302 = vst.msk [vmem:[#allocation2 + $0x1d0] sm:$0xff] %vm2276_vm6, %v2204_v39 }
 0x21e   : > { %2620 = vrot.lane.b32.xlu1 %v2539_v6, %s12222_s4  ;;  %v2206_v48 = vsel %vm2151_vm5, %v2203_v50, %v2205_v42 }
 0x21f   : > { %v1811_v60 = vmax.f32 %v1770_v44, 0.0  ;;  %2618 = vrot.lane.b32.xlu0 %v2537_v59, %s12222_s4  ;;  %v2097_v24 = vmul.f32 %v13115_v26, %v1810_v8  ;;  %2303 = vst.msk [vmem:[#allocation2 + $0x1e0] sm:$0xff] %vm2276_vm6, %v2206_v48 }
 0x220   : > { %v1647_v43 = vpop.f32.mrb[152].mxu0 }
 0x221   : > { %v2098_v0 = vmul.f32 %v13110_v20, %v1811_v60  ;;  %v1723_v38 = vadd.f32 %v1647_v43, %v12878_v61  ;;  %v11066_v41 = vpop.f32.mrb[153].mxu0  ;;  %v2207_v53 = vrot.slane %v2097_v24, 7  ;;  %v2540_v12 = vrot.slane %v2097_v24, 1 }
 0x222   : > { %2374 = vrot.lane.b32.xlu1 %v2097_v24, %s16428_s27  ;;  %v1650_v1 = vpop.f32.mrb[154].mxu0 }
 0x223   : > { %v1771_v16 = vadd.f32 %v12916_v4, %v1723_v38  ;;  %v1724_v26 = vadd.f32 %v1650_v1, %v12880_v10  ;;  %v2319_v14 = vpop.permute.xlu1 %2318  ;;  %2372 = vrot.lane.b32.xlu0 %v2096_v34, %s16428_s27  ;;  %v2542_v18 = vrot.slane %v2098_v0, 1  ;;  %v2541_v49 = vsel %vm2484_vm4, %v2538_v55, %v2540_v12  ;;  %v11067_v9 = vpop.f32.mrb[155].mxu0 }
 0x224   : > { %2442 = vst.msk [vmem:[#allocation2 + $0x30] sm:$0xff] %vm2441_vm8, %v2319_v14  ;;  %v2208_v61 = vsel %vm2151_vm5, %v2205_v42, %v2207_v53  ;;  %v2209_v20 = vrot.slane %v2098_v0, 7 }
 0x225   : > { %v1812_v57 = vmax.f32 %v1771_v16, 0.0  ;;  %v1772_v7 = vadd.f32 %v12916_v4, %v1724_v26  ;;  %v2321_v27 = vpop.permute.xlu0 %2320  ;;  %v2543_v15 = vsel %vm2484_vm4, %v2540_v12, %v2542_v18  ;;  %2304 = vst.msk [vmem:[#allocation2 + $0x1f0] sm:$0xff] %vm2276_vm6, %v2208_v61 }
 0x226   : > { %2443 = vst.msk [vmem:[#allocation2 + $0x40] sm:$0xff] %vm2441_vm8, %v2321_v27  ;;  %2624 = vrot.lane.b32.xlu1 %v2543_v15, %s12222_s4  ;;  %v2210_v10 = vsel %vm2151_vm5, %v2207_v53, %v2209_v20 }
 0x227   : > { %v1813_v56 = vmax.f32 %v1772_v7, 0.0  ;;  %2622 = vrot.lane.b32.xlu0 %v2541_v49, %s12222_s4  ;;  %v2099_v54 = vmul.f32 %v13135_v21, %v1812_v57  ;;  %2305 = vst.msk [vmem:[#allocation2 + $0x200] sm:$0xff] %vm2276_vm6, %v2210_v10 }
 0x228   : > { %v2569_v34 = vpop.permute.xlu1 %2568  ;;  %v1655_v37 = vpop.f32.mrb[156].mxu0 }
 0x229   : > { %v2100_v62 = vmul.f32 %v13128_v47, %v1813_v56  ;;  %2695 = vst.msk [vmem:[#allocation2 + $0x30] sm:$0xff] %vm2694_vm9, %v2569_v34  ;;  %v1725_v50 = vadd.f32 %v1655_v37, %v12886_v23  ;;  %v11070_v52 = vpop.f32.mrb[157].mxu0  ;;  %v2544_v29 = vrot.slane %v2099_v54, 1  ;;  %v2211_v40 = vrot.slane %v2099_v54, 7 }
 0x22a   : > { %2378 = vrot.lane.b32.xlu1 %v2099_v54, %s16428_s27  ;;  %v1658_v28 = vpop.f32.mrb[158].mxu0 }
 0x22b   : > { %v1773_v55 = vadd.f32 %v12916_v4, %v1725_v50  ;;  %v1726_v21 = vadd.f32 %v1658_v28, %v12888_v35  ;;  %2376 = vrot.lane.b32.xlu0 %v2098_v0, %s16428_s27  ;;  %v2546_v59 = vrot.slane %v2100_v62, 1  ;;  %v2545_v32 = vsel %vm2484_vm4, %v2542_v18, %v2544_v29  ;;  %v11071_v47 = vpop.f32.mrb[159].mxu0 }
 0x22c   : > { %v2323_v39 = vpop.permute.xlu1 %2322  ;;  %v2212_v42 = vsel %vm2151_vm5, %v2209_v20, %v2211_v40  ;;  %v2213_v23 = vrot.slane %v2100_v62, 7 }
 0x22d   : > { %v1814_v44 = vmax.f32 %v1773_v55, 0.0  ;;  %v1774_v6 = vadd.f32 %v12916_v4, %v1726_v21  ;;  %2444 = vst.msk [vmem:[#allocation2 + $0x50] sm:$0xff] %vm2441_vm8, %v2323_v39  ;;  %v2325_v8 = vpop.permute.xlu0 %2324  ;;  %v2547_v48 = vsel %vm2484_vm4, %v2544_v29, %v2546_v59 }
 0x22e   : > { %2306 = vst.msk [vmem:[#allocation2 + $0x210] sm:$0xff] %vm2276_vm6, %v2212_v42  ;;  %2628 = vrot.lane.b32.xlu1 %v2547_v48, %s12222_s4  ;;  %v2214_v35 = vsel %vm2151_vm5, %v2211_v40, %v2213_v23 }
 0x22f   : > { %2445 = vst.msk [vmem:[#allocation2 + $0x60] sm:$0xff] %vm2441_vm8, %v2325_v8  ;;  %v1815_v60 = vmax.f32 %v1774_v6, 0.0  ;;  %2626 = vrot.lane.b32.xlu0 %v2545_v32, %s12222_s4  ;;  %v2101_v24 = vmul.f32 %v13151_v19, %v1814_v44  ;;  %v13245_v19 = vld [vmem:[%s16408_s9] ss:$0 sm:$0xff] }
 0x230   : > { %2307 = vst.msk [vmem:[#allocation2 + $0x220] sm:$0xff] %vm2276_vm6, %v2214_v35  ;;  %v2573_v4 = vpop.permute.xlu1 %2572  ;;  %v1663_v43 = vpop.f32.mrb[160].mxu0  ;;  %v13267_v52 = vld [vmem:[#allocation2 + $0x30] sm:$0xff]  ;;  %v13286_v8 = vld [vmem:[#allocation2] sm:$0xff] }
 0x231   : > { %v2102_v0 = vmul.f32 %v13144_v25, %v1815_v60  ;;  %2697 = vst.msk [vmem:[#allocation2 + $0x50] sm:$0xff] %vm2694_vm9, %v2573_v4  ;;  %v1727_v38 = vadd.f32 %v1663_v43, %v12891_v45  ;;  %v2571_v41 = vpop.permute.xlu0 %2570  ;;  %v11074_v53 = vpop.f32.mrb[161].mxu0  ;;  %v2548_v12 = vrot.slane %v2101_v24, 1  ;;  %v2215_v1 = vrot.slane %v2101_v24, 7 }
 0x232   : > { %2696 = vst.msk [vmem:[#allocation2 + $0x40] sm:$0xff] %vm2694_vm9, %v2571_v41  ;;  %2382 = vrot.lane.b32.xlu1 %v2101_v24, %s16428_s27  ;;  %v1666_v16 = vpop.f32.mrb[162].mxu0 }
 0x233   : > { %v1775_v25 = vadd.f32 %v13245_v19, %v1727_v38  ;;  %v1728_v26 = vadd.f32 %v1666_v16, %v12893_v46  ;;  %2380 = vrot.lane.b32.xlu0 %v2100_v62, %s16428_s27  ;;  %v2550_v45 = vrot.slane %v2102_v0, 1  ;;  %v2549_v14 = vsel %vm2484_vm4, %v2546_v59, %v2548_v12  ;;  %v11075_v18 = vpop.f32.mrb[163].mxu0 }
 0x234   : > { %v2327_v49 = vpop.permute.xlu1 %2326  ;;  %v2216_v9 = vsel %vm2151_vm5, %v2213_v23, %v2215_v1  ;;  %v2217_v61 = vrot.slane %v2102_v0, 7 }
 0x235   : > { %v1816_v20 = vmax.f32 %v1775_v25, 0.0  ;;  %v1776_v57 = vadd.f32 %v13245_v19, %v1728_v26  ;;  %2446 = vst.msk [vmem:[#allocation2 + $0x70] sm:$0xff] %vm2441_vm8, %v2327_v49  ;;  %v2329_v7 = vpop.permute.xlu0 %2328  ;;  %v2551_v27 = vsel %vm2484_vm4, %v2548_v12, %v2550_v45 }
 0x236   : > { %2308 = vst.msk [vmem:[#allocation2 + $0x230] sm:$0xff] %vm2276_vm6, %v2216_v9  ;;  %2632 = vrot.lane.b32.xlu1 %v2551_v27, %s12222_s4  ;;  %v2218_v46 = vsel %vm2151_vm5, %v2215_v1, %v2217_v61 }
 0x237   : > { %2447 = vst.msk [vmem:[#allocation2 + $0x80] sm:$0xff] %vm2441_vm8, %v2329_v7  ;;  %v1817_v15 = vmax.f32 %v1776_v57, 0.0  ;;  %2630 = vrot.lane.b32.xlu0 %v2549_v14, %s12222_s4  ;;  %v2103_v10 = vmul.f32 %v13166_v51, %v1816_v20 }
 0x238   : > { %2309 = vst.msk [vmem:[#allocation2 + $0x240] sm:$0xff] %vm2276_vm6, %v2218_v46  ;;  %v2577_v56 = vpop.permute.xlu1 %2576  ;;  %v1671_v54 = vpop.f32.mrb[164].mxu0  ;;  %v13300_v53 = vld [vmem:[#allocation2 + $0x50] sm:$0xff] }
 0x239   : > { %v13263_v34 = vmul.f32 %v13159_v13, %v1817_v15  ;;  %2699 = vst.msk [vmem:[#allocation2 + $0x70] sm:$0xff] %vm2694_vm9, %v2577_v56  ;;  %v1729_v37 = vadd.f32 %v1671_v54, %v12895_v63  ;;  %v2575_v62 = vpop.permute.xlu0 %2574  ;;  %v11078_v50 = vpop.f32.mrb[165].mxu0  ;;  %v13269_v29 = vld [vmem:[#allocation2 + $0x40] sm:$0xff]  ;;  %v2552_v40 = vrot.slane %v2103_v10, 1  ;;  %v2219_v28 = vrot.slane %v2103_v10, 7 }
 0x23a   : > { %2698 = vst.msk [vmem:[#allocation2 + $0x60] sm:$0xff] %vm2694_vm9, %v2575_v62  ;;  %2386 = vrot.lane.b32.xlu1 %v2103_v10, %s16428_s27  ;;  %v1674_v51 = vpop.f32.mrb[166].mxu0  ;;  %v2815_v13 = vpack.c.bf16 %v13269_v29, %v13267_v52 }
 0x23b   : > { %v1777_v55 = vadd.f32 %v13245_v19, %v1729_v37  ;;  %v1730_v63 = vadd.f32 %v1674_v51, %v12897_v17  ;;  %2384 = vrot.lane.b32.xlu0 %v2102_v0, %s16428_s27  ;;  %v2554_v21 = vrot.slane %v13263_v34, 1  ;;  %v2553_v59 = vsel %vm2484_vm4, %v2550_v45, %v2552_v40  ;;  %v11079_v32 = vpop.f32.mrb[167].mxu0 }
 0x23c   : > { %11101 = vmatmul.mubr.msk.bf16.vlgmr.msra.gmra.mrb[76].mxu1 %vm663_vm7, %v2815_v13  ;;  %v2331_v47 = vpop.permute.xlu1 %2330  ;;  %v2220_v39 = vsel %vm2151_vm5, %v2217_v61, %v2219_v28  ;;  %v2221_v42 = vrot.slane %v13263_v34, 7 }
 0x23d   : > { %v1818_v23 = vmax.f32 %v1777_v55, 0.0  ;;  %v1778_v44 = vadd.f32 %v13245_v19, %v1730_v63  ;;  %2448 = vst.msk [vmem:[#allocation2 + $0x90] sm:$0xff] %vm2441_vm8, %v2331_v47  ;;  %v2333_v17 = vpop.permute.xlu0 %2332  ;;  %v2555_v6 = vsel %vm2484_vm4, %v2552_v40, %v2554_v21  ;;  %11104 = vmatprep.mubr.msk.bf16.mxu1 %vm12219_vm1, %v13286_v8 }
 0x23e   : > { %2310 = vst.msk [vmem:[#allocation2 + $0x250] sm:$0xff] %vm2276_vm6, %v2220_v39  ;;  %2636 = vrot.lane.b32.xlu1 %v2555_v6, %s12222_s4  ;;  %v2222_v48 = vsel %vm2151_vm5, %v2219_v28, %v2221_v42 }
 0x23f   : > { %2449 = vst.msk [vmem:[#allocation2 + $0xa0] sm:$0xff] %vm2441_vm8, %v2333_v17  ;;  %v1819_v35 = vmax.f32 %v1778_v44, 0.0  ;;  %2634 = vrot.lane.b32.xlu0 %v2553_v59, %s12222_s4  ;;  %v2105_v60 = vmul.f32 %v13181_v30, %v1818_v23 }
 0x240   : > { %2311 = vst.msk [vmem:[#allocation2 + $0x260] sm:$0xff] %vm2276_vm6, %v2222_v48  ;;  %v2581_v24 = vpop.permute.xlu1 %2580  ;;  %v1679_v4 = vpop.f32.mrb[168].mxu0  ;;  %v13334_v37 = vld [vmem:[#allocation2 + $0x70] sm:$0xff] }
 0x241   : > { %v2106_v43 = vmul.f32 %v13176_v22, %v1819_v35  ;;  %2701 = vst.msk [vmem:[#allocation2 + $0x90] sm:$0xff] %vm2694_vm9, %v2581_v24  ;;  %v1731_v0 = vadd.f32 %v1679_v4, %v12899_v31  ;;  %v2579_v38 = vpop.permute.xlu0 %2578  ;;  %v11082_v41 = vpop.f32.mrb[169].mxu0  ;;  %v13302_v12 = vld [vmem:[#allocation2 + $0x60] sm:$0xff]  ;;  %v2556_v1 = vrot.slane %v2105_v60, 1  ;;  %v2223_v16 = vrot.slane %v2105_v60, 7 }
 0x242   : > { %2700 = vst.msk [vmem:[#allocation2 + $0x80] sm:$0xff] %vm2694_vm9, %v2579_v38  ;;  %2390 = vrot.lane.b32.xlu1 %v2105_v60, %s16428_s27  ;;  %v1682_v30 = vpop.f32.mrb[170].mxu0  ;;  %v2816_v22 = vpack.c.bf16 %v13302_v12, %v13300_v53  ;;  %v12023_v38 = vld [vmem:[%s16409_s10 + $0x8] sm:$0xff]  }
 0x243   : > { %v1779_v25 = vadd.f32 %v13245_v19, %v1731_v0  ;;  %v1732_v31 = vadd.f32 %v1682_v30, %v12901_v36  ;;  %2388 = vrot.lane.b32.xlu0 %v13263_v34, %s16428_s27  ;;  %v2558_v26 = vrot.slane %v2106_v43, 1  ;;  %v2557_v45 = vsel %vm2484_vm4, %v2554_v21, %v2556_v1  ;;  %v11083_v14 = vpop.f32.mrb[171].mxu0 }
 0x244   : > { %11105 = vmatmul.mubr.msk.bf16.gmra.mrb[80].mxu1 %vm663_vm7, %v2816_v22  ;;  %v2335_v18 = vpop.permute.xlu1 %2334  ;;  %v2224_v49 = vsel %vm2151_vm5, %v2221_v42, %v2223_v16  ;;  %v2225_v9 = vrot.slane %v2106_v43, 7 }
 0x245   : > { %v1820_v61 = vmax.f32 %v1779_v25, 0.0  ;;  %v1780_v20 = vadd.f32 %v13245_v19, %v1732_v31  ;;  %2450 = vst.msk [vmem:[#allocation2 + $0xb0] sm:$0xff] %vm2441_vm8, %v2335_v18  ;;  %v2337_v57 = vpop.permute.xlu0 %2336  ;;  %v2559_v36 = vsel %vm2484_vm4, %v2556_v1, %v2558_v26  ;;  %11108 = vmatprep.mubr.msk.bf16.mxu1 %vm12219_vm1, %v13286_v8 }
 0x246   : > { %2312 = vst.msk [vmem:[#allocation2 + $0x270] sm:$0xff] %vm2276_vm6, %v2224_v49  ;;  %2640 = vrot.lane.b32.xlu1 %v2559_v36, %s12222_s4  ;;  %v2226_v7 = vsel %vm2151_vm5, %v2223_v16, %v2225_v9 }
 0x247   : > { %2451 = vst.msk [vmem:[#allocation2 + $0xc0] sm:$0xff] %vm2441_vm8, %v2337_v57  ;;  %v1821_v27 = vmax.f32 %v1780_v20, 0.0  ;;  %2638 = vrot.lane.b32.xlu0 %v2557_v45, %s12222_s4  ;;  %v2107_v46 = vmul.f32 %v13198_v11, %v1820_v61 }
 0x248   : > { %2313 = vst.msk [vmem:[#allocation2 + $0x280] sm:$0xff] %vm2276_vm6, %v2226_v7  ;;  %v2585_v15 = vpop.permute.xlu1 %2584  ;;  %v1687_v10 = vpop.f32.mrb[172].mxu0  ;;  %v13363_v23 = vld [vmem:[#allocation2 + $0x90] sm:$0xff] }
 0x249   : > { %v13328_v56 = vmul.f32 %v13193_v3, %v1821_v27  ;;  %2703 = vst.msk [vmem:[#allocation2 + $0xb0] sm:$0xff] %vm2694_vm9, %v2585_v15  ;;  %v13332_v54 = vadd.f32 %v1687_v10, %v12903_v33  ;;  %v2583_v34 = vpop.permute.xlu0 %2582  ;;  %v13336_v62 = vld [vmem:[#allocation2 + $0x80] sm:$0xff]  ;;  %v2560_v50 = vrot.slane %v2107_v46, 1  ;;  %v11086_v40 = vpop.f32.mrb[173].mxu0  ;;  %v2227_v11 = vrot.slane %v2107_v46, 7 }
 0x24a   : > { %2702 = vst.msk [vmem:[#allocation2 + $0xa0] sm:$0xff] %vm2694_vm9, %v2583_v34  ;;  %2394 = vrot.lane.b32.xlu1 %v2107_v46, %s16428_s27  ;;  %v2817_v3 = vpack.c.bf16 %v13336_v62, %v13334_v37  ;;  %v1690_v28 = vpop.f32.mrb[174].mxu0 }
 0x24b   : > { %2392 = vrot.lane.b32.xlu0 %v2106_v43, %s16428_s27  ;;  %v2562_v33 = vrot.slane %v13328_v56, 1  ;;  %v2561_v51 = vsel %vm2484_vm4, %v2558_v26, %v2560_v50  ;;  %v11087_v13 = vpop.f32.mrb[175].mxu0  ;;  %v2228_v55 = vsel %vm2151_vm5, %v2225_v9, %v2227_v11  ;;  %v2229_v21 = vrot.slane %v13328_v56, 7  ;;  %v12022_v43 = vld [vmem:[%s16409_s10] sm:$0xff]  }
 0x24c   : > { %11109 = vmatmul.mubr.msk.bf16.gmra.mrb[84].mxu1 %vm663_vm7, %v2817_v3  ;;  %v2339_v63 = vpop.permute.xlu1 %2338  ;;  %2314 = vst.msk [vmem:[#allocation2 + $0x290] sm:$0xff] %vm2276_vm6, %v2228_v55 }
 0x24d   : > { %2452 = vst.msk [vmem:[#allocation2 + $0xd0] sm:$0xff] %vm2441_vm8, %v2339_v63  ;;  %v2341_v59 = vpop.permute.xlu0 %2340  ;;  %v2563_v32 = vsel %vm2484_vm4, %v2560_v50, %v2562_v33  ;;  %11112 = vmatprep.mubr.msk.bf16.mxu1 %vm12219_vm1, %v13286_v8  ;;  %v2230_v47 = vsel %vm2151_vm5, %v2227_v11, %v2229_v21  ;;  %11185 = vmatpush3.bf16.msra.mxu1 %v12022_v43 }
 0x24e   : > { %2453 = vst.msk [vmem:[#allocation2 + $0xe0] sm:$0xff] %vm2441_vm8, %v2341_v59  ;;  %2644 = vrot.lane.b32.xlu1 %v2563_v32, %s12222_s4  ;;  %11186 = vmatprep.subr.bf16.mxu1 %v13286_v8 }
 0x24f   : > { %2642 = vrot.lane.b32.xlu0 %v2561_v51, %s12222_s4  ;;  %2315 = vst.msk [vmem:[#allocation2 + $0x2a0] sm:$0xff] %vm2276_vm6, %v2230_v47 }
 0x250   : > { %v2589_v39 = vpop.permute.xlu1 %2588  ;;  %v13378_v24 = vld [vmem:[#allocation2 + $0xb0] sm:$0xff] }
 0x251   : > { %2705 = vst.msk [vmem:[#allocation2 + $0xd0] sm:$0xff] %vm2694_vm9, %v2589_v39  ;;  %v2587_v42 = vpop.permute.xlu0 %2586  ;;  %v13365_v44 = vld [vmem:[#allocation2 + $0xa0] sm:$0xff]  ;;  %11187 = vmatpush3.bf16.msra.mxu1 %v12023_v38 }
 0x252   : > { %2704 = vst.msk [vmem:[#allocation2 + $0xc0] sm:$0xff] %vm2694_vm9, %v2587_v42  ;;  %v2818_v17 = vpack.c.bf16 %v13365_v44, %v13363_v23  ;;  %11188 = vmatprep.subr.bf16.mxu1 %v13286_v8 }
 0x253   : > { %2396 = vrot.lane.b32.xlu0 %v13328_v56, %s16428_s27 }
 0x254   : > { %11113 = vmatmul.mubr.msk.bf16.gmra.mrb[88].mxu1 %vm663_vm7, %v2818_v17  ;;  %v2343_v6 = vpop.permute.xlu1 %2342 }
 0x255   : > { %2454 = vst.msk [vmem:[#allocation2 + $0xf0] sm:$0xff] %vm2441_vm8, %v2343_v6  ;;  %v2345_v48 = vpop.permute.xlu0 %2344  ;;  %11116 = vmatprep.mubr.msk.bf16.mxu1 %vm12219_vm1, %v13286_v8 }
 0x256   : > { %2455 = vst.msk [vmem:[#allocation2 + $0x100] sm:$0xff] %vm2441_vm8, %v2345_v48 }
 0x258   : > { %v2593_v35 = vpop.permute.xlu1 %2592  ;;  %v13402_v22 = vld [vmem:[#allocation2 + $0xd0] sm:$0xff] }
 0x259   : > { %2707 = vst.msk [vmem:[#allocation2 + $0xf0] sm:$0xff] %vm2694_vm9, %v2593_v35  ;;  %v2591_v60 = vpop.permute.xlu0 %2590  ;;  %v13380_v4 = vld [vmem:[#allocation2 + $0xc0] sm:$0xff] }
 0x25a   : > { %2706 = vst.msk [vmem:[#allocation2 + $0xe0] sm:$0xff] %vm2694_vm9, %v2591_v60  ;;  %v13388_v0 = vpack.c.bf16 %v13380_v4, %v13378_v24 }
 0x25c   : > { %11117 = vmatmul.mubr.msk.bf16.gmra.mrb[92].mxu1 %vm663_vm7, %v13388_v0  ;;  %v2347_v41 = vpop.permute.xlu1 %2346  ;;  %v16426_v45 = vrot.slane %v13388_v0, 1 }
 0x25d   : > { %2456 = vst.msk [vmem:[#allocation2 + $0x110] sm:$0xff] %vm2441_vm8, %v2347_v41  ;;  %v2349_v1 = vpop.permute.xlu0 %2348  ;;  %11120 = vmatprep.mubr.msk.bf16.mxu1 %vm12219_vm1, %v13286_v8  ;;  %v1781_v41 = vadd.f32 %v13245_v19, %v13332_v54  ;;  %v12024_v19 = vld [vmem:[%s16409_s10 + $0x10] sm:$0xff]  }
 0x25e   : > { %2457 = vst.msk [vmem:[#allocation2 + $0x120] sm:$0xff] %vm2441_vm8, %v2349_v1  ;;  %11189 = vmatpush3.bf16.msra.mxu1 %v12024_v19 }
 0x25f   : > { %11190 = vmatprep.subr.bf16.mxu1 %v13286_v8 }
 0x260   : > { %v2597_v16 = vpop.permute.xlu1 %2596  ;;  %v13421_v20 = vld [vmem:[#allocation2 + $0xf0] sm:$0xff] }
 0x261   : > { %2709 = vst.msk [vmem:[#allocation2 + $0x110] sm:$0xff] %vm2694_vm9, %v2597_v16  ;;  %v2595_v30 = vpop.permute.xlu0 %2594  ;;  %v13404_v25 = vld [vmem:[#allocation2 + $0xe0] sm:$0xff] }
 0x262   : > { %2708 = vst.msk [vmem:[#allocation2 + $0x100] sm:$0xff] %vm2694_vm9, %v2595_v30  ;;  %v2820_v31 = vpack.c.bf16 %v13404_v25, %v13402_v22  ;;  %v1822_v30 = vmax.f32 %v1781_v41, 0.0 }
 0x264   : > { %11121 = vmatmul.mubr.msk.bf16.gmra.mrb[96].mxu1 %vm663_vm7, %v2820_v31  ;;  %v2351_v26 = vpop.permute.xlu1 %2350  ;;  %v3614_v14 = vrot.slane %v2820_v31, 1 }
 0x265   : > { %2458 = vst.msk [vmem:[#allocation2 + $0x130] sm:$0xff] %vm2441_vm8, %v2351_v26  ;;  %v2353_v18 = vpop.permute.xlu0 %2352  ;;  %11124 = vmatprep.mubr.msk.bf16.mxu1 %vm12219_vm1, %v13286_v8 }
 0x266   : > { %2459 = vst.msk [vmem:[#allocation2 + $0x140] sm:$0xff] %vm2441_vm8, %v2353_v18  ;;  %v13418_v49 = vsel %vm2484_vm4, %v16426_v45, %v3614_v14 }
 0x268   : > { %v2601_v9 = vpop.permute.xlu1 %2600  ;;  %v13437_v50 = vld [vmem:[#allocation2 + $0x110] sm:$0xff] }
 0x269   : > { %2711 = vst.msk [vmem:[#allocation2 + $0x130] sm:$0xff] %vm2694_vm9, %v2601_v9  ;;  %v2599_v61 = vpop.permute.xlu0 %2598  ;;  %v13423_v57 = vld [vmem:[#allocation2 + $0x100] sm:$0xff] }
 0x26a   : > { %2710 = vst.msk [vmem:[#allocation2 + $0x120] sm:$0xff] %vm2694_vm9, %v2599_v61  ;;  %v2821_v36 = vpack.c.bf16 %v13423_v57, %v13421_v20 }
 0x26c   : > { %11125 = vmatmul.mubr.msk.bf16.gmra.mrb[100].mxu1 %vm663_vm7, %v2821_v36  ;;  %v2355_v7 = vpop.permute.xlu1 %2354  ;;  %v3616_v27 = vrot.slane %v2821_v36, 1 }
 0x26d   : > { %2460 = vst.msk [vmem:[#allocation2 + $0x150] sm:$0xff] %vm2441_vm8, %v2355_v7  ;;  %v2357_v46 = vpop.permute.xlu0 %2356  ;;  %11128 = vmatprep.mubr.msk.bf16.mxu1 %vm12219_vm1, %v13286_v8  ;;  %v12025_v7 = vld [vmem:[%s16409_s10 + $0x18] sm:$0xff]  }
 0x26e   : > { %2461 = vst.msk [vmem:[#allocation2 + $0x160] sm:$0xff] %vm2441_vm8, %v2357_v46  ;;  %v13434_v15 = vsel %vm2484_vm4, %v3614_v14, %v3616_v27  ;;  %11191 = vmatpush3.bf16.msra.mxu1 %v12025_v7 }
 0x26f   : > { %11192 = vmatprep.subr.bf16.mxu1 %v13286_v8 }
 0x270   : > { %v2605_v10 = vpop.permute.xlu1 %2604  ;;  %v13453_v59 = vld [vmem:[#allocation2 + $0x130] sm:$0xff] }
 0x271   : > { %2713 = vst.msk [vmem:[#allocation2 + $0x150] sm:$0xff] %vm2694_vm9, %v2605_v10  ;;  %v2603_v34 = vpop.permute.xlu0 %2602  ;;  %v13439_v40 = vld [vmem:[#allocation2 + $0x120] sm:$0xff] }
 0x272   : > { %2712 = vst.msk [vmem:[#allocation2 + $0x140] sm:$0xff] %vm2694_vm9, %v2603_v34  ;;  %v2822_v11 = vpack.c.bf16 %v13439_v40, %v13437_v50 }
 0x274   : > { %11129 = vmatmul.mubr.msk.bf16.gmra.mrb[104].mxu1 %vm663_vm7, %v2822_v11  ;;  %v2359_v3 = vpop.permute.xlu1 %2358  ;;  %v3618_v28 = vrot.slane %v2822_v11, 1  ;;  %v4360_v11 = vld [vmem:[%s16441_s3 + $0x18] sm:$0xff] }
 0x275   : > { %2462 = vst.msk [vmem:[#allocation2 + $0x170] sm:$0xff] %vm2441_vm8, %v2359_v3  ;;  %v2361_v51 = vpop.permute.xlu0 %2360  ;;  %11132 = vmatprep.mubr.msk.bf16.mxu1 %vm12219_vm1, %v13286_v8 }
 0x276   : > { %2463 = vst.msk [vmem:[#allocation2 + $0x180] sm:$0xff] %vm2441_vm8, %v2361_v51  ;;  %v13450_v13 = vsel %vm2484_vm4, %v3616_v27, %v3618_v28  ;;  %v12027_v51 = vld [vmem:[%s16409_s10 + $0x28] sm:$0xff]  }
 0x278   : > { %v2609_v55 = vpop.permute.xlu1 %2608  ;;  %v13468_v48 = vld [vmem:[#allocation2 + $0x150] sm:$0xff] }
 0x279   : > { %2715 = vst.msk [vmem:[#allocation2 + $0x170] sm:$0xff] %vm2694_vm9, %v2609_v55  ;;  %v2607_v63 = vpop.permute.xlu0 %2606  ;;  %v13455_v32 = vld [vmem:[#allocation2 + $0x140] sm:$0xff]  ;;  %v4359_v55 = vld [vmem:[%s16441_s3 + $0x10] sm:$0xff] }
 0x27a   : > { %2714 = vst.msk [vmem:[#allocation2 + $0x160] sm:$0xff] %vm2694_vm9, %v2607_v63  ;;  %v2823_v47 = vpack.c.bf16 %v13455_v32, %v13453_v59 }
 0x27c   : > { %11133 = vmatmul.mubr.msk.bf16.gmra.mrb[108].mxu1 %vm663_vm7, %v2823_v47  ;;  %v2363_v39 = vpop.permute.xlu1 %2362  ;;  %v3620_v42 = vrot.slane %v2823_v47, 1 }
 0x27d   : > { %2464 = vst.msk [vmem:[#allocation2 + $0x190] sm:$0xff] %vm2441_vm8, %v2363_v39  ;;  %11136 = vmatprep.mubr.msk.bf16.mxu1 %vm12219_vm1, %v13286_v8  ;;  %v4362_v39 = vld [vmem:[%s16441_s3 + $0x28] sm:$0xff] }
 0x27e   : > { %v13465_v17 = vsel %vm2484_vm4, %v3618_v28, %v3620_v42 }
 0x280   : > { %v2613_v6 = vpop.permute.xlu1 %2612  ;;  %v13523_v10 = vld [vmem:[#allocation2 + $0x170] sm:$0xff] }
 0x281   : > { %2717 = vst.msk [vmem:[#allocation2 + $0x190] sm:$0xff] %vm2694_vm9, %v2613_v6  ;;  %v13470_v35 = vld [vmem:[#allocation2 + $0x160] sm:$0xff] }
 0x282   : > { %v13474_v60 = vpack.c.bf16 %v13470_v35, %v13468_v48 }
 0x284   : > { %11137 = vmatmul.mubr.msk.bf16.gmra.mrb[112].mxu1 %vm663_vm7, %v13474_v60  ;;  %v2367_v43 = vpop.permute.xlu1 %2366  ;;  %v3622_v38 = vrot.slane %v13474_v60, 1  ;;  %v4361_v60 = vld [vmem:[%s16441_s3 + $0x20] sm:$0xff] }
 0x285   : > { %2466 = vst.msk [vmem:[#allocation2 + $0x1b0] sm:$0xff] %vm2441_vm8, %v2367_v43  ;;  %11140 = vmatprep.mubr.msk.bf16.mxu1 %vm12219_vm1, %v13286_v8 }
 0x286   : > { %v13485_v1 = vsel %vm2484_vm4, %v3620_v42, %v3622_v38 }
 0x288   : > { %v2617_v16 = vpop.permute.xlu1 %2616  ;;  %v13556_v41 = vld [vmem:[#allocation2 + $0x190] sm:$0xff] }
 0x289   : > { %2719 = vst.msk [vmem:[#allocation2 + $0x1b0] sm:$0xff] %vm2694_vm9, %v2617_v16 }
 0x28a   : > { %v2067_v31 = vpop.permute.xlu0 %2066 }
 0x28b   : > { %v2109_v26 = vmul.f32 %v2067_v31, %v1822_v30 }
 0x28c   : > { %v2371_v14 = vpop.permute.xlu1 %2370 }
 0x28d   : > { %v2231_v18 = vrot.slane %v2109_v26, 7  ;;  %v2564_v9 = vrot.slane %v2109_v26, 1  ;;  %2468 = vst.msk [vmem:[#allocation2 + $0x1d0] sm:$0xff] %vm2441_vm8, %v2371_v14  ;;  %2398 = vrot.lane.b32.xlu1 %v2109_v26, %s16428_s27  ;;  %v4363_v26 = vld [vmem:[%s16441_s3 + $0x30] sm:$0xff] }
 0x28e   : > { %v2611_v54 = vpop.permute.xlu0 %2610 }
 0x28f   : > { %2716 = vst.msk [vmem:[#allocation2 + $0x180] sm:$0xff] %vm2694_vm9, %v2611_v54  ;;  %v2565_v61 = vsel %vm2484_vm4, %v2562_v33, %v2564_v9  ;;  %v2232_v36 = vsel %vm2151_vm5, %v2229_v21, %v2231_v18  ;;  %v4358_v33 = vld [vmem:[%s16441_s3 + $0x8] sm:$0xff] }
 0x290   : > { %v2621_v27 = vpop.permute.xlu1 %2620  ;;  %2646 = vrot.lane.b32.xlu0 %v2565_v61, %s12222_s4  ;;  %2317 = vst.msk [vmem:[#allocation2 + $0x2b0] sm:$0x1f] %vm2316_vm10, %v2232_v36  ;;  %v4365_v61 = vld [vmem:[%s16441_s3 + $0x40] sm:$0xff]  ;;  %v13584_v7 = vld [vmem:[#allocation2 + $0x1b0] sm:$0xff] }
 0x291   : > { %2721 = vst.msk [vmem:[#allocation2 + $0x1d0] sm:$0xff] %vm2694_vm9, %v2621_v27  ;;  %2566 = vrot.lane.b32.xlu1 %v2485_v5, %s12222_s4  ;;  %v12026_v5 = vld [vmem:[%s16409_s10 + $0x20] sm:$0xff]  }
 0x292   : > { %v2365_v56 = vpop.permute.xlu0 %2364  ;;  %11193 = vmatpush3.bf16.msra.mxu1 %v12026_v5 }
 0x293   : > { %2465 = vst.msk [vmem:[#allocation2 + $0x1a0] sm:$0xff] %vm2441_vm8, %v2365_v56  ;;  %11194 = vmatprep.subr.bf16.mxu1 %v13286_v8  ;;  %v4368_v56 = vld [vmem:[%s16441_s3 + $0x58] sm:$0xff] }
 0x294   : > { %v2375_v21 = vpop.permute.xlu1 %2374  ;;  %2648 = vrot.lane.b32.xlu0 %v2564_v9, %s12222_s4  ;;  %v4366_v9 = vld [vmem:[%s16441_s3 + $0x48] sm:$0xff] }
 0x295   : > { %2470 = vst.msk [vmem:[#allocation2 + $0x1f0] sm:$0xff] %vm2441_vm8, %v2375_v21  ;;  %4377 = vperm.xlu1 %12009, %v4358_v33  }
 0x296   : > { %v2615_v46 = vpop.permute.xlu0 %2614  ;;  %v13525_v34 = vld [vmem:[#allocation2 + $0x180] sm:$0xff]  ;;  %11195 = vmatpush3.bf16.msra.mxu1 %v12027_v51 }
 0x297   : > { %2718 = vst.msk [vmem:[#allocation2 + $0x1a0] sm:$0xff] %vm2694_vm9, %v2615_v46  ;;  %v2825_v3 = vpack.c.bf16 %v13525_v34, %v13523_v10  ;;  %11280 = vmatprep.subr.bf16.mxu1 %v13286_v8 }
 0x298   : > { %v2625_v28 = vpop.permute.xlu1 %2624  ;;  %4372 = vperm.xlu0 %12008, %v4357_v58   ;;  %v4367_v58 = vld [vmem:[%s16441_s3 + $0x50] sm:$0xff] }
 0x299   : > { %2723 = vst.msk [vmem:[#allocation2 + $0x1f0] sm:$0xff] %vm2694_vm9, %v2625_v28  ;;  %11141 = vmatmul.mubr.msk.bf16.gmra.mrb[116].mxu1 %vm663_vm7, %v2825_v3  ;;  %4387 = vperm.xlu1 %12009, %v4360_v11   ;;  %v3624_v63 = vrot.slane %v2825_v3, 1  ;;  %v4369_v28 = vld [vmem:[%s16441_s3 + $0x60] sm:$0xf] }
 0x29a   : > { %v2369_v47 = vpop.permute.xlu0 %2368  ;;  %11144 = vmatprep.mubr.msk.bf16.mxu1 %vm12219_vm1, %v13286_v8 }
 0x29b   : > { %2467 = vst.msk [vmem:[#allocation2 + $0x1c0] sm:$0xff] %vm2441_vm8, %v2369_v47  ;;  %v13549_v42 = vsel %vm2484_vm4, %v3622_v38, %v3624_v63  ;;  %v4364_v38 = vld [vmem:[%s16441_s3 + $0x38] sm:$0xff] }
 0x29c   : > { %v2379_v6 = vpop.permute.xlu1 %2378  ;;  %4382 = vperm.xlu0 %12008, %v4359_v55   ;;  %v13609_v55 = vld [vmem:[#allocation2 + $0x1d0] sm:$0xff] }
 0x29d   : > { %2472 = vst.msk [vmem:[#allocation2 + $0x210] sm:$0xff] %vm2441_vm8, %v2379_v6  ;;  %4397 = vperm.xlu1 %12009, %v4362_v39  }
 0x29e   : > { %v2619_v43 = vpop.permute.xlu0 %2618  ;;  %v13558_v16 = vld [vmem:[#allocation2 + $0x1a0] sm:$0xff] }
 0x29f   : > { %2720 = vst.msk [vmem:[#allocation2 + $0x1c0] sm:$0xff] %vm2694_vm9, %v2619_v43  ;;  %v2826_v30 = vpack.c.bf16 %v13558_v16, %v13556_v41 }
 0x2a0   : > { %v2629_v31 = vpop.permute.xlu1 %2628  ;;  %4392 = vperm.xlu0 %12008, %v4361_v60  }
 0x2a1   : > { %2725 = vst.msk [vmem:[#allocation2 + $0x210] sm:$0xff] %vm2694_vm9, %v2629_v31  ;;  %11145 = vmatmul.mubr.msk.bf16.gmra.mrb[120].mxu1 %vm663_vm7, %v2826_v30  ;;  %4407 = vperm.xlu1 %12009, %v4364_v38   ;;  %v3626_v14 = vrot.slane %v2826_v30, 1  ;;  %v13625_v31 = vld [vmem:[#allocation2 + $0x1f0] sm:$0xff] }
 0x2a2   : > { %v2373_v18 = vpop.permute.xlu0 %2372  ;;  %11148 = vmatprep.mubr.msk.bf16.mxu1 %vm12219_vm1, %v13286_v8 }
 0x2a3   : > { %2469 = vst.msk [vmem:[#allocation2 + $0x1e0] sm:$0xff] %vm2441_vm8, %v2373_v18  ;;  %v13578_v19 = vsel %vm2484_vm4, %v3624_v63, %v3626_v14 }
 0x2a4   : > { %v2383_v54 = vpop.permute.xlu1 %2382  ;;  %4402 = vperm.xlu0 %12008, %v4363_v26  }
 0x2a5   : > { %2474 = vst.msk [vmem:[#allocation2 + $0x230] sm:$0xff] %vm2441_vm8, %v2383_v54  ;;  %4417 = vperm.xlu1 %12009, %v4366_v9  }
 0x2a6   : > { %v2623_v36 = vpop.permute.xlu0 %2622  ;;  %v13586_v27 = vld [vmem:[#allocation2 + $0x1c0] sm:$0xff] }
 0x2a7   : > { %2722 = vst.msk [vmem:[#allocation2 + $0x1e0] sm:$0xff] %vm2694_vm9, %v2623_v36  ;;  %v2827_v33 = vpack.c.bf16 %v13586_v27, %v13584_v7 }
 0x2a8   : > { %v2633_v21 = vpop.permute.xlu1 %2632  ;;  %4412 = vperm.xlu0 %12008, %v4365_v61  }
 0x2a9   : > { %2727 = vst.msk [vmem:[#allocation2 + $0x230] sm:$0xff] %vm2694_vm9, %v2633_v21  ;;  %11149 = vmatmul.mubr.msk.bf16.gmra.mrb[124].mxu1 %vm663_vm7, %v2827_v33  ;;  %4427 = vperm.xlu1 %12009, %v4368_v56   ;;  %v3628_v5 = vrot.slane %v2827_v33, 1  ;;  %v13641_v33 = vld [vmem:[#allocation2 + $0x210] sm:$0xff] }
 0x2aa   : > { %v2377_v46 = vpop.permute.xlu0 %2376  ;;  %11152 = vmatprep.mubr.msk.bf16.mxu1 %vm12219_vm1, %v13286_v8 }
 0x2ab   : > { %2471 = vst.msk [vmem:[#allocation2 + $0x200] sm:$0xff] %vm2441_vm8, %v2377_v46  ;;  %v13603_v11 = vsel %vm2484_vm4, %v3626_v14, %v3628_v5 }
 0x2ac   : > { %v2387_v3 = vpop.permute.xlu1 %2386  ;;  %4422 = vperm.xlu0 %12008, %v4367_v58  }
 0x2ad   : > { %2476 = vst.msk [vmem:[#allocation2 + $0x250] sm:$0xff] %vm2441_vm8, %v2387_v3 }
 0x2ae   : > { %v2627_v51 = vpop.permute.xlu0 %2626  ;;  %v13611_v63 = vld [vmem:[#allocation2 + $0x1e0] sm:$0xff] }
 0x2af   : > { %2724 = vst.msk [vmem:[#allocation2 + $0x200] sm:$0xff] %vm2694_vm9, %v2627_v51  ;;  %v2828_v47 = vpack.c.bf16 %v13611_v63, %v13609_v55 }
 0x2b0   : > { %v2637_v39 = vpop.permute.xlu1 %2636  ;;  %4432 = vperm.xlu0 %12008, %v4369_v28  }
 0x2b1   : > { %2729 = vst.msk [vmem:[#allocation2 + $0x250] sm:$0xff] %vm2694_vm9, %v2637_v39  ;;  %11153 = vmatmul.mubr.msk.bf16.gmra.mrb[128].mxu1 %vm663_vm7, %v2828_v47  ;;  %v3630_v6 = vrot.slane %v2828_v47, 1  ;;  %v13656_v47 = vld [vmem:[#allocation2 + $0x230] sm:$0xff] }
 0x2b2   : > { %v2381_v60 = vpop.permute.xlu0 %2380  ;;  %11156 = vmatprep.mubr.msk.bf16.mxu1 %vm12219_vm1, %v13286_v8 }
 0x2b3   : > { %2473 = vst.msk [vmem:[#allocation2 + $0x220] sm:$0xff] %vm2441_vm8, %v2381_v60  ;;  %v13622_v43 = vsel %vm2484_vm4, %v3628_v5, %v3630_v6 }
 0x2b4   : > { %v2391_v38 = vpop.permute.xlu1 %2390 }
 0x2b5   : > { %2478 = vst.msk [vmem:[#allocation2 + $0x270] sm:$0xff] %vm2441_vm8, %v2391_v38 }
 0x2b6   : > { %v2631_v30 = vpop.permute.xlu0 %2630  ;;  %v13627_v26 = vld [vmem:[#allocation2 + $0x200] sm:$0xff] }
 0x2b7   : > { %2726 = vst.msk [vmem:[#allocation2 + $0x220] sm:$0xff] %vm2694_vm9, %v2631_v30  ;;  %v2829_v14 = vpack.c.bf16 %v13627_v26, %v13625_v31 }
 0x2b8   : > { %v2641_v18 = vpop.permute.xlu1 %2640 }
 0x2b9   : > { %2731 = vst.msk [vmem:[#allocation2 + $0x270] sm:$0xff] %vm2694_vm9, %v2641_v18  ;;  %11157 = vmatmul.mubr.msk.bf16.gmra.mrb[132].mxu1 %vm663_vm7, %v2829_v14  ;;  %v3632_v9 = vrot.slane %v2829_v14, 1  ;;  %v13670_v18 = vld [vmem:[#allocation2 + $0x250] sm:$0xff] }
 0x2ba   : > { %v2385_v54 = vpop.permute.xlu0 %2384  ;;  %11160 = vmatprep.mubr.msk.bf16.mxu1 %vm12219_vm1, %v13286_v8 }
 0x2bb   : > { %2475 = vst.msk [vmem:[#allocation2 + $0x240] sm:$0xff] %vm2441_vm8, %v2385_v54  ;;  %v13638_v61 = vsel %vm2484_vm4, %v3630_v6, %v3632_v9 }
 0x2bc   : > { %v2395_v36 = vpop.permute.xlu1 %2394 }
 0x2bd   : > { %2480 = vst.msk [vmem:[#allocation2 + $0x290] sm:$0xff] %vm2441_vm8, %v2395_v36 }
 0x2be   : > { %v2635_v56 = vpop.permute.xlu0 %2634  ;;  %v13643_v21 = vld [vmem:[#allocation2 + $0x220] sm:$0xff] }
 0x2bf   : > { %2728 = vst.msk [vmem:[#allocation2 + $0x240] sm:$0xff] %vm2694_vm9, %v2635_v56  ;;  %v2830_v58 = vpack.c.bf16 %v13643_v21, %v13641_v33 }
 0x2c0   : > { %v2645_v5 = vpop.permute.xlu1 %2644 }
 0x2c1   : > { %2733 = vst.msk [vmem:[#allocation2 + $0x290] sm:$0xff] %vm2694_vm9, %v2645_v5  ;;  %11161 = vmatmul.mubr.msk.bf16.gmra.mrb[136].mxu1 %vm663_vm7, %v2830_v58  ;;  %v3634_v46 = vrot.slane %v2830_v58, 1  ;;  %v13684_v5 = vld [vmem:[#allocation2 + $0x270] sm:$0xff] }
 0x2c2   : > { %v2389_v3 = vpop.permute.xlu0 %2388  ;;  %11164 = vmatprep.mubr.msk.bf16.mxu1 %vm12219_vm1, %v13286_v8 }
 0x2c3   : > { %2477 = vst.msk [vmem:[#allocation2 + $0x260] sm:$0xff] %vm2441_vm8, %v2389_v3  ;;  %v13654_v28 = vsel %vm2484_vm4, %v3632_v9, %v3634_v46 }
 0x2c6   : > { %v2639_v51 = vpop.permute.xlu0 %2638  ;;  %v13658_v39 = vld [vmem:[#allocation2 + $0x240] sm:$0xff] }
 0x2c7   : > { %2730 = vst.msk [vmem:[#allocation2 + $0x260] sm:$0xff] %vm2694_vm9, %v2639_v51  ;;  %v2831_v6 = vpack.c.bf16 %v13658_v39, %v13656_v47 }
 0x2c9   : > { %11165 = vmatmul.mubr.msk.bf16.gmra.mrb[140].mxu1 %vm663_vm7, %v2831_v6  ;;  %v3636_v60 = vrot.slane %v2831_v6, 1 }
 0x2ca   : > { %v2393_v38 = vpop.permute.xlu0 %2392  ;;  %11168 = vmatprep.mubr.msk.bf16.mxu1 %vm12219_vm1, %v13286_v8 }
 0x2cb   : > { %2479 = vst.msk [vmem:[#allocation2 + $0x280] sm:$0xff] %vm2441_vm8, %v2393_v38  ;;  %v13668_v30 = vsel %vm2484_vm4, %v3634_v46, %v3636_v60 }
 0x2ce   : > { %v2643_v14 = vpop.permute.xlu0 %2642  ;;  %v13672_v9 = vld [vmem:[#allocation2 + $0x260] sm:$0xff] }
 0x2cf   : > { %2732 = vst.msk [vmem:[#allocation2 + $0x280] sm:$0xff] %vm2694_vm9, %v2643_v14  ;;  %v2832_v54 = vpack.c.bf16 %v13672_v9, %v13670_v18 }
 0x2d1   : > { %11169 = vmatmul.mubr.msk.bf16.gmra.mrb[144].mxu1 %vm663_vm7, %v2832_v54  ;;  %v3638_v36 = vrot.slane %v2832_v54, 1 }
 0x2d2   : > { %v2397_v56 = vpop.permute.xlu0 %2396  ;;  %11172 = vmatprep.mubr.msk.bf16.mxu1 %vm12219_vm1, %v13286_v8 }
 0x2d3   : > { %2481 = vst.msk [vmem:[#allocation2 + $0x2a0] sm:$0xff] %vm2441_vm8, %v2397_v56  ;;  %v13682_v58 = vsel %vm2484_vm4, %v3636_v60, %v3638_v36  ;;  %v2812_v56 = vld [vmem:[#allocation2 + $0x290] sm:$0xff] }
 0x2d4   : > { %16442 = vst [vmem:[#allocation5_spill] sm:$0xff] %v13682_v58 }
 0x2d6   : > { %v13686_v46 = vld [vmem:[#allocation2 + $0x280] sm:$0xff] }
 0x2d7   : > { %v2833_v3 = vpack.c.bf16 %v13686_v46, %v13684_v5 }
 0x2d9   : > { %11173 = vmatmul.mubr.msk.bf16.gmra.mrb[148].mxu1 %vm663_vm7, %v2833_v3  ;;  %v3640_v51 = vrot.slane %v2833_v3, 1 }
 0x2da   : > { %11176 = vmatprep.mubr.msk.bf16.mxu1 %vm12219_vm1, %v13286_v8 }
 0x2db   : > { %v13694_v6 = vsel %vm2484_vm4, %v3638_v36, %v3640_v51 }
 0x2dc   : > { %16443 = vst [vmem:[#allocation6_spill] sm:$0xff] %v13694_v6 }
 0x2ff   : > { %v2399_v38 = vpop.permute.xlu1 %2398 }
 0x300   : > { %2483 = vst.msk [vmem:[#allocation2 + $0x2b0] sm:$0xf] %vm2482_vm11, %v2399_v38 }
 0x302   : > { %v2647_v60 = vpop.permute.xlu0 %2646 }
 0x303   : > { %2734 = vst.msk [vmem:[#allocation2 + $0x2a0] sm:$0xff] %vm2694_vm9, %v2647_v60  ;;  %v2567_v14 = vpop.permute.xlu1 %2566 }
 0x304   : > { %2693 = vst.msk [vmem:[#allocation2 + $0x20] sm:$0x80] %vm2692_vm12, %v2567_v14  ;;  %v2737_v14 = vld [vmem:[#allocation2] sm:$0xc0] }
 0x306   : > { %v2649_v54 = vpop.permute.xlu0 %2648 }
 0x307   : > { %2736 = vst.msk [vmem:[#allocation2 + $0x2b0] sm:$0x7] %vm2735_vm13, %v2649_v54 }
 0x30a   : > { %v2813_v3 = vld [vmem:[#allocation2 + $0x2a0] sm:$0xff] }
 0x30b   : > { %v13700_v2 = vpack.c.bf16 %v2813_v3, %v2812_v56  ;;  %v2739_v54 = vld [vmem:[#allocation2 + $0x20] sm:$0xff]  ;;  %v2779_v56 = vpack.c.bf16 %v13286_v8, %v2737_v14  ;;  %v2782_v14 = vpack.c.bf16 %v13334_v37, %v13302_v12 }
 0x30c   : > { %v2780_v3 = vpack.c.bf16 %v13267_v52, %v2739_v54  ;;  %v2781_v52 = vpack.c.bf16 %v13300_v53, %v13269_v29  ;;  %v12030_v54 = vld [vmem:[%s16409_s10 + $0x70] sm:$0xff]  }
 0x30d   : > { %11177 = vmatmul.mubr.msk.bf16.gmra.mrb[152].mxu1 %vm663_vm7, %v13700_v2  ;;  %v16427_v36 = vrot.slane %v13700_v2, 1  ;;  %v3170_v6 = vrot.slane %v2779_v56, 3  ;;  %v3175_v29 = vrot.slane %v2782_v14, 3  ;;  %v12032_v56 = vld [vmem:[%s16409_s10 + $0x80] sm:$0xff]  }
 0x30e   : > { %11180 = vmatprep.mubr.msk.bf16.mxu1 %vm12219_vm1, %v13286_v8  ;;  %v2814_v60 = vld [vmem:[#allocation2 + $0x2b0] sm:$0xf]  ;;  %v3171_v58 = vrot.slane %v2780_v3, 3  ;;  %v12033_v3 = vld [vmem:[%s16409_s10 + $0x88] sm:$0xff]  }
 0x30f   : > { %v13710_v38 = vsel %vm2484_vm4, %v3640_v51, %v16427_v36  ;;  %v2835_v45 = vpack.c.bf16 %v2814_v60, %v2814_v60  ;;  %v12028_v51 = vld [vmem:[%s16409_s10 + $0x60] sm:$0xff]  }
 0x310   : > { %v3172_v36 = vsel %vm3169_vm14, %v3170_v6, %v3171_v58  ;;  %v12029_v6 = vld [vmem:[%s16409_s10 + $0x68] sm:$0xff]  }
 0x315   : > { %11181 = vmatmul.mubr.msk.bf16.gmra.mrb[156].mxu1 %vm663_vm7, %v2835_v45  ;;  %v3173_v45 = vrot.slane %v2781_v52, 3 }
 0x316   : > { %11196 = vmatprep.mubr.msk.bf16.mxu1 %vm12219_vm1, %v13286_v8 }
 0x317   : > { %v3174_v60 = vsel %vm3169_vm14, %v3171_v58, %v3173_v45  ;;  %v3176_v53 = vsel %vm3169_vm14, %v3173_v45, %v3175_v29  ;;  %v2783_v58 = vpack.c.bf16 %v13363_v23, %v13336_v62  ;;  %v12031_v62 = vld [vmem:[%s16409_s10 + $0x78] sm:$0xff]  }
 0x319   : > { %v3177_v12 = vrot.slane %v2783_v58, 3 }
 0x31b   : > { %v3178_v37 = vsel %vm3169_vm14, %v3175_v29, %v3177_v12 }
 0x31d   : > { %11197 = vmatmul.mubr.msk.bf16.vlgmr.msra.gmra.mrb[76].mxu1 %vm663_vm7, %v3172_v36  ;;  %v2784_v36 = vpack.c.bf16 %v13378_v24, %v13365_v44  ;;  %v2785_v24 = vpack.c.bf16 %v13402_v22, %v13380_v4  ;;  %v2786_v22 = vpack.c.bf16 %v13421_v20, %v13404_v25  ;;  %v2788_v20 = vpack.c.bf16 %v13453_v59, %v13439_v40 }
 0x31e   : > { %11200 = vmatprep.mubr.msk.bf16.mxu1 %vm12219_vm1, %v13286_v8  ;;  %11281 = vmatpush3.bf16.msra.mxu1 %v12028_v51  ;;  %v2790_v40 = vpack.c.bf16 %v13523_v10, %v13470_v35  ;;  %v2792_v35 = vpack.c.bf16 %v13584_v7, %v13558_v16  ;;  %v2794_v16 = vpack.c.bf16 %v13625_v31, %v13611_v63 }
 0x31f   : > { %11282 = vmatprep.subr.bf16.mxu1 %v13286_v8  ;;  %v3179_v23 = vrot.slane %v2784_v36, 3  ;;  %v3181_v51 = vrot.slane %v2785_v24, 3  ;;  %v3183_v52 = vrot.slane %v2786_v22, 3  ;;  %v2796_v63 = vpack.c.bf16 %v13656_v47, %v13643_v21  ;;  %v2778_v24 = vld [vmem:[#allocation2 + $0x290] sm:$0x3]  ;;  %v13859_v22 = vld [vmem:[#allocation2] sm:$0xff] }
 0x320   : > { %v3191_v59 = vrot.slane %v2790_v40, 3  ;;  %v3195_v10 = vrot.slane %v2792_v35, 3  ;;  %v3199_v7 = vrot.slane %v2794_v16, 3  ;;  %v2798_v21 = vpack.c.bf16 %v13684_v5, %v13672_v9  ;;  %v3513_v9 = vld [vmem:[#allocation2 + $0x80] sm:$0xff] }
 0x321   : > { %v3180_v44 = vsel %vm3169_vm14, %v3177_v12, %v3179_v23  ;;  %v3182_v4 = vsel %vm3169_vm14, %v3179_v23, %v3181_v51  ;;  %v3184_v45 = vsel %vm3169_vm14, %v3181_v51, %v3183_v52  ;;  %v3203_v31 = vrot.slane %v2796_v63, 3  ;;  %v3511_v5 = vld [vmem:[#allocation2 + $0x60] sm:$0xff]  ;;  %v3512_v51 = vld [vmem:[#allocation2 + $0x70] sm:$0xff] }
 0x322   : > { %11283 = vmatpush3.bf16.msra.mxu1 %v12029_v6  ;;  %v3187_v6 = vrot.slane %v2788_v20, 3  ;;  %v3207_v47 = vrot.slane %v2798_v21, 3 }
 0x323   : > { %11284 = vmatprep.subr.bf16.mxu1 %v13286_v8 }
 0x325   : > { %11201 = vmatmul.mubr.msk.bf16.gmra.mrb[80].mxu1 %vm663_vm7, %v3174_v60  ;;  %v2787_v60 = vpack.c.bf16 %v13437_v50, %v13423_v57  ;;  %v2789_v57 = vpack.c.bf16 %v13468_v48, %v13455_v32  ;;  %v2791_v32 = vpack.c.bf16 %v13556_v41, %v13525_v34  ;;  %v2793_v34 = vpack.c.bf16 %v13609_v55, %v13586_v27 }
 0x326   : > { %11204 = vmatprep.mubr.msk.bf16.mxu1 %vm12219_vm1, %v13286_v8  ;;  %11285 = vmatpush3.bf16.msra.mxu1 %v12030_v54  ;;  %v2795_v27 = vpack.c.bf16 %v13641_v33, %v13627_v26  ;;  %v2797_v26 = vpack.c.bf16 %v13670_v18, %v13658_v39  ;;  %v2799_v18 = vpack.c.bf16 %v2778_v24, %v13686_v46  ;;  %v3510_v46 = vld [vmem:[#allocation2 + $0x50] sm:$0xfc] }
 0x327   : > { %11286 = vmatprep.subr.bf16.mxu1 %v13286_v8  ;;  %v3185_v14 = vrot.slane %v2787_v60, 3  ;;  %v3189_v50 = vrot.slane %v2789_v57, 3  ;;  %v3193_v48 = vrot.slane %v2791_v32, 3  ;;  %v3197_v41 = vrot.slane %v2793_v34, 3  ;;  %v3515_v60 = vld [vmem:[#allocation2 + $0xa0] sm:$0xff] }
 0x328   : > { %v3201_v55 = vrot.slane %v2795_v27, 3  ;;  %v3205_v33 = vrot.slane %v2797_v26, 3  ;;  %v16444_v57 = vrot.slane %v13388_v0, 1  ;;  %v16445_v0 = vld [vmem:[#allocation5_spill] sm:$0xff] }
 0x329   : > { %v3186_v25 = vsel %vm3169_vm14, %v3183_v52, %v3185_v14  ;;  %v3188_v29 = vsel %vm3169_vm14, %v3185_v14, %v3187_v6  ;;  %v3192_v58 = vsel %vm3169_vm14, %v3189_v50, %v3191_v59  ;;  %v3194_v12 = vsel %vm3169_vm14, %v3191_v59, %v3193_v48 }
 0x32a   : > { %11287 = vmatpush3.bf16.msra.mxu1 %v12031_v62  ;;  %v3198_v36 = vsel %vm3169_vm14, %v3195_v10, %v3197_v41  ;;  %v3200_v54 = vsel %vm3169_vm14, %v3197_v41, %v3199_v7  ;;  %v3202_v62 = vsel %vm3169_vm14, %v3199_v7, %v3201_v55  ;;  %v3204_v23 = vsel %vm3169_vm14, %v3201_v55, %v3203_v31 }
 0x32b   : > { %11288 = vmatprep.subr.bf16.mxu1 %v13286_v8  ;;  %v3208_v39 = vsel %vm3169_vm14, %v3205_v33, %v3207_v47  ;;  %v3551_v52 = vpack.c.bf16 %v3511_v5, %v3510_v46 }
 0x32d   : > { %11205 = vmatmul.mubr.msk.bf16.gmra.mrb[84].mxu1 %vm663_vm7, %v3176_v53  ;;  %v3190_v53 = vsel %vm3169_vm14, %v3187_v6, %v3189_v50  ;;  %v3607_v14 = vrot.slane %v3551_v52, 1 }
 0x32e   : > { %11208 = vmatprep.mubr.msk.bf16.mxu1 %vm12219_vm1, %v13286_v8  ;;  %11289 = vmatpush3.bf16.msra.mxu1 %v12032_v56  ;;  %v3209_v56 = vrot.slane %v2799_v18, 3 }
 0x32f   : > { %11290 = vmatprep.subr.bf16.mxu1 %v13286_v8 }
 0x332   : > { %11291 = vmatpush3.bf16.msra.mxu1 %v12033_v3  ;;  %v3210_v3 = vsel %vm3169_vm14, %v3207_v47, %v3209_v56 }
 0x333   : > { %11608 = vmatprep.subr.bf16.mxu1 %v13286_v8 }
 0x335   : > { %11209 = vmatmul.mubr.msk.bf16.gmra.mrb[88].mxu1 %vm663_vm7, %v3178_v37  ;;  %v3196_v37 = vsel %vm3169_vm14, %v3193_v48, %v3195_v10 }
 0x336   : > { %11212 = vmatprep.mubr.msk.bf16.mxu1 %vm12219_vm1, %v13286_v8 }
 0x33d   : > { %11213 = vmatmul.mubr.msk.bf16.gmra.mrb[92].mxu1 %vm663_vm7, %v3180_v44  ;;  %v3206_v44 = vsel %vm3169_vm14, %v3203_v31, %v3205_v33 }
 0x33e   : > { %11216 = vmatprep.mubr.msk.bf16.mxu1 %vm12219_vm1, %v13286_v8 }
 0x345   : > { %11217 = vmatmul.mubr.msk.bf16.gmra.mrb[96].mxu1 %vm663_vm7, %v3182_v4  ;;  %v3552_v4 = vpack.c.bf16 %v3513_v9, %v3512_v51 }
 0x346   : > { %11220 = vmatprep.mubr.msk.bf16.mxu1 %vm12219_vm1, %v13286_v8 }
 0x34d   : > { %11221 = vmatmul.mubr.msk.bf16.gmra.mrb[100].mxu1 %vm663_vm7, %v3184_v45  ;;  %v3608_v45 = vrot.slane %v3552_v4, 1 }
 0x34e   : > { %11224 = vmatprep.mubr.msk.bf16.mxu1 %vm12219_vm1, %v13286_v8 }
 0x34f   : > { %v3609_v20 = vsel %vm2484_vm4, %v3607_v14, %v3608_v45 }
 0x355   : > { %11225 = vmatmul.mubr.msk.bf16.gmra.mrb[104].mxu1 %vm663_vm7, %v3186_v25  ;;  %v3514_v25 = vld [vmem:[#allocation2 + $0x90] sm:$0xff] }
 0x356   : > { %11228 = vmatprep.mubr.msk.bf16.mxu1 %vm12219_vm1, %v13286_v8 }
 0x35d   : > { %11229 = vmatmul.mubr.msk.bf16.gmra.mrb[108].mxu1 %vm663_vm7, %v3188_v29 }
 0x35e   : > { %11232 = vmatprep.mubr.msk.bf16.mxu1 %vm12219_vm1, %v13286_v8 }
 0x365   : > { %11233 = vmatmul.mubr.msk.bf16.gmra.mrb[112].mxu1 %vm663_vm7, %v3190_v53 }
 0x366   : > { %11236 = vmatprep.mubr.msk.bf16.mxu1 %vm12219_vm1, %v13286_v8 }
 0x36d   : > { %11237 = vmatmul.mubr.msk.bf16.gmra.mrb[116].mxu1 %vm663_vm7, %v3192_v58 }
 0x36e   : > { %11240 = vmatprep.mubr.msk.bf16.mxu1 %vm12219_vm1, %v13286_v8 }
 0x375   : > { %11241 = vmatmul.mubr.msk.bf16.gmra.mrb[120].mxu1 %vm663_vm7, %v3194_v12 }
 0x376   : > { %11244 = vmatprep.mubr.msk.bf16.mxu1 %vm12219_vm1, %v13286_v8 }
 0x37d   : > { %11245 = vmatmul.mubr.msk.bf16.gmra.mrb[124].mxu1 %vm663_vm7, %v3196_v37 }
 0x37e   : > { %11248 = vmatprep.mubr.msk.bf16.mxu1 %vm12219_vm1, %v13286_v8 }
 0x385   : > { %11249 = vmatmul.mubr.msk.bf16.gmra.mrb[128].mxu1 %vm663_vm7, %v3198_v36 }
 0x386   : > { %11252 = vmatprep.mubr.msk.bf16.mxu1 %vm12219_vm1, %v13286_v8 }
 0x38d   : > { %11253 = vmatmul.mubr.msk.bf16.gmra.mrb[132].mxu1 %vm663_vm7, %v3200_v54 }
 0x38e   : > { %11256 = vmatprep.mubr.msk.bf16.mxu1 %vm12219_vm1, %v13286_v8 }
 0x395   : > { %11257 = vmatmul.mubr.msk.bf16.gmra.mrb[136].mxu1 %vm663_vm7, %v3202_v62 }
 0x396   : > { %11260 = vmatprep.mubr.msk.bf16.mxu1 %vm12219_vm1, %v13286_v8 }
 0x39d   : > { %11261 = vmatmul.mubr.msk.bf16.gmra.mrb[140].mxu1 %vm663_vm7, %v3204_v23 }
 0x39e   : > { %11264 = vmatprep.mubr.msk.bf16.mxu1 %vm12219_vm1, %v13286_v8 }
 0x3a5   : > { %11265 = vmatmul.mubr.msk.bf16.gmra.mrb[144].mxu1 %vm663_vm7, %v3206_v44 }
 0x3a6   : > { %11268 = vmatprep.mubr.msk.bf16.mxu1 %vm12219_vm1, %v13286_v8 }
 0x3ad   : > { %11269 = vmatmul.mubr.msk.bf16.gmra.mrb[148].mxu1 %vm663_vm7, %v3208_v39 }
 0x3ae   : > { %11272 = vmatprep.mubr.msk.bf16.mxu1 %vm12219_vm1, %v13286_v8 }
 0x3b5   : > { %11273 = vmatmul.mubr.msk.bf16.gmra.mrb[152].mxu1 %vm663_vm7, %v3210_v3 }
 0x3b6   : > { %11276 = vmatprep.mubr.msk.bf16.mxu1 %vm12219_vm1, %v13286_v8  ;;  %v3553_v8 = vpack.c.bf16 %v3515_v60, %v3514_v25 }
 0x3b8   : > { %v3610_v6 = vrot.slane %v3553_v8, 1 }
 0x3ba   : > { %v3611_v29 = vsel %vm2484_vm4, %v3608_v45, %v3610_v6  ;;  %v3613_v50 = vsel %vm2484_vm4, %v3610_v6, %v16444_v57 }
 0x3bd   : > { %11277 = vmatmul.mubr.msk.bf16.gmra.mrb[156].mxu1 %vm663_vm7, %v3209_v56 }
 0x3be   : > { %11292 = vmatprep.mubr.msk.bf16.mxu1 %vm12219_vm1, %v13859_v22 }
 0x3c5   : > { %11293 = vmatmul.mubr.msk.bf16.vlgmr.msra.gmra.mrb[76].mxu1 %vm663_vm7, %v3609_v20 }
 0x3c6   : > { %11296 = vmatprep.mubr.msk.bf16.mxu1 %vm12219_vm1, %v13859_v22 }
 0x3cd   : > { %11297 = vmatmul.mubr.msk.bf16.gmra.mrb[80].mxu1 %vm663_vm7, %v3611_v29 }
 0x3ce   : > { %11300 = vmatprep.mubr.msk.bf16.mxu1 %vm12219_vm1, %v13859_v22 }
 0x3d5   : > { %11301 = vmatmul.mubr.msk.bf16.gmra.mrb[84].mxu1 %vm663_vm7, %v3613_v50 }
 0x3d6   : > { %11304 = vmatprep.mubr.msk.bf16.mxu1 %vm12219_vm1, %v13859_v22 }
 0x3dd   : > { %11305 = vmatmul.mubr.msk.bf16.gmra.mrb[88].mxu1 %vm663_vm7, %v13418_v49  ;;  %v16446_v49 = vld [vmem:[#allocation6_spill] sm:$0xff] }
 0x3de   : > { %11308 = vmatprep.mubr.msk.bf16.mxu1 %vm12219_vm1, %v13859_v22 }
 0x3e5   : > { %11309 = vmatmul.mubr.msk.bf16.gmra.mrb[92].mxu1 %vm663_vm7, %v13434_v15  ;;  %v3548_v15 = vld [vmem:[#allocation2 + $0x2b0] sm:$0xff] }
 0x3e6   : > { %11312 = vmatprep.mubr.msk.bf16.mxu1 %vm12219_vm1, %v13859_v22 }
 0x3ed   : > { %11313 = vmatmul.mubr.msk.bf16.gmra.mrb[96].mxu1 %vm663_vm7, %v13450_v13  ;;  %v3570_v13 = vpack.c.bf16 %v13859_v22, %v3548_v15 }
 0x3ee   : > { %11316 = vmatprep.mubr.msk.bf16.mxu1 %vm12219_vm1, %v13859_v22 }
 0x3f5   : > { %11317 = vmatmul.mubr.msk.bf16.gmra.mrb[100].mxu1 %vm663_vm7, %v13465_v17  ;;  %v3644_v17 = vrot.slane %v3570_v13, 1 }
 0x3f6   : > { %11320 = vmatprep.mubr.msk.bf16.mxu1 %vm12219_vm1, %v13859_v22 }
 0x3fd   : > { %11321 = vmatmul.mubr.msk.bf16.gmra.mrb[104].mxu1 %vm663_vm7, %v13485_v1  ;;  %v3550_v1 = vld [vmem:[#allocation2 + $0x2d0] sm:$0x3f] }
 0x3fe   : > { %11324 = vmatprep.mubr.msk.bf16.mxu1 %vm12219_vm1, %v13859_v22 }
 0x405   : > { %11325 = vmatmul.mubr.msk.bf16.gmra.mrb[108].mxu1 %vm663_vm7, %v13549_v42  ;;  %v16447_v42 = vrot.slane %v13700_v2, 1  ;;  %v12036_v2 = vld [vmem:[%s16448_s23 + $0x4] ss:$12 sps:$4 sm:$0xff]  }
 0x406   : > { %11328 = vmatprep.mubr.msk.bf16.mxu1 %vm12219_vm1, %v13859_v22  ;;  %4200 = vmatprep.mubr.bf16.mxu0 %v12036_v2 }
 0x40d   : > { %11329 = vmatmul.mubr.msk.bf16.gmra.mrb[112].mxu1 %vm663_vm7, %v13578_v19  ;;  %v3645_v19 = vsel %vm2484_vm4, %v16447_v42, %v3644_v17 }
 0x40e   : > { %11332 = vmatprep.mubr.msk.bf16.mxu1 %vm12219_vm1, %v13859_v22 }
 0x415   : > { %11333 = vmatmul.mubr.msk.bf16.gmra.mrb[116].mxu1 %vm663_vm7, %v13603_v11  ;;  %v3571_v11 = vpack.c.bf16 %v3550_v1, %v3550_v1 }
 0x416   : > { %11336 = vmatprep.mubr.msk.bf16.mxu1 %vm12219_vm1, %v13859_v22 }
 0x41d   : > { %11337 = vmatmul.mubr.msk.bf16.gmra.mrb[120].mxu1 %vm663_vm7, %v13622_v43  ;;  %v3646_v43 = vrot.slane %v3571_v11, 1 }
 0x41e   : > { %11340 = vmatprep.mubr.msk.bf16.mxu1 %vm12219_vm1, %v13859_v22 }
 0x425   : > { %11341 = vmatmul.mubr.msk.bf16.gmra.mrb[124].mxu1 %vm663_vm7, %v13638_v61  ;;  %v3647_v61 = vsel %vm2484_vm4, %v3644_v17, %v3646_v43 }
 0x426   : > { %11344 = vmatprep.mubr.msk.bf16.mxu1 %vm12219_vm1, %v13859_v22 }
 0x42d   : > { %11345 = vmatmul.mubr.msk.bf16.gmra.mrb[128].mxu1 %vm663_vm7, %v13654_v28 }
 0x42e   : > { %11348 = vmatprep.mubr.msk.bf16.mxu1 %vm12219_vm1, %v13859_v22 }
 0x435   : > { %11349 = vmatmul.mubr.msk.bf16.gmra.mrb[132].mxu1 %vm663_vm7, %v13668_v30 }
 0x436   : > { %11352 = vmatprep.mubr.msk.bf16.mxu1 %vm12219_vm1, %v13859_v22 }
 0x43d   : > { %11353 = vmatmul.mubr.msk.bf16.gmra.mrb[136].mxu1 %vm663_vm7, %v16445_v0 }
 0x43e   : > { %11356 = vmatprep.mubr.msk.bf16.mxu1 %vm12219_vm1, %v13859_v22 }
 0x445   : > { %11357 = vmatmul.mubr.msk.bf16.gmra.mrb[140].mxu1 %vm663_vm7, %v16446_v49 }
 0x446   : > { %11360 = vmatprep.mubr.msk.bf16.mxu1 %vm12219_vm1, %v13859_v22 }
 0x44d   : > { %11361 = vmatmul.mubr.msk.bf16.gmra.mrb[144].mxu1 %vm663_vm7, %v13710_v38 }
 0x44e   : > { %11364 = vmatprep.mubr.msk.bf16.mxu1 %vm12219_vm1, %v13859_v22 }
 0x455   : > { %11365 = vmatmul.mubr.msk.bf16.gmra.mrb[148].mxu1 %vm663_vm7, %v3645_v19 }
 0x456   : > { %11368 = vmatprep.mubr.msk.bf16.mxu1 %vm12219_vm1, %v13859_v22 }
 0x45d   : > { %11369 = vmatmul.mubr.msk.bf16.gmra.mrb[152].mxu1 %vm663_vm7, %v3647_v61 }
 0x45e   : > { %11372 = vmatprep.mubr.msk.bf16.mxu1 %vm12219_vm1, %v13859_v22 }
 0x465   : > { %11373 = vmatmul.mubr.msk.bf16.gmra.mrb[156].mxu1 %vm663_vm7, %v3646_v43 }
 0x466   : > { %11620 = vmatprep.mubr.msk.bf16.mxu1 %vm12219_vm1, %v13859_v22 }
 0x498   : > { %v3781_v28 = vpop.f32.mrb[76].mxu1 }
 0x499   : > { %v11294_v30 = vpop.f32.mrb[77].mxu1 }
 0x49a   : > { %v3784_v38 = vpop.f32.mrb[78].mxu1 }
 0x49b   : > { %v4014_v53 = vpack.c.bf16 %v3784_v38, %v3781_v28  ;;  %v11295_v40 = vpop.f32.mrb[79].mxu1 }
 0x4a0   : > { %v3789_v59 = vpop.f32.mrb[80].mxu1 }
 0x4a1   : > { %v11298_v58 = vpop.f32.mrb[81].mxu1 }
 0x4a2   : > { %v3792_v32 = vpop.f32.mrb[82].mxu1 }
 0x4a3   : > { %v4015_v48 = vpack.c.bf16 %v3792_v32, %v3789_v59  ;;  %v11299_v12 = vpop.f32.mrb[83].mxu1 }
 0x4a8   : > { %v3797_v35 = vpop.f32.mrb[84].mxu1 }
 0x4a9   : > { %v11302_v10 = vpop.f32.mrb[85].mxu1 }
 0x4aa   : > { %v3800_v37 = vpop.f32.mrb[86].mxu1 }
 0x4ab   : > { %v4016_v34 = vpack.c.bf16 %v3800_v37, %v3797_v35  ;;  %v11303_v41 = vpop.f32.mrb[87].mxu1 }
 0x4b0   : > { %v3805_v36 = vpop.f32.mrb[88].mxu1 }
 0x4b1   : > { %v11306_v16 = vpop.f32.mrb[89].mxu1 }
 0x4b2   : > { %v3808_v7 = vpop.f32.mrb[90].mxu1 }
 0x4b3   : > { %v4017_v54 = vpack.c.bf16 %v3808_v7, %v3805_v36  ;;  %v11307_v27 = vpop.f32.mrb[91].mxu1  ;;  %v12034_v7 = vld [vmem:[%s16448_s23] ss:$12 sps:$4 sm:$0xff]  }
 0x4b8   : > { %v3813_v55 = vpop.f32.mrb[92].mxu1 }
 0x4b9   : > { %v11310_v62 = vpop.f32.mrb[93].mxu1 }
 0x4ba   : > { %v3816_v63 = vpop.f32.mrb[94].mxu1 }
 0x4bb   : > { %v4018_v31 = vpack.c.bf16 %v3816_v63, %v3813_v55  ;;  %v11311_v23 = vpop.f32.mrb[95].mxu1 }
 0x4bc   : > { %v12039_v23 = vld [vmem:[%s16448_s23 + $0x18] ss:$12 sps:$4 sm:$0xff]  }
 0x4c0   : > { %v3821_v26 = vpop.f32.mrb[96].mxu1 }
 0x4c1   : > { %v11314_v33 = vpop.f32.mrb[97].mxu1 }
 0x4c2   : > { %v3824_v44 = vpop.f32.mrb[98].mxu1 }
 0x4c3   : > { %v4019_v21 = vpack.c.bf16 %v3824_v44, %v3821_v26  ;;  %v11315_v47 = vpop.f32.mrb[99].mxu1  ;;  %v12040_v26 = vld [vmem:[%s16448_s23 + $0x34] ss:$12 sps:$4 sm:$0xff]  }
 0x4c8   : > { %v3829_v24 = vpop.f32.mrb[100].mxu1 }
 0x4c9   : > { %v11318_v39 = vpop.f32.mrb[101].mxu1 }
 0x4ca   : > { %v3832_v18 = vpop.f32.mrb[102].mxu1  ;;  %v12042_v39 = vld [vmem:[%s16448_s23 + $0x30] ss:$12 sps:$4 sm:$0xff]  }
 0x4cb   : > { %v4020_v56 = vpack.c.bf16 %v3832_v18, %v3829_v24  ;;  %v11319_v3 = vpop.f32.mrb[103].mxu1  ;;  %v12043_v18 = vld [vmem:[%s16448_s23 + $0x4c] ss:$12 sps:$4 sm:$0xff]  }
 0x4d0   : > { %v3837_v9 = vpop.f32.mrb[104].mxu1 }
 0x4d1   : > { %v11322_v5 = vpop.f32.mrb[105].mxu1 }
 0x4d2   : > { %v3840_v51 = vpop.f32.mrb[106].mxu1 }
 0x4d3   : > { %v4021_v4 = vpack.c.bf16 %v3840_v51, %v3837_v9  ;;  %v11323_v46 = vpop.f32.mrb[107].mxu1 }
 0x4d4   : > { %v12046_v46 = vld [vmem:[%s16448_s23 + $0x64] ss:$12 sps:$4 sm:$0xff]  }
 0x4d8   : > { %v3845_v52 = vpop.f32.mrb[108].mxu1 }
 0x4d9   : > { %v11326_v45 = vpop.f32.mrb[109].mxu1 }
 0x4da   : > { %v3848_v60 = vpop.f32.mrb[110].mxu1 }
 0x4db   : > { %v4022_v14 = vpack.c.bf16 %v3848_v60, %v3845_v52  ;;  %v11327_v25 = vpop.f32.mrb[111].mxu1 }
 0x4dd   : > { %10640 = vmatprep.subr.bf16.mxu0 %v4022_v14 }
 0x4de   : > { %10641 = vmatpush3.bf16.msra.mxu0 %v4014_v53 }
 0x4e0   : > { %v3853_v20 = vpop.f32.mrb[112].mxu1 }
 0x4e1   : > { %v11330_v8 = vpop.f32.mrb[113].mxu1 }
 0x4e2   : > { %v3856_v6 = vpop.f32.mrb[114].mxu1  ;;  %v12049_v8 = vld [vmem:[%s16448_s23 + $0x7c] ss:$12 sps:$4 sm:$0xff]  }
 0x4e3   : > { %v4023_v29 = vpack.c.bf16 %v3856_v6, %v3853_v20  ;;  %v11331_v57 = vpop.f32.mrb[115].mxu1  ;;  %v12048_v20 = vld [vmem:[%s16448_s23 + $0x60] ss:$12 sps:$4 sm:$0xff]  }
 0x4e5   : > { %10642 = vmatprep.subr.bf16.mxu0 %v4023_v29 }
 0x4e6   : > { %10643 = vmatpush3.bf16.msra.mxu0 %v4015_v48 }
 0x4e8   : > { %v3861_v50 = vpop.f32.mrb[116].mxu1 }
 0x4e9   : > { %v11334_v0 = vpop.f32.mrb[117].mxu1 }
 0x4ea   : > { %v3864_v49 = vpop.f32.mrb[118].mxu1 }
 0x4eb   : > { %v4024_v15 = vpack.c.bf16 %v3864_v49, %v3861_v50  ;;  %v11335_v13 = vpop.f32.mrb[119].mxu1 }
 0x4ec   : > { %v12051_v13 = vld [vmem:[%s16448_s23 + $0x78] ss:$12 sps:$4 sm:$0xff]  }
 0x4ed   : > { %10644 = vmatprep.subr.bf16.mxu0 %v4024_v15  ;;  %v4012_v15 = vld [vmem:[%s16448_s23 + $0x90] sm:$0x33] }
 0x4ee   : > { %10645 = vmatpush3.bf16.msra.mxu0 %v4016_v34 }
 0x4f0   : > { %v3869_v17 = vpop.f32.mrb[120].mxu1 }
 0x4f1   : > { %v11338_v1 = vpop.f32.mrb[121].mxu1 }
 0x4f2   : > { %v3872_v42 = vpop.f32.mrb[122].mxu1  ;;  %v10046_v1 = vcombine.low %v4012_v15, %v4012_v15 }
 0x4f3   : > { %v4025_v19 = vpack.c.bf16 %v3872_v42, %v3869_v17  ;;  %v11339_v11 = vpop.f32.mrb[123].mxu1  ;;  %v10047_v17 = vcombine.high %v4012_v15, %v4012_v15  ;;  %v12054_v42 = vld [vmem:[%s16448_s23 + $0x8] ss:$12 sps:$4 sm:$0xff]  }
 0x4f4   : > { %v12056_v11 = vld [vmem:[%s16448_s23 + $0x38] ss:$12 sps:$4 sm:$0xff]  }
 0x4f5   : > { %10646 = vmatprep.subr.bf16.mxu0 %v4025_v19  ;;  %v12055_v19 = vld [vmem:[%s16448_s23 + $0x20] ss:$12 sps:$4 sm:$0xff]  }
 0x4f6   : > { %10647 = vmatpush3.bf16.msra.mxu0 %v4017_v54  ;;  %v12037_v54 = vld [vmem:[%s16448_s23 + $0x1c] ss:$12 sps:$4 sm:$0xff]  }
 0x4f8   : > { %v3877_v43 = vpop.f32.mrb[124].mxu1 }
 0x4f9   : > { %v11342_v61 = vpop.f32.mrb[125].mxu1 }
 0x4fa   : > { %v3880_v2 = vpop.f32.mrb[126].mxu1  ;;  %v12058_v61 = vld [vmem:[%s16448_s23 + $0x68] ss:$12 sps:$4 sm:$0xff]  }
 0x4fb   : > { %v4026_v28 = vpack.c.bf16 %v3880_v2, %v3877_v43  ;;  %v11343_v30 = vpop.f32.mrb[127].mxu1  ;;  %v12057_v43 = vld [vmem:[%s16448_s23 + $0x50] ss:$12 sps:$4 sm:$0xff]   ;;  %v12059_v2 = vld [vmem:[%s16448_s23 + $0x80] ss:$12 sps:$4 sm:$0xff]  }
 0x4fd   : > { %10648 = vmatprep.subr.bf16.mxu0 %v4026_v28  ;;  %v12060_v28 = vld [vmem:[%s16448_s23 + $0x98] ss:$0 sps:$4 sm:$0x33]  }
 0x4fe   : > { %10649 = vmatpush3.bf16.msra.mxu0 %v4018_v31 }
 0x500   : > { %v3885_v38 = vpop.f32.mrb[128].mxu1 }
 0x501   : > { %v11346_v53 = vpop.f32.mrb[129].mxu1 }
 0x502   : > { %v3888_v40 = vpop.f32.mrb[130].mxu1 }
 0x503   : > { %v4027_v59 = vpack.c.bf16 %v3888_v40, %v3885_v38  ;;  %v11347_v58 = vpop.f32.mrb[131].mxu1 }
 0x505   : > { %10650 = vmatprep.subr.bf16.mxu0 %v4027_v59  ;;  %v12061_v59 = vld [vmem:[%s16411_s12 + $0x30] sm:$0xff]  }
 0x506   : > { %10651 = vmatpush3.bf16.msra.mxu0 %v4019_v21 }
 0x508   : > { %v3893_v32 = vpop.f32.mrb[132].mxu1 }
 0x509   : > { %v11350_v48 = vpop.f32.mrb[133].mxu1 }
 0x50a   : > { %v3896_v12 = vpop.f32.mrb[134].mxu1 }
 0x50b   : > { %v4028_v35 = vpack.c.bf16 %v3896_v12, %v3893_v32  ;;  %v11351_v10 = vpop.f32.mrb[135].mxu1 }
 0x50d   : > { %10652 = vmatprep.subr.bf16.mxu0 %v4028_v35 }
 0x50e   : > { %10653 = vmatpush3.bf16.msra.mxu0 %v4020_v56 }
 0x510   : > { %v3901_v37 = vpop.f32.mrb[136].mxu1 }
 0x511   : > { %v11354_v34 = vpop.f32.mrb[137].mxu1 }
 0x512   : > { %v3904_v41 = vpop.f32.mrb[138].mxu1 }
 0x513   : > { %v4029_v36 = vpack.c.bf16 %v3904_v41, %v3901_v37  ;;  %v11355_v16 = vpop.f32.mrb[139].mxu1 }
 0x515   : > { %10654 = vmatprep.subr.bf16.mxu0 %v4029_v36 }
 0x516   : > { %10655 = vmatpush3.bf16.msra.mxu0 %v4021_v4  ;;  %v12045_v4 = vld [vmem:[%s16448_s23 + $0x48] ss:$12 sps:$4 sm:$0xff]  }
 0x517   : > { %11376 = vmatprep.subr.bf16.mxu0 %v13859_v22 }
 0x518   : > { %v3909_v27 = vpop.f32.mrb[140].mxu1 }
 0x519   : > { %v11358_v55 = vpop.f32.mrb[141].mxu1  ;;  %4201 = vmatmul.mubr.bf16.vlgmr.msra.gmra.mrb[176].mxu0 %v12034_v7 }
 0x51a   : > { %v3912_v62 = vpop.f32.mrb[142].mxu1  ;;  %4208 = vmatprep.mubr.bf16.mxu0 %v12037_v54 }
 0x51b   : > { %v4030_v63 = vpack.c.bf16 %v3912_v62, %v3909_v27  ;;  %v11359_v31 = vpop.f32.mrb[143].mxu1 }
 0x51d   : > { %11377 = vmatpush3.bf16.msra.mxu0 %v4030_v63 }
 0x51e   : > { %11378 = vmatprep.subr.bf16.mxu0 %v13859_v22 }
 0x520   : > { %v3917_v33 = vpop.f32.mrb[144].mxu1 }
 0x521   : > { %v11362_v44 = vpop.f32.mrb[145].mxu1  ;;  %4209 = vmatmul.mubr.bf16.gmra.mrb[180].mxu0 %v12039_v23 }
 0x522   : > { %v3920_v21 = vpop.f32.mrb[146].mxu1  ;;  %4216 = vmatprep.mubr.bf16.mxu0 %v12040_v26 }
 0x523   : > { %v4031_v47 = vpack.c.bf16 %v3920_v21, %v3917_v33  ;;  %v11363_v24 = vpop.f32.mrb[147].mxu1 }
 0x525   : > { %11379 = vmatpush3.bf16.msra.mxu0 %v4031_v47 }
 0x526   : > { %11380 = vmatprep.subr.bf16.mxu0 %v13859_v22 }
 0x528   : > { %v3925_v56 = vpop.f32.mrb[148].mxu1 }
 0x529   : > { %v11366_v3 = vpop.f32.mrb[149].mxu1  ;;  %4217 = vmatmul.mubr.bf16.gmra.mrb[184].mxu0 %v12042_v39 }
 0x52a   : > { %v3928_v9 = vpop.f32.mrb[150].mxu1  ;;  %4224 = vmatprep.mubr.bf16.mxu0 %v12043_v18 }
 0x52b   : > { %v4032_v5 = vpack.c.bf16 %v3928_v9, %v3925_v56  ;;  %v11367_v51 = vpop.f32.mrb[151].mxu1 }
 0x52d   : > { %11381 = vmatpush3.bf16.msra.mxu0 %v4032_v5 }
 0x52e   : > { %11382 = vmatprep.subr.bf16.mxu0 %v13859_v22 }
 0x530   : > { %v3933_v52 = vpop.f32.mrb[152].mxu1 }
 0x531   : > { %v11370_v45 = vpop.f32.mrb[153].mxu1  ;;  %4225 = vmatmul.mubr.bf16.gmra.mrb[188].mxu0 %v12045_v4 }
 0x532   : > { %v3936_v60 = vpop.f32.mrb[154].mxu1  ;;  %4232 = vmatprep.mubr.bf16.mxu0 %v12046_v46 }
 0x533   : > { %v4033_v14 = vpack.c.bf16 %v3936_v60, %v3933_v52  ;;  %v11371_v25 = vpop.f32.mrb[155].mxu1 }
 0x534   : > { %v14069_v25 = vld [vmem:[%s16410_s11] ss:$0 sm:$0xff] }
 0x535   : > { %11383 = vmatpush3.bf16.msra.mxu0 %v4033_v14  ;;  %v12062_v14 = vld [vmem:[%s16411_s12 + $0x38] sm:$0xff]  }
 0x536   : > { %11384 = vmatprep.subr.bf16.mxu0 %v13859_v22 }
 0x538   : > { %v3941_v6 = vpop.f32.mrb[156].mxu1 }
 0x539   : > { %v4034_v29 = vpack.c.bf16 %v3941_v6, %v3941_v6  ;;  %v11374_v57 = vpop.f32.mrb[157].mxu1  ;;  %4233 = vmatmul.mubr.bf16.gmra.mrb[192].mxu0 %v12048_v20 }
 0x53a   : > { %v3944_v50 = vpop.f32.mrb[158].mxu1  ;;  %4240 = vmatprep.mubr.bf16.mxu0 %v12049_v8  ;;  %v12063_v8 = vld [vmem:[%s16411_s12 + $0x40] sm:$0xff]  }
 0x53b   : > { %v4166_v0 = vsel %vm4164_vm15, %v4034_v29, 0  ;;  %v11375_v49 = vpop.f32.mrb[159].mxu1 }
 0x53c   : > { %11385 = vmatpush3.bf16.msra.mxu0 %v4166_v0 }
 0x53d   : > { %11414 = vmatprep.subr.bf16.mxu0 %v13859_v22 }
 0x541   : > { %4241 = vmatmul.mubr.bf16.gmra.mrb[196].mxu0 %v12051_v13 }
 0x542   : > { %4248 = vmatprep.mubr.bf16.mxu0 %v10047_v17  ;;  %v12064_v17 = vld [vmem:[%s16411_s12 + $0x48] sm:$0xff]  }
 0x549   : > { %4249 = vmatmul.mubr.bf16.gmra.mrb[200].mxu0 %v10046_v1  ;;  %v4373_v1 = vpop.permute.xlu0 %4372 }
 0x54a   : > { %11386 = vmatprep.mubr.msk.bf16.mxu0 %vm12219_vm1, %v13859_v22 }
 0x551   : > { %11387 = vmatmul.mubr.msk.bf16.vlgmr.msra.gmra.mrb[204].mxu0 %vm4142_vm0, %v12054_v42 }
 0x552   : > { %11390 = vmatprep.mubr.msk.bf16.mxu0 %vm12219_vm1, %v13859_v22  ;;  %11415 = vmatpush3.bf16.msra.mxu0 %v12061_v59 }
 0x553   : > { %11416 = vmatprep.subr.bf16.mxu0 %v13859_v22 }
 0x556   : > { %11417 = vmatpush3.bf16.msra.mxu0 %v12062_v14 }
 0x557   : > { %11418 = vmatprep.subr.bf16.mxu0 %v13859_v22 }
 0x559   : > { %11391 = vmatmul.mubr.msk.bf16.gmra.mrb[208].mxu0 %vm4142_vm0, %v12055_v19 }
 0x55a   : > { %11394 = vmatprep.mubr.msk.bf16.mxu0 %vm12219_vm1, %v13859_v22  ;;  %11419 = vmatpush3.bf16.msra.mxu0 %v12063_v8 }
 0x55b   : > { %11420 = vmatprep.subr.bf16.mxu0 %v13859_v22 }
 0x55e   : > { %11421 = vmatpush3.bf16.msra.mxu0 %v12064_v17 }
 0x55f   : > { %11422 = vmatprep.subr.bf16.mxu0 %v13859_v22 }
 0x561   : > { %11395 = vmatmul.mubr.msk.bf16.gmra.mrb[212].mxu0 %vm4142_vm0, %v12056_v11  ;;  %v4378_v11 = vpop.permute.xlu1 %4377 }
 0x562   : > { %11398 = vmatprep.mubr.msk.bf16.mxu0 %vm12219_vm1, %v13859_v22 }
 0x569   : > { %11399 = vmatmul.mubr.msk.bf16.gmra.mrb[216].mxu0 %vm4142_vm0, %v12057_v43 }
 0x56a   : > { %11402 = vmatprep.mubr.msk.bf16.mxu0 %vm12219_vm1, %v13859_v22 }
 0x571   : > { %11403 = vmatmul.mubr.msk.bf16.gmra.mrb[220].mxu0 %vm4142_vm0, %v12058_v61 }
 0x572   : > { %11406 = vmatprep.mubr.msk.bf16.mxu0 %vm12219_vm1, %v13859_v22 }
 0x579   : > { %11407 = vmatmul.mubr.msk.bf16.gmra.mrb[224].mxu0 %vm4142_vm0, %v12059_v2 }
 0x57a   : > { %11410 = vmatprep.mubr.msk.bf16.mxu0 %vm12219_vm1, %v13859_v22 }
 0x581   : > { %11411 = vmatmul.mubr.msk.bf16.gmra.mrb[228].mxu0 %vm4142_vm0, %v12060_v28  ;;  %v12065_v28 = vld [vmem:[%s16411_s12 + $0x50] sm:$0xff]   ;;  %vm6035_vm0 = vcmask 1048321  }
 0x582   : > { %11426 = vmatprep.mubr.msk.bf16.mxu0 %vm12219_vm1, %v13859_v22  ;;  %11423 = vmatpush3.bf16.msra.mxu0 %v12065_v28 }
 0x583   : > { %11424 = vmatprep.subr.bf16.mxu0 %v13859_v22 }
 0x5ec   : > { %v10656_v30 = vpop.f32.mrb[176].mxu0 }
 0x5ed   : > { %v10657_v38 = vpop.f32.mrb[177].mxu0 }
 0x5ee   : > { %v10658_v53 = vadd.f32 %v10657_v38, %v10656_v30  ;;  %v10659_v40 = vpop.f32.mrb[178].mxu0 }
 0x5ef   : > { %v10660_v58 = vpop.f32.mrb[179].mxu0 }
 0x5f0   : > { %v10661_v32 = vadd.f32 %v10660_v58, %v10659_v40  ;;  %v4203_v20 = vadd.f32 %v10658_v53, %v14069_v25 }
 0x5f2   : > { %v4206_v50 = vadd.f32 %v10661_v32, %v14069_v25 }
 0x5f4   : > { %v10662_v48 = vpop.f32.mrb[180].mxu0 }
 0x5f5   : > { %v10663_v12 = vpop.f32.mrb[181].mxu0 }
 0x5f6   : > { %v10664_v35 = vadd.f32 %v10663_v12, %v10662_v48  ;;  %v10665_v10 = vpop.f32.mrb[182].mxu0 }
 0x5f7   : > { %v10666_v37 = vpop.f32.mrb[183].mxu0 }
 0x5f8   : > { %v10667_v34 = vadd.f32 %v10666_v37, %v10665_v10  ;;  %v4211_v61 = vadd.f32 %v10664_v35, %v14069_v25 }
 0x5fa   : > { %v4214_v38 = vadd.f32 %v10667_v34, %v14069_v25 }
 0x5fc   : > { %v10668_v41 = vpop.f32.mrb[184].mxu0 }
 0x5fd   : > { %v10669_v36 = vpop.f32.mrb[185].mxu0 }
 0x5fe   : > { %v14045_v16 = vadd.f32 %v10669_v36, %v10668_v41  ;;  %v10671_v7 = vpop.f32.mrb[186].mxu0  ;;  %v12066_v41 = vld [vmem:[%s16411_s12 + $0x58] sm:$0xff]   ;;  %v4383_v36 = vpop.permute.xlu0 %4382 }
 0x5ff   : > { %v10672_v54 = vpop.f32.mrb[187].mxu0  ;;  %11425 = vmatpush3.bf16.msra.mxu0 %v12066_v41 }
 0x600   : > { %v14047_v27 = vadd.f32 %v10672_v54, %v10671_v7  ;;  %11454 = vmatprep.subr.bf16.mxu0 %v13859_v22 }
 0x602   : > { %v4393_v14 = vpop.permute.xlu0 %4392 }
 0x604   : > { %v10674_v55 = vpop.f32.mrb[188].mxu0 }
 0x605   : > { %v10675_v62 = vpop.f32.mrb[189].mxu0 }
 0x606   : > { %v14049_v63 = vadd.f32 %v10675_v62, %v10674_v55  ;;  %v10677_v31 = vpop.f32.mrb[190].mxu0  ;;  %v4388_v55 = vpop.permute.xlu1 %4387 }
 0x607   : > { %v10678_v23 = vpop.f32.mrb[191].mxu0 }
 0x608   : > { %v14051_v26 = vadd.f32 %v10678_v23, %v10677_v31  ;;  %v4219_v31 = vadd.f32 %v14045_v16, %v14069_v25 }
 0x60c   : > { %v10680_v33 = vpop.f32.mrb[192].mxu0 }
 0x60d   : > { %v10681_v44 = vpop.f32.mrb[193].mxu0 }
 0x60e   : > { %v14053_v21 = vadd.f32 %v10681_v44, %v10680_v33  ;;  %v10683_v47 = vpop.f32.mrb[194].mxu0 }
 0x60f   : > { %v10684_v24 = vpop.f32.mrb[195].mxu0 }
 0x610   : > { %v14055_v39 = vadd.f32 %v10684_v24, %v10683_v47  ;;  %v4222_v47 = vadd.f32 %v14047_v27, %v14069_v25 }
 0x614   : > { %v10686_v18 = vpop.f32.mrb[196].mxu0 }
 0x615   : > { %v10687_v56 = vpop.f32.mrb[197].mxu0 }
 0x616   : > { %v14057_v3 = vadd.f32 %v10687_v56, %v10686_v18  ;;  %v10689_v9 = vpop.f32.mrb[198].mxu0 }
 0x617   : > { %v10690_v5 = vpop.f32.mrb[199].mxu0 }
 0x618   : > { %v14059_v51 = vadd.f32 %v10690_v5, %v10689_v9 }
 0x61c   : > { %v10692_v4 = vpop.f32.mrb[200].mxu0 }
 0x61d   : > { %v10693_v46 = vpop.f32.mrb[201].mxu0 }
 0x61e   : > { %v14061_v52 = vadd.f32 %v10693_v46, %v10692_v4  ;;  %v10695_v45 = vpop.f32.mrb[202].mxu0 }
 0x61f   : > { %v10696_v60 = vpop.f32.mrb[203].mxu0 }
 0x624   : > { %v4290_v6 = vpop.f32.mrb[204].mxu0 }
 0x625   : > { %v4291_v29 = vadd.f32 %v4290_v6, %v4203_v20  ;;  %v11388_v57 = vpop.f32.mrb[205].mxu0  ;;  %v4398_v6 = vpop.permute.xlu1 %4397 }
 0x626   : > { %v4293_v0 = vpop.f32.mrb[206].mxu0  ;;  %v4227_v57 = vadd.f32 %v14049_v63, %v14069_v25 }
 0x627   : > { %v4344_v49 = vmax.f32 %v4291_v29, 0.0  ;;  %v4294_v15 = vadd.f32 %v4293_v0, %v4206_v50  ;;  %v11389_v13 = vpop.f32.mrb[207].mxu0 }
 0x629   : > { %v14081_v42 = vmul.f32 %v4373_v1, %v4344_v49  ;;  %v4345_v19 = vmax.f32 %v4294_v15, 0.0  ;;  %v4230_v15 = vadd.f32 %v14051_v26, %v14069_v25 }
 0x62b   : > { %v4436_v43 = vmul.f32 %v4378_v11, %v4345_v19  ;;  %4512 = vrot.lane.b32.xlu1 %v14081_v42, %s16428_s27  ;;  %v4461_v2 = vrot.slane %v14081_v42, 7  ;;  %v4564_v59 = vrot.slane %v14081_v42, 1  ;;  %v5324_v42 = vld [vmem:[%s16449_s30 + $0x10] sm:$0xff] }
 0x62c   : > { %v4298_v30 = vpop.f32.mrb[208].mxu0 }
 0x62d   : > { %v4299_v53 = vadd.f32 %v4298_v30, %v4211_v61  ;;  %v11392_v40 = vpop.f32.mrb[209].mxu0  ;;  %4514 = vrot.lane.b32.xlu0 %v4436_v43, %s16428_s27  ;;  %v4565_v58 = vrot.slane %v4436_v43, 1  ;;  %4499 = vst.msk [vmem:[#allocation3 + $0x20] sm:$0xfe] %vm2274_vm3, %v4461_v2  ;;  %v4462_v32 = vrot.slane %v4436_v43, 7  ;;  %vm665_vm3 = vcmask 778240  }
 0x62e   : > { %v4301_v48 = vpop.f32.mrb[210].mxu0 }
 0x62f   : > { %v4346_v12 = vmax.f32 %v4299_v53, 0.0  ;;  %v4302_v35 = vadd.f32 %v4301_v48, %v4214_v38  ;;  %v4566_v10 = vsel %vm2484_vm4, %v4564_v59, %v4565_v58  ;;  %v11393_v37 = vpop.f32.mrb[211].mxu0  ;;  %v4463_v34 = vsel %vm2151_vm5, %v4461_v2, %v4462_v32  ;;  %v4403_v38 = vpop.permute.xlu0 %4402 }
 0x630   : > { %4591 = vrot.lane.b32.xlu1 %v4566_v10, %s12222_s4  ;;  %4500 = vst.msk [vmem:[#allocation3 + $0x30] sm:$0xff] %vm2276_vm6, %v4463_v34  ;;  %v4235_v48 = vadd.f32 %v14053_v21, %v14069_v25  ;;  %v4238_v37 = vadd.f32 %v14055_v39, %v14069_v25 }
 0x631   : > { %v4437_v7 = vmul.f32 %v4383_v36, %v4346_v12  ;;  %v4347_v54 = vmax.f32 %v4302_v35, 0.0 }
 0x633   : > { %v4438_v62 = vmul.f32 %v4388_v55, %v4347_v54  ;;  %v4567_v23 = vrot.slane %v4437_v7, 1  ;;  %v4464_v33 = vrot.slane %v4437_v7, 7 }
 0x634   : > { %v4306_v44 = vpop.f32.mrb[212].mxu0  ;;  %4516 = vrot.lane.b32.xlu1 %v4437_v7, %s16428_s27 }
 0x635   : > { %v4307_v24 = vadd.f32 %v4306_v44, %v4219_v31  ;;  %v11396_v18 = vpop.f32.mrb[213].mxu0  ;;  %v4568_v56 = vsel %vm2484_vm4, %v4565_v58, %v4567_v23  ;;  %v4569_v9 = vrot.slane %v4438_v62, 1  ;;  %v4465_v5 = vsel %vm2151_vm5, %v4462_v32, %v4464_v33  ;;  %v4408_v58 = vpop.permute.xlu1 %4407 }
 0x636   : > { %v4309_v22 = vpop.f32.mrb[214].mxu0  ;;  %4593 = vrot.lane.b32.xlu0 %v4568_v56, %s12222_s4  ;;  %4501 = vst.msk [vmem:[#allocation3 + $0x40] sm:$0xff] %vm2276_vm6, %v4465_v5  ;;  %v4466_v16 = vrot.slane %v4438_v62, 7  ;;  %v4413_v44 = vpop.permute.xlu0 %4412 }
 0x637   : > { %v4348_v4 = vmax.f32 %v4307_v24, 0.0  ;;  %v4310_v46 = vadd.f32 %v4309_v22, %v4222_v47  ;;  %v4570_v45 = vsel %vm2484_vm4, %v4567_v23, %v4569_v9  ;;  %v11397_v60 = vpop.f32.mrb[215].mxu0 }
 0x638   : > { %4595 = vrot.lane.b32.xlu1 %v4570_v45, %s12222_s4  ;;  %v4467_v27 = vsel %vm2151_vm5, %v4464_v33, %v4466_v16 }
 0x639   : > { %v4439_v20 = vmul.f32 %v4393_v14, %v4348_v4  ;;  %v4349_v8 = vmax.f32 %v4310_v46, 0.0  ;;  %4502 = vst.msk [vmem:[#allocation3 + $0x50] sm:$0xff] %vm2276_vm6, %v4467_v27  ;;  %v4418_v18 = vpop.permute.xlu1 %4417  ;;  %v4246_v4 = vadd.f32 %v14059_v51, %v14069_v25 }
 0x63a   : > { %4518 = vrot.lane.b32.xlu0 %v4438_v62, %s16428_s27 }
 0x63b   : > { %v4440_v29 = vmul.f32 %v4398_v6, %v4349_v8  ;;  %v4571_v50 = vrot.slane %v4439_v20, 1  ;;  %v4468_v0 = vrot.slane %v4439_v20, 7 }
 0x63c   : > { %v4314_v49 = vpop.f32.mrb[216].mxu0  ;;  %4520 = vrot.lane.b32.xlu1 %v4439_v20, %s16428_s27 }
 0x63d   : > { %v4315_v13 = vadd.f32 %v4314_v49, %v4227_v57  ;;  %v11400_v17 = vpop.f32.mrb[217].mxu0  ;;  %v4572_v1 = vsel %vm2484_vm4, %v4569_v9, %v4571_v50  ;;  %v4573_v19 = vrot.slane %v4440_v29, 1  ;;  %v4469_v11 = vsel %vm2151_vm5, %v4466_v16, %v4468_v0 }
 0x63e   : > { %v4317_v43 = vpop.f32.mrb[218].mxu0  ;;  %4597 = vrot.lane.b32.xlu0 %v4572_v1, %s12222_s4  ;;  %4503 = vst.msk [vmem:[#allocation3 + $0x60] sm:$0xff] %vm2276_vm6, %v4469_v11  ;;  %v4470_v63 = vrot.slane %v4440_v29, 7  ;;  %v4243_v9 = vadd.f32 %v14057_v3, %v14069_v25  ;;  %v4251_v17 = vadd.f32 %v14061_v52, %v14069_v25 }
 0x63f   : > { %v4350_v61 = vmax.f32 %v4315_v13, 0.0  ;;  %v4318_v2 = vadd.f32 %v4317_v43, %v4230_v15  ;;  %v4574_v28 = vsel %vm2484_vm4, %v4571_v50, %v4573_v19  ;;  %v11401_v30 = vpop.f32.mrb[219].mxu0  ;;  %v4423_v50 = vpop.permute.xlu0 %4422 }
 0x640   : > { %4599 = vrot.lane.b32.xlu1 %v4574_v28, %s12222_s4  ;;  %v4471_v26 = vsel %vm2151_vm5, %v4468_v0, %v4470_v63  ;;  %v4428_v15 = vpop.permute.xlu1 %4427 }
 0x641   : > { %v4441_v53 = vmul.f32 %v4403_v38, %v4350_v61  ;;  %v4351_v40 = vmax.f32 %v4318_v2, 0.0  ;;  %4504 = vst.msk [vmem:[#allocation3 + $0x70] sm:$0xff] %vm2276_vm6, %v4471_v26 }
 0x642   : > { %4522 = vrot.lane.b32.xlu0 %v4440_v29, %s16428_s27 }
 0x643   : > { %v4442_v32 = vmul.f32 %v4408_v58, %v4351_v40  ;;  %v4575_v12 = vrot.slane %v4441_v53, 1  ;;  %v4472_v35 = vrot.slane %v4441_v53, 7 }
 0x644   : > { %v4322_v10 = vpop.f32.mrb[220].mxu0  ;;  %4524 = vrot.lane.b32.xlu1 %v4441_v53, %s16428_s27  ;;  %v4433_v53 = vpop.permute.xlu0 %4432 }
 0x645   : > { %v4323_v34 = vadd.f32 %v4322_v10, %v4235_v48  ;;  %v11404_v41 = vpop.f32.mrb[221].mxu0  ;;  %v4576_v36 = vsel %vm2484_vm4, %v4573_v19, %v4575_v12  ;;  %v4577_v7 = vrot.slane %v4442_v32, 1  ;;  %v4473_v54 = vsel %vm2151_vm5, %v4470_v63, %v4472_v35  ;;  %v5323_v10 = vld [vmem:[%s16449_s30 + $0x8] sm:$0xff] }
 0x646   : > { %v4325_v55 = vpop.f32.mrb[222].mxu0  ;;  %4601 = vrot.lane.b32.xlu0 %v4576_v36, %s12222_s4  ;;  %4505 = vst.msk [vmem:[#allocation3 + $0x80] sm:$0xff] %vm2276_vm6, %v4473_v54  ;;  %v4474_v21 = vrot.slane %v4442_v32, 7 }
 0x647   : > { %v4352_v62 = vmax.f32 %v4323_v34, 0.0  ;;  %v4326_v31 = vadd.f32 %v4325_v55, %v4238_v37  ;;  %v4578_v23 = vsel %vm2484_vm4, %v4575_v12, %v4577_v7  ;;  %v11405_v33 = vpop.f32.mrb[223].mxu0  ;;  %v5322_v37 = vld [vmem:[%s16449_s30] sm:$0xff]  ;;  %v5325_v34 = vld [vmem:[%s16449_s30 + $0x18] sm:$0xff] }
 0x648   : > { %4603 = vrot.lane.b32.xlu1 %v4578_v23, %s12222_s4  ;;  %v4475_v39 = vsel %vm2151_vm5, %v4472_v35, %v4474_v21 }
 0x649   : > { %v4443_v47 = vmul.f32 %v4413_v44, %v4352_v62  ;;  %v4353_v24 = vmax.f32 %v4326_v31, 0.0  ;;  %4506 = vst.msk [vmem:[#allocation3 + $0x90] sm:$0xff] %vm2276_vm6, %v4475_v39  ;;  %v12067_v39 = vld [vmem:[%s16411_s12] sm:$0xff]  }
 0x64a   : > { %4526 = vrot.lane.b32.xlu0 %v4442_v32, %s16428_s27 }
 0x64b   : > { %v4444_v56 = vmul.f32 %v4418_v18, %v4353_v24  ;;  %v4579_v5 = vrot.slane %v4443_v47, 1  ;;  %v4476_v22 = vrot.slane %v4443_v47, 7 }
 0x64c   : > { %v4330_v16 = vpop.f32.mrb[224].mxu0  ;;  %4528 = vrot.lane.b32.xlu1 %v4443_v47, %s16428_s27 }
 0x64d   : > { %v4331_v46 = vadd.f32 %v4330_v16, %v4243_v9  ;;  %v11408_v45 = vpop.f32.mrb[225].mxu0  ;;  %v4580_v60 = vsel %vm2484_vm4, %v4577_v7, %v4579_v5  ;;  %v4581_v14 = vrot.slane %v4444_v56, 1  ;;  %v4477_v27 = vsel %vm2151_vm5, %v4474_v21, %v4476_v22  ;;  %v12068_v9 = vld [vmem:[%s16411_s12 + $0x8] sm:$0xff]  }
 0x64e   : > { %v4333_v20 = vpop.f32.mrb[226].mxu0  ;;  %4605 = vrot.lane.b32.xlu0 %v4580_v60, %s12222_s4  ;;  %4507 = vst.msk [vmem:[#allocation3 + $0xa0] sm:$0xff] %vm2276_vm6, %v4477_v27  ;;  %v4478_v3 = vrot.slane %v4444_v56, 7  ;;  %v12070_v27 = vld [vmem:[%s16411_s12 + $0x18] sm:$0xff]  }
 0x64f   : > { %v4354_v8 = vmax.f32 %v4331_v46, 0.0  ;;  %v4334_v6 = vadd.f32 %v4333_v20, %v4246_v4  ;;  %v4582_v29 = vsel %vm2484_vm4, %v4579_v5, %v4581_v14  ;;  %v11409_v57 = vpop.f32.mrb[227].mxu0  ;;  %v12069_v46 = vld [vmem:[%s16411_s12 + $0x10] sm:$0xff]  }
 0x650   : > { %4607 = vrot.lane.b32.xlu1 %v4582_v29, %s12222_s4  ;;  %v4479_v51 = vsel %vm2151_vm5, %v4476_v22, %v4478_v3  ;;  %v12071_v29 = vld [vmem:[%s16411_s12 + $0x20] sm:$0xff]  }
 0x651   : > { %v4445_v0 = vmul.f32 %v4423_v50, %v4354_v8  ;;  %v4355_v49 = vmax.f32 %v4334_v6, 0.0  ;;  %4508 = vst.msk [vmem:[#allocation3 + $0xb0] sm:$0xff] %vm2276_vm6, %v4479_v51 }
 0x652   : > { %4530 = vrot.lane.b32.xlu0 %v4444_v56, %s16428_s27  ;;  %v14215_v56 = vld [vmem:[#allocation2] sm:$0xff] }
 0x653   : > { %v4446_v13 = vmul.f32 %v4428_v15, %v4355_v49  ;;  %v4583_v1 = vrot.slane %v4445_v0, 1  ;;  %v4480_v19 = vrot.slane %v4445_v0, 7  ;;  %666 = vst.msk [vmem:[#allocation4 + $0x8] sm:$0x1] %vm665_vm3, %v14215_v56  ;;  %vm6037_vm3 = vcmask 1048320  }
 0x654   : > { %v4338_v11 = vpop.f32.mrb[228].mxu0  ;;  %4532 = vrot.lane.b32.xlu1 %v4445_v0, %s16428_s27  ;;  %v12072_v0 = vld [vmem:[%s16411_s12 + $0x28] sm:$0xff]  }
 0x655   : > { %v4339_v43 = vadd.f32 %v4338_v11, %v4251_v17  ;;  %v4584_v63 = vsel %vm2484_vm4, %v4581_v14, %v4583_v1  ;;  %v4585_v61 = vrot.slane %v4446_v13, 1  ;;  %v11412_v2 = vpop.f32.mrb[229].mxu0  ;;  %v4481_v28 = vsel %vm2151_vm5, %v4478_v3, %v4480_v19 }
 0x656   : > { %4609 = vrot.lane.b32.xlu0 %v4584_v63, %s12222_s4  ;;  %v4341_v30 = vpop.f32.mrb[230].mxu0  ;;  %4509 = vst.msk [vmem:[#allocation3 + $0xc0] sm:$0xff] %vm2276_vm6, %v4481_v28  ;;  %v4482_v38 = vrot.slane %v4446_v13, 7 }
 0x657   : > { %v4356_v26 = vmax.f32 %v4339_v43, 0.0  ;;  %v4586_v52 = vsel %vm2484_vm4, %v4583_v1, %v4585_v61  ;;  %v11413_v25 = vpop.f32.mrb[231].mxu0 }
 0x658   : > { %4611 = vrot.lane.b32.xlu1 %v4586_v52, %s12222_s4  ;;  %v4483_v40 = vsel %vm2151_vm5, %v4480_v19, %v4482_v38 }
 0x659   : > { %v4447_v58 = vmul.f32 %v4433_v53, %v4356_v26  ;;  %4510 = vst.msk [vmem:[#allocation3 + $0xd0] sm:$0xff] %vm2276_vm6, %v4483_v40  ;;  %v4645_v40 = vld [vmem:[#allocation3] sm:$0xc0] }
 0x65a   : > { %4534 = vrot.lane.b32.xlu0 %v4446_v13, %s16428_s27 }
 0x65b   : > { %v4484_v32 = vrot.slane %v4447_v58, 7  ;;  %v4587_v48 = vrot.slane %v4447_v58, 1 }
 0x65c   : > { %4536 = vrot.lane.b32.xlu1 %v4447_v58, %s16428_s27  ;;  %s16450_s27 = smov 32  }
 0x65d   : > { %v4588_v12 = vsel %vm2484_vm4, %v4585_v61, %v4587_v48  ;;  %v4485_v35 = vsel %vm2151_vm5, %v4482_v38, %v4484_v32 }
 0x65e   : > { %4613 = vrot.lane.b32.xlu0 %v4588_v12, %s12222_s4  ;;  %4511 = vst.msk [vmem:[#allocation3 + $0xe0] sm:$0x1f] %vm2316_vm10, %v4485_v35  ;;  %vm5361_vm10 = vcmask 257024  }
 0x660   : > { %4589 = vrot.lane.b32.xlu1 %v4564_v59, %s12222_s4  ;;  %v5326_v59 = vld [vmem:[%s16449_s30 + $0x20] sm:$0xf] }
 0x662   : > { %4615 = vrot.lane.b32.xlu0 %v4587_v48, %s12222_s4 }
 0x664   : > { %5334 = vperm.xlu1 %12009, %v5323_v10   ;;  %v12073_v10 = vld [vmem:[%s16411_s12 + $0x60] sm:$0xff]  }
 0x666   : > { %5329 = vperm.xlu0 %12008, %v5322_v37  }
 0x668   : > { %5344 = vperm.xlu1 %12009, %v5325_v34   ;;  %v12074_v34 = vld [vmem:[%s16411_s12 + $0x68] sm:$0xff]  }
 0x66a   : > { %5339 = vperm.xlu0 %12008, %v5324_v42  }
 0x66e   : > { %5349 = vperm.xlu0 %12008, %v5326_v59   ;;  %v12075_v59 = vld [vmem:[%s16411_s12 + $0x70] sm:$0xff]  }
 0x69d   : > { %v4513_v41 = vpop.permute.xlu1 %4512 }
 0x69e   : > { %4551 = vst.msk [vmem:[#allocation3 + $0x20] sm:$0xff] %vm2441_vm8, %v4513_v41 }
 0x69f   : > { %v4515_v36 = vpop.permute.xlu0 %4514 }
 0x6a0   : > { %4552 = vst.msk [vmem:[#allocation3 + $0x30] sm:$0xff] %vm2441_vm8, %v4515_v36  ;;  %v12076_v36 = vld [vmem:[%s16411_s12 + $0x78] sm:$0xff]  }
 0x6a2   : > { %v4592_v7 = vpop.permute.xlu1 %4591 }
 0x6a3   : > { %4632 = vst.msk [vmem:[#allocation3 + $0x20] sm:$0xff] %vm2694_vm9, %v4592_v7 }
 0x6a6   : > { %v4517_v54 = vpop.permute.xlu1 %4516 }
 0x6a7   : > { %4553 = vst.msk [vmem:[#allocation3 + $0x40] sm:$0xff] %vm2441_vm8, %v4517_v54  ;;  %v12077_v54 = vld [vmem:[%s16411_s12 + $0x80] sm:$0xff]  }
 0x6a8   : > { %v4594_v55 = vpop.permute.xlu0 %4593 }
 0x6a9   : > { %4633 = vst.msk [vmem:[#allocation3 + $0x30] sm:$0xff] %vm2694_vm9, %v4594_v55 }
 0x6aa   : > { %v4596_v21 = vpop.permute.xlu1 %4595  ;;  %v4647_v33 = vld [vmem:[#allocation3 + $0x20] sm:$0xff] }
 0x6ab   : > { %4634 = vst.msk [vmem:[#allocation3 + $0x40] sm:$0xff] %vm2694_vm9, %v4596_v21  ;;  %v12078_v21 = vld [vmem:[%s16411_s12 + $0x88] sm:$0xff]  }
 0x6ac   : > { %v4519_v62 = vpop.permute.xlu0 %4518 }
 0x6ad   : > { %4554 = vst.msk [vmem:[#allocation3 + $0x50] sm:$0xff] %vm2441_vm8, %v4519_v62 }
 0x6ae   : > { %v4521_v31 = vpop.permute.xlu1 %4520 }
 0x6af   : > { %4555 = vst.msk [vmem:[#allocation3 + $0x60] sm:$0xff] %vm2441_vm8, %v4521_v31 }
 0x6b0   : > { %v4598_v23 = vpop.permute.xlu0 %4597  ;;  %v4648_v44 = vld [vmem:[#allocation3 + $0x30] sm:$0xff] }
 0x6b1   : > { %4635 = vst.msk [vmem:[#allocation3 + $0x50] sm:$0xff] %vm2694_vm9, %v4598_v23  ;;  %v14210_v47 = vpack.c.bf16 %v4648_v44, %v4647_v33 }
 0x6b2   : > { %v4600_v24 = vpop.permute.xlu1 %4599  ;;  %v14225_v16 = vld [vmem:[#allocation3 + $0x40] sm:$0xff] }
 0x6b3   : > { %4636 = vst.msk [vmem:[#allocation3 + $0x60] sm:$0xff] %vm2694_vm9, %v4600_v24  ;;  %11427 = vmatmul.mubr.msk.bf16.vlgmr.msra.gmra.mrb[232].mxu0 %vm663_vm7, %v14210_v47  ;;  %v4848_v35 = vrot.slane %v14210_v47, 3 }
 0x6b4   : > { %v4523_v18 = vpop.permute.xlu0 %4522  ;;  %11430 = vmatprep.mubr.msk.bf16.mxu0 %vm12219_vm1, %v14215_v56  ;;  %11455 = vmatpush3.bf16.msra.mxu0 %v12067_v39 }
 0x6b5   : > { %4556 = vst.msk [vmem:[#allocation3 + $0x70] sm:$0xff] %vm2441_vm8, %v4523_v18  ;;  %11456 = vmatprep.subr.bf16.mxu0 %v14215_v56 }
 0x6b6   : > { %v4525_v5 = vpop.permute.xlu1 %4524 }
 0x6b7   : > { %4557 = vst.msk [vmem:[#allocation3 + $0x80] sm:$0xff] %vm2441_vm8, %v4525_v5 }
 0x6b8   : > { %v4602_v22 = vpop.permute.xlu0 %4601  ;;  %v14227_v4 = vld [vmem:[#allocation3 + $0x50] sm:$0xff]  ;;  %11457 = vmatpush3.bf16.msra.mxu0 %v12068_v9 }
 0x6b9   : > { %4637 = vst.msk [vmem:[#allocation3 + $0x70] sm:$0xff] %vm2694_vm9, %v4602_v22  ;;  %v14235_v45 = vpack.c.bf16 %v14227_v4, %v14225_v16  ;;  %11458 = vmatprep.subr.bf16.mxu0 %v14215_v56  ;;  %v5005_v9 = vld [vmem:[#allocation3 + $0x30] sm:$0xfc] }
 0x6ba   : > { %v4604_v60 = vpop.permute.xlu1 %4603  ;;  %v14249_v8 = vld [vmem:[#allocation3 + $0x60] sm:$0xff]  ;;  %v5018_v5 = vpack.c.bf16 %v14225_v16, %v5005_v9  ;;  %v12084_v9 = vld [vmem:[%s16413_s14 + $0x38] sm:$0xff]  }
 0x6bb   : > { %4638 = vst.msk [vmem:[#allocation3 + $0x80] sm:$0xff] %vm2694_vm9, %v4604_v60  ;;  %11431 = vmatmul.mubr.msk.bf16.gmra.mrb[236].mxu0 %vm663_vm7, %v14235_v45  ;;  %v4850_v42 = vrot.slane %v14235_v45, 3  ;;  %v5019_v18 = vpack.c.bf16 %v14249_v8, %v14227_v4 }
 0x6bc   : > { %v4527_v14 = vpop.permute.xlu0 %4526  ;;  %11434 = vmatprep.mubr.msk.bf16.mxu0 %vm12219_vm1, %v14215_v56  ;;  %11459 = vmatpush3.bf16.msra.mxu0 %v12069_v46  ;;  %v5045_v46 = vrot.slane %v5018_v5, 1  ;;  %v12085_v5 = vld [vmem:[%s16413_s14 + $0x68] sm:$0xff]  }
 0x6bd   : > { %4558 = vst.msk [vmem:[#allocation3 + $0x90] sm:$0xff] %vm2441_vm8, %v4527_v14  ;;  %11460 = vmatprep.subr.bf16.mxu0 %v14215_v56  ;;  %v4851_v41 = vsel %vm3169_vm14, %v4848_v35, %v4850_v42  ;;  %v5046_v22 = vrot.slane %v5019_v18, 1  ;;  %v12083_v18 = vld [vmem:[%s16413_s14 + $0x30] sm:$0xff]  }
 0x6be   : > { %v4529_v20 = vpop.permute.xlu1 %4528 }
 0x6bf   : > { %4559 = vst.msk [vmem:[#allocation3 + $0xa0] sm:$0xff] %vm2441_vm8, %v4529_v20  ;;  %v5047_v45 = vsel %vm2484_vm4, %v5045_v46, %v5046_v22  ;;  %v12086_v46 = vld [vmem:[%s16413_s14 + $0x40] sm:$0xff]  }
 0x6c0   : > { %v4606_v3 = vpop.permute.xlu0 %4605  ;;  %v14251_v6 = vld [vmem:[#allocation3 + $0x70] sm:$0xff]  ;;  %11461 = vmatpush3.bf16.msra.mxu0 %v12070_v27 }
 0x6c1   : > { %4639 = vst.msk [vmem:[#allocation3 + $0x90] sm:$0xff] %vm2694_vm9, %v4606_v3  ;;  %v14259_v57 = vpack.c.bf16 %v14251_v6, %v14249_v8  ;;  %11462 = vmatprep.subr.bf16.mxu0 %v14215_v56 }
 0x6c2   : > { %v4608_v50 = vpop.permute.xlu1 %4607  ;;  %v14273_v13 = vld [vmem:[#allocation3 + $0x80] sm:$0xff] }
 0x6c3   : > { %4640 = vst.msk [vmem:[#allocation3 + $0xa0] sm:$0xff] %vm2694_vm9, %v4608_v50  ;;  %11435 = vmatmul.mubr.msk.bf16.gmra.mrb[240].mxu0 %vm663_vm7, %v14259_v57  ;;  %v4852_v7 = vrot.slane %v14259_v57, 3  ;;  %v5020_v60 = vpack.c.bf16 %v14273_v13, %v14251_v6 }
 0x6c4   : > { %v4531_v51 = vpop.permute.xlu0 %4530  ;;  %11438 = vmatprep.mubr.msk.bf16.mxu0 %vm12219_vm1, %v14215_v56  ;;  %11463 = vmatpush3.bf16.msra.mxu0 %v12071_v29 }
 0x6c5   : > { %4560 = vst.msk [vmem:[#allocation3 + $0xb0] sm:$0xff] %vm2441_vm8, %v4531_v51  ;;  %11464 = vmatprep.subr.bf16.mxu0 %v14215_v56  ;;  %v4853_v55 = vsel %vm3169_vm14, %v4850_v42, %v4852_v7  ;;  %v5048_v4 = vrot.slane %v5020_v60, 1  ;;  %v5017_v51 = vld [vmem:[#allocation3 + $0xf0] sm:$0x3f] }
 0x6c6   : > { %v4533_v49 = vpop.permute.xlu1 %4532 }
 0x6c7   : > { %4561 = vst.msk [vmem:[#allocation3 + $0xc0] sm:$0xff] %vm2441_vm8, %v4533_v49  ;;  %v5049_v14 = vsel %vm2484_vm4, %v5046_v22, %v5048_v4  ;;  %v5024_v49 = vpack.c.bf16 %v5017_v51, %v5017_v51  ;;  %v10119_v22 = vld [vmem:[%s16412_s13] ss:$0 sm:$0xff] }
 0x6c8   : > { %v4610_v15 = vpop.permute.xlu0 %4609  ;;  %v14275_v17 = vld [vmem:[#allocation3 + $0x90] sm:$0xff]  ;;  %11465 = vmatpush3.bf16.msra.mxu0 %v12072_v0 }
 0x6c9   : > { %4641 = vst.msk [vmem:[#allocation3 + $0xb0] sm:$0xff] %vm2694_vm9, %v4610_v15  ;;  %v14280_v1 = vpack.c.bf16 %v14275_v17, %v14273_v13  ;;  %11494 = vmatprep.subr.bf16.mxu0 %v14215_v56  ;;  %v5056_v15 = vrot.slane %v5024_v49, 1 }
 0x6ca   : > { %v4612_v19 = vpop.permute.xlu1 %4611  ;;  %v14290_v61 = vld [vmem:[#allocation3 + $0xa0] sm:$0xff] }
 0x6cb   : > { %4642 = vst.msk [vmem:[#allocation3 + $0xc0] sm:$0xff] %vm2694_vm9, %v4612_v19  ;;  %11439 = vmatmul.mubr.msk.bf16.gmra.mrb[244].mxu0 %vm663_vm7, %v14280_v1  ;;  %v4854_v62 = vrot.slane %v14280_v1, 3  ;;  %v5021_v27 = vpack.c.bf16 %v14290_v61, %v14275_v17 }
 0x6cc   : > { %v4535_v11 = vpop.permute.xlu0 %4534  ;;  %11442 = vmatprep.mubr.msk.bf16.mxu0 %vm12219_vm1, %v14215_v56 }
 0x6cd   : > { %4562 = vst.msk [vmem:[#allocation3 + $0xd0] sm:$0xff] %vm2441_vm8, %v4535_v11  ;;  %v4855_v31 = vsel %vm3169_vm14, %v4852_v7, %v4854_v62  ;;  %v5050_v16 = vrot.slane %v5021_v27, 1 }
 0x6ce   : > { %v4537_v43 = vpop.permute.xlu1 %4536 }
 0x6cf   : > { %4563 = vst.msk [vmem:[#allocation3 + $0xe0] sm:$0xf] %vm2482_vm11, %v4537_v43  ;;  %v5051_v20 = vsel %vm2484_vm4, %v5048_v4, %v5050_v16 }
 0x6d0   : > { %v4614_v63 = vpop.permute.xlu0 %4613  ;;  %v14292_v2 = vld [vmem:[#allocation3 + $0xb0] sm:$0xff] }
 0x6d1   : > { %4643 = vst.msk [vmem:[#allocation3 + $0xd0] sm:$0xff] %vm2694_vm9, %v4614_v63  ;;  %v14297_v28 = vpack.c.bf16 %v14292_v2, %v14290_v61 }
 0x6d2   : > { %v4590_v30 = vpop.permute.xlu1 %4589  ;;  %v14305_v26 = vld [vmem:[#allocation3 + $0xc0] sm:$0xff] }
 0x6d3   : > { %4631 = vst.msk [vmem:[#allocation3 + $0x10] sm:$0x80] %vm2692_vm12, %v4590_v30  ;;  %11443 = vmatmul.mubr.msk.bf16.gmra.mrb[248].mxu0 %vm663_vm7, %v14297_v28  ;;  %v4856_v23 = vrot.slane %v14297_v28, 3  ;;  %v5022_v3 = vpack.c.bf16 %v14305_v26, %v14292_v2  ;;  %vm5407_vm12 = vcmask 781824  }
 0x6d4   : > { %v4616_v38 = vpop.permute.xlu0 %4615  ;;  %11446 = vmatprep.mubr.msk.bf16.mxu0 %vm12219_vm1, %v14215_v56 }
 0x6d5   : > { %4644 = vst.msk [vmem:[#allocation3 + $0xe0] sm:$0x7] %vm2735_vm13, %v4616_v38  ;;  %v4857_v44 = vsel %vm3169_vm14, %v4854_v62, %v4856_v23  ;;  %v5052_v8 = vrot.slane %v5022_v3, 1  ;;  %vm632_vm13 = vcmask 523264  }
 0x6d7   : > { %v5053_v29 = vsel %vm2484_vm4, %v5050_v16, %v5052_v8 }
 0x6d8   : > { %v14307_v52 = vld [vmem:[#allocation3 + $0xd0] sm:$0xff] }
 0x6d9   : > { %v4680_v25 = vpack.c.bf16 %v14307_v52, %v14305_v26  ;;  %v4658_v33 = vld [vmem:[#allocation3 + $0xd0] sm:$0x3] }
 0x6da   : > { %v4646_v58 = vld [vmem:[#allocation3 + $0x10] sm:$0xff]  ;;  %v4665_v39 = vpack.c.bf16 %v4658_v33, %v14305_v26 }
 0x6db   : > { %11447 = vmatmul.mubr.msk.bf16.gmra.mrb[252].mxu0 %vm663_vm7, %v4680_v25  ;;  %v4659_v48 = vpack.c.bf16 %v4646_v58, %v4645_v40 }
 0x6dc   : > { %11450 = vmatprep.mubr.msk.bf16.mxu0 %vm12219_vm1, %v14215_v56  ;;  %v4679_v53 = vld [vmem:[#allocation3 + $0xe0] sm:$0xf]  ;;  %v4858_v47 = vrot.slane %v4665_v39, 3  ;;  %v12080_v39 = vld [vmem:[%s16404_s5 + $0x8] sm:$0xff]  }
 0x6dd   : > { %v4681_v32 = vpack.c.bf16 %v4679_v53, %v4679_v53  ;;  %v4847_v12 = vrot.slane %v4659_v48, 3  ;;  %v5016_v6 = vld [vmem:[#allocation3 + $0xe0] sm:$0xff] }
 0x6de   : > { %v4859_v24 = vsel %vm3169_vm14, %v4856_v23, %v4858_v47  ;;  %v5023_v57 = vpack.c.bf16 %v5016_v6, %v14307_v52  ;;  %v12089_v6 = vld [vmem:[%s16413_s14 + $0x78] sm:$0xff]  }
 0x6df   : > { %v4849_v37 = vsel %vm3169_vm14, %v4847_v12, %v4848_v35 }
 0x6e0   : > { %v5054_v50 = vrot.slane %v5023_v57, 1 }
 0x6e2   : > { %v5055_v0 = vsel %vm2484_vm4, %v5052_v8, %v5054_v50  ;;  %v5057_v13 = vsel %vm2484_vm4, %v5054_v50, %v5056_v15  ;;  %v12088_v8 = vld [vmem:[%s16413_s14 + $0x48] sm:$0xff]  }
 0x6e3   : > { %11451 = vmatmul.mubr.msk.bf16.gmra.mrb[0].mxu0 %vm663_vm7, %v4681_v32  ;;  %v5335_v51 = vpop.permute.xlu1 %5334 }
 0x6e4   : > { %11466 = vmatprep.mubr.msk.bf16.mxu0 %vm12219_vm1, %v14215_v56 }
 0x6eb   : > { %11467 = vmatmul.mubr.msk.bf16.vlgmr.msra.gmra.mrb[232].mxu0 %vm663_vm7, %v4849_v37 }
 0x6ec   : > { %11470 = vmatprep.mubr.msk.bf16.mxu0 %vm12219_vm1, %v14215_v56  ;;  %11495 = vmatpush3.bf16.msra.mxu0 %v12073_v10 }
 0x6ed   : > { %11496 = vmatprep.subr.bf16.mxu0 %v14215_v56 }
 0x6f0   : > { %11497 = vmatpush3.bf16.msra.mxu0 %v12074_v34 }
 0x6f1   : > { %11498 = vmatprep.subr.bf16.mxu0 %v14215_v56 }
 0x6f3   : > { %11471 = vmatmul.mubr.msk.bf16.gmra.mrb[236].mxu0 %vm663_vm7, %v4851_v41 }
 0x6f4   : > { %11474 = vmatprep.mubr.msk.bf16.mxu0 %vm12219_vm1, %v14215_v56  ;;  %11499 = vmatpush3.bf16.msra.mxu0 %v12075_v59 }
 0x6f5   : > { %11500 = vmatprep.subr.bf16.mxu0 %v14215_v56 }
 0x6f8   : > { %11501 = vmatpush3.bf16.msra.mxu0 %v12076_v36 }
 0x6f9   : > { %11502 = vmatprep.subr.bf16.mxu0 %v14215_v56 }
 0x6fb   : > { %11475 = vmatmul.mubr.msk.bf16.gmra.mrb[240].mxu0 %vm663_vm7, %v4853_v55 }
 0x6fc   : > { %11478 = vmatprep.mubr.msk.bf16.mxu0 %vm12219_vm1, %v14215_v56  ;;  %11503 = vmatpush3.bf16.msra.mxu0 %v12077_v54 }
 0x6fd   : > { %11504 = vmatprep.subr.bf16.mxu0 %v14215_v56 }
 0x700   : > { %11505 = vmatpush3.bf16.msra.mxu0 %v12078_v21 }
 0x701   : > { %11534 = vmatprep.subr.bf16.mxu0 %v14215_v56 }
 0x703   : > { %11479 = vmatmul.mubr.msk.bf16.gmra.mrb[244].mxu0 %vm663_vm7, %v4855_v31 }
 0x704   : > { %11482 = vmatprep.mubr.msk.bf16.mxu0 %vm12219_vm1, %v14215_v56 }
 0x70b   : > { %11483 = vmatmul.mubr.msk.bf16.gmra.mrb[248].mxu0 %vm663_vm7, %v4857_v44  ;;  %v12079_v44 = vld [vmem:[%s16404_s5] sm:$0xff]  }
 0x70c   : > { %11486 = vmatprep.mubr.msk.bf16.mxu0 %vm12219_vm1, %v14215_v56 }
 0x713   : > { %11487 = vmatmul.mubr.msk.bf16.gmra.mrb[252].mxu0 %vm663_vm7, %v4859_v24  ;;  %v12082_v24 = vld [vmem:[%s16413_s14 + $0x60] sm:$0xff]  }
 0x714   : > { %11490 = vmatprep.mubr.msk.bf16.mxu0 %vm12219_vm1, %v14215_v56  ;;  %11609 = vmatpush3.bf16.msra.mxu1 %v12082_v24  ;;  %v12095_v24 = vld [vmem:[%s16413_s14 + $0x8] sm:$0xff]  }
 0x715   : > { %11610 = vmatprep.subr.bf16.mxu1 %v14215_v56 }
 0x718   : > { %11611 = vmatpush3.bf16.msra.mxu1 %v12085_v5 }
 0x719   : > { %11612 = vmatprep.subr.bf16.mxu1 %v14215_v56 }
 0x71b   : > { %11491 = vmatmul.mubr.msk.bf16.gmra.mrb[0].mxu0 %vm663_vm7, %v4858_v47  ;;  %v12081_v47 = vld [vmem:[%s16404_s5 + $0x10] ss:$0 sps:$4 sm:$0x33]  }
 0x71c   : > { %11506 = vmatprep.mubr.msk.bf16.mxu0 %vm12219_vm1, %v14215_v56 }
 0x723   : > { %11507 = vmatmul.mubr.msk.bf16.vlgmr.msra.gmra.mrb[232].mxu0 %vm663_vm7, %v5047_v45  ;;  %v12087_v45 = vld [vmem:[%s16413_s14 + $0x70] sm:$0xff]  }
 0x724   : > { %11510 = vmatprep.mubr.msk.bf16.mxu0 %vm12219_vm1, %v14215_v56  ;;  %11613 = vmatpush3.bf16.msra.mxu1 %v12087_v45 }
 0x725   : > { %11614 = vmatprep.subr.bf16.mxu1 %v14215_v56 }
 0x728   : > { %11615 = vmatpush3.bf16.msra.mxu1 %v12089_v6 }
 0x729   : > { %11616 = vmatprep.subr.bf16.mxu1 %v14215_v56 }
 0x72b   : > { %11511 = vmatmul.mubr.msk.bf16.gmra.mrb[236].mxu0 %vm663_vm7, %v5049_v14 }
 0x72c   : > { %11514 = vmatprep.mubr.msk.bf16.mxu0 %vm12219_vm1, %v14215_v56 }
 0x733   : > { %11515 = vmatmul.mubr.msk.bf16.gmra.mrb[240].mxu0 %vm663_vm7, %v5051_v20 }
 0x734   : > { %11518 = vmatprep.mubr.msk.bf16.mxu0 %vm12219_vm1, %v14215_v56 }
 0x73b   : > { %11519 = vmatmul.mubr.msk.bf16.gmra.mrb[244].mxu0 %vm663_vm7, %v5053_v29  ;;  %v5330_v29 = vpop.permute.xlu0 %5329 }
 0x73c   : > { %11522 = vmatprep.mubr.msk.bf16.mxu0 %vm12219_vm1, %v14215_v56 }
 0x743   : > { %11523 = vmatmul.mubr.msk.bf16.gmra.mrb[248].mxu0 %vm663_vm7, %v5055_v0 }
 0x744   : > { %11526 = vmatprep.mubr.msk.bf16.mxu0 %vm12219_vm1, %v14215_v56 }
 0x74b   : > { %11527 = vmatmul.mubr.msk.bf16.gmra.mrb[252].mxu0 %vm663_vm7, %v5057_v13  ;;  %v12091_v13 = vld [vmem:[%s16413_s14 + $0x80] sm:$0xff]  }
 0x74c   : > { %11530 = vmatprep.mubr.msk.bf16.mxu0 %vm12219_vm1, %v14215_v56  ;;  %11617 = vmatpush3.bf16.msra.mxu1 %v12091_v13 }
 0x74d   : > { %11618 = vmatprep.subr.bf16.mxu1 %v14215_v56 }
 0x753   : > { %11531 = vmatmul.mubr.msk.bf16.gmra.mrb[0].mxu0 %vm663_vm7, %v5056_v15  ;;  %v12090_v15 = vld [vmem:[%s16413_s14 + $0x50] sm:$0xff]  }
 0x754   : > { %11548 = vmatprep.mubr.msk.bf16.mxu0 %vm12219_vm1, %v14215_v56 }
 0x7f6   : > { %v5149_v17 = vpop.f32.mrb[232].mxu0 }
 0x7f7   : > { %v11508_v1 = vpop.f32.mrb[233].mxu0 }
 0x7f8   : > { %v5152_v19 = vpop.f32.mrb[234].mxu0 }
 0x7f9   : > { %v5221_v11 = vpack.c.bf16 %v5152_v19, %v5149_v17  ;;  %v11509_v43 = vpop.f32.mrb[235].mxu0 }
 0x7fb   : > { %11535 = vmatpush3.bf16.msra.mxu0 %v5221_v11 }
 0x7fc   : > { %11536 = vmatprep.subr.bf16.mxu0 %v14215_v56 }
 0x7fe   : > { %v5157_v63 = vpop.f32.mrb[236].mxu0 }
 0x7ff   : > { %v11512_v61 = vpop.f32.mrb[237].mxu0 }
 0x800   : > { %v5160_v2 = vpop.f32.mrb[238].mxu0  ;;  %v5340_v61 = vpop.permute.xlu0 %5339 }
 0x801   : > { %v5222_v28 = vpack.c.bf16 %v5160_v2, %v5157_v63  ;;  %v11513_v30 = vpop.f32.mrb[239].mxu0  ;;  %v12092_v2 = vld [vmem:[%s16413_s14 + $0x58] sm:$0xff]  }
 0x803   : > { %11537 = vmatpush3.bf16.msra.mxu0 %v5222_v28  ;;  %v12093_v28 = vld [vmem:[%s16413_s14 + $0x88] sm:$0xff]  }
 0x804   : > { %11538 = vmatprep.subr.bf16.mxu0 %v14215_v56  ;;  %11619 = vmatpush3.bf16.msra.mxu1 %v12093_v28 }
 0x806   : > { %v5165_v38 = vpop.f32.mrb[240].mxu0 }
 0x807   : > { %v11516_v26 = vpop.f32.mrb[241].mxu0 }
 0x808   : > { %v5168_v52 = vpop.f32.mrb[242].mxu0  ;;  %v5345_v26 = vpop.permute.xlu1 %5344 }
 0x809   : > { %v5223_v25 = vpack.c.bf16 %v5168_v52, %v5165_v38  ;;  %v11517_v53 = vpop.f32.mrb[243].mxu0 }
 0x80a   : > { %v16451_v53 = vmov 0  }
 0x80b   : > { %11539 = vmatpush3.bf16.msra.mxu0 %v5223_v25  ;;  %6339 = vmatprep.subr.bf16.mxu1 %v16451_v53 }
 0x80c   : > { %11540 = vmatprep.subr.bf16.mxu0 %v14215_v56 }
 0x80e   : > { %v5173_v40 = vpop.f32.mrb[244].mxu0 }
 0x80f   : > { %v11520_v58 = vpop.f32.mrb[245].mxu0 }
 0x810   : > { %v5176_v32 = vpop.f32.mrb[246].mxu0 }
 0x811   : > { %v5224_v48 = vpack.c.bf16 %v5176_v32, %v5173_v40  ;;  %v11521_v12 = vpop.f32.mrb[247].mxu0 }
 0x813   : > { %11541 = vmatpush3.bf16.msra.mxu0 %v5224_v48 }
 0x814   : > { %11542 = vmatprep.subr.bf16.mxu0 %v14215_v56 }
 0x816   : > { %v5181_v35 = vpop.f32.mrb[248].mxu0 }
 0x817   : > { %v11524_v10 = vpop.f32.mrb[249].mxu0 }
 0x818   : > { %v5184_v37 = vpop.f32.mrb[250].mxu0 }
 0x819   : > { %v5225_v34 = vpack.c.bf16 %v5184_v37, %v5181_v35  ;;  %v11525_v42 = vpop.f32.mrb[251].mxu0  ;;  %v5350_v35 = vpop.permute.xlu0 %5349 }
 0x81b   : > { %11543 = vmatpush3.bf16.msra.mxu0 %v5225_v34 }
 0x81c   : > { %11544 = vmatprep.subr.bf16.mxu0 %v14215_v56 }
 0x81e   : > { %v5189_v59 = vpop.f32.mrb[252].mxu0 }
 0x81f   : > { %v11528_v41 = vpop.f32.mrb[253].mxu0 }
 0x820   : > { %v5192_v36 = vpop.f32.mrb[254].mxu0 }
 0x821   : > { %v5226_v7 = vpack.c.bf16 %v5192_v36, %v5189_v59  ;;  %v11529_v54 = vpop.f32.mrb[255].mxu0 }
 0x823   : > { %11545 = vmatpush3.bf16.msra.mxu0 %v5226_v7 }
 0x824   : > { %11546 = vmatprep.subr.bf16.mxu0 %v14215_v56 }
 0x826   : > { %v5197_v55 = vpop.f32.mrb[0].mxu0 }
 0x827   : > { %v5227_v21 = vpack.c.bf16 %v5197_v55, %v5197_v55  ;;  %v11532_v62 = vpop.f32.mrb[1].mxu0 }
 0x828   : > { %v5200_v31 = vpop.f32.mrb[2].mxu0 }
 0x829   : > { %v11533_v23 = vpop.f32.mrb[3].mxu0  ;;  %v5259_v33 = vsel %vm4164_vm15, %v5227_v21, 0 }
 0x82a   : > { %11547 = vmatpush3.bf16.msra.mxu0 %v5259_v33  ;;  %v12094_v23 = vld [vmem:[%s16413_s14] sm:$0xff]  }
 0x82b   : > { %11560 = vmatprep.subr.bf16.mxu0 %v14215_v56 }
 0x82d   : > { %11549 = vmatmul.mubr.msk.bf16.vlgmr.msra.gmra.mrb[4].mxu0 %vm5248_vm2, %v12079_v44 }
 0x82e   : > { %11552 = vmatprep.mubr.msk.bf16.mxu0 %vm12219_vm1, %v14215_v56  ;;  %11561 = vmatpush3.bf16.msra.mxu0 %v12083_v18  ;;  %v12096_v18 = vld [vmem:[%s16413_s14 + $0x10] sm:$0xff]  }
 0x82f   : > { %11562 = vmatprep.subr.bf16.mxu0 %v14215_v56 }
 0x832   : > { %11563 = vmatpush3.bf16.msra.mxu0 %v12084_v9 }
 0x833   : > { %11564 = vmatprep.subr.bf16.mxu0 %v14215_v56 }
 0x835   : > { %11553 = vmatmul.mubr.msk.bf16.gmra.mrb[8].mxu0 %vm5248_vm2, %v12080_v39 }
 0x836   : > { %11556 = vmatprep.mubr.msk.bf16.mxu0 %vm12219_vm1, %v14215_v56  ;;  %11565 = vmatpush3.bf16.msra.mxu0 %v12086_v46 }
 0x837   : > { %11566 = vmatprep.subr.bf16.mxu0 %v14215_v56 }
 0x83a   : > { %11567 = vmatpush3.bf16.msra.mxu0 %v12088_v8  ;;  %v12099_v8 = vld [vmem:[%s16413_s14 + $0x28] sm:$0xff]  }
 0x83b   : > { %11568 = vmatprep.subr.bf16.mxu0 %v14215_v56 }
 0x83d   : > { %11557 = vmatmul.mubr.msk.bf16.gmra.mrb[12].mxu0 %vm5248_vm2, %v12081_v47 }
 0x83e   : > { %11572 = vmatprep.mubr.msk.bf16.mxu0 %vm12219_vm1, %v14215_v56  ;;  %11569 = vmatpush3.bf16.msra.mxu0 %v12090_v15 }
 0x83f   : > { %11570 = vmatprep.subr.bf16.mxu0 %v14215_v56 }
 0x842   : > { %11571 = vmatpush3.bf16.msra.mxu0 %v12092_v2 }
 0x843   : > { %11584 = vmatprep.subr.bf16.mxu0 %v14215_v56 }
 0x900   : > { %v5295_v60 = vpop.f32.mrb[4].mxu0 }
 0x901   : > { %v5296_v4 = vadd.f32 %v10119_v22, %v5295_v60  ;;  %v11550_v14 = vpop.f32.mrb[5].mxu0 }
 0x902   : > { %v5298_v27 = vpop.f32.mrb[6].mxu0 }
 0x903   : > { %v5317_v16 = vmax.f32 %v5296_v4, 0.0  ;;  %v5299_v20 = vadd.f32 %v10119_v22, %v5298_v27  ;;  %v11551_v3 = vpop.f32.mrb[7].mxu0  ;;  %v12097_v4 = vld [vmem:[%s16413_s14 + $0x18] sm:$0xff]   ;;  %v5656_v27 = vld [vmem:[#allocation4 + $0x2e] sm:$0xf] }
 0x904   : > { %v5659_v3 = vpack.c.bf16 %v5656_v27, %v5656_v27 }
 0x905   : > { %v5352_v57 = vmul.f32 %v5330_v29, %v5317_v16  ;;  %v5318_v50 = vmax.f32 %v5299_v20, 0.0  ;;  %v12098_v16 = vld [vmem:[%s16413_s14 + $0x20] sm:$0xff]  }
 0x907   : > { %5357 = vst.msk [vmem:[#allocation4 + $0x9] sm:$0xff] %vm2276_vm6, %v5352_v57  ;;  %v5353_v0 = vmul.f32 %v5335_v51, %v5318_v50  ;;  %5388 = vrot.lane.b32.xlu0 %v5352_v57, %s12222_s4  ;;  %5368 = vrot.lane.b32.xlu1 %v5352_v57, %s16450_s27 }
 0x908   : > { %v5303_v49 = vpop.f32.mrb[8].mxu0 }
 0x909   : > { %5358 = vst.msk [vmem:[#allocation4 + $0x11] sm:$0xff] %vm2276_vm6, %v5353_v0  ;;  %v5304_v17 = vadd.f32 %v10119_v22, %v5303_v49  ;;  %v11554_v1 = vpop.f32.mrb[9].mxu0 }
 0x90a   : > { %v5306_v19 = vpop.f32.mrb[10].mxu0 }
 0x90b   : > { %v5319_v11 = vmax.f32 %v5304_v17, 0.0  ;;  %v5307_v43 = vadd.f32 %v10119_v22, %v5306_v19  ;;  %5370 = vrot.lane.b32.xlu0 %v5353_v0, %s16450_s27  ;;  %v11555_v63 = vpop.f32.mrb[11].mxu0 }
 0x90d   : > { %v5354_v30 = vmul.f32 %v5340_v61, %v5319_v11  ;;  %v5320_v38 = vmax.f32 %v5307_v43, 0.0 }
 0x90f   : > { %5359 = vst.msk [vmem:[#allocation4 + $0x19] sm:$0xff] %vm2276_vm6, %v5354_v30  ;;  %v5355_v52 = vmul.f32 %v5345_v26, %v5320_v38  ;;  %5392 = vrot.lane.b32.xlu0 %v5354_v30, %s12222_s4  ;;  %5372 = vrot.lane.b32.xlu1 %v5354_v30, %s16450_s27 }
 0x910   : > { %v5311_v25 = vpop.f32.mrb[12].mxu0 }
 0x911   : > { %5360 = vst.msk [vmem:[#allocation4 + $0x21] sm:$0xff] %vm2276_vm6, %v5355_v52  ;;  %v5312_v40 = vadd.f32 %v10119_v22, %v5311_v25  ;;  %v11558_v58 = vpop.f32.mrb[13].mxu0 }
 0x912   : > { %v5314_v32 = vpop.f32.mrb[14].mxu0 }
 0x913   : > { %v5321_v48 = vmax.f32 %v5312_v40, 0.0  ;;  %5390 = vrot.lane.b32.xlu1 %v5353_v0, %s12222_s4  ;;  %v11559_v12 = vpop.f32.mrb[15].mxu0 }
 0x915   : > { %v5356_v10 = vmul.f32 %v5350_v35, %v5321_v48 }
 0x917   : > { %5374 = vrot.lane.b32.xlu1 %v5355_v52, %s16450_s27  ;;  %5376 = vrot.lane.b32.xlu0 %v5356_v10, %s16450_s27  ;;  %5362 = vst.msk [vmem:[#allocation4 + $0x29] sm:$0xf] %vm5361_vm10, %v5356_v10 }
 0x91b   : > { %5394 = vrot.lane.b32.xlu1 %v5355_v52, %s12222_s4  ;;  %5396 = vrot.lane.b32.xlu0 %v5356_v10, %s12222_s4 }
 0x979   : > { %v5389_v37 = vpop.permute.xlu0 %5388  ;;  %v5369_v34 = vpop.permute.xlu1 %5368 }
 0x97a   : > { %5383 = vst.msk [vmem:[#allocation4 + $0x8] sm:$0xff] %vm2441_vm8, %v5369_v34 }
 0x97b   : > { %5403 = vst.msk [vmem:[#allocation4 + $0x7] sm:$0xff] %vm2694_vm9, %v5389_v37 }
 0x97d   : > { %v5371_v42 = vpop.permute.xlu0 %5370 }
 0x97e   : > { %5384 = vst.msk [vmem:[#allocation4 + $0x10] sm:$0xff] %vm2441_vm8, %v5371_v42 }
 0x981   : > { %v5393_v59 = vpop.permute.xlu0 %5392  ;;  %v5373_v41 = vpop.permute.xlu1 %5372 }
 0x982   : > { %5385 = vst.msk [vmem:[#allocation4 + $0x18] sm:$0xff] %vm2441_vm8, %v5373_v41  ;;  %v5409_v29 = vld [vmem:[#allocation4 + $0x2] sm:$0xff] }
 0x983   : > { %5405 = vst.msk [vmem:[#allocation4 + $0x17] sm:$0xff] %vm2694_vm9, %v5393_v59 }
 0x985   : > { %v5391_v36 = vpop.permute.xlu1 %5390 }
 0x986   : > { %5404 = vst.msk [vmem:[#allocation4 + $0xf] sm:$0xff] %vm2694_vm9, %v5391_v36  ;;  %v10177_v36 = vld [vmem:[%s16414_s15] ss:$0 sm:$0xff] }
 0x989   : > { %v5375_v7 = vpop.permute.xlu1 %5374  ;;  %v5377_v54 = vpop.permute.xlu0 %5376 }
 0x98a   : > { %5386 = vst.msk [vmem:[#allocation4 + $0x20] sm:$0xff] %vm2441_vm8, %v5375_v7 }
 0x98b   : > { %5387 = vst.msk [vmem:[#allocation4 + $0x28] sm:$0xf] %vm2482_vm11, %v5377_v54  ;;  %vm642_vm11 = vcmask 523267  }
 0x98c   : > { %658 = vst.msk [vmem:[#allocation3 + $0xe8] sm:$0xf8] %vm642_vm11, %v14215_v56  ;;  %643 = vst.msk [vmem:[#allocation2 + $0x2b8] sm:$0xf8] %vm642_vm11, %v14215_v56 }
 0x98d   : > { %v5429_v55 = vld [vmem:[#allocation4 + $0x8] sm:$0xff]  ;;  %v5430_v21 = vld [vmem:[#allocation4 + $0x10] sm:$0xff]  ;;  %v5395_v62 = vpop.permute.xlu1 %5394  ;;  %v5397_v31 = vpop.permute.xlu0 %5396 }
 0x98e   : > { %v5434_v33 = vpack.c.bf16 %v5430_v21, %v5429_v55  ;;  %5406 = vst.msk [vmem:[#allocation4 + $0x1f] sm:$0xff] %vm2694_vm9, %v5395_v62  ;;  %v5652_v44 = vld [vmem:[#allocation4 + $0xe] sm:$0xff]  ;;  %v5653_v39 = vld [vmem:[#allocation4 + $0x16] sm:$0xff]  ;;  %vm639_vm9 = vcmask 516096  }
 0x98f   : > { %5408 = vst.msk [vmem:[#allocation4 + $0x27] sm:$0xf] %vm5407_vm12, %v5397_v31  ;;  %v5657_v47 = vpack.c.bf16 %v5653_v39, %v5652_v44  ;;  %v5410_v6 = vld [vmem:[#allocation4 + $0xa] sm:$0xff]  ;;  %v5411_v51 = vld [vmem:[#allocation4 + $0x12] sm:$0xff]  ;;  %vm6145_vm12 = vcmask 518400  }
 0x990   : > { %11573 = vmatmul.mubr.msk.bf16.vlgmr.msra.gmra.mrb[16].mxu0 %vm663_vm7, %v5434_v33  ;;  %v5414_v57 = vpack.c.bf16 %v5410_v6, %v5409_v29  ;;  %656 = vst.msk [vmem:[#allocation3 + $0x28] sm:$0x1] %vm639_vm9, %v14215_v56  ;;  %640 = vst.msk [vmem:[#allocation2 + $0x38] sm:$0x1] %vm639_vm9, %v14215_v56  ;;  %vm6131_vm9 = vcmask 523527  }
 0x991   : > { %11621 = vmatmul.mubr.msk.bf16.vlgmr.msra.gmra.mrb[160].mxu1 %vm663_vm7, %v5657_v47  ;;  %11585 = vmatpush3.bf16.msra.mxu0 %v12094_v23 }
 0x992   : > { %11586 = vmatprep.subr.bf16.mxu0 %v14215_v56  ;;  %11576 = vmatprep.mubr.msk.bf16.mxu0 %vm12219_vm1, %v14215_v56 }
 0x993   : > { %11624 = vmatprep.mubr.msk.bf16.mxu1 %vm12219_vm1, %v14215_v56 }
 0x995   : > { %11587 = vmatpush3.bf16.msra.mxu0 %v12095_v24  ;;  %v5431_v9 = vld [vmem:[#allocation4 + $0x18] sm:$0xff]  ;;  %v5413_v49 = vld [vmem:[#allocation4 + $0x22] sm:$0xf] }
 0x996   : > { %v5432_v5 = vld [vmem:[#allocation4 + $0x20] sm:$0xff]  ;;  %11588 = vmatprep.subr.bf16.mxu0 %v14215_v56  ;;  %v5433_v14 = vld [vmem:[#allocation4 + $0x28] sm:$0xf]  ;;  %v5416_v15 = vpack.c.bf16 %v5413_v49, %v5413_v49 }
 0x997   : > { %v5654_v22 = vld [vmem:[#allocation4 + $0x1e] sm:$0xff]  ;;  %v5435_v46 = vpack.c.bf16 %v5432_v5, %v5431_v9  ;;  %v5655_v45 = vld [vmem:[#allocation4 + $0x26] sm:$0xff]  ;;  %v5436_v20 = vpack.c.bf16 %v5433_v14, %v5433_v14 }
 0x998   : > { %v5658_v60 = vpack.c.bf16 %v5655_v45, %v5654_v22  ;;  %v5412_v50 = vld [vmem:[#allocation4 + $0x1a] sm:$0xff] }
 0x999   : > { %11577 = vmatmul.mubr.msk.bf16.gmra.mrb[20].mxu0 %vm663_vm7, %v5435_v46  ;;  %v5415_v0 = vpack.c.bf16 %v5412_v50, %v5411_v51 }
 0x99a   : > { %11625 = vmatmul.mubr.msk.bf16.gmra.mrb[164].mxu1 %vm663_vm7, %v5658_v60  ;;  %11589 = vmatpush3.bf16.msra.mxu0 %v12096_v18 }
 0x99b   : > { %11590 = vmatprep.subr.bf16.mxu0 %v14215_v56  ;;  %11580 = vmatprep.mubr.msk.bf16.mxu0 %vm12219_vm1, %v14215_v56 }
 0x99c   : > { %11628 = vmatprep.mubr.msk.bf16.mxu1 %vm12219_vm1, %v14215_v56 }
 0x99e   : > { %11591 = vmatpush3.bf16.msra.mxu0 %v12097_v4 }
 0x99f   : > { %11592 = vmatprep.subr.bf16.mxu0 %v14215_v56 }
 0x9a1   : > { %11581 = vmatmul.mubr.msk.bf16.gmra.mrb[24].mxu0 %vm663_vm7, %v5436_v20 }
 0x9a2   : > { %11593 = vmatpush3.bf16.msra.mxu0 %v12098_v16  ;;  %11596 = vmatprep.mubr.msk.bf16.mxu0 %vm12219_vm1, %v14215_v56 }
 0x9a3   : > { %11594 = vmatprep.subr.bf16.mxu0 %v14215_v56  ;;  %11629 = vmatmul.mubr.msk.bf16.gmra.mrb[168].mxu1 %vm663_vm7, %v5659_v3 }
 0x9a6   : > { %11595 = vmatpush3.bf16.msra.mxu0 %v12099_v8 }
 0x9a7   : > { %11632 = vmatprep.subr.bf16.mxu0 %v14215_v56 }
 0x9a9   : > { %11597 = vmatmul.mubr.msk.bf16.vlgmr.msra.gmra.mrb[28].mxu0 %vm663_vm7, %v5414_v57 }
 0x9aa   : > { %11600 = vmatprep.mubr.msk.bf16.mxu0 %vm12219_vm1, %v14215_v56 }
 0x9b1   : > { %11601 = vmatmul.mubr.msk.bf16.gmra.mrb[32].mxu0 %vm663_vm7, %v5415_v0 }
 0x9b2   : > { %11604 = vmatprep.mubr.msk.bf16.mxu0 %vm12219_vm1, %v14215_v56 }
 0x9b9   : > { %11605 = vmatmul.mubr.msk.bf16.gmra.mrb[36].mxu0 %vm663_vm7, %v5416_v15  ;;  %v12100_v15 = vld [vmem:[%s16405_s6] sm:$0xff]   ;;  %vm5845_vm7 = vcmask 293888  }
 0x9ba   : > { %11638 = vmatprep.mubr.msk.bf16.mxu0 %vm12219_vm1, %v14215_v56 }
 0xa63   : > { %v5529_v13 = vpop.f32.mrb[16].mxu0 }
 0xa64   : > { %v5752_v17 = vpop.f32.mrb[160].mxu1  ;;  %v11574_v1 = vpop.f32.mrb[17].mxu0 }
 0xa65   : > { %v11622_v19 = vpop.f32.mrb[161].mxu1  ;;  %v5532_v11 = vpop.f32.mrb[18].mxu0  ;;  %v12103_v1 = vld [vmem:[%s16405_s6 + $0x18] sm:$0xff]  }
 0xa66   : > { %v5755_v43 = vpop.f32.mrb[162].mxu1  ;;  %v11575_v63 = vpop.f32.mrb[19].mxu0  ;;  %v12104_v19 = vld [vmem:[%s16405_s6 + $0x20] sm:$0xff]  }
 0xa67   : > { %v11623_v61 = vpop.f32.mrb[163].mxu1  ;;  %v12107_v63 = vld [vmem:[%s16415_s16 + $0x60] sm:$0xff]  }
 0xa68   : > { %6340 = vmatpush1.bf16.msra.mxu1 %v12107_v63  ;;  %v12108_v61 = vld [vmem:[%s16415_s16 + $0x68] sm:$0xff]  }
 0xa69   : > { %6341 = vmatprep.subr.bf16.mxu1 %v16451_v53 }
 0xa6c   : > { %v5537_v2 = vpop.f32.mrb[20].mxu0  ;;  %6342 = vmatpush1.bf16.msra.mxu1 %v12108_v61  ;;  %v12127_v61 = vld [vmem:[%s16415_s16 + $0x28] sm:$0xff]  }
 0xa6d   : > { %v5760_v28 = vpop.f32.mrb[164].mxu1  ;;  %v11578_v30 = vpop.f32.mrb[21].mxu0  ;;  %6343 = vmatprep.subr.bf16.mxu1 %v16451_v53 }
 0xa6e   : > { %v11626_v38 = vpop.f32.mrb[165].mxu1  ;;  %v5540_v26 = vpop.f32.mrb[22].mxu0  ;;  %v12112_v30 = vld [vmem:[%s16415_s16 + $0x88] sm:$0xff]  }
 0xa6f   : > { %v5763_v52 = vpop.f32.mrb[166].mxu1  ;;  %v11579_v25 = vpop.f32.mrb[23].mxu0  ;;  %v12113_v38 = vld [vmem:[%s16415_s16 + $0x90] sm:$0xff]  }
 0xa70   : > { %v11627_v40 = vpop.f32.mrb[167].mxu1 }
 0xa74   : > { %v5545_v58 = vpop.f32.mrb[24].mxu0 }
 0xa75   : > { %v11582_v32 = vpop.f32.mrb[25].mxu0 }
 0xa76   : > { %v5548_v48 = vpop.f32.mrb[26].mxu0  ;;  %v5768_v12 = vpop.f32.mrb[168].mxu1 }
 0xa77   : > { %v11583_v35 = vpop.f32.mrb[27].mxu0  ;;  %v11630_v10 = vpop.f32.mrb[169].mxu1 }
 0xa78   : > { %v5771_v37 = vpop.f32.mrb[170].mxu1 }
 0xa79   : > { %v11631_v34 = vpop.f32.mrb[171].mxu1 }
 0xa7c   : > { %v5630_v42 = vpop.f32.mrb[28].mxu0 }
 0xa7d   : > { %v5631_v59 = vadd.f32 %v5630_v42, %v5529_v13  ;;  %v11598_v41 = vpop.f32.mrb[29].mxu0  ;;  %v12101_v13 = vld [vmem:[%s16405_s6 + $0x8] sm:$0xff]  }
 0xa7e   : > { %v5633_v7 = vpop.f32.mrb[30].mxu0 }
 0xa7f   : > { %v5774_v54 = vadd.f32 %v5752_v17, %v5631_v59  ;;  %v5634_v55 = vadd.f32 %v5633_v7, %v5532_v11  ;;  %v11599_v21 = vpop.f32.mrb[31].mxu0  ;;  %v12102_v17 = vld [vmem:[%s16405_s6 + $0x10] sm:$0xff]   ;;  %v12105_v11 = vld [vmem:[%s16405_s6 + $0x28] sm:$0xff]  }
 0xa80   : > { %v12117_v59 = vld [vmem:[%s16415_s16 + $0xb0] sm:$0xff]  }
 0xa81   : > { %v5786_v62 = vadd.f32 %v10177_v36, %v5774_v54  ;;  %v5775_v31 = vadd.f32 %v5755_v43, %v5634_v55  ;;  %v12106_v43 = vld [vmem:[%s16405_s6 + $0x30] ss:$0 sps:$4 sm:$0x33]   ;;  %v12118_v55 = vld [vmem:[%s16415_s16 + $0xb8] sm:$0xff]  }
 0xa83   : > { %v5787_v23 = vadd.f32 %v10177_v36, %v5775_v31  ;;  %v5791_v44 = vmax.f32 %v5786_v62, 0.0 }
 0xa84   : > { %v5638_v33 = vpop.f32.mrb[32].mxu0 }
 0xa85   : > { %v5792_v39 = vmax.f32 %v5787_v23, 0.0  ;;  %v5639_v47 = vadd.f32 %v5638_v33, %v5537_v2  ;;  %v11602_v24 = vpop.f32.mrb[33].mxu0  ;;  %v12109_v2 = vld [vmem:[%s16415_s16 + $0x70] sm:$0xff]  }
 0xa86   : > { %v5641_v18 = vpop.f32.mrb[34].mxu0  ;;  %6344 = vmatpush1.bf16.msra.mxu1 %v12109_v2 }
 0xa87   : > { %v5809_v9 = vpack.c.bf16 %v5792_v39, %v5791_v44  ;;  %v5776_v5 = vadd.f32 %v5760_v28, %v5639_v47  ;;  %v5642_v22 = vadd.f32 %v5641_v18, %v5540_v26  ;;  %v11603_v46 = vpop.f32.mrb[35].mxu0  ;;  %6345 = vmatprep.subr.bf16.mxu1 %v16451_v53  ;;  %v12111_v28 = vld [vmem:[%s16415_s16 + $0x80] sm:$0xff]   ;;  %v12114_v26 = vld [vmem:[%s16415_s16 + $0x98] sm:$0xff]  }
 0xa88   : > { %v14677_v39 = vld [vmem:[#allocation2] sm:$0xff] }
 0xa89   : > { %v5788_v45 = vadd.f32 %v10177_v36, %v5776_v5  ;;  %v5777_v60 = vadd.f32 %v5763_v52, %v5642_v22  ;;  %11633 = vmatpush3.bf16.msra.mxu0 %v5809_v9  ;;  %v12115_v52 = vld [vmem:[%s16415_s16 + $0xa0] sm:$0xff]   ;;  %633 = vst.msk [vmem:[#allocation2 + $0x8] sm:$0xff] %vm632_vm13, %v14677_v39  ;;  %635 = vst.msk [vmem:[#allocation2 + $0x18] sm:$0xff] %vm632_vm13, %v14677_v39  ;;  %v12120_v9 = vld [vmem:[%s16415_s16 + $0x8] sm:$0xff]  }
 0xa8a   : > { %11634 = vmatprep.subr.bf16.mxu0 %v14215_v56  ;;  %637 = vst.msk [vmem:[#allocation2 + $0x28] sm:$0xff] %vm632_vm13, %v14677_v39  ;;  %645 = vst.msk [vmem:[#allocation2 + $0x2c8] sm:$0xff] %vm632_vm13, %v14677_v39  ;;  %v12119_v47 = vld [vmem:[%s16415_s16] sm:$0xff]  }
 0xa8b   : > { %v5789_v4 = vadd.f32 %v10177_v36, %v5777_v60  ;;  %v5793_v27 = vmax.f32 %v5788_v45, 0.0  ;;  %647 = vst.msk [vmem:[#allocation2 + $0x2d8] sm:$0xff] %vm632_vm13, %v14677_v39  ;;  %652 = vst.msk [vmem:[#allocation3 + $0x8] sm:$0xff] %vm632_vm13, %v14677_v39 }
 0xa8c   : > { %v5646_v14 = vpop.f32.mrb[36].mxu0  ;;  %654 = vst.msk [vmem:[#allocation3 + $0x18] sm:$0xff] %vm632_vm13, %v14677_v39  ;;  %660 = vst.msk [vmem:[#allocation3 + $0xf8] sm:$0xff] %vm632_vm13, %v14677_v39 }
 0xa8d   : > { %v5794_v16 = vmax.f32 %v5789_v4, 0.0  ;;  %v5647_v20 = vadd.f32 %v5646_v14, %v5545_v58  ;;  %v11606_v3 = vpop.f32.mrb[37].mxu0  ;;  %v12116_v58 = vld [vmem:[%s16415_s16 + $0xa8] sm:$0xff]  }
 0xa8e   : > { %v5649_v8 = vpop.f32.mrb[38].mxu0  ;;  %v12121_v3 = vld [vmem:[%s16415_s16 + $0x10] sm:$0xff]  }
 0xa8f   : > { %v5810_v6 = vpack.c.bf16 %v5794_v16, %v5793_v27  ;;  %v5778_v29 = vadd.f32 %v5768_v12, %v5647_v20  ;;  %v11607_v57 = vpop.f32.mrb[39].mxu0 }
 0xa91   : > { %v5790_v50 = vadd.f32 %v10177_v36, %v5778_v29  ;;  %11635 = vmatpush3.bf16.msra.mxu0 %v5810_v6  ;;  %v12123_v29 = vld [vmem:[%s16415_s16 + $0x18] sm:$0xff]  }
 0xa92   : > { %11636 = vmatprep.subr.bf16.mxu0 %v14215_v56 }
 0xa93   : > { %v5795_v51 = vmax.f32 %v5790_v50, 0.0 }
 0xa95   : > { %v5811_v0 = vpack.c.bf16 %v5795_v51, %v5795_v51 }
 0xa97   : > { %v5868_v49 = vsel %vm4164_vm15, %v5811_v0, 0 }
 0xa98   : > { %11637 = vmatpush3.bf16.msra.mxu0 %v5868_v49 }
 0xa99   : > { %6567 = vmatprep.subr.bf16.mxu0 %v16451_v53 }
 0xa9b   : > { %11639 = vmatmul.mubr.msk.bf16.vlgmr.msra.gmra.mrb[40].mxu0 %vm5845_vm7, %v12100_v15 }
 0xa9c   : > { %11642 = vmatprep.mubr.msk.bf16.mxu0 %vm12219_vm1, %v14215_v56  ;;  %6568 = vmatpush1.bf16.msra.mxu0 %v12119_v47 }
 0xa9d   : > { %6569 = vmatprep.subr.bf16.mxu0 %v16451_v53 }
 0xaa0   : > { %6570 = vmatpush1.bf16.msra.mxu0 %v12120_v9 }
 0xaa1   : > { %6571 = vmatprep.subr.bf16.mxu0 %v16451_v53 }
 0xaa3   : > { %11643 = vmatmul.mubr.msk.bf16.gmra.mrb[44].mxu0 %vm5845_vm7, %v12101_v13 }
 0xaa4   : > { %11646 = vmatprep.mubr.msk.bf16.mxu0 %vm12219_vm1, %v14215_v56  ;;  %6572 = vmatpush1.bf16.msra.mxu0 %v12121_v3 }
 0xaa5   : > { %6573 = vmatprep.subr.bf16.mxu0 %v16451_v53 }
 0xaa8   : > { %6574 = vmatpush1.bf16.msra.mxu0 %v12123_v29 }
 0xaa9   : > { %6575 = vmatprep.subr.bf16.mxu0 %v16451_v53 }
 0xaab   : > { %11647 = vmatmul.mubr.msk.bf16.gmra.mrb[48].mxu0 %vm5845_vm7, %v12102_v17 }
 0xaac   : > { %11650 = vmatprep.mubr.msk.bf16.mxu0 %vm12219_vm1, %v14215_v56 }
 0xab3   : > { %11651 = vmatmul.mubr.msk.bf16.gmra.mrb[52].mxu0 %vm5845_vm7, %v12103_v1 }
 0xab4   : > { %11654 = vmatprep.mubr.msk.bf16.mxu0 %vm12219_vm1, %v14215_v56 }
 0xabb   : > { %11655 = vmatmul.mubr.msk.bf16.gmra.mrb[56].mxu0 %vm5845_vm7, %v12104_v19 }
 0xabc   : > { %11658 = vmatprep.mubr.msk.bf16.mxu0 %vm12219_vm1, %v14215_v56 }
 0xac3   : > { %11659 = vmatmul.mubr.msk.bf16.gmra.mrb[60].mxu0 %vm5845_vm7, %v12105_v11  ;;  %v12125_v11 = vld [vmem:[%s16415_s16 + $0x20] sm:$0xff]  }
 0xac4   : > { %11662 = vmatprep.mubr.msk.bf16.mxu0 %vm12219_vm1, %v14215_v56  ;;  %v12110_v56 = vld [vmem:[%s16415_s16 + $0x78] sm:$0xff]   ;;  %6576 = vmatpush1.bf16.msra.mxu0 %v12125_v11  ;;  %v12124_v11 = vld [vmem:[%s16415_s16 + $0xc8] sm:$0xff]  }
 0xac5   : > { %6346 = vmatpush1.bf16.msra.mxu1 %v12110_v56  ;;  %6577 = vmatprep.subr.bf16.mxu0 %v16451_v53 }
 0xac6   : > { %6347 = vmatprep.subr.bf16.mxu1 %v16451_v53 }
 0xac8   : > { %6578 = vmatpush1.bf16.msra.mxu0 %v12127_v61 }
 0xac9   : > { %6348 = vmatpush1.bf16.msra.mxu1 %v12111_v28  ;;  %6579 = vmatprep.subr.bf16.mxu0 %v16451_v53 }
 0xaca   : > { %6349 = vmatprep.subr.bf16.mxu1 %v16451_v53 }
 0xacb   : > { %11663 = vmatmul.mubr.msk.bf16.gmra.mrb[64].mxu0 %vm5845_vm7, %v12106_v43  ;;  %vm6049_vm7 = vcmask 1045248  }
 0xacd   : > { %6350 = vmatpush1.bf16.msra.mxu1 %v12112_v30 }
 0xace   : > { %6351 = vmatprep.subr.bf16.mxu1 %v16451_v53 }
 0xad1   : > { %6352 = vmatpush1.bf16.msra.mxu1 %v12113_v38 }
 0xad2   : > { %6353 = vmatprep.subr.bf16.mxu1 %v16451_v53 }
 0xad5   : > { %6354 = vmatpush1.bf16.msra.mxu1 %v12114_v26 }
 0xad6   : > { %6355 = vmatprep.subr.bf16.mxu1 %v16451_v53 }
 0xad9   : > { %6356 = vmatpush1.bf16.msra.mxu1 %v12115_v52 }
 0xada   : > { %6357 = vmatprep.subr.bf16.mxu1 %v16451_v53 }
 0xadd   : > { %6358 = vmatpush1.bf16.msra.mxu1 %v12116_v58 }
 0xade   : > { %6359 = vmatprep.subr.bf16.mxu1 %v16451_v53 }
 0xae1   : > { %6360 = vmatpush1.bf16.msra.mxu1 %v12117_v59 }
 0xae2   : > { %6361 = vmatprep.subr.bf16.mxu1 %v16451_v53 }
 0xae5   : > { %6362 = vmatpush1.bf16.msra.mxu1 %v12118_v55 }
 0xae6   : > { %6860 = vmatprep.subr.bf16.mxu1 %v16451_v53 }
 0xb6e   : > { %v14648_v25 = vpop.f32.mrb[40].mxu0 }
 0xb6f   : > { %6051 = vst.msk [vmem:[#allocation3 + $0x28] sm:$0xff] %vm2276_vm6, %v14648_v25  ;;  %v11640_v40 = vpop.f32.mrb[41].mxu0  ;;  %v5971_v48 = vrot.slane %v14648_v25, 7  ;;  %v6064_v12 = vrot.slane %v14648_v25, 1 }
 0xb70   : > { %v5907_v32 = vpop.f32.mrb[42].mxu0 }
 0xb71   : > { %v5972_v35 = vrot.slane %v5907_v32, 7  ;;  %6052 = vst.msk [vmem:[#allocation3 + $0x38] sm:$0xff] %vm2276_vm6, %v5907_v32  ;;  %v6065_v10 = vrot.slane %v5907_v32, 1  ;;  %v11641_v37 = vpop.f32.mrb[43].mxu0 }
 0xb72   : > { %v12131_v37 = vld [vmem:[%s16415_s16 + $0x38] sm:$0xff]  }
 0xb73   : > { %v6066_v34 = vsel %vm2484_vm4, %v6064_v12, %v6065_v10  ;;  %v5973_v42 = vsel %vm2151_vm5, %v5971_v48, %v5972_v35 }
 0xb74   : > { %6091 = vrot.lane.b32.xlu1 %v6066_v34, %s16450_s27 }
 0xb76   : > { %v5912_v41 = vpop.f32.mrb[44].mxu0 }
 0xb77   : > { %v5974_v36 = vrot.slane %v5912_v41, 7  ;;  %6053 = vst.msk [vmem:[#allocation3 + $0x48] sm:$0xff] %vm2276_vm6, %v5912_v41  ;;  %v6067_v7 = vrot.slane %v5912_v41, 1  ;;  %v11644_v54 = vpop.f32.mrb[45].mxu0 }
 0xb78   : > { %5996 = vrot.lane.b32.xlu1 %v5971_v48, %s16430_s28  ;;  %v5915_v21 = vpop.f32.mrb[46].mxu0  ;;  %v12129_v48 = vld [vmem:[%s16415_s16 + $0x30] sm:$0xff]  }
 0xb79   : > { %v5976_v62 = vrot.slane %v5915_v21, 7  ;;  %6054 = vst.msk [vmem:[#allocation3 + $0x58] sm:$0xff] %vm2276_vm6, %v5915_v21  ;;  %v6069_v31 = vrot.slane %v5915_v21, 1  ;;  %v6068_v23 = vsel %vm2484_vm4, %v6065_v10, %v6067_v7  ;;  %v11645_v33 = vpop.f32.mrb[47].mxu0  ;;  %v5975_v44 = vsel %vm2151_vm5, %v5972_v35, %v5974_v36  ;;  %6580 = vmatpush1.bf16.msra.mxu0 %v12129_v48 }
 0xb7a   : > { %6093 = vrot.lane.b32.xlu0 %v6068_v23, %s16450_s27  ;;  %6581 = vmatprep.subr.bf16.mxu0 %v16451_v53 }
 0xb7b   : > { %v6070_v24 = vsel %vm2484_vm4, %v6067_v7, %v6069_v31  ;;  %v5977_v18 = vsel %vm2151_vm5, %v5974_v36, %v5976_v62 }
 0xb7c   : > { %6095 = vrot.lane.b32.xlu1 %v6070_v24, %s16450_s27 }
 0xb7d   : > { %6582 = vmatpush1.bf16.msra.mxu0 %v12131_v37 }
 0xb7e   : > { %5998 = vrot.lane.b32.xlu0 %v5973_v42, %s16430_s28  ;;  %v5920_v5 = vpop.f32.mrb[48].mxu0  ;;  %6583 = vmatprep.subr.bf16.mxu0 %v16451_v53 }
 0xb7f   : > { %v5978_v22 = vrot.slane %v5920_v5, 7  ;;  %6055 = vst.msk [vmem:[#allocation3 + $0x68] sm:$0xff] %vm2276_vm6, %v5920_v5  ;;  %v6071_v46 = vrot.slane %v5920_v5, 1  ;;  %v11648_v45 = vpop.f32.mrb[49].mxu0  ;;  %v12137_v5 = vld [vmem:[%s16415_s16 + $0x50] sm:$0xff]  }
 0xb80   : > { %6000 = vrot.lane.b32.xlu1 %v5975_v44, %s16430_s28  ;;  %v5923_v60 = vpop.f32.mrb[50].mxu0  ;;  %v12135_v44 = vld [vmem:[%s16415_s16 + $0x48] sm:$0xff]  }
 0xb81   : > { %v5980_v4 = vrot.slane %v5923_v60, 7  ;;  %6056 = vst.msk [vmem:[#allocation3 + $0x78] sm:$0xff] %vm2276_vm6, %v5923_v60  ;;  %v6073_v14 = vrot.slane %v5923_v60, 1  ;;  %v6072_v27 = vsel %vm2484_vm4, %v6069_v31, %v6071_v46  ;;  %v11649_v16 = vpop.f32.mrb[51].mxu0  ;;  %v5979_v20 = vsel %vm2151_vm5, %v5976_v62, %v5978_v22  ;;  %v12133_v31 = vld [vmem:[%s16415_s16 + $0x40] sm:$0xff]  }
 0xb82   : > { %6097 = vrot.lane.b32.xlu0 %v6072_v27, %s16450_s27  ;;  %6584 = vmatpush1.bf16.msra.mxu0 %v12133_v31 }
 0xb83   : > { %v6074_v8 = vsel %vm2484_vm4, %v6071_v46, %v6073_v14  ;;  %v5981_v6 = vsel %vm2151_vm5, %v5978_v22, %v5980_v4  ;;  %6585 = vmatprep.subr.bf16.mxu0 %v16451_v53 }
 0xb84   : > { %6099 = vrot.lane.b32.xlu1 %v6074_v8, %s16450_s27 }
 0xb86   : > { %6002 = vrot.lane.b32.xlu0 %v5977_v18, %s16430_s28  ;;  %v5928_v57 = vpop.f32.mrb[52].mxu0  ;;  %6586 = vmatpush1.bf16.msra.mxu0 %v12135_v44 }
 0xb87   : > { %v5982_v50 = vrot.slane %v5928_v57, 7  ;;  %6057 = vst.msk [vmem:[#allocation3 + $0x88] sm:$0xff] %vm2276_vm6, %v5928_v57  ;;  %v6075_v51 = vrot.slane %v5928_v57, 1  ;;  %v11652_v0 = vpop.f32.mrb[53].mxu0  ;;  %6587 = vmatprep.subr.bf16.mxu0 %v16451_v53 }
 0xb88   : > { %6004 = vrot.lane.b32.xlu1 %v5979_v20, %s16430_s28  ;;  %v5931_v49 = vpop.f32.mrb[54].mxu0 }
 0xb89   : > { %v5984_v15 = vrot.slane %v5931_v49, 7  ;;  %6058 = vst.msk [vmem:[#allocation3 + $0x98] sm:$0xff] %vm2276_vm6, %v5931_v49  ;;  %v6077_v13 = vrot.slane %v5931_v49, 1  ;;  %v6076_v17 = vsel %vm2484_vm4, %v6073_v14, %v6075_v51  ;;  %v11653_v1 = vpop.f32.mrb[55].mxu0  ;;  %v5983_v19 = vsel %vm2151_vm5, %v5980_v4, %v5982_v50  ;;  %v12139_v4 = vld [vmem:[%s16415_s16 + $0x58] sm:$0xff]   ;;  %v12122_v49 = vld [vmem:[%s16415_s16 + $0xc0] sm:$0xff]  }
 0xb8a   : > { %6101 = vrot.lane.b32.xlu0 %v6076_v17, %s16450_s27  ;;  %6588 = vmatpush1.bf16.msra.mxu0 %v12137_v5  ;;  %v12136_v5 = vld [vmem:[%s16415_s16 + $0xf8] sm:$0xff]  }
 0xb8b   : > { %v6078_v43 = vsel %vm2484_vm4, %v6075_v51, %v6077_v13  ;;  %v5985_v63 = vsel %vm2151_vm5, %v5982_v50, %v5984_v15  ;;  %6589 = vmatprep.subr.bf16.mxu0 %v16451_v53 }
 0xb8c   : > { %6103 = vrot.lane.b32.xlu1 %v6078_v43, %s16450_s27 }
 0xb8e   : > { %6006 = vrot.lane.b32.xlu0 %v5981_v6, %s16430_s28  ;;  %v5936_v2 = vpop.f32.mrb[56].mxu0  ;;  %6590 = vmatpush1.bf16.msra.mxu0 %v12139_v4 }
 0xb8f   : > { %v5986_v56 = vrot.slane %v5936_v2, 7  ;;  %6059 = vst.msk [vmem:[#allocation3 + $0xa8] sm:$0xff] %vm2276_vm6, %v5936_v2  ;;  %v6079_v28 = vrot.slane %v5936_v2, 1  ;;  %v11656_v30 = vpop.f32.mrb[57].mxu0  ;;  %11666 = vmatprep.subr.bf16.mxu0 %v14677_v39 }
 0xb90   : > { %6008 = vrot.lane.b32.xlu1 %v5983_v19, %s16430_s28  ;;  %v5939_v38 = vpop.f32.mrb[58].mxu0 }
 0xb91   : > { %v5988_v26 = vrot.slane %v5939_v38, 7  ;;  %6060 = vst.msk [vmem:[#allocation3 + $0xb8] sm:$0xff] %vm2276_vm6, %v5939_v38  ;;  %v6081_v52 = vrot.slane %v5939_v38, 1  ;;  %v6080_v40 = vsel %vm2484_vm4, %v6077_v13, %v6079_v28  ;;  %v11657_v58 = vpop.f32.mrb[59].mxu0  ;;  %v5987_v32 = vsel %vm2151_vm5, %v5984_v15, %v5986_v56 }
 0xb92   : > { %6105 = vrot.lane.b32.xlu0 %v6080_v40, %s16450_s27  ;;  %v12128_v58 = vld [vmem:[%s16415_s16 + $0xd8] sm:$0xff]  }
 0xb93   : > { %v6082_v35 = vsel %vm2484_vm4, %v6079_v28, %v6081_v52  ;;  %v5989_v10 = vsel %vm2151_vm5, %v5986_v56, %v5988_v26  ;;  %v12126_v28 = vld [vmem:[%s16415_s16 + $0xd0] sm:$0xff]  }
 0xb94   : > { %6107 = vrot.lane.b32.xlu1 %v6082_v35, %s16450_s27 }
 0xb96   : > { %6010 = vrot.lane.b32.xlu0 %v5985_v63, %s16430_s28  ;;  %v5944_v34 = vpop.f32.mrb[60].mxu0 }
 0xb97   : > { %v5990_v42 = vrot.slane %v5944_v34, 7  ;;  %6061 = vst.msk [vmem:[#allocation3 + $0xc8] sm:$0xff] %vm2276_vm6, %v5944_v34  ;;  %v6083_v59 = vrot.slane %v5944_v34, 1  ;;  %v11660_v41 = vpop.f32.mrb[61].mxu0  ;;  %v12130_v34 = vld [vmem:[%s16415_s16 + $0xe0] sm:$0xff]  }
 0xb98   : > { %6012 = vrot.lane.b32.xlu1 %v5987_v32, %s16430_s28  ;;  %v5947_v36 = vpop.f32.mrb[62].mxu0 }
 0xb99   : > { %v5992_v7 = vrot.slane %v5947_v36, 7  ;;  %6062 = vst.msk [vmem:[#allocation3 + $0xd8] sm:$0xff] %vm2276_vm6, %v5947_v36  ;;  %v6085_v54 = vrot.slane %v5947_v36, 1  ;;  %v6084_v55 = vsel %vm2484_vm4, %v6081_v52, %v6083_v59  ;;  %v11661_v21 = vpop.f32.mrb[63].mxu0  ;;  %v5991_v62 = vsel %vm2151_vm5, %v5988_v26, %v5990_v42 }
 0xb9a   : > { %6109 = vrot.lane.b32.xlu0 %v6084_v55, %s16450_s27 }
 0xb9b   : > { %v6086_v23 = vsel %vm2484_vm4, %v6083_v59, %v6085_v54  ;;  %v5993_v33 = vsel %vm2151_vm5, %v5990_v42, %v5992_v7 }
 0xb9c   : > { %6111 = vrot.lane.b32.xlu1 %v6086_v23, %s16450_s27 }
 0xb9e   : > { %6014 = vrot.lane.b32.xlu0 %v5989_v10, %s16430_s28  ;;  %v5952_v47 = vpop.f32.mrb[64].mxu0 }
 0xb9f   : > { %v5994_v24 = vrot.slane %v5952_v47, 7  ;;  %6063 = vst.msk [vmem:[#allocation3 + $0xe8] sm:$0xf] %vm5361_vm10, %v5952_v47  ;;  %v6087_v18 = vrot.slane %v5952_v47, 1  ;;  %v11664_v9 = vpop.f32.mrb[65].mxu0 }
 0xba0   : > { %6016 = vrot.lane.b32.xlu1 %v5991_v62, %s16430_s28  ;;  %v5955_v22 = vpop.f32.mrb[66].mxu0 }
 0xba1   : > { %v6088_v46 = vsel %vm2484_vm4, %v6085_v54, %v6087_v18  ;;  %v5995_v45 = vsel %vm2151_vm5, %v5992_v7, %v5994_v24  ;;  %v11665_v60 = vpop.f32.mrb[67].mxu0  ;;  %v12132_v54 = vld [vmem:[%s16415_s16 + $0xe8] sm:$0xff]  }
 0xba2   : > { %6113 = vrot.lane.b32.xlu0 %v6088_v46, %s16450_s27 }
 0xba4   : > { %6115 = vrot.lane.b32.xlu1 %v6087_v18, %s16450_s27 }
 0xba6   : > { %6018 = vrot.lane.b32.xlu0 %v5993_v33, %s16430_s28  ;;  %v12134_v33 = vld [vmem:[%s16415_s16 + $0xf0] sm:$0xff]  }
 0xba8   : > { %6089 = vrot.lane.b32.xlu1 %v6064_v12, %s16450_s27 }
 0xbaa   : > { %6020 = vrot.lane.b32.xlu0 %v5995_v45, %s16430_s28 }
 0xbe6   : > { %v6092_v14 = vpop.permute.xlu1 %6091 }
 0xbe7   : > { %6133 = vst.msk [vmem:[#allocation3 + $0x28] sm:$0xff] %vm2441_vm8, %v6092_v14  ;;  %v12138_v14 = vld [vmem:[%s16415_s16 + $0x100] sm:$0xff]  }
 0xbea   : > { %v5997_v27 = vpop.permute.xlu1 %5996 }
 0xbeb   : > { %6036 = vst.msk [vmem:[#allocation3 + $0x20] sm:$0xfe] %vm6035_vm0, %v5997_v27 }
 0xbec   : > { %v6094_v16 = vpop.permute.xlu0 %6093 }
 0xbed   : > { %6134 = vst.msk [vmem:[#allocation3 + $0x38] sm:$0xff] %vm2441_vm8, %v6094_v16 }
 0xbee   : > { %v6096_v20 = vpop.permute.xlu1 %6095  ;;  %v6152_v8 = vld [vmem:[#allocation3 + $0x28] sm:$0xff] }
 0xbef   : > { %6135 = vst.msk [vmem:[#allocation3 + $0x48] sm:$0xff] %vm2441_vm8, %v6096_v20 }
 0xbf0   : > { %v5999_v25 = vpop.permute.xlu0 %5998 }
 0xbf1   : > { %6038 = vst.msk [vmem:[#allocation3 + $0x30] sm:$0xff] %vm6037_vm3, %v5999_v25 }
 0xbf2   : > { %v6001_v12 = vpop.permute.xlu1 %6000  ;;  %v6151_v51 = vld [vmem:[#allocation3 + $0x20] sm:$0xff] }
 0xbf3   : > { %6039 = vst.msk [vmem:[#allocation3 + $0x40] sm:$0xff] %vm6037_vm3, %v6001_v12 }
 0xbf4   : > { %v6098_v3 = vpop.permute.xlu0 %6097  ;;  %v6154_v6 = vld [vmem:[#allocation3 + $0x38] sm:$0xff] }
 0xbf5   : > { %6136 = vst.msk [vmem:[#allocation3 + $0x58] sm:$0xff] %vm2441_vm8, %v6098_v3  ;;  %v14807_v29 = vpack.c.bf16 %v6154_v6, %v6152_v8  ;;  %v12140_v3 = vld [vmem:[%s16415_s16 + $0x108] sm:$0xff]   ;;  %v6147_v6 = vld [vmem:[#allocation3] sm:$0xc0] }
 0xbf6   : > { %v6100_v57 = vpop.permute.xlu1 %6099  ;;  %v14820_v1 = vld [vmem:[#allocation3 + $0x48] sm:$0xff] }
 0xbf7   : > { %6137 = vst.msk [vmem:[#allocation3 + $0x68] sm:$0xff] %vm2441_vm8, %v6100_v57  ;;  %10228 = vmatprep.mubr.msk.bf16.mxu1 %vm632_vm13, %v14807_v29  ;;  %v6149_v57 = vld [vmem:[#allocation3 + $0x10] sm:$0xff] }
 0xbf8   : > { %v6003_v50 = vpop.permute.xlu0 %6002  ;;  %v6153_v0 = vld [vmem:[#allocation3 + $0x30] sm:$0xff] }
 0xbf9   : > { %6040 = vst.msk [vmem:[#allocation3 + $0x50] sm:$0xff] %vm6037_vm3, %v6003_v50  ;;  %v14816_v15 = vpack.c.bf16 %v6153_v0, %v6151_v51  ;;  %v6148_v51 = vld [vmem:[#allocation3 + $0x8] sm:$0xc0] }
 0xbfa   : > { %v6005_v13 = vpop.permute.xlu1 %6004  ;;  %v14836_v2 = vld [vmem:[#allocation3 + $0x40] sm:$0xff] }
 0xbfb   : > { %6041 = vst.msk [vmem:[#allocation3 + $0x60] sm:$0xff] %vm6037_vm3, %v6005_v13  ;;  %6372 = vmatmul.mubr.bf16.vlgmr.msra.gmra.mrb[172].mxu1 %v14816_v15  ;;  %v12141_v13 = vld [vmem:[%s16415_s16 + $0x110] sm:$0xff]  }
 0xbfc   : > { %v6102_v17 = vpop.permute.xlu0 %6101  ;;  %v14822_v19 = vld [vmem:[#allocation3 + $0x58] sm:$0xff]  ;;  %6861 = vmatpush1.bf16.msra.mxu1 %v12122_v49 }
 0xbfd   : > { %6138 = vst.msk [vmem:[#allocation3 + $0x78] sm:$0xff] %vm2441_vm8, %v6102_v17  ;;  %v14830_v43 = vpack.c.bf16 %v14822_v19, %v14820_v1  ;;  %6862 = vmatprep.subr.bf16.mxu1 %v16451_v53 }
 0xbfe   : > { %v6104_v63 = vpop.permute.xlu1 %6103  ;;  %v14851_v52 = vld [vmem:[#allocation3 + $0x68] sm:$0xff] }
 0xbff   : > { %6139 = vst.msk [vmem:[#allocation3 + $0x88] sm:$0xff] %vm2441_vm8, %v6104_v63  ;;  %10229 = vmatprep.mubr.msk.bf16.mxu1 %vm632_vm13, %v14830_v43 }
 0xc00   : > { %v6007_v61 = vpop.permute.xlu0 %6006  ;;  %v14838_v56 = vld [vmem:[#allocation3 + $0x50] sm:$0xff]  ;;  %6863 = vmatpush1.bf16.msra.mxu1 %v12124_v11  ;;  %v6175_v11 = vpack.c.bf16 %v6149_v57, %v6147_v6 }
 0xc01   : > { %6042 = vst.msk [vmem:[#allocation3 + $0x70] sm:$0xff] %vm6037_vm3, %v6007_v61  ;;  %v14846_v30 = vpack.c.bf16 %v14838_v56, %v14836_v2  ;;  %6864 = vmatprep.subr.bf16.mxu1 %v16451_v53 }
 0xc02   : > { %v6009_v38 = vpop.permute.xlu1 %6008  ;;  %v14867_v10 = vld [vmem:[#allocation3 + $0x60] sm:$0xff] }
 0xc03   : > { %6043 = vst.msk [vmem:[#allocation3 + $0x80] sm:$0xff] %vm6037_vm3, %v6009_v38  ;;  %6380 = vmatmul.mubr.bf16.gmra.mrb[176].mxu1 %v14846_v30  ;;  %v6684_v38 = vpack.c.bf16 %v14851_v52, %v14822_v19  ;;  %v6441_v19 = vrot.slane %v6175_v11, 3 }
 0xc04   : > { %v6106_v26 = vpop.permute.xlu0 %6105  ;;  %v14853_v40 = vld [vmem:[#allocation3 + $0x78] sm:$0xff]  ;;  %6865 = vmatpush1.bf16.msra.mxu1 %v12126_v28 }
 0xc05   : > { %6140 = vst.msk [vmem:[#allocation3 + $0x98] sm:$0xff] %vm2441_vm8, %v6106_v26  ;;  %v14861_v32 = vpack.c.bf16 %v14853_v40, %v14851_v52  ;;  %6866 = vmatprep.subr.bf16.mxu1 %v16451_v53  ;;  %v6442_v26 = vrot.slane %v14816_v15, 3 }
 0xc06   : > { %v6108_v48 = vpop.permute.xlu1 %6107  ;;  %v14882_v36 = vld [vmem:[#allocation3 + $0x88] sm:$0xff] }
 0xc07   : > { %6141 = vst.msk [vmem:[#allocation3 + $0xa8] sm:$0xff] %vm2441_vm8, %v6108_v48  ;;  %10230 = vmatprep.mubr.msk.bf16.mxu1 %vm632_vm13, %v14861_v32  ;;  %v6656_v48 = vld [vmem:[#allocation3 + $0x38] sm:$0xfc] }
 0xc08   : > { %v6011_v35 = vpop.permute.xlu0 %6010  ;;  %v14869_v37 = vld [vmem:[#allocation3 + $0x70] sm:$0xff]  ;;  %6867 = vmatpush1.bf16.msra.mxu1 %v12128_v58  ;;  %v12142_v58 = vld [vmem:[%s16415_s16 + $0x118] sm:$0xff]  }
 0xc09   : > { %6044 = vst.msk [vmem:[#allocation3 + $0x90] sm:$0xff] %vm6037_vm3, %v6011_v35  ;;  %v14877_v42 = vpack.c.bf16 %v14869_v37, %v14867_v10  ;;  %6868 = vmatprep.subr.bf16.mxu1 %v16451_v53 }
 0xc0a   : > { %v6013_v59 = vpop.permute.xlu1 %6012  ;;  %v14898_v31 = vld [vmem:[#allocation3 + $0x80] sm:$0xff] }
 0xc0b   : > { %6045 = vst.msk [vmem:[#allocation3 + $0xa0] sm:$0xff] %vm6037_vm3, %v6013_v59  ;;  %6388 = vmatmul.mubr.bf16.gmra.mrb[180].mxu1 %v14877_v42  ;;  %v6449_v59 = vrot.slane %v14830_v43, 3 }
 0xc0c   : > { %v6110_v41 = vpop.permute.xlu0 %6109  ;;  %v14884_v7 = vld [vmem:[#allocation3 + $0x98] sm:$0xff]  ;;  %6869 = vmatpush1.bf16.msra.mxu1 %v12130_v34  ;;  %v6445_v34 = vrot.slane %v14807_v29, 3 }
 0xc0d   : > { %6142 = vst.msk [vmem:[#allocation3 + $0xb8] sm:$0xff] %vm2441_vm8, %v6110_v41  ;;  %v14892_v55 = vpack.c.bf16 %v14884_v7, %v14882_v36  ;;  %6870 = vmatprep.subr.bf16.mxu1 %v16451_v53  ;;  %v6682_v41 = vpack.c.bf16 %v14820_v1, %v6656_v48  ;;  %v6683_v1 = vpack.c.bf16 %v14867_v10, %v14838_v56 }
 0xc0e   : > { %v6112_v21 = vpop.permute.xlu1 %6111  ;;  %v14913_v18 = vld [vmem:[#allocation3 + $0xa8] sm:$0xff]  ;;  %v6450_v29 = vsel %vm3169_vm14, %v6445_v34, %v6449_v59 }
 0xc0f   : > { %6143 = vst.msk [vmem:[#allocation3 + $0xc8] sm:$0xff] %vm2441_vm8, %v6112_v21  ;;  %10231 = vmatprep.mubr.msk.bf16.mxu1 %vm632_vm13, %v14892_v55  ;;  %v6443_v21 = vsel %vm3169_vm14, %v6441_v19, %v6442_v26 }
 0xc10   : > { %v6015_v62 = vpop.permute.xlu0 %6014  ;;  %v14900_v23 = vld [vmem:[#allocation3 + $0x90] sm:$0xff]  ;;  %6871 = vmatpush1.bf16.msra.mxu1 %v12132_v54  ;;  %v6738_v54 = vrot.slane %v6684_v38, 1 }
 0xc11   : > { %6046 = vst.msk [vmem:[#allocation3 + $0xb0] sm:$0xff] %vm6037_vm3, %v6015_v62  ;;  %v14908_v44 = vpack.c.bf16 %v14900_v23, %v14898_v31  ;;  %6872 = vmatprep.subr.bf16.mxu1 %v16451_v53 }
 0xc12   : > { %v6017_v47 = vpop.permute.xlu1 %6016  ;;  %v14929_v60 = vld [vmem:[#allocation3 + $0xa0] sm:$0xff] }
 0xc13   : > { %6047 = vst.msk [vmem:[#allocation3 + $0xc0] sm:$0xff] %vm6037_vm3, %v6017_v47  ;;  %6396 = vmatmul.mubr.bf16.gmra.mrb[184].mxu1 %v14908_v44  ;;  %v6655_v47 = vld [vmem:[#allocation3 + $0x30] sm:$0xfc] }
 0xc14   : > { %v6114_v24 = vpop.permute.xlu0 %6113  ;;  %v14915_v9 = vld [vmem:[#allocation3 + $0xb8] sm:$0xff]  ;;  %6873 = vmatpush1.bf16.msra.mxu1 %v12134_v33  ;;  %v6737_v33 = vrot.slane %v6682_v41, 1 }
 0xc15   : > { %6144 = vst.msk [vmem:[#allocation3 + $0xd8] sm:$0xff] %vm2441_vm8, %v6114_v24  ;;  %v14923_v22 = vpack.c.bf16 %v14915_v9, %v14913_v18  ;;  %6874 = vmatprep.subr.bf16.mxu1 %v16451_v53  ;;  %v6686_v24 = vpack.c.bf16 %v14882_v36, %v14853_v40  ;;  %v6685_v40 = vpack.c.bf16 %v14898_v31, %v14869_v37  ;;  %v6457_v36 = vrot.slane %v14892_v55, 3 }
 0xc16   : > { %v6116_v46 = vpop.permute.xlu1 %6115  ;;  %v14944_v25 = vld [vmem:[#allocation3 + $0xc8] sm:$0xff]  ;;  %v6739_v43 = vsel %vm2484_vm4, %v6737_v33, %v6738_v54  ;;  %v6455_v55 = vrot.slane %v14908_v44, 3 }
 0xc17   : > { %6146 = vst.msk [vmem:[#allocation3 + $0xe8] sm:$0x7] %vm6145_vm12, %v6116_v46  ;;  %10232 = vmatprep.mubr.msk.bf16.mxu1 %vm632_vm13, %v14923_v22  ;;  %v6681_v46 = vpack.c.bf16 %v14836_v2, %v6655_v47 }
 0xc18   : > { %v6019_v45 = vpop.permute.xlu0 %6018  ;;  %v14931_v4 = vld [vmem:[#allocation3 + $0xb0] sm:$0xff]  ;;  %6875 = vmatpush1.bf16.msra.mxu1 %v12136_v5  ;;  %v6447_v5 = vrot.slane %v14846_v30, 3  ;;  %v6688_v30 = vpack.c.bf16 %v14913_v18, %v14884_v7  ;;  %v6690_v7 = vpack.c.bf16 %v14944_v25, %v14915_v9  ;;  %v6461_v18 = vrot.slane %v14923_v22, 3 }
 0xc19   : > { %6048 = vst.msk [vmem:[#allocation3 + $0xd0] sm:$0xff] %vm6037_vm3, %v6019_v45  ;;  %v14939_v27 = vpack.c.bf16 %v14931_v4, %v14929_v60  ;;  %6876 = vmatprep.subr.bf16.mxu1 %v16451_v53  ;;  %v6453_v45 = vrot.slane %v14861_v32, 3  ;;  %v6734_v56 = vrot.slane %v6681_v46, 1  ;;  %v6451_v32 = vrot.slane %v14877_v42, 3 }
 0xc1a   : > { %v6090_v16 = vpop.permute.xlu1 %6089  ;;  %v14956_v0 = vld [vmem:[#allocation3 + $0xc0] sm:$0xff]  ;;  %v6746_v6 = vrot.slane %v6688_v30, 1 }
 0xc1b   : > { %6132 = vst.msk [vmem:[#allocation3 + $0x18] sm:$0x80] %vm6131_vm9, %v6090_v16  ;;  %6404 = vmatmul.mubr.bf16.gmra.mrb[188].mxu1 %v14939_v27  ;;  %v6742_v16 = vrot.slane %v6686_v24, 1  ;;  %v6454_v10 = vsel %vm3169_vm14, %v6449_v59, %v6453_v45  ;;  %v6452_v57 = vsel %vm3169_vm14, %v6447_v5, %v6451_v32  ;;  %v6458_v37 = vsel %vm3169_vm14, %v6453_v45, %v6457_v36 }
 0xc1c   : > { %v6021_v20 = vpop.permute.xlu0 %6020  ;;  %v14946_v12 = vld [vmem:[#allocation3 + $0xd8] sm:$0xff]  ;;  %6877 = vmatpush1.bf16.msra.mxu1 %v12138_v14  ;;  %v6735_v14 = vrot.slane %v6683_v1, 1  ;;  %v6456_v11 = vsel %vm3169_vm14, %v6451_v32, %v6455_v55  ;;  %v6689_v44 = vpack.c.bf16 %v14956_v0, %v14931_v4 }
 0xc1d   : > { %6050 = vst.msk [vmem:[#allocation3 + $0xe0] sm:$0x1f] %vm6049_vm7, %v6021_v20  ;;  %v6218_v8 = vpack.c.bf16 %v14946_v12, %v14944_v25  ;;  %6878 = vmatprep.subr.bf16.mxu1 %v16451_v53  ;;  %v6448_v20 = vsel %vm3169_vm14, %v6442_v26, %v6447_v5  ;;  %v6743_v2 = vsel %vm2484_vm4, %v6738_v54, %v6742_v16 }
 0xc1e   : > { %v6216_v50 = vld [vmem:[#allocation3 + $0xe8] sm:$0xf]  ;;  %v6747_v42 = vsel %vm2484_vm4, %v6742_v16, %v6746_v6 }
 0xc1f   : > { %10233 = vmatprep.mubr.msk.bf16.mxu1 %vm632_vm13, %v6218_v8  ;;  %v6220_v63 = vpack.c.bf16 %v6216_v50, %v6216_v50  ;;  %v6740_v8 = vrot.slane %v6685_v40, 1  ;;  %v6687_v50 = vpack.c.bf16 %v14929_v60, %v14900_v23  ;;  %v6678_v23 = vld [vmem:[#allocation3 + $0xe8] sm:$0xff]  ;;  %v6462_v60 = vsel %vm3169_vm14, %v6457_v36, %v6461_v18 }
 0xc20   : > { %v14958_v49 = vld [vmem:[#allocation3 + $0xd0] sm:$0xff]  ;;  %6879 = vmatpush1.bf16.msra.mxu1 %v12140_v3  ;;  %v6736_v3 = vsel %vm2484_vm4, %v6734_v56, %v6735_v14  ;;  %v6692_v22 = vpack.c.bf16 %v6678_v23, %v14946_v12 }
 0xc21   : > { %v6217_v17 = vpack.c.bf16 %v14958_v49, %v14956_v0  ;;  %6880 = vmatprep.subr.bf16.mxu1 %v16451_v53  ;;  %v6741_v31 = vsel %vm2484_vm4, %v6735_v14, %v6740_v8  ;;  %v6173_v38 = vld [vmem:[#allocation3 + $0xd0] sm:$0x3] }
 0xc22   : > { %v6150_v61 = vld [vmem:[#allocation3 + $0x18] sm:$0xff]  ;;  %v6187_v4 = vpack.c.bf16 %v6173_v38, %v14956_v0  ;;  %v6679_v0 = vld [vmem:[#allocation3 + $0xf0] sm:$0x3f] }
 0xc23   : > { %6412 = vmatmul.mubr.bf16.gmra.mrb[192].mxu1 %v6217_v17  ;;  %v6176_v28 = vpack.c.bf16 %v6150_v61, %v6148_v51  ;;  %v6744_v51 = vrot.slane %v6687_v50, 1  ;;  %v6750_v17 = vrot.slane %v6690_v7, 1  ;;  %v15059_v38 = vld [vmem:[%s16416_s17] ss:$0 sm:$0xff] }
 0xc24   : > { %10234 = vmatprep.mubr.msk.bf16.mxu1 %vm632_vm13, %v6220_v63  ;;  %6881 = vmatpush1.bf16.msra.mxu1 %v12141_v13  ;;  %v6215_v52 = vld [vmem:[#allocation3 + $0xe0] sm:$0xf]  ;;  %v6174_v13 = vld [vmem:[#allocation3 + $0xd8] sm:$0x3] }
 0xc25   : > { %v6444_v35 = vrot.slane %v6176_v28, 3  ;;  %6882 = vmatprep.subr.bf16.mxu1 %v16451_v53  ;;  %v6219_v62 = vpack.c.bf16 %v6215_v52, %v6215_v52  ;;  %v6188_v63 = vpack.c.bf16 %v6174_v13, %v14944_v25  ;;  %v6745_v61 = vsel %vm2484_vm4, %v6740_v8, %v6744_v51  ;;  %v6677_v48 = vld [vmem:[#allocation3 + $0xe0] sm:$0xff] }
 0xc26   : > { %v6751_v9 = vsel %vm2484_vm4, %v6746_v6, %v6750_v17  ;;  %v6459_v28 = vrot.slane %v14939_v27, 3  ;;  %v6754_v25 = vrot.slane %v6692_v22, 1  ;;  %v6691_v12 = vpack.c.bf16 %v6677_v48, %v14958_v49 }
 0xc27   : > { %v6446_v15 = vsel %vm3169_vm14, %v6444_v35, %v6445_v34  ;;  %v6465_v26 = vrot.slane %v6188_v63, 3  ;;  %v6680_v34 = vld [vmem:[#allocation3 + $0xf8] sm:$0x3f]  ;;  %v6463_v52 = vrot.slane %v6187_v4, 3 }
 0xc28   : > { %10247 = vmatprep.mubr.msk.bf16.mxu0 %vm632_vm13, %v6446_v15  ;;  %6883 = vmatpush1.bf16.msra.mxu1 %v12142_v58  ;;  %v6748_v58 = vrot.slane %v6689_v44, 1  ;;  %v6460_v35 = vsel %vm3169_vm14, %v6455_v55, %v6459_v28  ;;  %v6755_v27 = vsel %vm2484_vm4, %v6750_v17, %v6754_v25  ;;  %v6694_v19 = vpack.c.bf16 %v6680_v34, %v6680_v34 }
 0xc29   : > { %6600 = vmatmul.mubr.bf16.vlgmr.msra.gmra.mrb[68].mxu0 %v6443_v21  ;;  %8345 = vmatprep.subr.bf16.mxu1 %v16451_v53  ;;  %v6466_v59 = vsel %vm3169_vm14, %v6461_v18, %v6465_v26  ;;  %v6752_v15 = vrot.slane %v6691_v12, 1  ;;  %v6464_v21 = vsel %vm3169_vm14, %v6459_v28, %v6463_v52 }
 0xc2a   : > { %10248 = vmatprep.mubr.msk.bf16.mxu0 %vm632_vm13, %v6450_v29  ;;  %v6749_v41 = vsel %vm2484_vm4, %v6744_v51, %v6748_v58  ;;  %v6758_v54 = vrot.slane %v6694_v19, 1  ;;  %v6693_v29 = vpack.c.bf16 %v6679_v0, %v6679_v0 }
 0xc2b   : > { %6420 = vmatmul.mubr.bf16.gmra.mrb[196].mxu1 %v6219_v62  ;;  %v6753_v62 = vsel %vm2484_vm4, %v6748_v58, %v6752_v15 }
 0xc2c   : > { %10290 = vmatprep.mubr.msk.bf16.mxu1 %vm632_vm13, %v6739_v43  ;;  %v6759_v49 = vsel %vm2484_vm4, %v6754_v25, %v6758_v54  ;;  %v6756_v33 = vrot.slane %v6693_v29, 1 }
 0xc2e   : > { %v6757_v1 = vsel %vm2484_vm4, %v6752_v15, %v6756_v33 }
 0xc31   : > { %6608 = vmatmul.mubr.bf16.gmra.mrb[72].mxu0 %v6448_v20 }
 0xc32   : > { %10249 = vmatprep.mubr.msk.bf16.mxu0 %vm632_vm13, %v6454_v10 }
 0xc33   : > { %6893 = vmatmul.mubr.bf16.vlgmr.msra.gmra.mrb[200].mxu1 %v6736_v3 }
 0xc34   : > { %10291 = vmatprep.mubr.msk.bf16.mxu1 %vm632_vm13, %v6743_v2 }
 0xc39   : > { %6616 = vmatmul.mubr.bf16.gmra.mrb[76].mxu0 %v6452_v57 }
 0xc3a   : > { %10250 = vmatprep.mubr.msk.bf16.mxu0 %vm632_vm13, %v6458_v37 }
 0xc3b   : > { %6901 = vmatmul.mubr.bf16.gmra.mrb[204].mxu1 %v6741_v31 }
 0xc3c   : > { %10292 = vmatprep.mubr.msk.bf16.mxu1 %vm632_vm13, %v6747_v42 }
 0xc41   : > { %6624 = vmatmul.mubr.bf16.gmra.mrb[80].mxu0 %v6456_v11 }
 0xc42   : > { %10251 = vmatprep.mubr.msk.bf16.mxu0 %vm632_vm13, %v6462_v60 }
 0xc43   : > { %6909 = vmatmul.mubr.bf16.gmra.mrb[208].mxu1 %v6745_v61 }
 0xc44   : > { %10293 = vmatprep.mubr.msk.bf16.mxu1 %vm632_vm13, %v6751_v9 }
 0xc49   : > { %6632 = vmatmul.mubr.bf16.gmra.mrb[84].mxu0 %v6460_v35 }
 0xc4a   : > { %10252 = vmatprep.mubr.msk.bf16.mxu0 %vm632_vm13, %v6466_v59 }
 0xc4b   : > { %6917 = vmatmul.mubr.bf16.gmra.mrb[212].mxu1 %v6749_v41 }
 0xc4c   : > { %10294 = vmatprep.mubr.msk.bf16.mxu1 %vm632_vm13, %v6755_v27 }
 0xc51   : > { %6640 = vmatmul.mubr.bf16.gmra.mrb[88].mxu0 %v6464_v21 }
 0xc52   : > { %10253 = vmatprep.mubr.msk.bf16.mxu0 %vm632_vm13, %v6465_v26 }
 0xc53   : > { %6925 = vmatmul.mubr.bf16.gmra.mrb[216].mxu1 %v6753_v62 }
 0xc54   : > { %10295 = vmatprep.mubr.msk.bf16.mxu1 %vm632_vm13, %v6759_v49 }
 0xc59   : > { %6648 = vmatmul.mubr.bf16.gmra.mrb[92].mxu0 %v6463_v52 }
 0xc5a   : > { %11680 = vmatprep.mubr.msk.bf16.mxu0 %vm12219_vm1, %v14677_v39 }
 0xc5b   : > { %6933 = vmatmul.mubr.bf16.gmra.mrb[220].mxu1 %v6757_v1 }
 0xc5c   : > { %10296 = vmatprep.mubr.msk.bf16.mxu1 %vm632_vm13, %v6758_v54 }
 0xc63   : > { %6941 = vmatmul.mubr.bf16.gmra.mrb[224].mxu1 %v6756_v33 }
 0xcce   : > { %v6373_v43 = vpop.f32.mrb[172].mxu1 }
 0xccf   : > { %v6375_v47 = vpop.f32.mrb[173].mxu1 }
 0xcd0   : > { %v6376_v24 = vpop.f32.mrb[174].mxu1 }
 0xcd1   : > { %v6378_v5 = vpop.f32.mrb[175].mxu1 }
 0xcd6   : > { %v6381_v46 = vpop.f32.mrb[176].mxu1 }
 0xcd7   : > { %v6383_v45 = vpop.f32.mrb[177].mxu1 }
 0xcd8   : > { %v6384_v14 = vpop.f32.mrb[178].mxu1 }
 0xcd9   : > { %v6386_v16 = vpop.f32.mrb[179].mxu1 }
 0xcde   : > { %v6389_v20 = vpop.f32.mrb[180].mxu1 }
 0xcdf   : > { %v6391_v56 = vpop.f32.mrb[181].mxu1 }
 0xce0   : > { %v6392_v10 = vpop.f32.mrb[182].mxu1 }
 0xce1   : > { %v6394_v3 = vpop.f32.mrb[183].mxu1 }
 0xce6   : > { %v6397_v40 = vpop.f32.mrb[184].mxu1 }
 0xce7   : > { %v6399_v2 = vpop.f32.mrb[185].mxu1 }
 0xce8   : > { %v15044_v30 = vpop.f32.mrb[186].mxu1 }
 0xce9   : > { %v6402_v32 = vpop.f32.mrb[187].mxu1 }
 0xcee   : > { %v15046_v36 = vpop.f32.mrb[188].mxu1 }
 0xcef   : > { %v6407_v8 = vpop.f32.mrb[189].mxu1 }
 0xcf0   : > { %v15048_v6 = vpop.f32.mrb[190].mxu1 }
 0xcf1   : > { %v6410_v57 = vpop.f32.mrb[191].mxu1 }
 0xcf6   : > { %v15050_v37 = vpop.f32.mrb[192].mxu1 }
 0xcf7   : > { %v6415_v31 = vpop.f32.mrb[193].mxu1 }
 0xcf8   : > { %v15052_v50 = vpop.f32.mrb[194].mxu1 }
 0xcf9   : > { %v6418_v42 = vpop.f32.mrb[195].mxu1 }
 0xcfc   : > { %v6601_v7 = vpop.f32.mrb[68].mxu0 }
 0xcfd   : > { %v6602_v55 = vadd.f32 %v6601_v7, %v6373_v43  ;;  %v6603_v18 = vpop.f32.mrb[69].mxu0 }
 0xcfe   : > { %v6604_v51 = vpop.f32.mrb[70].mxu0  ;;  %v15054_v13 = vpop.f32.mrb[196].mxu1 }
 0xcff   : > { %v6605_v17 = vadd.f32 %v6604_v51, %v6376_v24  ;;  %v6606_v11 = vpop.f32.mrb[71].mxu0  ;;  %v6423_v23 = vpop.f32.mrb[197].mxu1 }
 0xd00   : > { %v6424_v60 = vpop.f32.mrb[198].mxu1 }
 0xd01   : > { %v6425_v63 = vpop.f32.mrb[199].mxu1 }
 0xd04   : > { %v6609_v61 = vpop.f32.mrb[72].mxu0 }
 0xd05   : > { %v6610_v44 = vadd.f32 %v6609_v61, %v6381_v46  ;;  %v6611_v9 = vpop.f32.mrb[73].mxu0 }
 0xd06   : > { %v6612_v22 = vpop.f32.mrb[74].mxu0  ;;  %v6894_v28 = vpop.f32.mrb[200].mxu1 }
 0xd07   : > { %v6613_v26 = vadd.f32 %v6612_v22, %v6384_v14  ;;  %v6948_v58 = vadd.f32 %v6894_v28, %v6602_v55  ;;  %v6614_v25 = vpop.f32.mrb[75].mxu0  ;;  %v6896_v48 = vpop.f32.mrb[201].mxu1 }
 0xd08   : > { %v6897_v35 = vpop.f32.mrb[202].mxu1 }
 0xd09   : > { %v6968_v4 = vadd.f32 %v15059_v38, %v6948_v58  ;;  %v6949_v34 = vadd.f32 %v6897_v35, %v6605_v17  ;;  %v6899_v59 = vpop.f32.mrb[203].mxu1 }
 0xd0b   : > { %v6969_v41 = vadd.f32 %v15059_v38, %v6949_v34  ;;  %v6981_v27 = vmax.f32 %v6968_v4, 0.0 }
 0xd0c   : > { %v6617_v12 = vpop.f32.mrb[76].mxu0 }
 0xd0d   : > { %v6982_v19 = vmax.f32 %v6969_v41, 0.0  ;;  %v6618_v52 = vadd.f32 %v6617_v12, %v6389_v20  ;;  %v6619_v15 = vpop.f32.mrb[77].mxu0 }
 0xd0e   : > { %v6902_v54 = vpop.f32.mrb[204].mxu1  ;;  %v6620_v0 = vpop.f32.mrb[78].mxu0 }
 0xd0f   : > { %v7035_v21 = vpack.c.bf16 %v6982_v19, %v6981_v27  ;;  %v6950_v62 = vadd.f32 %v6902_v54, %v6610_v44  ;;  %v6904_v29 = vpop.f32.mrb[205].mxu1  ;;  %v6621_v49 = vadd.f32 %v6620_v0, %v6392_v10  ;;  %v6622_v33 = vpop.f32.mrb[79].mxu0 }
 0xd10   : > { %v6905_v1 = vpop.f32.mrb[206].mxu1 }
 0xd11   : > { %v6970_v43 = vadd.f32 %v15059_v38, %v6950_v62  ;;  %v6951_v47 = vadd.f32 %v6905_v1, %v6613_v26  ;;  %11667 = vmatpush3.bf16.msra.mxu0 %v7035_v21  ;;  %v6907_v24 = vpop.f32.mrb[207].mxu1  ;;  %v15078_v62 = vld [vmem:[#allocation2] sm:$0xff] }
 0xd12   : > { %11668 = vmatprep.subr.bf16.mxu0 %v14677_v39 }
 0xd13   : > { %v6971_v5 = vadd.f32 %v15059_v38, %v6951_v47  ;;  %v6983_v45 = vmax.f32 %v6970_v43, 0.0 }
 0xd14   : > { %v6625_v46 = vpop.f32.mrb[80].mxu0 }
 0xd15   : > { %v6984_v14 = vmax.f32 %v6971_v5, 0.0  ;;  %v6626_v16 = vadd.f32 %v6625_v46, %v6397_v40  ;;  %v6627_v20 = vpop.f32.mrb[81].mxu0 }
 0xd16   : > { %v6910_v56 = vpop.f32.mrb[208].mxu1  ;;  %v6628_v3 = vpop.f32.mrb[82].mxu0 }
 0xd17   : > { %v7036_v2 = vpack.c.bf16 %v6984_v14, %v6983_v45  ;;  %v6952_v10 = vadd.f32 %v6910_v56, %v6618_v52  ;;  %v6912_v32 = vpop.f32.mrb[209].mxu1  ;;  %v6629_v8 = vadd.f32 %v6628_v3, %v15044_v30  ;;  %v6630_v57 = vpop.f32.mrb[83].mxu0 }
 0xd18   : > { %v6913_v31 = vpop.f32.mrb[210].mxu1 }
 0xd19   : > { %11669 = vmatpush3.bf16.msra.mxu0 %v7036_v2  ;;  %v6972_v42 = vadd.f32 %v15059_v38, %v6952_v10  ;;  %v6953_v7 = vadd.f32 %v6913_v31, %v6621_v49  ;;  %v6915_v55 = vpop.f32.mrb[211].mxu1 }
 0xd1a   : > { %11670 = vmatprep.subr.bf16.mxu0 %v14677_v39 }
 0xd1b   : > { %v6973_v18 = vadd.f32 %v15059_v38, %v6953_v7  ;;  %v6985_v51 = vmax.f32 %v6972_v42, 0.0 }
 0xd1c   : > { %v6633_v40 = vpop.f32.mrb[84].mxu0 }
 0xd1d   : > { %v6986_v17 = vmax.f32 %v6973_v18, 0.0  ;;  %v6634_v11 = vadd.f32 %v6633_v40, %v15046_v36  ;;  %v6635_v23 = vpop.f32.mrb[85].mxu0 }
 0xd1e   : > { %v6918_v60 = vpop.f32.mrb[212].mxu1  ;;  %v6636_v63 = vpop.f32.mrb[86].mxu0  ;;  %v12147_v23 = vld [vmem:[%s16406_s7 + $0x20] sm:$0xff]  }
 0xd1f   : > { %v7037_v30 = vpack.c.bf16 %v6986_v17, %v6985_v51  ;;  %v6954_v61 = vadd.f32 %v6918_v60, %v6626_v16  ;;  %v6920_v44 = vpop.f32.mrb[213].mxu1  ;;  %v6637_v9 = vadd.f32 %v6636_v63, %v15048_v6  ;;  %v6638_v22 = vpop.f32.mrb[87].mxu0  ;;  %v12143_v51 = vld [vmem:[%s16406_s7] sm:$0xff]   ;;  %v12145_v17 = vld [vmem:[%s16406_s7 + $0x10] sm:$0xff]   ;;  %v12148_v60 = vld [vmem:[%s16406_s7 + $0x28] sm:$0xff]  }
 0xd20   : > { %v6921_v28 = vpop.f32.mrb[214].mxu1  ;;  %v12149_v63 = vld [vmem:[%s16406_s7 + $0x30] sm:$0xff]   ;;  %v12152_v44 = vld [vmem:[%s16406_s7 + $0x48] sm:$0xff]   ;;  %v12154_v22 = vld [vmem:[%s16406_s7 + $0x58] sm:$0xff]  }
 0xd21   : > { %v6974_v26 = vadd.f32 %v15059_v38, %v6954_v61  ;;  %v6955_v58 = vadd.f32 %v6921_v28, %v6629_v8  ;;  %v6923_v25 = vpop.f32.mrb[215].mxu1  ;;  %11671 = vmatpush3.bf16.msra.mxu0 %v7037_v30  ;;  %v12150_v30 = vld [vmem:[%s16406_s7 + $0x38] sm:$0xff]   ;;  %v12151_v61 = vld [vmem:[%s16406_s7 + $0x40] sm:$0xff]  }
 0xd22   : > { %11672 = vmatprep.subr.bf16.mxu0 %v14677_v39  ;;  %v12155_v28 = vld [vmem:[%s16406_s7 + $0x60] sm:$0xff]   ;;  %v12158_v25 = vld [vmem:[%s16406_s7 + $0x78] sm:$0xff]  }
 0xd23   : > { %v6975_v48 = vadd.f32 %v15059_v38, %v6955_v58  ;;  %v6987_v35 = vmax.f32 %v6974_v26, 0.0  ;;  %v12156_v26 = vld [vmem:[%s16406_s7 + $0x68] sm:$0xff]   ;;  %v12157_v58 = vld [vmem:[%s16406_s7 + $0x70] sm:$0xff]  }
 0xd24   : > { %v6641_v36 = vpop.f32.mrb[88].mxu0 }
 0xd25   : > { %v6988_v4 = vmax.f32 %v6975_v48, 0.0  ;;  %v6642_v34 = vadd.f32 %v6641_v36, %v15050_v37  ;;  %v6643_v59 = vpop.f32.mrb[89].mxu0  ;;  %v12159_v48 = vld [vmem:[%s16406_s7 + $0x80] sm:$0xff]   ;;  %v12160_v36 = vld [vmem:[%s16406_s7 + $0x88] sm:$0xff]  }
 0xd26   : > { %v6926_v41 = vpop.f32.mrb[216].mxu1  ;;  %v6644_v12 = vpop.f32.mrb[90].mxu0  ;;  %v12164_v59 = vld [vmem:[%s16417_s18 + $0x60] sm:$0xff]  }
 0xd27   : > { %v7038_v6 = vpack.c.bf16 %v6988_v4, %v6987_v35  ;;  %v6956_v27 = vadd.f32 %v6926_v41, %v6634_v11  ;;  %v6928_v19 = vpop.f32.mrb[217].mxu1  ;;  %v6645_v52 = vadd.f32 %v6644_v12, %v15052_v50  ;;  %v6646_v15 = vpop.f32.mrb[91].mxu0  ;;  %v12146_v11 = vld [vmem:[%s16406_s7 + $0x18] sm:$0xff]   ;;  %v12161_v35 = vld [vmem:[%s16406_s7 + $0x90] sm:$0xff]   ;;  %8346 = vmatpush1.bf16.msra.mxu1 %v12164_v59  ;;  %v12165_v41 = vld [vmem:[%s16417_s18 + $0x68] sm:$0xff]  }
 0xd28   : > { %v6929_v54 = vpop.f32.mrb[218].mxu1  ;;  %v12162_v4 = vld [vmem:[%s16406_s7 + $0x98] sm:$0xff]   ;;  %8347 = vmatprep.subr.bf16.mxu1 %v16451_v53  ;;  %v12166_v12 = vld [vmem:[%s16417_s18 + $0x70] sm:$0xff]   ;;  %v12169_v19 = vld [vmem:[%s16417_s18 + $0x88] sm:$0xff]  }
 0xd29   : > { %v6976_v0 = vadd.f32 %v15059_v38, %v6956_v27  ;;  %v6957_v39 = vadd.f32 %v6929_v54, %v6637_v9  ;;  %v6931_v21 = vpop.f32.mrb[219].mxu1  ;;  %11673 = vmatpush3.bf16.msra.mxu0 %v7038_v6  ;;  %v12153_v9 = vld [vmem:[%s16406_s7 + $0x50] sm:$0xff]   ;;  %v12167_v6 = vld [vmem:[%s16417_s18 + $0x78] sm:$0xff]   ;;  %v12168_v27 = vld [vmem:[%s16417_s18 + $0x80] sm:$0xff]  }
 0xd2a   : > { %11674 = vmatprep.subr.bf16.mxu0 %v15078_v62  ;;  %v12171_v15 = vld [vmem:[%s16417_s18 + $0x98] sm:$0xff]   ;;  %v12172_v54 = vld [vmem:[%s16417_s18 + $0xa0] sm:$0xff]   ;;  %v12173_v21 = vld [vmem:[%s16417_s18 + $0xa8] sm:$0xff]  }
 0xd2b   : > { %v6977_v37 = vadd.f32 %v15059_v38, %v6957_v39  ;;  %v6989_v49 = vmax.f32 %v6976_v0, 0.0  ;;  %8348 = vmatpush1.bf16.msra.mxu1 %v12165_v41 }
 0xd2c   : > { %v6649_v29 = vpop.f32.mrb[92].mxu0  ;;  %8349 = vmatprep.subr.bf16.mxu1 %v16451_v53 }
 0xd2d   : > { %v6990_v33 = vmax.f32 %v6977_v37, 0.0  ;;  %v6650_v1 = vadd.f32 %v6649_v29, %v15054_v13  ;;  %v6651_v43 = vpop.f32.mrb[93].mxu0 }
 0xd2e   : > { %v6934_v50 = vpop.f32.mrb[220].mxu1  ;;  %v6652_v47 = vpop.f32.mrb[94].mxu0 }
 0xd2f   : > { %v7039_v24 = vpack.c.bf16 %v6990_v33, %v6989_v49  ;;  %v6958_v5 = vadd.f32 %v6934_v50, %v6642_v34  ;;  %v6936_v46 = vpop.f32.mrb[221].mxu1  ;;  %v6653_v45 = vpop.f32.mrb[95].mxu0  ;;  %v12163_v34 = vld [vmem:[%s16406_s7 + $0xa0] ss:$0 sps:$4 sm:$0x33]   ;;  %8350 = vmatpush1.bf16.msra.mxu1 %v12166_v12  ;;  %v12174_v47 = vld [vmem:[%s16417_s18 + $0xb0] sm:$0xff]  }
 0xd30   : > { %v6937_v14 = vpop.f32.mrb[222].mxu1  ;;  %8351 = vmatprep.subr.bf16.mxu1 %v16451_v53 }
 0xd31   : > { %v6978_v16 = vadd.f32 %v15059_v38, %v6958_v5  ;;  %v6959_v20 = vadd.f32 %v6937_v14, %v6645_v52  ;;  %v6939_v56 = vpop.f32.mrb[223].mxu1  ;;  %11675 = vmatpush3.bf16.msra.mxu0 %v7039_v24  ;;  %v12170_v52 = vld [vmem:[%s16417_s18 + $0x90] sm:$0xff]   ;;  %v12175_v14 = vld [vmem:[%s16417_s18 + $0xb8] sm:$0xff]  }
 0xd32   : > { %11676 = vmatprep.subr.bf16.mxu0 %v15078_v62 }
 0xd33   : > { %v6979_v3 = vadd.f32 %v15059_v38, %v6959_v20  ;;  %v6991_v2 = vmax.f32 %v6978_v16, 0.0  ;;  %8352 = vmatpush1.bf16.msra.mxu1 %v12167_v6 }
 0xd34   : > { %8353 = vmatprep.subr.bf16.mxu1 %v16451_v53 }
 0xd35   : > { %v6992_v10 = vmax.f32 %v6979_v3, 0.0 }
 0xd36   : > { %v6942_v13 = vpop.f32.mrb[224].mxu1 }
 0xd37   : > { %v7040_v32 = vpack.c.bf16 %v6992_v10, %v6991_v2  ;;  %v6960_v8 = vadd.f32 %v6942_v13, %v6650_v1  ;;  %v6944_v57 = vpop.f32.mrb[225].mxu1  ;;  %8354 = vmatpush1.bf16.msra.mxu1 %v12168_v27 }
 0xd38   : > { %v6945_v31 = vpop.f32.mrb[226].mxu1  ;;  %8355 = vmatprep.subr.bf16.mxu1 %v16451_v53 }
 0xd39   : > { %v6980_v42 = vadd.f32 %v15059_v38, %v6960_v8  ;;  %11677 = vmatpush3.bf16.msra.mxu0 %v7040_v32  ;;  %v6946_v7 = vpop.f32.mrb[227].mxu1  ;;  %v12144_v38 = vld [vmem:[%s16406_s7 + $0x8] sm:$0xff]  }
 0xd3a   : > { %11678 = vmatprep.subr.bf16.mxu0 %v15078_v62 }
 0xd3b   : > { %v6993_v55 = vmax.f32 %v6980_v42, 0.0  ;;  %8356 = vmatpush1.bf16.msra.mxu1 %v12169_v19 }
 0xd3c   : > { %8357 = vmatprep.subr.bf16.mxu1 %v16451_v53 }
 0xd3d   : > { %v7041_v18 = vpack.c.bf16 %v6993_v55, %v6993_v55 }
 0xd3f   : > { %v7209_v40 = vsel %vm4164_vm15, %v7041_v18, 0  ;;  %8358 = vmatpush1.bf16.msra.mxu1 %v12170_v52 }
 0xd40   : > { %11679 = vmatpush3.bf16.msra.mxu0 %v7209_v40  ;;  %8359 = vmatprep.subr.bf16.mxu1 %v16451_v53 }
 0xd41   : > { %8825 = vmatprep.subr.bf16.mxu0 %v16451_v53 }
 0xd43   : > { %11681 = vmatmul.mubr.msk.bf16.vlgmr.msra.gmra.mrb[96].mxu0 %vm5248_vm2, %v12143_v51  ;;  %8360 = vmatpush1.bf16.msra.mxu1 %v12171_v15 }
 0xd44   : > { %11684 = vmatprep.mubr.msk.bf16.mxu0 %vm12219_vm1, %v15078_v62  ;;  %8361 = vmatprep.subr.bf16.mxu1 %v16451_v53 }
 0xd47   : > { %8362 = vmatpush1.bf16.msra.mxu1 %v12172_v54 }
 0xd48   : > { %8363 = vmatprep.subr.bf16.mxu1 %v16451_v53 }
 0xd4b   : > { %11685 = vmatmul.mubr.msk.bf16.gmra.mrb[100].mxu0 %vm5248_vm2, %v12144_v38  ;;  %8364 = vmatpush1.bf16.msra.mxu1 %v12173_v21 }
 0xd4c   : > { %11688 = vmatprep.mubr.msk.bf16.mxu0 %vm12219_vm1, %v15078_v62  ;;  %8365 = vmatprep.subr.bf16.mxu1 %v16451_v53 }
 0xd4f   : > { %8366 = vmatpush1.bf16.msra.mxu1 %v12174_v47 }
 0xd50   : > { %8367 = vmatprep.subr.bf16.mxu1 %v16451_v53 }
 0xd53   : > { %11689 = vmatmul.mubr.msk.bf16.gmra.mrb[104].mxu0 %vm5248_vm2, %v12145_v17  ;;  %8368 = vmatpush1.bf16.msra.mxu1 %v12175_v14 }
 0xd54   : > { %11692 = vmatprep.mubr.msk.bf16.mxu0 %vm12219_vm1, %v15078_v62  ;;  %9454 = vmatprep.subr.bf16.mxu1 %v16451_v53 }
 0xd5b   : > { %11693 = vmatmul.mubr.msk.bf16.gmra.mrb[108].mxu0 %vm5248_vm2, %v12146_v11 }
 0xd5c   : > { %11696 = vmatprep.mubr.msk.bf16.mxu0 %vm12219_vm1, %v15078_v62 }
 0xd63   : > { %11697 = vmatmul.mubr.msk.bf16.gmra.mrb[112].mxu0 %vm5248_vm2, %v12147_v23 }
 0xd64   : > { %11700 = vmatprep.mubr.msk.bf16.mxu0 %vm12219_vm1, %v15078_v62 }
 0xd6b   : > { %11701 = vmatmul.mubr.msk.bf16.gmra.mrb[116].mxu0 %vm5248_vm2, %v12148_v60 }
 0xd6c   : > { %11704 = vmatprep.mubr.msk.bf16.mxu0 %vm12219_vm1, %v15078_v62 }
 0xd73   : > { %11705 = vmatmul.mubr.msk.bf16.gmra.mrb[120].mxu0 %vm5248_vm2, %v12149_v63 }
 0xd74   : > { %11708 = vmatprep.mubr.msk.bf16.mxu0 %vm12219_vm1, %v15078_v62 }
 0xd7b   : > { %11709 = vmatmul.mubr.msk.bf16.gmra.mrb[124].mxu0 %vm5248_vm2, %v12150_v30 }
 0xd7c   : > { %11712 = vmatprep.mubr.msk.bf16.mxu0 %vm12219_vm1, %v15078_v62 }
 0xd83   : > { %11713 = vmatmul.mubr.msk.bf16.gmra.mrb[128].mxu0 %vm5248_vm2, %v12151_v61 }
 0xd84   : > { %11716 = vmatprep.mubr.msk.bf16.mxu0 %vm12219_vm1, %v15078_v62 }
 0xd8b   : > { %11717 = vmatmul.mubr.msk.bf16.gmra.mrb[132].mxu0 %vm5248_vm2, %v12152_v44 }
 0xd8c   : > { %11720 = vmatprep.mubr.msk.bf16.mxu0 %vm12219_vm1, %v15078_v62 }
 0xd93   : > { %11721 = vmatmul.mubr.msk.bf16.gmra.mrb[136].mxu0 %vm5248_vm2, %v12153_v9 }
 0xd94   : > { %11724 = vmatprep.mubr.msk.bf16.mxu0 %vm12219_vm1, %v15078_v62 }
 0xd9b   : > { %11725 = vmatmul.mubr.msk.bf16.gmra.mrb[140].mxu0 %vm5248_vm2, %v12154_v22 }
 0xd9c   : > { %11728 = vmatprep.mubr.msk.bf16.mxu0 %vm12219_vm1, %v15078_v62 }
 0xda3   : > { %11729 = vmatmul.mubr.msk.bf16.gmra.mrb[144].mxu0 %vm5248_vm2, %v12155_v28 }
 0xda4   : > { %11732 = vmatprep.mubr.msk.bf16.mxu0 %vm12219_vm1, %v15078_v62 }
 0xdab   : > { %11733 = vmatmul.mubr.msk.bf16.gmra.mrb[148].mxu0 %vm5248_vm2, %v12156_v26 }
 0xdac   : > { %11736 = vmatprep.mubr.msk.bf16.mxu0 %vm12219_vm1, %v15078_v62 }
 0xdb3   : > { %11737 = vmatmul.mubr.msk.bf16.gmra.mrb[152].mxu0 %vm5248_vm2, %v12157_v58 }
 0xdb4   : > { %11740 = vmatprep.mubr.msk.bf16.mxu0 %vm12219_vm1, %v15078_v62 }
 0xdbb   : > { %11741 = vmatmul.mubr.msk.bf16.gmra.mrb[156].mxu0 %vm5248_vm2, %v12158_v25 }
 0xdbc   : > { %11744 = vmatprep.mubr.msk.bf16.mxu0 %vm12219_vm1, %v15078_v62 }
 0xdc3   : > { %11745 = vmatmul.mubr.msk.bf16.gmra.mrb[160].mxu0 %vm5248_vm2, %v12159_v48 }
 0xdc4   : > { %11748 = vmatprep.mubr.msk.bf16.mxu0 %vm12219_vm1, %v15078_v62 }
 0xdcb   : > { %11749 = vmatmul.mubr.msk.bf16.gmra.mrb[164].mxu0 %vm5248_vm2, %v12160_v36 }
 0xdcc   : > { %11752 = vmatprep.mubr.msk.bf16.mxu0 %vm12219_vm1, %v15078_v62 }
 0xdd3   : > { %11753 = vmatmul.mubr.msk.bf16.gmra.mrb[168].mxu0 %vm5248_vm2, %v12161_v35 }
 0xdd4   : > { %11756 = vmatprep.mubr.msk.bf16.mxu0 %vm12219_vm1, %v15078_v62 }
 0xddb   : > { %11757 = vmatmul.mubr.msk.bf16.gmra.mrb[172].mxu0 %vm5248_vm2, %v12162_v4 }
 0xddc   : > { %11760 = vmatprep.mubr.msk.bf16.mxu0 %vm12219_vm1, %v15078_v62 }
 0xde3   : > { %11761 = vmatmul.mubr.msk.bf16.gmra.mrb[176].mxu0 %vm5248_vm2, %v12163_v34 }
 0xe16   : > { %v15249_v0 = vpop.f32.mrb[96].mxu0 }
 0xe17   : > { %7697 = vst.msk [vmem:[#allocation2 + $0x38] sm:$0xff] %vm2276_vm6, %v15249_v0  ;;  %v11682_v39 = vpop.f32.mrb[97].mxu0  ;;  %v7452_v37 = vrot.slane %v15249_v0, 7  ;;  %v7738_v29 = vrot.slane %v15249_v0, 1 }
 0xe18   : > { %v7248_v62 = vpop.f32.mrb[98].mxu0 }
 0xe19   : > { %v7453_v49 = vrot.slane %v7248_v62, 7  ;;  %7698 = vst.msk [vmem:[#allocation2 + $0x48] sm:$0xff] %vm2276_vm6, %v7248_v62  ;;  %v7739_v33 = vrot.slane %v7248_v62, 1  ;;  %v11683_v1 = vpop.f32.mrb[99].mxu0 }
 0xe1b   : > { %v7740_v43 = vsel %vm2484_vm4, %v7738_v29, %v7739_v33  ;;  %v7454_v50 = vsel %vm2151_vm5, %v7452_v37, %v7453_v49 }
 0xe1c   : > { %7821 = vrot.lane.b32.xlu0 %v7740_v43, %s16450_s27 }
 0xe1e   : > { %v7253_v24 = vpop.f32.mrb[100].mxu0 }
 0xe1f   : > { %v7455_v5 = vrot.slane %v7253_v24, 7  ;;  %7699 = vst.msk [vmem:[#allocation2 + $0x58] sm:$0xff] %vm2276_vm6, %v7253_v24  ;;  %v7741_v46 = vrot.slane %v7253_v24, 1  ;;  %v11686_v45 = vpop.f32.mrb[101].mxu0 }
 0xe20   : > { %7533 = vrot.lane.b32.xlu0 %v7452_v37, %s16452_s29  ;;  %v7256_v16 = vpop.f32.mrb[102].mxu0 }
 0xe21   : > { %v7457_v20 = vrot.slane %v7256_v16, 7  ;;  %7700 = vst.msk [vmem:[#allocation2 + $0x68] sm:$0xff] %vm2276_vm6, %v7256_v16  ;;  %v7743_v56 = vrot.slane %v7256_v16, 1  ;;  %v7742_v3 = vsel %vm2484_vm4, %v7739_v33, %v7741_v46  ;;  %v11687_v2 = vpop.f32.mrb[103].mxu0  ;;  %v7456_v10 = vsel %vm2151_vm5, %v7453_v49, %v7455_v5 }
 0xe22   : > { %7823 = vrot.lane.b32.xlu1 %v7742_v3, %s16450_s27 }
 0xe23   : > { %v7744_v13 = vsel %vm2484_vm4, %v7741_v46, %v7743_v56  ;;  %v7458_v32 = vsel %vm2151_vm5, %v7455_v5, %v7457_v20 }
 0xe24   : > { %7825 = vrot.lane.b32.xlu0 %v7744_v13, %s16450_s27 }
 0xe26   : > { %7535 = vrot.lane.b32.xlu1 %v7454_v50, %s16452_s29  ;;  %v7261_v8 = vpop.f32.mrb[104].mxu0 }
 0xe27   : > { %v7459_v57 = vrot.slane %v7261_v8, 7  ;;  %7701 = vst.msk [vmem:[#allocation2 + $0x78] sm:$0xff] %vm2276_vm6, %v7261_v8  ;;  %v7745_v31 = vrot.slane %v7261_v8, 1  ;;  %v11690_v42 = vpop.f32.mrb[105].mxu0 }
 0xe28   : > { %7537 = vrot.lane.b32.xlu0 %v7456_v10, %s16452_s29  ;;  %v7264_v7 = vpop.f32.mrb[106].mxu0 }
 0xe29   : > { %v7461_v55 = vrot.slane %v7264_v7, 7  ;;  %7702 = vst.msk [vmem:[#allocation2 + $0x88] sm:$0xff] %vm2276_vm6, %v7264_v7  ;;  %v7747_v18 = vrot.slane %v7264_v7, 1  ;;  %v7746_v40 = vsel %vm2484_vm4, %v7743_v56, %v7745_v31  ;;  %v11691_v51 = vpop.f32.mrb[107].mxu0  ;;  %v7460_v38 = vsel %vm2151_vm5, %v7457_v20, %v7459_v57 }
 0xe2a   : > { %7827 = vrot.lane.b32.xlu1 %v7746_v40, %s16450_s27 }
 0xe2b   : > { %v7748_v17 = vsel %vm2484_vm4, %v7745_v31, %v7747_v18  ;;  %v7462_v11 = vsel %vm2151_vm5, %v7459_v57, %v7461_v55 }
 0xe2c   : > { %7829 = vrot.lane.b32.xlu0 %v7748_v17, %s16450_s27 }
 0xe2e   : > { %7539 = vrot.lane.b32.xlu1 %v7458_v32, %s16452_s29  ;;  %v7269_v23 = vpop.f32.mrb[108].mxu0 }
 0xe2f   : > { %v7463_v60 = vrot.slane %v7269_v23, 7  ;;  %7703 = vst.msk [vmem:[#allocation2 + $0x98] sm:$0xff] %vm2276_vm6, %v7269_v23  ;;  %v7749_v63 = vrot.slane %v7269_v23, 1  ;;  %v11694_v30 = vpop.f32.mrb[109].mxu0 }
 0xe30   : > { %7541 = vrot.lane.b32.xlu0 %v7460_v38, %s16452_s29  ;;  %v7272_v61 = vpop.f32.mrb[110].mxu0 }
 0xe31   : > { %v7465_v44 = vrot.slane %v7272_v61, 7  ;;  %7704 = vst.msk [vmem:[#allocation2 + $0xa8] sm:$0xff] %vm2276_vm6, %v7272_v61  ;;  %v7751_v9 = vrot.slane %v7272_v61, 1  ;;  %v7750_v22 = vsel %vm2484_vm4, %v7747_v18, %v7749_v63  ;;  %v11695_v28 = vpop.f32.mrb[111].mxu0  ;;  %v7464_v26 = vsel %vm2151_vm5, %v7461_v55, %v7463_v60 }
 0xe32   : > { %7831 = vrot.lane.b32.xlu1 %v7750_v22, %s16450_s27 }
 0xe33   : > { %v7752_v58 = vsel %vm2484_vm4, %v7749_v63, %v7751_v9  ;;  %v7466_v25 = vsel %vm2151_vm5, %v7463_v60, %v7465_v44 }
 0xe34   : > { %7833 = vrot.lane.b32.xlu0 %v7752_v58, %s16450_s27 }
 0xe36   : > { %7543 = vrot.lane.b32.xlu1 %v7462_v11, %s16452_s29  ;;  %v7277_v48 = vpop.f32.mrb[112].mxu0 }
 0xe37   : > { %v7467_v36 = vrot.slane %v7277_v48, 7  ;;  %7705 = vst.msk [vmem:[#allocation2 + $0xb8] sm:$0xff] %vm2276_vm6, %v7277_v48  ;;  %v7753_v35 = vrot.slane %v7277_v48, 1  ;;  %v11698_v4 = vpop.f32.mrb[113].mxu0 }
 0xe38   : > { %7545 = vrot.lane.b32.xlu0 %v7464_v26, %s16452_s29  ;;  %v7280_v34 = vpop.f32.mrb[114].mxu0 }
 0xe39   : > { %v7469_v59 = vrot.slane %v7280_v34, 7  ;;  %7706 = vst.msk [vmem:[#allocation2 + $0xc8] sm:$0xff] %vm2276_vm6, %v7280_v34  ;;  %v7755_v41 = vrot.slane %v7280_v34, 1  ;;  %v7754_v12 = vsel %vm2484_vm4, %v7751_v9, %v7753_v35  ;;  %v11699_v6 = vpop.f32.mrb[115].mxu0  ;;  %v7468_v27 = vsel %vm2151_vm5, %v7465_v44, %v7467_v36 }
 0xe3a   : > { %7835 = vrot.lane.b32.xlu1 %v7754_v12, %s16450_s27 }
 0xe3b   : > { %v7756_v19 = vsel %vm2484_vm4, %v7753_v35, %v7755_v41  ;;  %v7470_v52 = vsel %vm2151_vm5, %v7467_v36, %v7469_v59 }
 0xe3c   : > { %7837 = vrot.lane.b32.xlu0 %v7756_v19, %s16450_s27 }
 0xe3e   : > { %7547 = vrot.lane.b32.xlu1 %v7466_v25, %s16452_s29  ;;  %v7285_v15 = vpop.f32.mrb[116].mxu0 }
 0xe3f   : > { %v7471_v54 = vrot.slane %v7285_v15, 7  ;;  %7707 = vst.msk [vmem:[#allocation2 + $0xd8] sm:$0xff] %vm2276_vm6, %v7285_v15  ;;  %v7757_v39 = vrot.slane %v7285_v15, 1  ;;  %v11702_v21 = vpop.f32.mrb[117].mxu0 }
 0xe40   : > { %7549 = vrot.lane.b32.xlu0 %v7468_v27, %s16452_s29  ;;  %v7288_v62 = vpop.f32.mrb[118].mxu0 }
 0xe41   : > { %v7473_v37 = vrot.slane %v7288_v62, 7  ;;  %7708 = vst.msk [vmem:[#allocation2 + $0xe8] sm:$0xff] %vm2276_vm6, %v7288_v62  ;;  %v7759_v49 = vrot.slane %v7288_v62, 1  ;;  %v7758_v33 = vsel %vm2484_vm4, %v7755_v41, %v7757_v39  ;;  %v11703_v1 = vpop.f32.mrb[119].mxu0  ;;  %v7472_v43 = vsel %vm2151_vm5, %v7469_v59, %v7471_v54 }
 0xe42   : > { %7839 = vrot.lane.b32.xlu1 %v7758_v33, %s16450_s27 }
 0xe43   : > { %v7760_v50 = vsel %vm2484_vm4, %v7757_v39, %v7759_v49  ;;  %v7474_v47 = vsel %vm2151_vm5, %v7471_v54, %v7473_v37 }
 0xe44   : > { %7841 = vrot.lane.b32.xlu0 %v7760_v50, %s16450_s27 }
 0xe46   : > { %7551 = vrot.lane.b32.xlu1 %v7470_v52, %s16452_s29  ;;  %v7293_v24 = vpop.f32.mrb[120].mxu0 }
 0xe47   : > { %v7475_v5 = vrot.slane %v7293_v24, 7  ;;  %7709 = vst.msk [vmem:[#allocation2 + $0xf8] sm:$0xff] %vm2276_vm6, %v7293_v24  ;;  %v7761_v46 = vrot.slane %v7293_v24, 1  ;;  %v11706_v45 = vpop.f32.mrb[121].mxu0 }
 0xe48   : > { %7553 = vrot.lane.b32.xlu0 %v7472_v43, %s16452_s29  ;;  %v7296_v14 = vpop.f32.mrb[122].mxu0 }
 0xe49   : > { %v7477_v16 = vrot.slane %v7296_v14, 7  ;;  %7710 = vst.msk [vmem:[#allocation2 + $0x108] sm:$0xff] %vm2276_vm6, %v7296_v14  ;;  %v7763_v20 = vrot.slane %v7296_v14, 1  ;;  %v7762_v56 = vsel %vm2484_vm4, %v7759_v49, %v7761_v46  ;;  %v11707_v3 = vpop.f32.mrb[123].mxu0  ;;  %v7476_v2 = vsel %vm2151_vm5, %v7473_v37, %v7475_v5 }
 0xe4a   : > { %7843 = vrot.lane.b32.xlu1 %v7762_v56, %s16450_s27 }
 0xe4b   : > { %v7764_v10 = vsel %vm2484_vm4, %v7761_v46, %v7763_v20  ;;  %v7478_v13 = vsel %vm2151_vm5, %v7475_v5, %v7477_v16 }
 0xe4c   : > { %7845 = vrot.lane.b32.xlu0 %v7764_v10, %s16450_s27 }
 0xe4e   : > { %7555 = vrot.lane.b32.xlu1 %v7474_v47, %s16452_s29  ;;  %v7301_v32 = vpop.f32.mrb[124].mxu0 }
 0xe4f   : > { %v7479_v8 = vrot.slane %v7301_v32, 7  ;;  %7711 = vst.msk [vmem:[#allocation2 + $0x118] sm:$0xff] %vm2276_vm6, %v7301_v32  ;;  %v7765_v57 = vrot.slane %v7301_v32, 1  ;;  %v11710_v31 = vpop.f32.mrb[125].mxu0 }
 0xe50   : > { %7557 = vrot.lane.b32.xlu0 %v7476_v2, %s16452_s29  ;;  %v7304_v42 = vpop.f32.mrb[126].mxu0 }
 0xe51   : > { %v7481_v7 = vrot.slane %v7304_v42, 7  ;;  %7712 = vst.msk [vmem:[#allocation2 + $0x128] sm:$0xff] %vm2276_vm6, %v7304_v42  ;;  %v7767_v55 = vrot.slane %v7304_v42, 1  ;;  %v7766_v18 = vsel %vm2484_vm4, %v7763_v20, %v7765_v57  ;;  %v11711_v40 = vpop.f32.mrb[127].mxu0  ;;  %v7480_v51 = vsel %vm2151_vm5, %v7477_v16, %v7479_v8 }
 0xe52   : > { %7847 = vrot.lane.b32.xlu1 %v7766_v18, %s16450_s27 }
 0xe53   : > { %v7768_v38 = vsel %vm2484_vm4, %v7765_v57, %v7767_v55  ;;  %v7482_v17 = vsel %vm2151_vm5, %v7479_v8, %v7481_v7 }
 0xe54   : > { %7849 = vrot.lane.b32.xlu0 %v7768_v38, %s16450_s27 }
 0xe56   : > { %7559 = vrot.lane.b32.xlu1 %v7478_v13, %s16452_s29  ;;  %v7309_v11 = vpop.f32.mrb[128].mxu0 }
 0xe57   : > { %v7483_v23 = vrot.slane %v7309_v11, 7  ;;  %7713 = vst.msk [vmem:[#allocation2 + $0x138] sm:$0xff] %vm2276_vm6, %v7309_v11  ;;  %v7769_v60 = vrot.slane %v7309_v11, 1  ;;  %v11714_v63 = vpop.f32.mrb[129].mxu0 }
 0xe58   : > { %7561 = vrot.lane.b32.xlu0 %v7480_v51, %s16452_s29  ;;  %v7312_v30 = vpop.f32.mrb[130].mxu0 }
 0xe59   : > { %v7485_v61 = vrot.slane %v7312_v30, 7  ;;  %7714 = vst.msk [vmem:[#allocation2 + $0x148] sm:$0xff] %vm2276_vm6, %v7312_v30  ;;  %v7771_v44 = vrot.slane %v7312_v30, 1  ;;  %v7770_v9 = vsel %vm2484_vm4, %v7767_v55, %v7769_v60  ;;  %v11715_v22 = vpop.f32.mrb[131].mxu0  ;;  %v7484_v28 = vsel %vm2151_vm5, %v7481_v7, %v7483_v23 }
 0xe5a   : > { %7851 = vrot.lane.b32.xlu1 %v7770_v9, %s16450_s27 }
 0xe5b   : > { %v7772_v26 = vsel %vm2484_vm4, %v7769_v60, %v7771_v44  ;;  %v7486_v58 = vsel %vm2151_vm5, %v7483_v23, %v7485_v61 }
 0xe5c   : > { %7853 = vrot.lane.b32.xlu0 %v7772_v26, %s16450_s27 }
 0xe5e   : > { %7563 = vrot.lane.b32.xlu1 %v7482_v17, %s16452_s29  ;;  %v7317_v25 = vpop.f32.mrb[132].mxu0 }
 0xe5f   : > { %v7487_v48 = vrot.slane %v7317_v25, 7  ;;  %7715 = vst.msk [vmem:[#allocation2 + $0x158] sm:$0xff] %vm2276_vm6, %v7317_v25  ;;  %v7773_v36 = vrot.slane %v7317_v25, 1  ;;  %v11718_v35 = vpop.f32.mrb[133].mxu0 }
 0xe60   : > { %7565 = vrot.lane.b32.xlu0 %v7484_v28, %s16452_s29  ;;  %v7320_v4 = vpop.f32.mrb[134].mxu0 }
 0xe61   : > { %v7489_v34 = vrot.slane %v7320_v4, 7  ;;  %7716 = vst.msk [vmem:[#allocation2 + $0x168] sm:$0xff] %vm2276_vm6, %v7320_v4  ;;  %v7775_v59 = vrot.slane %v7320_v4, 1  ;;  %v7774_v41 = vsel %vm2484_vm4, %v7771_v44, %v7773_v36  ;;  %v11719_v12 = vpop.f32.mrb[135].mxu0  ;;  %v7488_v6 = vsel %vm2151_vm5, %v7485_v61, %v7487_v48 }
 0xe62   : > { %7855 = vrot.lane.b32.xlu1 %v7774_v41, %s16450_s27 }
 0xe63   : > { %v7776_v27 = vsel %vm2484_vm4, %v7773_v36, %v7775_v59  ;;  %v7490_v19 = vsel %vm2151_vm5, %v7487_v48, %v7489_v34 }
 0xe64   : > { %7857 = vrot.lane.b32.xlu0 %v7776_v27, %s16450_s27 }
 0xe66   : > { %7567 = vrot.lane.b32.xlu1 %v7486_v58, %s16452_s29  ;;  %v7325_v52 = vpop.f32.mrb[136].mxu0 }
 0xe67   : > { %v7491_v15 = vrot.slane %v7325_v52, 7  ;;  %7717 = vst.msk [vmem:[#allocation2 + $0x178] sm:$0xff] %vm2276_vm6, %v7325_v52  ;;  %v7777_v54 = vrot.slane %v7325_v52, 1  ;;  %v11722_v39 = vpop.f32.mrb[137].mxu0 }
 0xe68   : > { %7569 = vrot.lane.b32.xlu0 %v7488_v6, %s16452_s29  ;;  %v7328_v21 = vpop.f32.mrb[138].mxu0 }
 0xe69   : > { %v7493_v62 = vrot.slane %v7328_v21, 7  ;;  %7718 = vst.msk [vmem:[#allocation2 + $0x188] sm:$0xff] %vm2276_vm6, %v7328_v21  ;;  %v7779_v37 = vrot.slane %v7328_v21, 1  ;;  %v7778_v49 = vsel %vm2484_vm4, %v7775_v59, %v7777_v54  ;;  %v11723_v33 = vpop.f32.mrb[139].mxu0  ;;  %v7492_v1 = vsel %vm2151_vm5, %v7489_v34, %v7491_v15 }
 0xe6a   : > { %7859 = vrot.lane.b32.xlu1 %v7778_v49, %s16450_s27 }
 0xe6b   : > { %v7780_v43 = vsel %vm2484_vm4, %v7777_v54, %v7779_v37  ;;  %v7494_v50 = vsel %vm2151_vm5, %v7491_v15, %v7493_v62 }
 0xe6c   : > { %7861 = vrot.lane.b32.xlu0 %v7780_v43, %s16450_s27 }
 0xe6e   : > { %7571 = vrot.lane.b32.xlu1 %v7490_v19, %s16452_s29  ;;  %v7333_v47 = vpop.f32.mrb[140].mxu0  ;;  %v12176_v19 = vld [vmem:[%s16417_s18] sm:$0xff]  }
 0xe6f   : > { %v7495_v24 = vrot.slane %v7333_v47, 7  ;;  %7719 = vst.msk [vmem:[#allocation2 + $0x198] sm:$0xff] %vm2276_vm6, %v7333_v47  ;;  %v7781_v5 = vrot.slane %v7333_v47, 1  ;;  %v11726_v46 = vpop.f32.mrb[141].mxu0  ;;  %8826 = vmatpush1.bf16.msra.mxu0 %v12176_v19 }
 0xe70   : > { %7573 = vrot.lane.b32.xlu0 %v7492_v1, %s16452_s29  ;;  %v7336_v45 = vpop.f32.mrb[142].mxu0  ;;  %8827 = vmatprep.subr.bf16.mxu0 %v16451_v53  ;;  %v12178_v46 = vld [vmem:[%s16417_s18 + $0x8] sm:$0xff]  }
 0xe71   : > { %v7497_v14 = vrot.slane %v7336_v45, 7  ;;  %7720 = vst.msk [vmem:[#allocation2 + $0x1a8] sm:$0xff] %vm2276_vm6, %v7336_v45  ;;  %v7783_v16 = vrot.slane %v7336_v45, 1  ;;  %v7782_v20 = vsel %vm2484_vm4, %v7779_v37, %v7781_v5  ;;  %v11727_v56 = vpop.f32.mrb[143].mxu0  ;;  %v7496_v3 = vsel %vm2151_vm5, %v7493_v62, %v7495_v24 }
 0xe72   : > { %7863 = vrot.lane.b32.xlu1 %v7782_v20, %s16450_s27 }
 0xe73   : > { %v7784_v2 = vsel %vm2484_vm4, %v7781_v5, %v7783_v16  ;;  %v7498_v10 = vsel %vm2151_vm5, %v7495_v24, %v7497_v14  ;;  %8828 = vmatpush1.bf16.msra.mxu0 %v12178_v46 }
 0xe74   : > { %7865 = vrot.lane.b32.xlu0 %v7784_v2, %s16450_s27  ;;  %8829 = vmatprep.subr.bf16.mxu0 %v16451_v53 }
 0xe76   : > { %7575 = vrot.lane.b32.xlu1 %v7494_v50, %s16452_s29  ;;  %v7341_v13 = vpop.f32.mrb[144].mxu0 }
 0xe77   : > { %v7499_v32 = vrot.slane %v7341_v13, 7  ;;  %7721 = vst.msk [vmem:[#allocation2 + $0x1b8] sm:$0xff] %vm2276_vm6, %v7341_v13  ;;  %v7785_v8 = vrot.slane %v7341_v13, 1  ;;  %v11730_v57 = vpop.f32.mrb[145].mxu0 }
 0xe78   : > { %7577 = vrot.lane.b32.xlu0 %v7496_v3, %s16452_s29  ;;  %v7344_v31 = vpop.f32.mrb[146].mxu0 }
 0xe79   : > { %v7501_v42 = vrot.slane %v7344_v31, 7  ;;  %7722 = vst.msk [vmem:[#allocation2 + $0x1c8] sm:$0xff] %vm2276_vm6, %v7344_v31  ;;  %v7787_v7 = vrot.slane %v7344_v31, 1  ;;  %v7786_v55 = vsel %vm2484_vm4, %v7783_v16, %v7785_v8  ;;  %v11731_v18 = vpop.f32.mrb[147].mxu0  ;;  %v7500_v40 = vsel %vm2151_vm5, %v7497_v14, %v7499_v32  ;;  %v12179_v31 = vld [vmem:[%s16417_s18 + $0x10] sm:$0xff]  }
 0xe7a   : > { %7867 = vrot.lane.b32.xlu1 %v7786_v55, %s16450_s27  ;;  %8830 = vmatpush1.bf16.msra.mxu0 %v12179_v31 }
 0xe7b   : > { %v7788_v51 = vsel %vm2484_vm4, %v7785_v8, %v7787_v7  ;;  %v7502_v38 = vsel %vm2151_vm5, %v7499_v32, %v7501_v42  ;;  %8831 = vmatprep.subr.bf16.mxu0 %v16451_v53 }
 0xe7c   : > { %7869 = vrot.lane.b32.xlu0 %v7788_v51, %s16450_s27 }
 0xe7e   : > { %7579 = vrot.lane.b32.xlu1 %v7498_v10, %s16452_s29  ;;  %v7349_v17 = vpop.f32.mrb[148].mxu0 }
 0xe7f   : > { %v7503_v11 = vrot.slane %v7349_v17, 7  ;;  %7723 = vst.msk [vmem:[#allocation2 + $0x1d8] sm:$0xff] %vm2276_vm6, %v7349_v17  ;;  %v7789_v23 = vrot.slane %v7349_v17, 1  ;;  %v11734_v60 = vpop.f32.mrb[149].mxu0 }
 0xe80   : > { %7581 = vrot.lane.b32.xlu0 %v7500_v40, %s16452_s29  ;;  %v7352_v63 = vpop.f32.mrb[150].mxu0 }
 0xe81   : > { %v7505_v30 = vrot.slane %v7352_v63, 7  ;;  %7724 = vst.msk [vmem:[#allocation2 + $0x1e8] sm:$0xff] %vm2276_vm6, %v7352_v63  ;;  %v7791_v61 = vrot.slane %v7352_v63, 1  ;;  %v7790_v44 = vsel %vm2484_vm4, %v7787_v7, %v7789_v23  ;;  %v11735_v9 = vpop.f32.mrb[151].mxu0  ;;  %v7504_v22 = vsel %vm2151_vm5, %v7501_v42, %v7503_v11 }
 0xe82   : > { %7871 = vrot.lane.b32.xlu1 %v7790_v44, %s16450_s27  ;;  %v7991_v9 = vld [vmem:[#allocation2 + $0x20] sm:$0xff] }
 0xe83   : > { %v7792_v28 = vsel %vm2484_vm4, %v7789_v23, %v7791_v61  ;;  %v7506_v26 = vsel %vm2151_vm5, %v7503_v11, %v7505_v30  ;;  %v12180_v11 = vld [vmem:[%s16417_s18 + $0x18] sm:$0xff]  }
 0xe84   : > { %7873 = vrot.lane.b32.xlu0 %v7792_v28, %s16450_s27  ;;  %8832 = vmatpush1.bf16.msra.mxu0 %v12180_v11 }
 0xe85   : > { %8833 = vmatprep.subr.bf16.mxu0 %v16451_v53 }
 0xe86   : > { %7583 = vrot.lane.b32.xlu1 %v7502_v38, %s16452_s29  ;;  %v7357_v58 = vpop.f32.mrb[152].mxu0 }
 0xe87   : > { %v7507_v25 = vrot.slane %v7357_v58, 7  ;;  %7725 = vst.msk [vmem:[#allocation2 + $0x1f8] sm:$0xff] %vm2276_vm6, %v7357_v58  ;;  %v7793_v48 = vrot.slane %v7357_v58, 1  ;;  %v11738_v36 = vpop.f32.mrb[153].mxu0 }
 0xe88   : > { %7585 = vrot.lane.b32.xlu0 %v7504_v22, %s16452_s29  ;;  %v7360_v35 = vpop.f32.mrb[154].mxu0 }
 0xe89   : > { %v7509_v4 = vrot.slane %v7360_v35, 7  ;;  %7726 = vst.msk [vmem:[#allocation2 + $0x208] sm:$0xff] %vm2276_vm6, %v7360_v35  ;;  %v7795_v34 = vrot.slane %v7360_v35, 1  ;;  %v7794_v59 = vsel %vm2484_vm4, %v7791_v61, %v7793_v48  ;;  %v11739_v41 = vpop.f32.mrb[155].mxu0  ;;  %v7508_v12 = vsel %vm2151_vm5, %v7505_v30, %v7507_v25 }
 0xe8a   : > { %7875 = vrot.lane.b32.xlu1 %v7794_v59, %s16450_s27  ;;  %v12182_v41 = vld [vmem:[%s16417_s18 + $0x20] sm:$0xff]  }
 0xe8b   : > { %v7796_v6 = vsel %vm2484_vm4, %v7793_v48, %v7795_v34  ;;  %v7510_v27 = vsel %vm2151_vm5, %v7507_v25, %v7509_v4  ;;  %v12177_v48 = vld [vmem:[%s16417_s18 + $0xc0] sm:$0xff]   ;;  %8834 = vmatpush1.bf16.msra.mxu0 %v12182_v41 }
 0xe8c   : > { %7877 = vrot.lane.b32.xlu0 %v7796_v6, %s16450_s27  ;;  %8835 = vmatprep.subr.bf16.mxu0 %v16451_v53 }
 0xe8e   : > { %v7822_v52 = vpop.permute.xlu0 %7821  ;;  %7587 = vrot.lane.b32.xlu1 %v7506_v26, %s16452_s29  ;;  %v7365_v15 = vpop.f32.mrb[156].mxu0 }
 0xe8f   : > { %7946 = vst.msk [vmem:[#allocation2 + $0x38] sm:$0xff] %vm2441_vm8, %v7822_v52  ;;  %v7511_v54 = vrot.slane %v7365_v15, 7  ;;  %v7797_v39 = vrot.slane %v7365_v15, 1  ;;  %v11742_v21 = vpop.f32.mrb[157].mxu0 }
 0xe90   : > { %7727 = vst.msk [vmem:[#allocation2 + $0x218] sm:$0xff] %vm2276_vm6, %v7365_v15  ;;  %7589 = vrot.lane.b32.xlu0 %v7508_v12, %s16452_s29  ;;  %v7368_v62 = vpop.f32.mrb[158].mxu0  ;;  %v12181_v21 = vld [vmem:[%s16417_s18 + $0xc8] sm:$0xff]  }
 0xe91   : > { %v7513_v37 = vrot.slane %v7368_v62, 7  ;;  %7728 = vst.msk [vmem:[#allocation2 + $0x228] sm:$0xff] %vm2276_vm6, %v7368_v62  ;;  %v7799_v49 = vrot.slane %v7368_v62, 1  ;;  %v7798_v33 = vsel %vm2484_vm4, %v7795_v34, %v7797_v39  ;;  %v11743_v1 = vpop.f32.mrb[159].mxu0  ;;  %v7512_v43 = vsel %vm2151_vm5, %v7509_v4, %v7511_v54 }
 0xe92   : > { %v7534_v50 = vpop.permute.xlu0 %7533  ;;  %7879 = vrot.lane.b32.xlu1 %v7798_v33, %s16450_s27  ;;  %v12184_v33 = vld [vmem:[%s16417_s18 + $0x28] sm:$0xff]  }
 0xe93   : > { %7656 = vst.msk [vmem:[#allocation2 + $0x30] sm:$0xfe] %vm6035_vm0, %v7534_v50  ;;  %v7800_v47 = vsel %vm2484_vm4, %v7797_v39, %v7799_v49  ;;  %v7514_v24 = vsel %vm2151_vm5, %v7511_v54, %v7513_v37  ;;  %8836 = vmatpush1.bf16.msra.mxu0 %v12184_v33 }
 0xe94   : > { %v7824_v5 = vpop.permute.xlu1 %7823  ;;  %7881 = vrot.lane.b32.xlu0 %v7800_v47, %s16450_s27  ;;  %8837 = vmatprep.subr.bf16.mxu0 %v16451_v53 }
 0xe95   : > { %7947 = vst.msk [vmem:[#allocation2 + $0x48] sm:$0xff] %vm2441_vm8, %v7824_v5 }
 0xe96   : > { %v7826_v45 = vpop.permute.xlu0 %7825  ;;  %7591 = vrot.lane.b32.xlu1 %v7510_v27, %s16452_s29  ;;  %v7373_v14 = vpop.f32.mrb[160].mxu0  ;;  %v7994_v40 = vld [vmem:[#allocation2 + $0x38] sm:$0xff] }
 0xe97   : > { %7948 = vst.msk [vmem:[#allocation2 + $0x58] sm:$0xff] %vm2441_vm8, %v7826_v45  ;;  %v7515_v16 = vrot.slane %v7373_v14, 7  ;;  %v7801_v20 = vrot.slane %v7373_v14, 1  ;;  %v11746_v56 = vpop.f32.mrb[161].mxu0 }
 0xe98   : > { %7729 = vst.msk [vmem:[#allocation2 + $0x238] sm:$0xff] %vm2276_vm6, %v7373_v14  ;;  %v7536_v3 = vpop.permute.xlu1 %7535  ;;  %7593 = vrot.lane.b32.xlu0 %v7512_v43, %s16452_s29  ;;  %v7376_v2 = vpop.f32.mrb[162].mxu0 }
 0xe99   : > { %7657 = vst.msk [vmem:[#allocation2 + $0x40] sm:$0xff] %vm6037_vm3, %v7536_v3  ;;  %v7517_v10 = vrot.slane %v7376_v2, 7  ;;  %v7803_v13 = vrot.slane %v7376_v2, 1  ;;  %v7802_v32 = vsel %vm2484_vm4, %v7799_v49, %v7801_v20  ;;  %v11747_v8 = vpop.f32.mrb[163].mxu0  ;;  %v7516_v57 = vsel %vm2151_vm5, %v7513_v37, %v7515_v16 }
 0xe9a   : > { %7730 = vst.msk [vmem:[#allocation2 + $0x248] sm:$0xff] %vm2276_vm6, %v7376_v2  ;;  %v7538_v42 = vpop.permute.xlu0 %7537  ;;  %7883 = vrot.lane.b32.xlu1 %v7802_v32, %s16450_s27  ;;  %v7993_v17 = vld [vmem:[#allocation2 + $0x30] sm:$0xff] }
 0xe9b   : > { %7658 = vst.msk [vmem:[#allocation2 + $0x50] sm:$0xff] %vm6037_vm3, %v7538_v42  ;;  %v7804_v7 = vsel %vm2484_vm4, %v7801_v20, %v7803_v13  ;;  %v7518_v55 = vsel %vm2151_vm5, %v7515_v16, %v7517_v10  ;;  %v8073_v25 = vpack.c.bf16 %v7993_v17, %v7991_v9  ;;  %v12183_v20 = vld [vmem:[%s16417_s18 + $0xd0] sm:$0xff]  }
 0xe9c   : > { %v7828_v18 = vpop.permute.xlu1 %7827  ;;  %7885 = vrot.lane.b32.xlu0 %v7804_v7, %s16450_s27  ;;  %v15450_v51 = vld [vmem:[#allocation2 + $0x48] sm:$0xff]  ;;  %v12186_v8 = vld [vmem:[%s16417_s18 + $0x30] sm:$0xff]  }
 0xe9d   : > { %7949 = vst.msk [vmem:[#allocation2 + $0x68] sm:$0xff] %vm2441_vm8, %v7828_v18  ;;  %v8144_v38 = vpack.c.bf16 %v15450_v51, %v7994_v40  ;;  %v15495_v62 = vrot.slane %v8073_v25, 3  ;;  %8838 = vmatpush1.bf16.msra.mxu0 %v12186_v8 }
 0xe9e   : > { %v7830_v23 = vpop.permute.xlu0 %7829  ;;  %7595 = vrot.lane.b32.xlu1 %v7514_v24, %s16452_s29  ;;  %v7381_v60 = vpop.f32.mrb[164].mxu0  ;;  %v15459_v63 = vld [vmem:[#allocation2 + $0x58] sm:$0xff]  ;;  %8839 = vmatprep.subr.bf16.mxu0 %v16451_v53 }
 0xe9f   : > { %7950 = vst.msk [vmem:[#allocation2 + $0x78] sm:$0xff] %vm2441_vm8, %v7830_v23  ;;  %v7519_v30 = vrot.slane %v7381_v60, 7  ;;  %v7805_v61 = vrot.slane %v7381_v60, 1  ;;  %v11750_v44 = vpop.f32.mrb[165].mxu0  ;;  %10376 = vmatprep.mubr.msk.bf16.mxu1 %vm632_vm13, %v8144_v38  ;;  %v8076_v22 = vpack.c.bf16 %v15459_v63, %v15450_v51  ;;  %v12185_v23 = vld [vmem:[%s16417_s18 + $0xd8] sm:$0xff]  }
 0xea0   : > { %7731 = vst.msk [vmem:[#allocation2 + $0x258] sm:$0xff] %vm2276_vm6, %v7381_v60  ;;  %v7540_v28 = vpop.permute.xlu1 %7539  ;;  %7597 = vrot.lane.b32.xlu0 %v7516_v57, %s16452_s29  ;;  %v15467_v26 = vpop.f32.mrb[166].mxu0  ;;  %v7995_v58 = vld [vmem:[#allocation2 + $0x40] sm:$0xff]  ;;  %v12188_v44 = vld [vmem:[%s16417_s18 + $0x38] sm:$0xff]  }
 0xea1   : > { %7659 = vst.msk [vmem:[#allocation2 + $0x60] sm:$0xff] %vm6037_vm3, %v7540_v28  ;;  %v7521_v36 = vrot.slane %v15467_v26, 7  ;;  %v7807_v35 = vrot.slane %v15467_v26, 1  ;;  %v7806_v4 = vsel %vm2484_vm4, %v7803_v13, %v7805_v61  ;;  %v8143_v34 = vpack.c.bf16 %v7995_v58, %v7993_v17  ;;  %v11751_v59 = vpop.f32.mrb[167].mxu0  ;;  %v9026_v17 = vld [vmem:[#allocation2 + $0x58] sm:$0xfc]  ;;  %8840 = vmatpush1.bf16.msra.mxu0 %v12188_v44 }
 0xea2   : > { %7732 = vst.msk [vmem:[#allocation2 + $0x268] sm:$0xff] %vm2276_vm6, %v15467_v26  ;;  %v7542_v12 = vpop.permute.xlu0 %7541  ;;  %7887 = vrot.lane.b32.xlu1 %v7806_v4, %s16450_s27  ;;  %v7520_v6 = vsel %vm2151_vm5, %v7517_v10, %v7519_v30  ;;  %v7997_v27 = vld [vmem:[#allocation2 + $0x50] sm:$0xff]  ;;  %v15542_v7 = vrot.slane %v8076_v22, 3  ;;  %8841 = vmatprep.subr.bf16.mxu0 %v16451_v53 }
 0xea3   : > { %7660 = vst.msk [vmem:[#allocation2 + $0x70] sm:$0xff] %vm6037_vm3, %v7542_v12  ;;  %8378 = vmatmul.mubr.bf16.vlgmr.msra.gmra.mrb[228].mxu1 %v8143_v34  ;;  %v7808_v19 = vsel %vm2484_vm4, %v7805_v61, %v7807_v35  ;;  %v8075_v52 = vpack.c.bf16 %v7997_v27, %v7995_v58  ;;  %v15487_v15 = vsel %vm2151_vm5, %v7519_v30, %v7521_v36  ;;  %v9025_v9 = vld [vmem:[#allocation2 + $0x50] sm:$0xfc]  ;;  %v12187_v12 = vld [vmem:[%s16417_s18 + $0xe0] sm:$0xff]  }
 0xea4   : > { %v7832_v54 = vpop.permute.xlu1 %7831  ;;  %7889 = vrot.lane.b32.xlu0 %v7808_v19, %s16450_s27  ;;  %v15490_v39 = vld [vmem:[#allocation2 + $0x68] sm:$0xff]  ;;  %9455 = vmatpush1.bf16.msra.mxu1 %v12177_v48 }
 0xea5   : > { %7951 = vst.msk [vmem:[#allocation2 + $0x88] sm:$0xff] %vm2441_vm8, %v7832_v54  ;;  %v8146_v37 = vpack.c.bf16 %v15490_v39, %v15459_v63  ;;  %v15500_v49 = vrot.slane %v8075_v52, 3  ;;  %9456 = vmatprep.subr.bf16.mxu1 %v16451_v53  ;;  %v9108_v60 = vpack.c.bf16 %v15490_v39, %v9026_v17 }
 0xea6   : > { %v7834_v1 = vpop.permute.xlu0 %7833  ;;  %7599 = vrot.lane.b32.xlu1 %v7518_v55, %s16452_s29  ;;  %v7389_v43 = vpop.f32.mrb[168].mxu0  ;;  %v8002_v50 = vld [vmem:[#allocation2 + $0x78] sm:$0xff] }
 0xea7   : > { %7952 = vst.msk [vmem:[#allocation2 + $0x98] sm:$0xff] %vm2441_vm8, %v7834_v1  ;;  %v7523_v47 = vrot.slane %v7389_v43, 7  ;;  %v7809_v24 = vrot.slane %v7389_v43, 1  ;;  %v11754_v5 = vpop.f32.mrb[169].mxu0  ;;  %10377 = vmatprep.mubr.msk.bf16.mxu1 %vm632_vm13, %v8146_v37  ;;  %v15514_v46 = vsel %vm3169_vm14, %v15495_v62, %v15500_v49  ;;  %v8078_v56 = vpack.c.bf16 %v8002_v50, %v15490_v39 }
 0xea8   : > { %7733 = vst.msk [vmem:[#allocation2 + $0x278] sm:$0xff] %vm2276_vm6, %v7389_v43  ;;  %v7544_v45 = vpop.permute.xlu1 %7543  ;;  %7601 = vrot.lane.b32.xlu0 %v7520_v6, %s16452_s29  ;;  %v15517_v14 = vpop.f32.mrb[170].mxu0  ;;  %v15519_v16 = vld [vmem:[#allocation2 + $0x60] sm:$0xff]  ;;  %9457 = vmatpush1.bf16.msra.mxu1 %v12181_v21  ;;  %v9219_v6 = vrot.slane %v9108_v60, 1 }
 0xea9   : > { %7661 = vst.msk [vmem:[#allocation2 + $0x80] sm:$0xff] %vm6037_vm3, %v7544_v45  ;;  %v7525_v3 = vrot.slane %v15517_v14, 7  ;;  %v7811_v2 = vrot.slane %v15517_v14, 1  ;;  %v7810_v10 = vsel %vm2484_vm4, %v7807_v35, %v7809_v24  ;;  %v8145_v13 = vpack.c.bf16 %v15519_v16, %v7997_v27  ;;  %v11755_v32 = vpop.f32.mrb[171].mxu0  ;;  %9458 = vmatprep.subr.bf16.mxu1 %v16451_v53  ;;  %v12190_v21 = vld [vmem:[%s16417_s18 + $0x40] sm:$0xff]   ;;  %v12192_v45 = vld [vmem:[%s16417_s18 + $0x48] sm:$0xff]  }
 0xeaa   : > { %7734 = vst.msk [vmem:[#allocation2 + $0x288] sm:$0xff] %vm2276_vm6, %v15517_v14  ;;  %v7546_v57 = vpop.permute.xlu0 %7545  ;;  %7891 = vrot.lane.b32.xlu1 %v7810_v10, %s16450_s27  ;;  %v7524_v31 = vsel %vm2151_vm5, %v7521_v36, %v7523_v47  ;;  %v8001_v42 = vld [vmem:[#allocation2 + $0x70] sm:$0xff]  ;;  %v15544_v55 = vrot.slane %v8078_v56, 3  ;;  %v9107_v58 = vpack.c.bf16 %v15519_v16, %v9025_v9  ;;  %8842 = vmatpush1.bf16.msra.mxu0 %v12190_v21  ;;  %v12189_v56 = vld [vmem:[%s16417_s18 + $0xe8] sm:$0xff]  }
 0xeab   : > { %7662 = vst.msk [vmem:[#allocation2 + $0x90] sm:$0xff] %vm6037_vm3, %v7546_v57  ;;  %8386 = vmatmul.mubr.bf16.gmra.mrb[232].mxu1 %v8145_v13  ;;  %v7812_v18 = vsel %vm2484_vm4, %v7809_v24, %v7811_v2  ;;  %v8077_v40 = vpack.c.bf16 %v8001_v42, %v15519_v16  ;;  %v15552_v38 = vsel %vm2151_vm5, %v7523_v47, %v7525_v3 }
 0xeac   : > { %v7836_v11 = vpop.permute.xlu1 %7835  ;;  %7893 = vrot.lane.b32.xlu0 %v7812_v18, %s16450_s27  ;;  %v8004_v51 = vld [vmem:[#allocation2 + $0x88] sm:$0xff]  ;;  %9459 = vmatpush1.bf16.msra.mxu1 %v12183_v20  ;;  %v15562_v63 = vsel %vm3169_vm14, %v15542_v7, %v15544_v55  ;;  %v9216_v43 = vrot.slane %v9107_v58, 1 }
 0xead   : > { %7953 = vst.msk [vmem:[#allocation2 + $0xa8] sm:$0xff] %vm2441_vm8, %v7836_v11  ;;  %v15565_v30 = vpack.c.bf16 %v8004_v51, %v8002_v50  ;;  %v15567_v61 = vrot.slane %v8077_v40, 3  ;;  %9460 = vmatprep.subr.bf16.mxu1 %v16451_v53  ;;  %8843 = vmatprep.subr.bf16.mxu0 %v16451_v53  ;;  %v12194_v40 = vld [vmem:[%s16417_s18 + $0x50] sm:$0xff]  }
 0xeae   : > { %v7838_v22 = vpop.permute.xlu0 %7837  ;;  %7603 = vrot.lane.b32.xlu1 %v15487_v15, %s16452_s29  ;;  %v7397_v28 = vpop.f32.mrb[172].mxu0  ;;  %v8006_v26 = vld [vmem:[#allocation2 + $0x98] sm:$0xff]  ;;  %8844 = vmatpush1.bf16.msra.mxu0 %v12192_v45 }
 0xeaf   : > { %7954 = vst.msk [vmem:[#allocation2 + $0xb8] sm:$0xff] %vm2441_vm8, %v7838_v22  ;;  %v7527_v25 = vrot.slane %v7397_v28, 7  ;;  %v7813_v48 = vrot.slane %v7397_v28, 1  ;;  %v11758_v36 = vpop.f32.mrb[173].mxu0  ;;  %10378 = vmatprep.mubr.msk.bf16.mxu1 %vm632_vm13, %v15565_v30  ;;  %v15584_v35 = vsel %vm3169_vm14, %v15500_v49, %v15567_v61  ;;  %v9220_v4 = vrot.slane %v15565_v30, 1  ;;  %8845 = vmatprep.subr.bf16.mxu0 %v16451_v53  ;;  %v12193_v30 = vld [vmem:[%s16417_s18 + $0xf8] sm:$0xff]  }
 0xeb0   : > { %7735 = vst.msk [vmem:[#allocation2 + $0x298] sm:$0xff] %vm2276_vm6, %v7397_v28  ;;  %v7548_v34 = vpop.permute.xlu1 %7547  ;;  %7605 = vrot.lane.b32.xlu0 %v7524_v31, %s16452_s29  ;;  %v15588_v59 = vpop.f32.mrb[174].mxu0  ;;  %v8003_v41 = vld [vmem:[#allocation2 + $0x80] sm:$0xff]  ;;  %9461 = vmatpush1.bf16.msra.mxu1 %v12185_v23  ;;  %v8080_v27 = vpack.c.bf16 %v8006_v26, %v8004_v51  ;;  %v12191_v23 = vld [vmem:[%s16417_s18 + $0xf0] sm:$0xff]  }
 0xeb1   : > { %7663 = vst.msk [vmem:[#allocation2 + $0xa0] sm:$0xff] %vm6037_vm3, %v7548_v34  ;;  %v7529_v19 = vrot.slane %v15588_v59, 7  ;;  %v7815_v52 = vrot.slane %v15588_v59, 1  ;;  %v7814_v15 = vsel %vm2484_vm4, %v7811_v2, %v7813_v48  ;;  %v15599_v54 = vpack.c.bf16 %v8003_v41, %v8001_v42  ;;  %v11759_v39 = vpop.f32.mrb[175].mxu0  ;;  %9462 = vmatprep.subr.bf16.mxu1 %v16451_v53 }
 0xeb2   : > { %7736 = vst.msk [vmem:[#allocation2 + $0x2a8] sm:$0xff] %vm2276_vm6, %v15588_v59  ;;  %v7550_v37 = vpop.permute.xlu0 %7549  ;;  %7895 = vrot.lane.b32.xlu1 %v7814_v15, %s16450_s27  ;;  %v7528_v49 = vsel %vm2151_vm5, %v7525_v3, %v7527_v25  ;;  %v8005_v33 = vld [vmem:[#allocation2 + $0x90] sm:$0xff]  ;;  %v15613_v1 = vsel %vm2484_vm4, %v9219_v6, %v9220_v4  ;;  %v15615_v50 = vrot.slane %v8080_v27, 3  ;;  %8846 = vmatpush1.bf16.msra.mxu0 %v12194_v40 }
 0xeb3   : > { %7664 = vst.msk [vmem:[#allocation2 + $0xb0] sm:$0xff] %vm6037_vm3, %v7550_v37  ;;  %8394 = vmatmul.mubr.bf16.gmra.mrb[236].mxu1 %v15599_v54  ;;  %v7816_v47 = vsel %vm2484_vm4, %v7813_v48, %v7815_v52  ;;  %v8079_v24 = vpack.c.bf16 %v8005_v33, %v8003_v41  ;;  %v15621_v5 = vsel %vm2151_vm5, %v7527_v25, %v7529_v19  ;;  %v9217_v14 = vrot.slane %v15599_v54, 1  ;;  %v12198_v40 = vld [vmem:[%s16417_s18 + $0x110] sm:$0xff]  }
 0xeb4   : > { %v7840_v16 = vpop.permute.xlu1 %7839  ;;  %7897 = vrot.lane.b32.xlu0 %v7816_v47, %s16450_s27  ;;  %v8008_v20 = vld [vmem:[#allocation2 + $0xa8] sm:$0xff]  ;;  %9463 = vmatpush1.bf16.msra.mxu1 %v12187_v12  ;;  %v15634_v3 = vsel %vm3169_vm14, %v15544_v55, %v15615_v50 }
 0xeb5   : > { %7955 = vst.msk [vmem:[#allocation2 + $0xc8] sm:$0xff] %vm2441_vm8, %v7840_v16  ;;  %v15637_v2 = vpack.c.bf16 %v8008_v20, %v8006_v26  ;;  %v8601_v10 = vrot.slane %v8079_v24, 3  ;;  %9464 = vmatprep.subr.bf16.mxu1 %v16451_v53  ;;  %v15644_v13 = vsel %vm2484_vm4, %v9216_v43, %v9217_v14  ;;  %8847 = vmatprep.subr.bf16.mxu0 %v16451_v53  ;;  %v12197_v16 = vld [vmem:[%s16417_s18 + $0x108] sm:$0xff]  }
 0xeb6   : > { %v7842_v32 = vpop.permute.xlu0 %7841  ;;  %7607 = vrot.lane.b32.xlu1 %v15552_v38, %s16452_s29  ;;  %v7405_v8 = vpop.f32.mrb[176].mxu0  ;;  %v8010_v57 = vld [vmem:[#allocation2 + $0xb8] sm:$0xff] }
 0xeb7   : > { %7956 = vst.msk [vmem:[#allocation2 + $0xd8] sm:$0xff] %vm2441_vm8, %v7842_v32  ;;  %v7531_v31 = vrot.slane %v7405_v8, 7  ;;  %v7817_v42 = vrot.slane %v7405_v8, 1  ;;  %10379 = vmatprep.mubr.msk.bf16.mxu1 %vm632_vm13, %v15637_v2  ;;  %v15654_v55 = vsel %vm3169_vm14, %v15567_v61, %v8601_v10  ;;  %v11762_v18 = vpop.f32.mrb[177].mxu0  ;;  %v9224_v38 = vrot.slane %v15637_v2, 1 }
 0xeb8   : > { %7737 = vst.msk [vmem:[#allocation2 + $0x2b8] sm:$0xf] %vm5361_vm10, %v7405_v8  ;;  %v7552_v17 = vpop.permute.xlu1 %7551  ;;  %7609 = vrot.lane.b32.xlu0 %v7528_v49, %s16452_s29  ;;  %v8007_v11 = vld [vmem:[#allocation2 + $0xa0] sm:$0xff]  ;;  %v7408_v51 = vpop.f32.mrb[178].mxu0  ;;  %9465 = vmatpush1.bf16.msra.mxu1 %v12189_v56  ;;  %v8082_v60 = vpack.c.bf16 %v8010_v57, %v8008_v20 }
 0xeb9   : > { %7665 = vst.msk [vmem:[#allocation2 + $0xc0] sm:$0xff] %vm6037_vm3, %v7552_v17  ;;  %v7818_v61 = vsel %vm2484_vm4, %v7815_v52, %v7817_v42  ;;  %v15666_v44 = vpack.c.bf16 %v8007_v11, %v8005_v33  ;;  %v7532_v9 = vsel %vm2151_vm5, %v7529_v19, %v7531_v31  ;;  %v11763_v22 = vpop.f32.mrb[179].mxu0  ;;  %9466 = vmatprep.subr.bf16.mxu1 %v16451_v53  ;;  %v12195_v49 = vld [vmem:[%s16417_s18 + $0x100] sm:$0xff]  }
 0xeba   : > { %v7554_v28 = vpop.permute.xlu0 %7553  ;;  %7899 = vrot.lane.b32.xlu1 %v7818_v61, %s16450_s27  ;;  %v8009_v26 = vld [vmem:[#allocation2 + $0xb0] sm:$0xff]  ;;  %v15675_v58 = vsel %vm2484_vm4, %v9220_v4, %v9224_v38  ;;  %v8607_v25 = vrot.slane %v8082_v60, 3  ;;  %v12196_v4 = vld [vmem:[%s16417_s18 + $0x58] sm:$0xff]  }
 0xebb   : > { %7666 = vst.msk [vmem:[#allocation2 + $0xd0] sm:$0xff] %vm6037_vm3, %v7554_v28  ;;  %8402 = vmatmul.mubr.bf16.gmra.mrb[240].mxu1 %v15666_v44  ;;  %v8081_v48 = vpack.c.bf16 %v8009_v26, %v8007_v11  ;;  %v9222_v36 = vrot.slane %v15666_v44, 1  ;;  %8848 = vmatpush1.bf16.msra.mxu0 %v12196_v4  ;;  %v12199_v28 = vld [vmem:[%s16417_s18 + $0x118] sm:$0xff]  }
 0xebc   : > { %v7844_v34 = vpop.permute.xlu1 %7843  ;;  %7901 = vrot.lane.b32.xlu0 %v7817_v42, %s16450_s27  ;;  %v8012_v59 = vld [vmem:[#allocation2 + $0xc8] sm:$0xff]  ;;  %9467 = vmatpush1.bf16.msra.mxu1 %v12191_v23  ;;  %v15689_v41 = vsel %vm3169_vm14, %v15615_v50, %v8607_v25 }
 0xebd   : > { %7957 = vst.msk [vmem:[#allocation2 + $0xe8] sm:$0xff] %vm2441_vm8, %v7844_v34  ;;  %v8152_v12 = vpack.c.bf16 %v8012_v59, %v8010_v57  ;;  %v8605_v6 = vrot.slane %v8081_v48, 3  ;;  %9468 = vmatprep.subr.bf16.mxu1 %v16451_v53  ;;  %v15697_v27 = vsel %vm2484_vm4, %v9217_v14, %v9222_v36 }
 0xebe   : > { %v7846_v19 = vpop.permute.xlu0 %7845  ;;  %7611 = vrot.lane.b32.xlu1 %v15621_v5, %s16452_s29  ;;  %v8014_v52 = vld [vmem:[#allocation2 + $0xd8] sm:$0xff] }
 0xebf   : > { %7958 = vst.msk [vmem:[#allocation2 + $0xf8] sm:$0xff] %vm2441_vm8, %v7846_v19  ;;  %10380 = vmatprep.mubr.msk.bf16.mxu1 %vm632_vm13, %v8152_v12  ;;  %v15704_v15 = vsel %vm3169_vm14, %v8601_v10, %v8605_v6  ;;  %v9228_v39 = vrot.slane %v8152_v12, 1  ;;  %v8084_v21 = vpack.c.bf16 %v8014_v52, %v8012_v59 }
 0xec0   : > { %v7556_v37 = vpop.permute.xlu1 %7555  ;;  %7819 = vrot.lane.b32.xlu0 %v7738_v29, %s16450_s27  ;;  %v8011_v54 = vld [vmem:[#allocation2 + $0xc0] sm:$0xff]  ;;  %9469 = vmatpush1.bf16.msra.mxu1 %v12193_v30 }
 0xec1   : > { %7667 = vst.msk [vmem:[#allocation2 + $0xe0] sm:$0xff] %vm6037_vm3, %v7556_v37  ;;  %v8151_v33 = vpack.c.bf16 %v8011_v54, %v8009_v26  ;;  %9470 = vmatprep.subr.bf16.mxu1 %v16451_v53  ;;  %v15715_v43 = vsel %vm2484_vm4, %v9224_v38, %v9228_v39  ;;  %v8611_v50 = vrot.slane %v8084_v21, 3 }
 0xec2   : > { %v7558_v47 = vpop.permute.xlu0 %7557  ;;  %7613 = vrot.lane.b32.xlu1 %v7532_v9, %s16452_s29  ;;  %v8013_v0 = vld [vmem:[#allocation2 + $0xd0] sm:$0xff]  ;;  %s16234_s29 = scalar_lea.vmem %s16419_s20, %s11993_s25 }
 0xec3   : > { %7668 = vst.msk [vmem:[#allocation2 + $0xf0] sm:$0xff] %vm6037_vm3, %v7558_v47  ;;  %8410 = vmatmul.mubr.bf16.gmra.mrb[244].mxu1 %v8151_v33  ;;  %v8083_v29 = vpack.c.bf16 %v8013_v0, %v8011_v54  ;;  %v9226_v24 = vrot.slane %v8151_v33, 1  ;;  %v15720_v5 = vsel %vm3169_vm14, %v8607_v25, %v8611_v50 }
 0xec4   : > { %v7848_v45 = vpop.permute.xlu1 %7847  ;;  %v8016_v14 = vld [vmem:[#allocation2 + $0xe8] sm:$0xff]  ;;  %9471 = vmatpush1.bf16.msra.mxu1 %v12195_v49 }
 0xec5   : > { %7959 = vst.msk [vmem:[#allocation2 + $0x108] sm:$0xff] %vm2441_vm8, %v7848_v45  ;;  %v8154_v20 = vpack.c.bf16 %v8016_v14, %v8014_v52  ;;  %v8609_v56 = vrot.slane %v8083_v29, 3  ;;  %9472 = vmatprep.subr.bf16.mxu1 %v16451_v53  ;;  %v15728_v2 = vsel %vm2484_vm4, %v9222_v36, %v9226_v24 }
 0xec6   : > { %v7850_v10 = vpop.permute.xlu0 %7849  ;;  %v8018_v32 = vld [vmem:[#allocation2 + $0xf8] sm:$0xff] }
 0xec7   : > { %7960 = vst.msk [vmem:[#allocation2 + $0x118] sm:$0xff] %vm2441_vm8, %v7850_v10  ;;  %10381 = vmatprep.mubr.msk.bf16.mxu1 %vm632_vm13, %v8154_v20  ;;  %v15733_v8 = vsel %vm3169_vm14, %v8605_v6, %v8609_v56  ;;  %v9232_v57 = vrot.slane %v8154_v20, 1  ;;  %v8086_v31 = vpack.c.bf16 %v8018_v32, %v8016_v14 }
 0xec8   : > { %v7560_v42 = vpop.permute.xlu1 %7559  ;;  %v8015_v18 = vld [vmem:[#allocation2 + $0xe0] sm:$0xff]  ;;  %9473 = vmatpush1.bf16.msra.mxu1 %v12197_v16 }
 0xec9   : > { %7669 = vst.msk [vmem:[#allocation2 + $0x100] sm:$0xff] %vm6037_vm3, %v7560_v42  ;;  %v8153_v38 = vpack.c.bf16 %v8015_v18, %v8013_v0  ;;  %9474 = vmatprep.subr.bf16.mxu1 %v16451_v53  ;;  %v15741_v17 = vsel %vm2484_vm4, %v9228_v39, %v9232_v57  ;;  %v8615_v11 = vrot.slane %v8086_v31, 3 }
 0xeca   : > { %v7562_v51 = vpop.permute.xlu0 %7561  ;;  %v8017_v23 = vld [vmem:[#allocation2 + $0xf0] sm:$0xff] }
 0xecb   : > { %7670 = vst.msk [vmem:[#allocation2 + $0x110] sm:$0xff] %vm6037_vm3, %v7562_v51  ;;  %8418 = vmatmul.mubr.bf16.gmra.mrb[248].mxu1 %v8153_v38  ;;  %v8085_v60 = vpack.c.bf16 %v8017_v23, %v8015_v18  ;;  %v9230_v61 = vrot.slane %v8153_v38, 1  ;;  %v15745_v44 = vsel %vm3169_vm14, %v8611_v50, %v8615_v11 }
 0xecc   : > { %v7852_v9 = vpop.permute.xlu1 %7851  ;;  %v8020_v22 = vld [vmem:[#allocation2 + $0x108] sm:$0xff]  ;;  %9475 = vmatpush1.bf16.msra.mxu1 %v12198_v40 }
 0xecd   : > { %7961 = vst.msk [vmem:[#allocation2 + $0x128] sm:$0xff] %vm2441_vm8, %v7852_v9  ;;  %v8156_v26 = vpack.c.bf16 %v8020_v22, %v8018_v32  ;;  %v8613_v25 = vrot.slane %v8085_v60, 3  ;;  %9476 = vmatprep.subr.bf16.mxu1 %v16451_v53  ;;  %v15753_v48 = vsel %vm2484_vm4, %v9226_v24, %v9230_v61 }
 0xece   : > { %v7854_v36 = vpop.permute.xlu0 %7853  ;;  %v8022_v34 = vld [vmem:[#allocation2 + $0x118] sm:$0xff] }
 0xecf   : > { %7962 = vst.msk [vmem:[#allocation2 + $0x138] sm:$0xff] %vm2441_vm8, %v7854_v36  ;;  %10382 = vmatprep.mubr.msk.bf16.mxu1 %vm632_vm13, %v8156_v26  ;;  %v15758_v59 = vsel %vm3169_vm14, %v8609_v56, %v8613_v25  ;;  %v9236_v30 = vrot.slane %v8156_v26, 1  ;;  %v8088_v4 = vpack.c.bf16 %v8022_v34, %v8020_v22 }
 0xed0   : > { %v7564_v12 = vpop.permute.xlu1 %7563  ;;  %v8019_v6 = vld [vmem:[#allocation2 + $0x100] sm:$0xff]  ;;  %9477 = vmatpush1.bf16.msra.mxu1 %v12199_v28 }
 0xed1   : > { %7671 = vst.msk [vmem:[#allocation2 + $0x120] sm:$0xff] %vm6037_vm3, %v7564_v12  ;;  %v8155_v53 = vpack.c.bf16 %v8019_v6, %v8017_v23  ;;  %v15762_v19 = vsel %vm2484_vm4, %v9232_v57, %v9236_v30  ;;  %v8619_v52 = vrot.slane %v8088_v4, 3 }
 0xed2   : > { %v7566_v39 = vpop.permute.xlu0 %7565  ;;  %v8021_v21 = vld [vmem:[#allocation2 + $0x110] sm:$0xff] }
 0xed3   : > { %7672 = vst.msk [vmem:[#allocation2 + $0x130] sm:$0xff] %vm6037_vm3, %v7566_v39  ;;  %v8087_v37 = vpack.c.bf16 %v8021_v21, %v8019_v6  ;;  %8426 = vmatmul.mubr.bf16.gmra.mrb[252].mxu1 %v8155_v53  ;;  %v9234_v54 = vrot.slane %v8155_v53, 1  ;;  %v15766_v49 = vsel %vm3169_vm14, %v8615_v11, %v8619_v52 }
 0xed4   : > { %v7856_v33 = vpop.permute.xlu1 %7855  ;;  %v8024_v50 = vld [vmem:[#allocation2 + $0x128] sm:$0xff] }
 0xed5   : > { %v8617_v47 = vrot.slane %v8087_v37, 3  ;;  %7963 = vst.msk [vmem:[#allocation2 + $0x148] sm:$0xff] %vm2441_vm8, %v7856_v33  ;;  %v8158_v0 = vpack.c.bf16 %v8024_v50, %v8022_v34  ;;  %v15770_v29 = vsel %vm2484_vm4, %v9230_v61, %v9234_v54 }
 0xed6   : > { %v7858_v24 = vpop.permute.xlu0 %7857  ;;  %v8026_v45 = vld [vmem:[#allocation2 + $0x138] sm:$0xff] }
 0xed7   : > { %v15773_v14 = vsel %vm3169_vm14, %v8613_v25, %v8617_v47  ;;  %7964 = vst.msk [vmem:[#allocation2 + $0x158] sm:$0xff] %vm2441_vm8, %v7858_v24  ;;  %10383 = vmatprep.mubr.msk.bf16.mxu1 %vm632_vm13, %v8158_v0  ;;  %v9240_v16 = vrot.slane %v8158_v0, 1  ;;  %v8090_v20 = vpack.c.bf16 %v8026_v45, %v8024_v50 }
 0xed8   : > { %v8023_v56 = vld [vmem:[#allocation2 + $0x120] sm:$0xff]  ;;  %v7568_v10 = vpop.permute.xlu1 %7567 }
 0xed9   : > { %v8157_v32 = vpack.c.bf16 %v8023_v56, %v8021_v21  ;;  %7673 = vst.msk [vmem:[#allocation2 + $0x140] sm:$0xff] %vm6037_vm3, %v7568_v10  ;;  %v15779_v57 = vsel %vm2484_vm4, %v9236_v30, %v9240_v16  ;;  %v8623_v31 = vrot.slane %v8090_v20, 3 }
 0xeda   : > { %v8025_v42 = vld [vmem:[#allocation2 + $0x130] sm:$0xff]  ;;  %v7570_v18 = vpop.permute.xlu0 %7569 }
 0xedb   : > { %v8089_v40 = vpack.c.bf16 %v8025_v42, %v8023_v56  ;;  %7674 = vst.msk [vmem:[#allocation2 + $0x150] sm:$0xff] %vm6037_vm3, %v7570_v18  ;;  %8434 = vmatmul.mubr.bf16.gmra.mrb[0].mxu1 %v8157_v32  ;;  %v9238_v38 = vrot.slane %v8157_v32, 1  ;;  %v15783_v11 = vsel %vm3169_vm14, %v8619_v52, %v8623_v31 }
 0xedc   : > { %v7860_v51 = vpop.permute.xlu1 %7859  ;;  %v8028_v23 = vld [vmem:[#allocation2 + $0x148] sm:$0xff] }
 0xedd   : > { %v8621_v60 = vrot.slane %v8089_v40, 3  ;;  %7965 = vst.msk [vmem:[#allocation2 + $0x168] sm:$0xff] %vm2441_vm8, %v7860_v51  ;;  %v8160_v61 = vpack.c.bf16 %v8028_v23, %v8026_v45  ;;  %v15787_v9 = vsel %vm2484_vm4, %v9234_v54, %v9238_v38 }
 0xede   : > { %v7862_v22 = vpop.permute.xlu0 %7861  ;;  %v8030_v28 = vld [vmem:[#allocation2 + $0x158] sm:$0xff] }
 0xedf   : > { %v15790_v26 = vsel %vm3169_vm14, %v8617_v47, %v8621_v60  ;;  %7966 = vst.msk [vmem:[#allocation2 + $0x178] sm:$0xff] %vm2441_vm8, %v7862_v22  ;;  %10384 = vmatprep.mubr.msk.bf16.mxu1 %vm632_vm13, %v8160_v61  ;;  %v9244_v25 = vrot.slane %v8160_v61, 1  ;;  %v8092_v36 = vpack.c.bf16 %v8030_v28, %v8028_v23 }
 0xee0   : > { %v7572_v34 = vpop.permute.xlu1 %7571  ;;  %v8027_v30 = vld [vmem:[#allocation2 + $0x140] sm:$0xff] }
 0xee1   : > { %7675 = vst.msk [vmem:[#allocation2 + $0x160] sm:$0xff] %vm6037_vm3, %v7572_v34  ;;  %v8159_v4 = vpack.c.bf16 %v8027_v30, %v8025_v42  ;;  %v15796_v12 = vsel %vm2484_vm4, %v9240_v16, %v9244_v25  ;;  %v8627_v6 = vrot.slane %v8092_v36, 3 }
 0xee2   : > { %v7574_v53 = vpop.permute.xlu0 %7573  ;;  %v8029_v52 = vld [vmem:[#allocation2 + $0x150] sm:$0xff] }
 0xee3   : > { %7676 = vst.msk [vmem:[#allocation2 + $0x170] sm:$0xff] %vm6037_vm3, %v7574_v53  ;;  %8442 = vmatmul.mubr.bf16.gmra.mrb[4].mxu1 %v8159_v4  ;;  %v9242_v39 = vrot.slane %v8159_v4, 1  ;;  %v15800_v21 = vsel %vm3169_vm14, %v8623_v31, %v8627_v6  ;;  %v8091_v37 = vpack.c.bf16 %v8029_v52, %v8027_v30 }
 0xee4   : > { %v7864_v54 = vpop.permute.xlu1 %7863  ;;  %v8032_v33 = vld [vmem:[#allocation2 + $0x168] sm:$0xff] }
 0xee5   : > { %7967 = vst.msk [vmem:[#allocation2 + $0x188] sm:$0xff] %vm2441_vm8, %v7864_v54  ;;  %v8162_v50 = vpack.c.bf16 %v8032_v33, %v8030_v28  ;;  %v15804_v47 = vsel %vm2484_vm4, %v9238_v38, %v9242_v39  ;;  %v8625_v0 = vrot.slane %v8091_v37, 3 }
 0xee6   : > { %v7866_v24 = vpop.permute.xlu0 %7865  ;;  %v8034_v45 = vld [vmem:[#allocation2 + $0x178] sm:$0xff] }
 0xee7   : > { %7968 = vst.msk [vmem:[#allocation2 + $0x198] sm:$0xff] %vm2441_vm8, %v7866_v24  ;;  %10385 = vmatprep.mubr.msk.bf16.mxu1 %vm632_vm13, %v8162_v50  ;;  %v9248_v16 = vrot.slane %v8162_v50, 1  ;;  %v15809_v20 = vsel %vm3169_vm14, %v8621_v60, %v8625_v0  ;;  %v8094_v56 = vpack.c.bf16 %v8034_v45, %v8032_v33 }
 0xee8   : > { %v7576_v10 = vpop.permute.xlu1 %7575  ;;  %v8031_v32 = vld [vmem:[#allocation2 + $0x160] sm:$0xff] }
 0xee9   : > { %7677 = vst.msk [vmem:[#allocation2 + $0x180] sm:$0xff] %vm6037_vm3, %v7576_v10  ;;  %v8161_v31 = vpack.c.bf16 %v8031_v32, %v8029_v52  ;;  %v15813_v42 = vsel %vm2484_vm4, %v9244_v25, %v9248_v16  ;;  %v8631_v18 = vrot.slane %v8094_v56, 3 }
 0xeea   : > { %v7578_v40 = vpop.permute.xlu0 %7577  ;;  %v8033_v38 = vld [vmem:[#allocation2 + $0x170] sm:$0xff] }
 0xeeb   : > { %7678 = vst.msk [vmem:[#allocation2 + $0x190] sm:$0xff] %vm6037_vm3, %v7578_v40  ;;  %8450 = vmatmul.mubr.bf16.gmra.mrb[8].mxu1 %v8161_v31  ;;  %v9246_v51 = vrot.slane %v8161_v31, 1  ;;  %v15817_v23 = vsel %vm3169_vm14, %v8627_v6, %v8631_v18  ;;  %v8093_v60 = vpack.c.bf16 %v8033_v38, %v8031_v32 }
 0xeec   : > { %v7868_v61 = vpop.permute.xlu1 %7867  ;;  %v8036_v22 = vld [vmem:[#allocation2 + $0x188] sm:$0xff] }
 0xeed   : > { %7969 = vst.msk [vmem:[#allocation2 + $0x1a8] sm:$0xff] %vm2441_vm8, %v7868_v61  ;;  %v8164_v28 = vpack.c.bf16 %v8036_v22, %v8034_v45  ;;  %v15821_v36 = vsel %vm2484_vm4, %v9242_v39, %v9246_v51  ;;  %v8629_v25 = vrot.slane %v8093_v60, 3 }
 0xeee   : > { %v7870_v34 = vpop.permute.xlu0 %7869  ;;  %v8038_v30 = vld [vmem:[#allocation2 + $0x198] sm:$0xff] }
 0xeef   : > { %7970 = vst.msk [vmem:[#allocation2 + $0x1b8] sm:$0xff] %vm2441_vm8, %v7870_v34  ;;  %10386 = vmatprep.mubr.msk.bf16.mxu1 %vm632_vm13, %v8164_v28  ;;  %v9252_v4 = vrot.slane %v8164_v28, 1  ;;  %v15826_v6 = vsel %vm3169_vm14, %v8625_v0, %v8629_v25  ;;  %v8096_v53 = vpack.c.bf16 %v8038_v30, %v8036_v22 }
 0xef0   : > { %v7580_v52 = vpop.permute.xlu1 %7579  ;;  %v8035_v37 = vld [vmem:[#allocation2 + $0x180] sm:$0xff] }
 0xef1   : > { %7679 = vst.msk [vmem:[#allocation2 + $0x1a0] sm:$0xff] %vm6037_vm3, %v7580_v52  ;;  %v8163_v54 = vpack.c.bf16 %v8035_v37, %v8033_v38  ;;  %v15830_v39 = vsel %vm2484_vm4, %v9248_v16, %v9252_v4  ;;  %v8635_v33 = vrot.slane %v8096_v53, 3 }
 0xef2   : > { %v7582_v50 = vpop.permute.xlu0 %7581  ;;  %v8037_v24 = vld [vmem:[#allocation2 + $0x190] sm:$0xff] }
 0xef3   : > { %7680 = vst.msk [vmem:[#allocation2 + $0x1b0] sm:$0xff] %vm6037_vm3, %v7582_v50  ;;  %8458 = vmatmul.mubr.bf16.gmra.mrb[12].mxu1 %v8163_v54  ;;  %v9250_v45 = vrot.slane %v8163_v54, 1  ;;  %v15834_v56 = vsel %vm3169_vm14, %v8631_v18, %v8635_v33  ;;  %v8095_v0 = vpack.c.bf16 %v8037_v24, %v8035_v37 }
 0xef4   : > { %v7872_v10 = vpop.permute.xlu1 %7871  ;;  %v8040_v32 = vld [vmem:[#allocation2 + $0x1a8] sm:$0xff] }
 0xef5   : > { %7971 = vst.msk [vmem:[#allocation2 + $0x1c8] sm:$0xff] %vm2441_vm8, %v7872_v10  ;;  %v8166_v31 = vpack.c.bf16 %v8040_v32, %v8038_v30  ;;  %v15838_v40 = vsel %vm2484_vm4, %v9246_v51, %v9250_v45  ;;  %v8633_v16 = vrot.slane %v8095_v0, 3 }
 0xef6   : > { %v7874_v38 = vpop.permute.xlu0 %7873  ;;  %v8042_v60 = vld [vmem:[#allocation2 + $0x1b8] sm:$0xff] }
 0xef7   : > { %7972 = vst.msk [vmem:[#allocation2 + $0x1d8] sm:$0xff] %vm2441_vm8, %v7874_v38  ;;  %10387 = vmatprep.mubr.msk.bf16.mxu1 %vm632_vm13, %v8166_v31  ;;  %v9256_v61 = vrot.slane %v8166_v31, 1  ;;  %v15843_v18 = vsel %vm3169_vm14, %v8629_v25, %v8633_v16  ;;  %v8098_v22 = vpack.c.bf16 %v8042_v60, %v8040_v32 }
 0xef8   : > { %v7584_v28 = vpop.permute.xlu1 %7583  ;;  %v8039_v34 = vld [vmem:[#allocation2 + $0x1a0] sm:$0xff] }
 0xef9   : > { %7681 = vst.msk [vmem:[#allocation2 + $0x1c0] sm:$0xff] %vm6037_vm3, %v7584_v28  ;;  %v8165_v30 = vpack.c.bf16 %v8039_v34, %v8037_v24  ;;  %v15847_v51 = vsel %vm2484_vm4, %v9252_v4, %v9256_v61  ;;  %v8639_v53 = vrot.slane %v8098_v22, 3 }
 0xefa   : > { %v7586_v52 = vpop.permute.xlu0 %7585  ;;  %v8041_v37 = vld [vmem:[#allocation2 + $0x1b0] sm:$0xff] }
 0xefb   : > { %7682 = vst.msk [vmem:[#allocation2 + $0x1d0] sm:$0xff] %vm6037_vm3, %v7586_v52  ;;  %8466 = vmatmul.mubr.bf16.gmra.mrb[16].mxu1 %v8165_v30  ;;  %v9254_v54 = vrot.slane %v8165_v30, 1  ;;  %v15851_v50 = vsel %vm3169_vm14, %v8635_v33, %v8639_v53  ;;  %v8097_v25 = vpack.c.bf16 %v8041_v37, %v8039_v34 }
 0xefc   : > { %16453 = vst [vmem:[#allocation5_spill] sm:$0xff] %v15851_v50  ;;  %v7876_v0 = vpop.permute.xlu1 %7875  ;;  %v8044_v10 = vld [vmem:[#allocation2 + $0x1c8] sm:$0xff] }
 0xefd   : > { %7973 = vst.msk [vmem:[#allocation2 + $0x1e8] sm:$0xff] %vm2441_vm8, %v7876_v0  ;;  %v8168_v32 = vpack.c.bf16 %v8044_v10, %v8042_v60  ;;  %v15855_v24 = vsel %vm2484_vm4, %v9250_v45, %v9254_v54  ;;  %v8637_v4 = vrot.slane %v8097_v25, 3 }
 0xefe   : > { %v7878_v31 = vpop.permute.xlu0 %7877  ;;  %v8046_v38 = vld [vmem:[#allocation2 + $0x1d8] sm:$0xff] }
 0xeff   : > { %7974 = vst.msk [vmem:[#allocation2 + $0x1f8] sm:$0xff] %vm2441_vm8, %v7878_v31  ;;  %10388 = vmatprep.mubr.msk.bf16.mxu1 %vm632_vm13, %v8168_v32  ;;  %v9260_v22 = vrot.slane %v8168_v32, 1  ;;  %v15860_v33 = vsel %vm3169_vm14, %v8633_v16, %v8637_v4  ;;  %v8100_v28 = vpack.c.bf16 %v8046_v38, %v8044_v10 }
 0xf00   : > { %16454 = vst [vmem:[#allocation6_spill] sm:$0xff] %v15860_v33  ;;  %v7588_v34 = vpop.permute.xlu1 %7587  ;;  %v8043_v30 = vld [vmem:[#allocation2 + $0x1c0] sm:$0xff] }
 0xf01   : > { %7683 = vst.msk [vmem:[#allocation2 + $0x1e0] sm:$0xff] %vm6037_vm3, %v7588_v34  ;;  %v8167_v60 = vpack.c.bf16 %v8043_v30, %v8041_v37  ;;  %v15864_v45 = vsel %vm2484_vm4, %v9256_v61, %v9260_v22  ;;  %v8643_v52 = vrot.slane %v8100_v28, 3 }
 0xf02   : > { %v7590_v25 = vpop.permute.xlu0 %7589  ;;  %v8045_v0 = vld [vmem:[#allocation2 + $0x1d0] sm:$0xff] }
 0xf03   : > { %7684 = vst.msk [vmem:[#allocation2 + $0x1f0] sm:$0xff] %vm6037_vm3, %v7590_v25  ;;  %8474 = vmatmul.mubr.bf16.gmra.mrb[20].mxu1 %v8167_v60  ;;  %v9258_v31 = vrot.slane %v8167_v60, 1  ;;  %v15868_v32 = vsel %vm3169_vm14, %v8639_v53, %v8643_v52  ;;  %v8099_v16 = vpack.c.bf16 %v8045_v0, %v8043_v30 }
 0xf04   : > { %16455 = vst [vmem:[#allocation7_spill] sm:$0xff] %v15868_v32  ;;  %v7880_v10 = vpop.permute.xlu1 %7879  ;;  %v8048_v33 = vld [vmem:[#allocation2 + $0x1e8] sm:$0xff] }
 0xf05   : > { %7975 = vst.msk [vmem:[#allocation2 + $0x208] sm:$0xff] %vm2441_vm8, %v7880_v10  ;;  %v8170_v34 = vpack.c.bf16 %v8048_v33, %v8046_v38  ;;  %v15872_v37 = vsel %vm2484_vm4, %v9254_v54, %v9258_v31  ;;  %v8641_v61 = vrot.slane %v8099_v16, 3 }
 0xf06   : > { %16456 = vst [vmem:[#allocation8_spill] sm:$0xff] %v15872_v37  ;;  %v7882_v28 = vpop.permute.xlu0 %7881  ;;  %v8050_v50 = vld [vmem:[#allocation2 + $0x1f8] sm:$0xff] }
 0xf07   : > { %7976 = vst.msk [vmem:[#allocation2 + $0x218] sm:$0xff] %vm2441_vm8, %v7882_v28  ;;  %10389 = vmatprep.mubr.msk.bf16.mxu1 %vm632_vm13, %v8170_v34  ;;  %v9264_v60 = vrot.slane %v8170_v34, 1  ;;  %v15877_v53 = vsel %vm3169_vm14, %v8637_v4, %v8641_v61  ;;  %v8102_v30 = vpack.c.bf16 %v8050_v50, %v8048_v33 }
 0xf08   : > { %16457 = vst [vmem:[#allocation9_spill] sm:$0xff] %v15877_v53  ;;  %v7592_v25 = vpop.permute.xlu1 %7591  ;;  %v8047_v32 = vld [vmem:[#allocation2 + $0x1e0] sm:$0xff] }
 0xf09   : > { %7685 = vst.msk [vmem:[#allocation2 + $0x200] sm:$0xff] %vm6037_vm3, %v7592_v25  ;;  %v8169_v38 = vpack.c.bf16 %v8047_v32, %v8045_v0  ;;  %v15881_v54 = vsel %vm2484_vm4, %v9260_v22, %v9264_v60  ;;  %v8647_v16 = vrot.slane %v8102_v30, 3 }
 0xf0a   : > { %16458 = vst [vmem:[#allocation10_spill] sm:$0xff] %v15881_v54  ;;  %v7594_v10 = vpop.permute.xlu0 %7593  ;;  %v8049_v37 = vld [vmem:[#allocation2 + $0x1f0] sm:$0xff] }
 0xf0b   : > { %7686 = vst.msk [vmem:[#allocation2 + $0x210] sm:$0xff] %vm6037_vm3, %v7594_v10  ;;  %8482 = vmatmul.mubr.bf16.gmra.mrb[24].mxu1 %v8169_v38  ;;  %v9262_v28 = vrot.slane %v8169_v38, 1  ;;  %v15885_v34 = vsel %vm3169_vm14, %v8643_v52, %v8647_v16  ;;  %v8101_v4 = vpack.c.bf16 %v8049_v37, %v8047_v32 }
 0xf0c   : > { %16459 = vst [vmem:[#allocation11_spill] sm:$0xff] %v15885_v34  ;;  %v7884_v33 = vpop.permute.xlu1 %7883  ;;  %v8052_v53 = vld [vmem:[#allocation2 + $0x208] sm:$0xff] }
 0xf0d   : > { %7977 = vst.msk [vmem:[#allocation2 + $0x228] sm:$0xff] %vm2441_vm8, %v7884_v33  ;;  %v8172_v25 = vpack.c.bf16 %v8052_v53, %v8050_v50  ;;  %v15889_v0 = vsel %vm2484_vm4, %v9258_v31, %v9262_v28  ;;  %v8645_v22 = vrot.slane %v8101_v4, 3 }
 0xf0e   : > { %16460 = vst [vmem:[#allocation12_spill] sm:$0xff] %v15889_v0  ;;  %v7886_v30 = vpop.permute.xlu0 %7885  ;;  %v8054_v54 = vld [vmem:[#allocation2 + $0x218] sm:$0xff] }
 0xf0f   : > { %7978 = vst.msk [vmem:[#allocation2 + $0x238] sm:$0xff] %vm2441_vm8, %v7886_v30  ;;  %10390 = vmatprep.mubr.msk.bf16.mxu1 %vm632_vm13, %v8172_v25  ;;  %v9268_v38 = vrot.slane %v8172_v25, 1  ;;  %v15894_v52 = vsel %vm3169_vm14, %v8641_v61, %v8645_v22  ;;  %v8104_v32 = vpack.c.bf16 %v8054_v54, %v8052_v53 }
 0xf10   : > { %16461 = vst [vmem:[#allocation13_spill] sm:$0xff] %v15894_v52  ;;  %v7596_v10 = vpop.permute.xlu1 %7595  ;;  %v8051_v34 = vld [vmem:[#allocation2 + $0x200] sm:$0xff] }
 0xf11   : > { %7687 = vst.msk [vmem:[#allocation2 + $0x220] sm:$0xff] %vm6037_vm3, %v7596_v10  ;;  %v8171_v50 = vpack.c.bf16 %v8051_v34, %v8049_v37  ;;  %v15898_v31 = vsel %vm2484_vm4, %v9264_v60, %v9268_v38  ;;  %v8651_v4 = vrot.slane %v8104_v32, 3 }
 0xf12   : > { %16462 = vst [vmem:[#allocation14_spill] sm:$0xff] %v15898_v31  ;;  %v7598_v33 = vpop.permute.xlu0 %7597  ;;  %v8053_v0 = vld [vmem:[#allocation2 + $0x210] sm:$0xff] }
 0xf13   : > { %7688 = vst.msk [vmem:[#allocation2 + $0x230] sm:$0xff] %vm6037_vm3, %v7598_v33  ;;  %8490 = vmatmul.mubr.bf16.gmra.mrb[28].mxu1 %v8171_v50  ;;  %v9266_v30 = vrot.slane %v8171_v50, 1  ;;  %v15902_v25 = vsel %vm3169_vm14, %v8647_v16, %v8651_v4  ;;  %v8103_v61 = vpack.c.bf16 %v8053_v0, %v8051_v34 }
 0xf14   : > { %16463 = vst [vmem:[#allocation15_spill] sm:$0xff] %v15902_v25  ;;  %v7888_v53 = vpop.permute.xlu1 %7887  ;;  %v8056_v52 = vld [vmem:[#allocation2 + $0x228] sm:$0xff] }
 0xf15   : > { %7979 = vst.msk [vmem:[#allocation2 + $0x248] sm:$0xff] %vm2441_vm8, %v7888_v53  ;;  %v8174_v10 = vpack.c.bf16 %v8056_v52, %v8054_v54  ;;  %v15906_v37 = vsel %vm2484_vm4, %v9262_v28, %v9266_v30  ;;  %v8649_v60 = vrot.slane %v8103_v61, 3 }
 0xf16   : > { %16464 = vst [vmem:[#allocation16_spill] sm:$0xff] %v15906_v37  ;;  %v7890_v32 = vpop.permute.xlu0 %7889  ;;  %v8058_v31 = vld [vmem:[#allocation2 + $0x238] sm:$0xff] }
 0xf17   : > { %7980 = vst.msk [vmem:[#allocation2 + $0x258] sm:$0xff] %vm2441_vm8, %v7890_v32  ;;  %10391 = vmatprep.mubr.msk.bf16.mxu1 %vm632_vm13, %v8174_v10  ;;  %v9272_v50 = vrot.slane %v8174_v10, 1  ;;  %v15911_v16 = vsel %vm3169_vm14, %v8645_v22, %v8649_v60  ;;  %v8106_v34 = vpack.c.bf16 %v8058_v31, %v8056_v52 }
 0xf18   : > { %16465 = vst [vmem:[#allocation17_spill] sm:$0xff] %v15911_v16  ;;  %v7600_v33 = vpop.permute.xlu1 %7599  ;;  %v8055_v25 = vld [vmem:[#allocation2 + $0x220] sm:$0xff] }
 0xf19   : > { %7689 = vst.msk [vmem:[#allocation2 + $0x240] sm:$0xff] %vm6037_vm3, %v7600_v33  ;;  %v8173_v54 = vpack.c.bf16 %v8055_v25, %v8053_v0  ;;  %v15915_v28 = vsel %vm2484_vm4, %v9268_v38, %v9272_v50  ;;  %v8655_v61 = vrot.slane %v8106_v34, 3 }
 0xf1a   : > { %16466 = vst [vmem:[#allocation18_spill] sm:$0xff] %v15915_v28  ;;  %v7602_v53 = vpop.permute.xlu0 %7601  ;;  %v8057_v37 = vld [vmem:[#allocation2 + $0x230] sm:$0xff] }
 0xf1b   : > { %7690 = vst.msk [vmem:[#allocation2 + $0x250] sm:$0xff] %vm6037_vm3, %v7602_v53  ;;  %8498 = vmatmul.mubr.bf16.gmra.mrb[32].mxu1 %v8173_v54  ;;  %v9270_v32 = vrot.slane %v8173_v54, 1  ;;  %v15919_v10 = vsel %vm3169_vm14, %v8651_v4, %v8655_v61  ;;  %v8105_v22 = vpack.c.bf16 %v8057_v37, %v8055_v25 }
 0xf1c   : > { %16467 = vst [vmem:[#allocation19_spill] sm:$0xff] %v15919_v10  ;;  %v7892_v52 = vpop.permute.xlu1 %7891  ;;  %v8060_v16 = vld [vmem:[#allocation2 + $0x248] sm:$0xff] }
 0xf1d   : > { %7981 = vst.msk [vmem:[#allocation2 + $0x268] sm:$0xff] %vm2441_vm8, %v7892_v52  ;;  %v8176_v33 = vpack.c.bf16 %v8060_v16, %v8058_v31  ;;  %v15923_v0 = vsel %vm2484_vm4, %v9266_v30, %v9270_v32  ;;  %v8653_v38 = vrot.slane %v8105_v22, 3 }
 0xf1e   : > { %16468 = vst [vmem:[#allocation20_spill] sm:$0xff] %v15923_v0  ;;  %v7894_v34 = vpop.permute.xlu0 %7893  ;;  %v8062_v28 = vld [vmem:[#allocation2 + $0x258] sm:$0xff] }
 0xf1f   : > { %7982 = vst.msk [vmem:[#allocation2 + $0x278] sm:$0xff] %vm2441_vm8, %v7894_v34  ;;  %10392 = vmatprep.mubr.msk.bf16.mxu1 %vm632_vm13, %v8176_v33  ;;  %v9276_v54 = vrot.slane %v8176_v33, 1  ;;  %v15928_v4 = vsel %vm3169_vm14, %v8649_v60, %v8653_v38  ;;  %v8108_v25 = vpack.c.bf16 %v8062_v28, %v8060_v16 }
 0xf20   : > { %16469 = vst [vmem:[#allocation21_spill] sm:$0xff] %v15928_v4  ;;  %v7604_v53 = vpop.permute.xlu1 %7603  ;;  %v8059_v10 = vld [vmem:[#allocation2 + $0x240] sm:$0xff] }
 0xf21   : > { %7691 = vst.msk [vmem:[#allocation2 + $0x260] sm:$0xff] %vm6037_vm3, %v7604_v53  ;;  %v8175_v31 = vpack.c.bf16 %v8059_v10, %v8057_v37  ;;  %v15932_v30 = vsel %vm2484_vm4, %v9272_v50, %v9276_v54  ;;  %v8659_v22 = vrot.slane %v8108_v25, 3 }
 0xf22   : > { %16470 = vst [vmem:[#allocation22_spill] sm:$0xff] %v15932_v30  ;;  %v7606_v52 = vpop.permute.xlu0 %7605  ;;  %v8061_v0 = vld [vmem:[#allocation2 + $0x250] sm:$0xff] }
 0xf23   : > { %7692 = vst.msk [vmem:[#allocation2 + $0x270] sm:$0xff] %vm6037_vm3, %v7606_v52  ;;  %8506 = vmatmul.mubr.bf16.gmra.mrb[36].mxu1 %v8175_v31  ;;  %v9274_v34 = vrot.slane %v8175_v31, 1  ;;  %v15936_v33 = vsel %vm3169_vm14, %v8655_v61, %v8659_v22  ;;  %v8107_v60 = vpack.c.bf16 %v8061_v0, %v8059_v10 }
 0xf24   : > { %16471 = vst [vmem:[#allocation23_spill] sm:$0xff] %v15936_v33  ;;  %v7896_v16 = vpop.permute.xlu1 %7895  ;;  %v8064_v4 = vld [vmem:[#allocation2 + $0x268] sm:$0xff] }
 0xf25   : > { %7983 = vst.msk [vmem:[#allocation2 + $0x288] sm:$0xff] %vm2441_vm8, %v7896_v16  ;;  %v8178_v53 = vpack.c.bf16 %v8064_v4, %v8062_v28  ;;  %v15940_v37 = vsel %vm2484_vm4, %v9270_v32, %v9274_v34  ;;  %v8657_v50 = vrot.slane %v8107_v60, 3 }
 0xf26   : > { %16472 = vst [vmem:[#allocation24_spill] sm:$0xff] %v15940_v37  ;;  %v7898_v25 = vpop.permute.xlu0 %7897  ;;  %v8066_v30 = vld [vmem:[#allocation2 + $0x278] sm:$0xff] }
 0xf27   : > { %7984 = vst.msk [vmem:[#allocation2 + $0x298] sm:$0xff] %vm2441_vm8, %v7898_v25  ;;  %10393 = vmatprep.mubr.msk.bf16.mxu1 %vm632_vm13, %v8178_v53  ;;  %v9280_v31 = vrot.slane %v8178_v53, 1  ;;  %v15945_v61 = vsel %vm3169_vm14, %v8653_v38, %v8657_v50  ;;  %v8110_v10 = vpack.c.bf16 %v8066_v30, %v8064_v4 }
 0xf28   : > { %16473 = vst [vmem:[#allocation25_spill] sm:$0xff] %v15945_v61  ;;  %v7608_v52 = vpop.permute.xlu1 %7607  ;;  %v8063_v33 = vld [vmem:[#allocation2 + $0x260] sm:$0xff] }
 0xf29   : > { %7693 = vst.msk [vmem:[#allocation2 + $0x280] sm:$0xff] %vm6037_vm3, %v7608_v52  ;;  %v8177_v28 = vpack.c.bf16 %v8063_v33, %v8061_v0  ;;  %v15949_v32 = vsel %vm2484_vm4, %v9276_v54, %v9280_v31  ;;  %v8663_v60 = vrot.slane %v8110_v10, 3 }
 0xf2a   : > { %16474 = vst [vmem:[#allocation26_spill] sm:$0xff] %v15949_v32  ;;  %v7610_v16 = vpop.permute.xlu0 %7609  ;;  %v8065_v37 = vld [vmem:[#allocation2 + $0x270] sm:$0xff] }
 0xf2b   : > { %7694 = vst.msk [vmem:[#allocation2 + $0x290] sm:$0xff] %vm6037_vm3, %v7610_v16  ;;  %8514 = vmatmul.mubr.bf16.gmra.mrb[40].mxu1 %v8177_v28  ;;  %v9278_v25 = vrot.slane %v8177_v28, 1  ;;  %v15953_v53 = vsel %vm3169_vm14, %v8659_v22, %v8663_v60  ;;  %v8109_v38 = vpack.c.bf16 %v8065_v37, %v8063_v33 }
 0xf2c   : > { %16475 = vst [vmem:[#allocation27_spill] sm:$0xff] %v15953_v53  ;;  %v7900_v4 = vpop.permute.xlu1 %7899  ;;  %v8068_v61 = vld [vmem:[#allocation2 + $0x288] sm:$0xff] }
 0xf2d   : > { %7985 = vst.msk [vmem:[#allocation2 + $0x2a8] sm:$0xff] %vm2441_vm8, %v7900_v4  ;;  %v8180_v52 = vpack.c.bf16 %v8068_v61, %v8066_v30  ;;  %v15957_v0 = vsel %vm2484_vm4, %v9274_v34, %v9278_v25  ;;  %v8661_v54 = vrot.slane %v8109_v38, 3 }
 0xf2e   : > { %16476 = vst [vmem:[#allocation28_spill] sm:$0xff] %v15957_v0  ;;  %v7902_v10 = vpop.permute.xlu0 %7901  ;;  %v8070_v32 = vld [vmem:[#allocation2 + $0x298] sm:$0x3] }
 0xf2f   : > { %7986 = vst.msk [vmem:[#allocation2 + $0x2b8] sm:$0x7] %vm6145_vm12, %v7902_v10  ;;  %10394 = vmatprep.mubr.msk.bf16.mxu1 %vm632_vm13, %v8180_v52  ;;  %v9284_v28 = vrot.slane %v8180_v52, 1  ;;  %v15962_v22 = vsel %vm3169_vm14, %v8657_v50, %v8661_v54  ;;  %v8112_v33 = vpack.c.bf16 %v8070_v32, %v8068_v61  ;;  %v7988_v52 = vld [vmem:[#allocation2 + $0x8] sm:$0xc0] }
 0xf30   : > { %16477 = vst [vmem:[#allocation29_spill] sm:$0xff] %v15962_v22  ;;  %v7612_v16 = vpop.permute.xlu1 %7611  ;;  %v8067_v53 = vld [vmem:[#allocation2 + $0x280] sm:$0xff]  ;;  %v7990_v22 = vld [vmem:[#allocation2 + $0x18] sm:$0xff] }
 0xf31   : > { %7695 = vst.msk [vmem:[#allocation2 + $0x2a0] sm:$0xff] %vm6037_vm3, %v7612_v16  ;;  %v8179_v30 = vpack.c.bf16 %v8067_v53, %v8065_v37  ;;  %v15966_v34 = vsel %vm2484_vm4, %v9280_v31, %v9284_v28  ;;  %v15968_v38 = vrot.slane %v8112_v33, 3  ;;  %v8138_v16 = vld [vmem:[#allocation2 + $0x298] sm:$0xff]  ;;  %v7987_v31 = vld [vmem:[#allocation2] sm:$0xc0] }
 0xf32   : > { %16478 = vst [vmem:[#allocation30_spill] sm:$0xff] %v15966_v34  ;;  %v7820_v4 = vpop.permute.xlu0 %7819  ;;  %v8069_v0 = vld [vmem:[#allocation2 + $0x290] sm:$0x3] }
 0xf33   : > { %16479 = vst [vmem:[#allocation31_spill] sm:$0xff] %v15968_v38  ;;  %7945 = vst.msk [vmem:[#allocation2 + $0x28] sm:$0x80] %vm6131_vm9, %v7820_v4  ;;  %8522 = vmatmul.mubr.bf16.gmra.mrb[44].mxu1 %v8179_v30  ;;  %v9282_v10 = vrot.slane %v8179_v30, 1  ;;  %v15973_v50 = vsel %vm3169_vm14, %v8663_v60, %v15968_v38  ;;  %v8111_v61 = vpack.c.bf16 %v8069_v0, %v8067_v53  ;;  %v15990_v38 = vld [vmem:[#allocation2] sm:$0xff] }
 0xf34   : > { %16480 = vst [vmem:[#allocation32_spill] sm:$0xff] %v15973_v50  ;;  %v7614_v32 = vpop.permute.xlu1 %7613  ;;  %v8140_v37 = vld [vmem:[#allocation2 + $0x2a8] sm:$0xff]  ;;  %v8072_v30 = vpack.c.bf16 %v7990_v22, %v7988_v52  ;;  %v12209_v50 = vld [vmem:[#allocation2 + $0x38] sm:$0xff] }
 0xf35   : > { %7696 = vst.msk [vmem:[#allocation2 + $0x2b0] sm:$0x1f] %vm6049_vm7, %v7614_v32  ;;  %v15976_v33 = vpack.c.bf16 %v8140_v37, %v8138_v16  ;;  %v15979_v34 = vsel %vm2484_vm4, %v9278_v25, %v9282_v10  ;;  %v15981_v4 = vrot.slane %v8111_v61, 3  ;;  %v8071_v32 = vpack.c.bf16 %v15990_v38, %v7987_v31  ;;  %v8137_v16 = vld [vmem:[#allocation2 + $0x290] sm:$0xff] }
 0xf36   : > { %16481 = vst [vmem:[#allocation33_spill] sm:$0xff] %v15979_v34  ;;  %v8142_v60 = vld [vmem:[#allocation2 + $0x2b8] sm:$0xf] }
 0xf37   : > { %16482 = vst [vmem:[#allocation34_spill] sm:$0xff] %v15981_v4  ;;  %10395 = vmatprep.mubr.msk.bf16.mxu1 %vm632_vm13, %v15976_v33  ;;  %v9288_v53 = vrot.slane %v15976_v33, 1  ;;  %v15988_v0 = vsel %vm3169_vm14, %v8661_v54, %v15981_v4  ;;  %v8184_v22 = vpack.c.bf16 %v8142_v60, %v8142_v60  ;;  %v8590_v4 = vrot.slane %v8072_v30, 3 }
 0xf38   : > { %16483 = vst [vmem:[#allocation35_spill] sm:$0xff] %v15988_v0  ;;  %v8139_v25 = vld [vmem:[#allocation2 + $0x2a0] sm:$0xff]  ;;  %v8587_v34 = vrot.slane %v8071_v32, 3 }
 0xf39   : > { %v15993_v37 = vpack.c.bf16 %v8139_v25, %v8137_v16  ;;  %v15998_v61 = vsel %vm2484_vm4, %v9284_v28, %v9288_v53 }
 0xf3a   : > { %v7992_v52 = vld [vmem:[#allocation2 + $0x28] sm:$0xff]  ;;  %v8589_v25 = vsel %vm3169_vm14, %v8587_v34, %v15495_v62 }
 0xf3b   : > { %8530 = vmatmul.mubr.bf16.gmra.mrb[48].mxu1 %v15993_v37  ;;  %v8074_v54 = vpack.c.bf16 %v12209_v50, %v7992_v52  ;;  %v9286_v0 = vrot.slane %v15993_v37, 1  ;;  %v16496_v34 = vld [vmem:[#allocation15_spill] sm:$0xff] }
 0xf3c   : > { %10396 = vmatprep.mubr.msk.bf16.mxu1 %vm632_vm13, %v8184_v22  ;;  %v8141_v28 = vld [vmem:[#allocation2 + $0x2b0] sm:$0xf] }
 0xf3d   : > { %v8591_v31 = vrot.slane %v8074_v54, 3  ;;  %v16006_v16 = vsel %vm2484_vm4, %v9282_v10, %v9286_v0  ;;  %v8183_v30 = vpack.c.bf16 %v8141_v28, %v8141_v28  ;;  %v16497_v10 = vld [vmem:[#allocation20_spill] sm:$0xff]  ;;  %v16499_v54 = vld [vmem:[#allocation17_spill] sm:$0xff]  ;;  %v16500_v28 = vld [vmem:[#allocation19_spill] sm:$0xff] }
 0xf3f   : > { %v8592_v60 = vsel %vm3169_vm14, %v8590_v4, %v8591_v31  ;;  %v8596_v50 = vsel %vm3169_vm14, %v8591_v31, %v15542_v7  ;;  %v16498_v4 = vld [vmem:[#allocation22_spill] sm:$0xff] }
 0xf40   : > { %10409 = vmatprep.mubr.msk.bf16.mxu0 %vm632_vm13, %v8592_v60  ;;  %v16501_v60 = vld [vmem:[#allocation24_spill] sm:$0xff] }
 0xf41   : > { %8858 = vmatmul.mubr.bf16.vlgmr.msra.gmra.mrb[180].mxu0 %v8589_v25  ;;  %v16502_v25 = vld [vmem:[#allocation26_spill] sm:$0xff] }
 0xf42   : > { %10410 = vmatprep.mubr.msk.bf16.mxu0 %vm632_vm13, %v8596_v50 }
 0xf43   : > { %8538 = vmatmul.mubr.bf16.gmra.mrb[52].mxu1 %v8183_v30 }
 0xf44   : > { %10466 = vmatprep.mubr.msk.bf16.mxu1 %vm632_vm13, %v15613_v1 }
 0xf49   : > { %8866 = vmatmul.mubr.bf16.gmra.mrb[184].mxu0 %v15514_v46 }
 0xf4a   : > { %10411 = vmatprep.mubr.msk.bf16.mxu0 %vm632_vm13, %v15562_v63 }
 0xf4b   : > { %9487 = vmatmul.mubr.bf16.vlgmr.msra.gmra.mrb[56].mxu1 %v15644_v13 }
 0xf4c   : > { %10467 = vmatprep.mubr.msk.bf16.mxu1 %vm632_vm13, %v15675_v58 }
 0xf51   : > { %8874 = vmatmul.mubr.bf16.gmra.mrb[188].mxu0 %v15584_v35 }
 0xf52   : > { %10412 = vmatprep.mubr.msk.bf16.mxu0 %vm632_vm13, %v15634_v3 }
 0xf53   : > { %9495 = vmatmul.mubr.bf16.gmra.mrb[60].mxu1 %v15697_v27 }
 0xf54   : > { %10468 = vmatprep.mubr.msk.bf16.mxu1 %vm632_vm13, %v15715_v43 }
 0xf59   : > { %8882 = vmatmul.mubr.bf16.gmra.mrb[192].mxu0 %v15654_v55 }
 0xf5a   : > { %10413 = vmatprep.mubr.msk.bf16.mxu0 %vm632_vm13, %v15689_v41 }
 0xf5b   : > { %9503 = vmatmul.mubr.bf16.gmra.mrb[64].mxu1 %v15728_v2 }
 0xf5c   : > { %10469 = vmatprep.mubr.msk.bf16.mxu1 %vm632_vm13, %v15741_v17 }
 0xf61   : > { %8890 = vmatmul.mubr.bf16.gmra.mrb[196].mxu0 %v15704_v15 }
 0xf62   : > { %10414 = vmatprep.mubr.msk.bf16.mxu0 %vm632_vm13, %v15720_v5 }
 0xf63   : > { %9511 = vmatmul.mubr.bf16.gmra.mrb[68].mxu1 %v15753_v48 }
 0xf64   : > { %10470 = vmatprep.mubr.msk.bf16.mxu1 %vm632_vm13, %v15762_v19  ;;  %v16485_v19 = vld [vmem:[#allocation8_spill] sm:$0xff] }
 0xf69   : > { %8898 = vmatmul.mubr.bf16.gmra.mrb[200].mxu0 %v15733_v8 }
 0xf6a   : > { %10415 = vmatprep.mubr.msk.bf16.mxu0 %vm632_vm13, %v15745_v44 }
 0xf6b   : > { %9519 = vmatmul.mubr.bf16.gmra.mrb[72].mxu1 %v15770_v29 }
 0xf6c   : > { %10471 = vmatprep.mubr.msk.bf16.mxu1 %vm632_vm13, %v15779_v57 }
 0xf71   : > { %8906 = vmatmul.mubr.bf16.gmra.mrb[204].mxu0 %v15758_v59  ;;  %v16484_v59 = vld [vmem:[#allocation5_spill] sm:$0xff] }
 0xf72   : > { %10416 = vmatprep.mubr.msk.bf16.mxu0 %vm632_vm13, %v15766_v49  ;;  %v16486_v49 = vld [vmem:[#allocation10_spill] sm:$0xff] }
 0xf73   : > { %9527 = vmatmul.mubr.bf16.gmra.mrb[76].mxu1 %v15787_v9 }
 0xf74   : > { %10472 = vmatprep.mubr.msk.bf16.mxu1 %vm632_vm13, %v15796_v12  ;;  %v16489_v12 = vld [vmem:[#allocation12_spill] sm:$0xff] }
 0xf76   : > { %v16053_v62 = vpop.f32.mrb[228].mxu1 }
 0xf77   : > { %v8381_v46 = vpop.f32.mrb[229].mxu1 }
 0xf78   : > { %v16055_v7 = vpop.f32.mrb[230].mxu1 }
 0xf79   : > { %v8384_v63 = vpop.f32.mrb[231].mxu1  ;;  %8914 = vmatmul.mubr.bf16.gmra.mrb[208].mxu0 %v15773_v14 }
 0xf7a   : > { %10417 = vmatprep.mubr.msk.bf16.mxu0 %vm632_vm13, %v15783_v11  ;;  %v16487_v11 = vld [vmem:[#allocation6_spill] sm:$0xff]  ;;  %v16503_v63 = vld [vmem:[#allocation21_spill] sm:$0xff] }
 0xf7b   : > { %9535 = vmatmul.mubr.bf16.gmra.mrb[80].mxu1 %v15804_v47 }
 0xf7c   : > { %10473 = vmatprep.mubr.msk.bf16.mxu1 %vm632_vm13, %v15813_v42 }
 0xf7e   : > { %v16063_v35 = vpop.f32.mrb[232].mxu1 }
 0xf7f   : > { %v8389_v1 = vpop.f32.mrb[233].mxu1 }
 0xf80   : > { %v16065_v3 = vpop.f32.mrb[234].mxu1 }
 0xf81   : > { %8922 = vmatmul.mubr.bf16.gmra.mrb[212].mxu0 %v15790_v26  ;;  %v8392_v13 = vpop.f32.mrb[235].mxu1  ;;  %v16488_v26 = vld [vmem:[#allocation7_spill] sm:$0xff] }
 0xf82   : > { %10418 = vmatprep.mubr.msk.bf16.mxu0 %vm632_vm13, %v15800_v21  ;;  %v16490_v21 = vld [vmem:[#allocation14_spill] sm:$0xff]  ;;  %v16504_v13 = vld [vmem:[#allocation23_spill] sm:$0xff] }
 0xf83   : > { %9543 = vmatmul.mubr.bf16.gmra.mrb[84].mxu1 %v15821_v36 }
 0xf84   : > { %10474 = vmatprep.mubr.msk.bf16.mxu1 %vm632_vm13, %v15830_v39  ;;  %v16493_v39 = vld [vmem:[#allocation16_spill] sm:$0xff] }
 0xf86   : > { %v16073_v55 = vpop.f32.mrb[236].mxu1 }
 0xf87   : > { %v8397_v58 = vpop.f32.mrb[237].mxu1 }
 0xf88   : > { %v16075_v41 = vpop.f32.mrb[238].mxu1  ;;  %v16505_v58 = vld [vmem:[#allocation28_spill] sm:$0xff] }
 0xf89   : > { %8930 = vmatmul.mubr.bf16.gmra.mrb[216].mxu0 %v15809_v20  ;;  %v8400_v27 = vpop.f32.mrb[239].mxu1 }
 0xf8a   : > { %10419 = vmatprep.mubr.msk.bf16.mxu0 %vm632_vm13, %v15817_v23  ;;  %v16491_v23 = vld [vmem:[#allocation9_spill] sm:$0xff]  ;;  %v16506_v27 = vld [vmem:[#allocation30_spill] sm:$0xff] }
 0xf8b   : > { %9551 = vmatmul.mubr.bf16.gmra.mrb[88].mxu1 %v15838_v40 }
 0xf8c   : > { %10475 = vmatprep.mubr.msk.bf16.mxu1 %vm632_vm13, %v15847_v51 }
 0xf8e   : > { %v16083_v15 = vpop.f32.mrb[240].mxu1 }
 0xf8f   : > { %v8405_v43 = vpop.f32.mrb[241].mxu1 }
 0xf90   : > { %v16085_v5 = vpop.f32.mrb[242].mxu1 }
 0xf91   : > { %8938 = vmatmul.mubr.bf16.gmra.mrb[220].mxu0 %v15826_v6  ;;  %v8408_v2 = vpop.f32.mrb[243].mxu1  ;;  %v16492_v6 = vld [vmem:[#allocation11_spill] sm:$0xff] }
 0xf92   : > { %10420 = vmatprep.mubr.msk.bf16.mxu0 %vm632_vm13, %v15834_v56  ;;  %v16494_v56 = vld [vmem:[#allocation18_spill] sm:$0xff] }
 0xf93   : > { %9559 = vmatmul.mubr.bf16.gmra.mrb[92].mxu1 %v15855_v24  ;;  %v16495_v24 = vld [vmem:[#allocation13_spill] sm:$0xff] }
 0xf94   : > { %10476 = vmatprep.mubr.msk.bf16.mxu1 %vm632_vm13, %v15864_v45 }
 0xf96   : > { %v16093_v8 = vpop.f32.mrb[244].mxu1 }
 0xf97   : > { %v8413_v17 = vpop.f32.mrb[245].mxu1 }
 0xf98   : > { %v16095_v44 = vpop.f32.mrb[246].mxu1  ;;  %v9102_v17 = vld [vmem:[#allocation2 + $0x2b8] sm:$0xff] }
 0xf99   : > { %8946 = vmatmul.mubr.bf16.gmra.mrb[224].mxu0 %v15843_v18  ;;  %v8416_v48 = vpop.f32.mrb[247].mxu1 }
 0xf9a   : > { %10421 = vmatprep.mubr.msk.bf16.mxu0 %vm632_vm13, %v16484_v59  ;;  %v9104_v48 = vld [vmem:[#allocation2 + $0x2c8] sm:$0xff] }
 0xf9b   : > { %9567 = vmatmul.mubr.bf16.gmra.mrb[96].mxu1 %v16485_v19  ;;  %v16507_v19 = vld [vmem:[#allocation25_spill] sm:$0xff] }
 0xf9c   : > { %10477 = vmatprep.mubr.msk.bf16.mxu1 %vm632_vm13, %v16486_v49 }
 0xf9e   : > { %v16103_v29 = vpop.f32.mrb[248].mxu1 }
 0xf9f   : > { %v8421_v14 = vpop.f32.mrb[249].mxu1 }
 0xfa0   : > { %v16105_v57 = vpop.f32.mrb[250].mxu1  ;;  %v16508_v14 = vld [vmem:[#allocation27_spill] sm:$0xff] }
 0xfa1   : > { %8954 = vmatmul.mubr.bf16.gmra.mrb[228].mxu0 %v16487_v11  ;;  %v8424_v9 = vpop.f32.mrb[251].mxu1  ;;  %v16509_v11 = vld [vmem:[#allocation33_spill] sm:$0xff] }
 0xfa2   : > { %10422 = vmatprep.mubr.msk.bf16.mxu0 %vm632_vm13, %v16488_v26  ;;  %v9146_v9 = vpack.c.bf16 %v9104_v48, %v9102_v17 }
 0xfa3   : > { %9575 = vmatmul.mubr.bf16.gmra.mrb[100].mxu1 %v16489_v12 }
 0xfa4   : > { %10478 = vmatprep.mubr.msk.bf16.mxu1 %vm632_vm13, %v16490_v21  ;;  %v9292_v12 = vrot.slane %v9146_v9, 1  ;;  %v9101_v21 = vld [vmem:[#allocation2 + $0x2b0] sm:$0xff] }
 0xfa6   : > { %v16113_v47 = vpop.f32.mrb[252].mxu1 }
 0xfa7   : > { %v8429_v20 = vpop.f32.mrb[253].mxu1 }
 0xfa8   : > { %v16115_v42 = vpop.f32.mrb[254].mxu1 }
 0xfa9   : > { %8962 = vmatmul.mubr.bf16.gmra.mrb[232].mxu0 %v16491_v23  ;;  %v8432_v36 = vpop.f32.mrb[255].mxu1  ;;  %v9106_v23 = vld [vmem:[#allocation2 + $0x2d8] sm:$0x3f] }
 0xfaa   : > { %10423 = vmatprep.mubr.msk.bf16.mxu0 %vm632_vm13, %v16492_v6  ;;  %v16510_v6 = vld [vmem:[#allocation29_spill] sm:$0xff] }
 0xfab   : > { %9583 = vmatmul.mubr.bf16.gmra.mrb[104].mxu1 %v16493_v39 }
 0xfac   : > { %10479 = vmatprep.mubr.msk.bf16.mxu1 %vm632_vm13, %v16494_v56  ;;  %v16511_v56 = vld [vmem:[#allocation32_spill] sm:$0xff] }
 0xfae   : > { %v16123_v40 = vpop.f32.mrb[0].mxu1 }
 0xfaf   : > { %v8437_v18 = vpop.f32.mrb[1].mxu1 }
 0xfb0   : > { %v16125_v51 = vpop.f32.mrb[2].mxu1  ;;  %v9145_v18 = vpack.c.bf16 %v15990_v38, %v9101_v21 }
 0xfb1   : > { %8970 = vmatmul.mubr.bf16.gmra.mrb[236].mxu0 %v16495_v24  ;;  %v8440_v45 = vpop.f32.mrb[3].mxu1  ;;  %v9148_v24 = vpack.c.bf16 %v9106_v23, %v9106_v23 }
 0xfb2   : > { %10424 = vmatprep.mubr.msk.bf16.mxu0 %vm632_vm13, %v16496_v34  ;;  %v9290_v45 = vrot.slane %v9145_v18, 1 }
 0xfb3   : > { %9591 = vmatmul.mubr.bf16.gmra.mrb[108].mxu1 %v16497_v10  ;;  %v9296_v10 = vrot.slane %v9148_v24, 1 }
 0xfb4   : > { %10480 = vmatprep.mubr.msk.bf16.mxu1 %vm632_vm13, %v16498_v4  ;;  %v9105_v4 = vld [vmem:[#allocation2 + $0x2d0] sm:$0x3f]  ;;  %v9291_v33 = vsel %vm2484_vm4, %v9286_v0, %v9290_v45 }
 0xfb6   : > { %v16133_v32 = vpop.f32.mrb[4].mxu1 }
 0xfb7   : > { %v8445_v22 = vpop.f32.mrb[5].mxu1 }
 0xfb8   : > { %v16135_v52 = vpop.f32.mrb[6].mxu1 }
 0xfb9   : > { %8978 = vmatmul.mubr.bf16.gmra.mrb[240].mxu0 %v16499_v54  ;;  %v8448_v31 = vpop.f32.mrb[7].mxu1 }
 0xfba   : > { %10425 = vmatprep.mubr.msk.bf16.mxu0 %vm632_vm13, %v16500_v28  ;;  %v16512_v31 = vld [vmem:[#allocation35_spill] sm:$0xff] }
 0xfbb   : > { %9599 = vmatmul.mubr.bf16.gmra.mrb[112].mxu1 %v16501_v60  ;;  %v16513_v28 = vld [vmem:[#allocation31_spill] sm:$0xff] }
 0xfbc   : > { %10481 = vmatprep.mubr.msk.bf16.mxu1 %vm632_vm13, %v16502_v25 }
 0xfbe   : > { %v16143_v50 = vpop.f32.mrb[8].mxu1 }
 0xfbf   : > { %v8453_v30 = vpop.f32.mrb[9].mxu1 }
 0xfc0   : > { %v16145_v46 = vpop.f32.mrb[10].mxu1 }
 0xfc1   : > { %8986 = vmatmul.mubr.bf16.gmra.mrb[244].mxu0 %v16503_v63  ;;  %v8456_v1 = vpop.f32.mrb[11].mxu1 }
 0xfc2   : > { %10426 = vmatprep.mubr.msk.bf16.mxu0 %vm632_vm13, %v16504_v13  ;;  %v16514_v1 = vld [vmem:[#allocation34_spill] sm:$0xff] }
 0xfc3   : > { %9607 = vmatmul.mubr.bf16.gmra.mrb[116].mxu1 %v16505_v58 }
 0xfc4   : > { %10482 = vmatprep.mubr.msk.bf16.mxu1 %vm632_vm13, %v16506_v27 }
 0xfc6   : > { %v16153_v43 = vpop.f32.mrb[12].mxu1 }
 0xfc7   : > { %v8461_v2 = vpop.f32.mrb[13].mxu1 }
 0xfc8   : > { %v16155_v59 = vpop.f32.mrb[14].mxu1 }
 0xfc9   : > { %8994 = vmatmul.mubr.bf16.gmra.mrb[248].mxu0 %v16507_v19  ;;  %v8464_v49 = vpop.f32.mrb[15].mxu1 }
 0xfca   : > { %10427 = vmatprep.mubr.msk.bf16.mxu0 %vm632_vm13, %v16508_v14 }
 0xfcb   : > { %9615 = vmatmul.mubr.bf16.gmra.mrb[120].mxu1 %v16509_v11 }
 0xfcc   : > { %10483 = vmatprep.mubr.msk.bf16.mxu1 %vm632_vm13, %v15998_v61  ;;  %v9293_v61 = vsel %vm2484_vm4, %v9288_v53, %v9292_v12  ;;  %v9147_v53 = vpack.c.bf16 %v9105_v4, %v9105_v4 }
 0xfce   : > { %v16163_v26 = vpop.f32.mrb[16].mxu1  ;;  %v9294_v60 = vrot.slane %v9147_v53, 1 }
 0xfcf   : > { %v8469_v20 = vpop.f32.mrb[17].mxu1 }
 0xfd0   : > { %v16165_v36 = vpop.f32.mrb[18].mxu1  ;;  %v9295_v58 = vsel %vm2484_vm4, %v9290_v45, %v9294_v60 }
 0xfd1   : > { %9002 = vmatmul.mubr.bf16.gmra.mrb[252].mxu0 %v16510_v6  ;;  %v8472_v39 = vpop.f32.mrb[19].mxu1 }
 0xfd2   : > { %10428 = vmatprep.mubr.msk.bf16.mxu0 %vm632_vm13, %v16511_v56 }
 0xfd3   : > { %9623 = vmatmul.mubr.bf16.gmra.mrb[124].mxu1 %v16006_v16  ;;  %v9297_v16 = vsel %vm2484_vm4, %v9292_v12, %v9296_v10 }
 0xfd4   : > { %10484 = vmatprep.mubr.msk.bf16.mxu1 %vm632_vm13, %v9293_v61 }
 0xfd6   : > { %v16176_v34 = vpop.f32.mrb[20].mxu1 }
 0xfd7   : > { %v8477_v22 = vpop.f32.mrb[21].mxu1 }
 0xfd8   : > { %v16178_v54 = vpop.f32.mrb[22].mxu1 }
 0xfd9   : > { %9010 = vmatmul.mubr.bf16.gmra.mrb[0].mxu0 %v16512_v31  ;;  %v8480_v38 = vpop.f32.mrb[23].mxu1 }
 0xfda   : > { %10429 = vmatprep.mubr.msk.bf16.mxu0 %vm632_vm13, %v16513_v28 }
 0xfdb   : > { %9631 = vmatmul.mubr.bf16.gmra.mrb[128].mxu1 %v9291_v33 }
 0xfdc   : > { %10485 = vmatprep.mubr.msk.bf16.mxu1 %vm632_vm13, %v9297_v16 }
 0xfde   : > { %v16188_v25 = vpop.f32.mrb[24].mxu1 }
 0xfdf   : > { %v8485_v30 = vpop.f32.mrb[25].mxu1 }
 0xfe0   : > { %v16190_v63 = vpop.f32.mrb[26].mxu1 }
 0xfe1   : > { %9018 = vmatmul.mubr.bf16.gmra.mrb[4].mxu0 %v16514_v1  ;;  %v8488_v13 = vpop.f32.mrb[27].mxu1 }
 0xfe3   : > { %9639 = vmatmul.mubr.bf16.gmra.mrb[132].mxu1 %v9295_v58 }
 0xfe4   : > { %10486 = vmatprep.mubr.msk.bf16.mxu1 %vm632_vm13, %v9296_v10 }
 0xfe6   : > { %v16195_v0 = vpop.f32.mrb[28].mxu1 }
 0xfe7   : > { %v8493_v37 = vpop.f32.mrb[29].mxu1 }
 0xfe8   : > { %v16197_v27 = vpop.f32.mrb[30].mxu1 }
 0xfe9   : > { %v8496_v2 = vpop.f32.mrb[31].mxu1 }
 0xfeb   : > { %9647 = vmatmul.mubr.bf16.gmra.mrb[136].mxu1 %v9294_v60 }
 0xfee   : > { %v16199_v17 = vpop.f32.mrb[32].mxu1 }
 0xfef   : > { %v8501_v48 = vpop.f32.mrb[33].mxu1 }
 0xff0   : > { %v16201_v19 = vpop.f32.mrb[34].mxu1 }
 0xff1   : > { %v8504_v49 = vpop.f32.mrb[35].mxu1 }
 0xff6   : > { %v16203_v14 = vpop.f32.mrb[36].mxu1 }
 0xff7   : > { %v8509_v11 = vpop.f32.mrb[37].mxu1 }
 0xff8   : > { %v16205_v9 = vpop.f32.mrb[38].mxu1 }
 0xff9   : > { %v8512_v12 = vpop.f32.mrb[39].mxu1 }
 0xffe   : > { %v16207_v21 = vpop.f32.mrb[40].mxu1 }
 0xfff   : > { %v8517_v20 = vpop.f32.mrb[41].mxu1 }
0x1000   : > { %v16209_v23 = vpop.f32.mrb[42].mxu1 }
0x1001   : > { %v8520_v6 = vpop.f32.mrb[43].mxu1 }
0x1006   : > { %v16211_v39 = vpop.f32.mrb[44].mxu1 }
0x1007   : > { %v8525_v56 = vpop.f32.mrb[45].mxu1 }
0x1008   : > { %v16213_v18 = vpop.f32.mrb[46].mxu1 }
0x1009   : > { %v8528_v61 = vpop.f32.mrb[47].mxu1 }
0x100e   : > { %v16215_v24 = vpop.f32.mrb[48].mxu1 }
0x100f   : > { %v8533_v45 = vpop.f32.mrb[49].mxu1 }
0x1010   : > { %v16217_v10 = vpop.f32.mrb[50].mxu1 }
0x1011   : > { %v8536_v4 = vpop.f32.mrb[51].mxu1 }
0x1014   : > { %v8859_v22 = vpop.f32.mrb[180].mxu0 }
0x1015   : > { %v8860_v31 = vadd.f32 %v8859_v22, %v16053_v62  ;;  %v8861_v38 = vpop.f32.mrb[181].mxu0  ;;  %v16228_v62 = vld [vmem:[%s16418_s19] ss:$0 sm:$0xff] }
0x1016   : > { %v8862_v28 = vpop.f32.mrb[182].mxu0  ;;  %v16220_v33 = vpop.f32.mrb[52].mxu1 }
0x1017   : > { %v8863_v53 = vadd.f32 %v8862_v28, %v16055_v7  ;;  %v8864_v16 = vpop.f32.mrb[183].mxu0  ;;  %v8541_v60 = vpop.f32.mrb[53].mxu1 }
0x1018   : > { %v8542_v30 = vpop.f32.mrb[54].mxu1 }
0x1019   : > { %v8543_v1 = vpop.f32.mrb[55].mxu1 }
0x101c   : > { %v8867_v13 = vpop.f32.mrb[184].mxu0 }
0x101d   : > { %v8868_v58 = vadd.f32 %v8867_v13, %v16063_v35  ;;  %v8869_v37 = vpop.f32.mrb[185].mxu0 }
0x101e   : > { %v8870_v2 = vpop.f32.mrb[186].mxu0  ;;  %v9488_v48 = vpop.f32.mrb[56].mxu1 }
0x101f   : > { %v8871_v49 = vadd.f32 %v8870_v2, %v16065_v3  ;;  %v9654_v11 = vadd.f32 %v9488_v48, %v8860_v31  ;;  %v8872_v7 = vpop.f32.mrb[187].mxu0  ;;  %v9490_v12 = vpop.f32.mrb[57].mxu1 }
0x1020   : > { %v9491_v35 = vpop.f32.mrb[58].mxu1 }
0x1021   : > { %v9702_v20 = vadd.f32 %v16228_v62, %v9654_v11  ;;  %v9655_v6 = vadd.f32 %v9491_v35, %v8863_v53  ;;  %v9493_v56 = vpop.f32.mrb[59].mxu1 }
0x1023   : > { %9743 = vst.msk [vmem:[%s16234_s29] sm:$0xff] %vm2276_vm6, %v9702_v20  ;;  %v9703_v3 = vadd.f32 %v16228_v62, %v9655_v6 }
0x1024   : > { %v8875_v61 = vpop.f32.mrb[188].mxu0 }
0x1025   : > { %9744 = vst.msk [vmem:[%s16234_s29 + $0x8] sm:$0xff] %vm2276_vm6, %v9703_v3  ;;  %v8876_v45 = vadd.f32 %v8875_v61, %v16073_v55  ;;  %v8877_v4 = vpop.f32.mrb[189].mxu0 }
0x1026   : > { %v8878_v22 = vpop.f32.mrb[190].mxu0  ;;  %v9496_v31 = vpop.f32.mrb[60].mxu1 }
0x1027   : > { %v8879_v38 = vadd.f32 %v8878_v22, %v16075_v41  ;;  %v9656_v28 = vadd.f32 %v9496_v31, %v8868_v58  ;;  %v8880_v16 = vpop.f32.mrb[191].mxu0  ;;  %v9498_v53 = vpop.f32.mrb[61].mxu1 }
0x1028   : > { %v9499_v60 = vpop.f32.mrb[62].mxu1 }
0x1029   : > { %v9704_v30 = vadd.f32 %v16228_v62, %v9656_v28  ;;  %v9657_v1 = vadd.f32 %v9499_v60, %v8871_v49  ;;  %v9501_v13 = vpop.f32.mrb[63].mxu1 }
0x102b   : > { %9745 = vst.msk [vmem:[%s16234_s29 + $0x10] sm:$0xff] %vm2276_vm6, %v9704_v30  ;;  %v9705_v37 = vadd.f32 %v16228_v62, %v9657_v1 }
0x102c   : > { %v8883_v2 = vpop.f32.mrb[192].mxu0 }
0x102d   : > { %9746 = vst.msk [vmem:[%s16234_s29 + $0x18] sm:$0xff] %vm2276_vm6, %v9705_v37  ;;  %v8884_v55 = vadd.f32 %v8883_v2, %v16083_v15  ;;  %v8885_v41 = vpop.f32.mrb[193].mxu0 }
0x102e   : > { %v8886_v58 = vpop.f32.mrb[194].mxu0  ;;  %v9504_v48 = vpop.f32.mrb[64].mxu1 }
0x102f   : > { %v8887_v11 = vadd.f32 %v8886_v58, %v16085_v5  ;;  %v9658_v7 = vadd.f32 %v9504_v48, %v8876_v45  ;;  %v8888_v12 = vpop.f32.mrb[195].mxu0  ;;  %v9506_v49 = vpop.f32.mrb[65].mxu1 }
0x1030   : > { %v9507_v35 = vpop.f32.mrb[66].mxu1 }
0x1031   : > { %v9706_v20 = vadd.f32 %v16228_v62, %v9658_v7  ;;  %v9659_v6 = vadd.f32 %v9507_v35, %v8879_v38  ;;  %v9509_v56 = vpop.f32.mrb[67].mxu1 }
0x1033   : > { %9747 = vst.msk [vmem:[%s16234_s29 + $0x20] sm:$0xff] %vm2276_vm6, %v9706_v20  ;;  %v9707_v3 = vadd.f32 %v16228_v62, %v9659_v6 }
0x1034   : > { %v8891_v61 = vpop.f32.mrb[196].mxu0 }
0x1035   : > { %9748 = vst.msk [vmem:[%s16234_s29 + $0x28] sm:$0xff] %vm2276_vm6, %v9707_v3  ;;  %v8892_v15 = vadd.f32 %v8891_v61, %v16093_v8  ;;  %v8893_v5 = vpop.f32.mrb[197].mxu0 }
0x1036   : > { %v8894_v45 = vpop.f32.mrb[198].mxu0  ;;  %v9512_v4 = vpop.f32.mrb[68].mxu1 }
0x1037   : > { %v8895_v22 = vadd.f32 %v8894_v45, %v16095_v44  ;;  %v9660_v31 = vadd.f32 %v9512_v4, %v8884_v55  ;;  %v8896_v28 = vpop.f32.mrb[199].mxu0  ;;  %v9514_v38 = vpop.f32.mrb[69].mxu1 }
0x1038   : > { %v9515_v16 = vpop.f32.mrb[70].mxu1 }
0x1039   : > { %v9708_v53 = vadd.f32 %v16228_v62, %v9660_v31  ;;  %v9661_v60 = vadd.f32 %v9515_v16, %v8887_v11  ;;  %v9517_v30 = vpop.f32.mrb[71].mxu1 }
0x103b   : > { %9749 = vst.msk [vmem:[%s16234_s29 + $0x30] sm:$0xff] %vm2276_vm6, %v9708_v53  ;;  %v9709_v1 = vadd.f32 %v16228_v62, %v9661_v60 }
0x103c   : > { %v8899_v13 = vpop.f32.mrb[200].mxu0 }
0x103d   : > { %9750 = vst.msk [vmem:[%s16234_s29 + $0x38] sm:$0xff] %vm2276_vm6, %v9709_v1  ;;  %v8900_v8 = vadd.f32 %v8899_v13, %v16103_v29  ;;  %v8901_v44 = vpop.f32.mrb[201].mxu0 }
0x103e   : > { %v8902_v37 = vpop.f32.mrb[202].mxu0  ;;  %v9520_v2 = vpop.f32.mrb[72].mxu1 }
0x103f   : > { %v8903_v55 = vadd.f32 %v8902_v37, %v16105_v57  ;;  %v9662_v41 = vadd.f32 %v9520_v2, %v8892_v15  ;;  %v8904_v58 = vpop.f32.mrb[203].mxu0  ;;  %v9522_v48 = vpop.f32.mrb[73].mxu1 }
0x1040   : > { %v9523_v11 = vpop.f32.mrb[74].mxu1 }
0x1041   : > { %v9710_v7 = vadd.f32 %v16228_v62, %v9662_v41  ;;  %v9663_v12 = vadd.f32 %v9523_v11, %v8895_v22  ;;  %v9525_v49 = vpop.f32.mrb[75].mxu1 }
0x1043   : > { %9751 = vst.msk [vmem:[%s16234_s29 + $0x40] sm:$0xff] %vm2276_vm6, %v9710_v7  ;;  %v9711_v35 = vadd.f32 %v16228_v62, %v9663_v12 }
0x1044   : > { %v8907_v20 = vpop.f32.mrb[204].mxu0 }
0x1045   : > { %9752 = vst.msk [vmem:[%s16234_s29 + $0x48] sm:$0xff] %vm2276_vm6, %v9711_v35  ;;  %v8908_v29 = vadd.f32 %v8907_v20, %v16113_v47  ;;  %v8909_v57 = vpop.f32.mrb[205].mxu0 }
0x1046   : > { %v8910_v6 = vpop.f32.mrb[206].mxu0  ;;  %v9528_v56 = vpop.f32.mrb[76].mxu1 }
0x1047   : > { %v8911_v3 = vadd.f32 %v8910_v6, %v16115_v42  ;;  %v9664_v61 = vadd.f32 %v9528_v56, %v8900_v8  ;;  %v8912_v15 = vpop.f32.mrb[207].mxu0  ;;  %v9530_v5 = vpop.f32.mrb[77].mxu1 }
0x1048   : > { %v9531_v45 = vpop.f32.mrb[78].mxu1 }
0x1049   : > { %v9712_v4 = vadd.f32 %v16228_v62, %v9664_v61  ;;  %v9665_v22 = vadd.f32 %v9531_v45, %v8903_v55  ;;  %v9533_v31 = vpop.f32.mrb[79].mxu1 }
0x104b   : > { %9753 = vst.msk [vmem:[%s16234_s29 + $0x50] sm:$0xff] %vm2276_vm6, %v9712_v4  ;;  %v9713_v28 = vadd.f32 %v16228_v62, %v9665_v22 }
0x104c   : > { %v8915_v38 = vpop.f32.mrb[208].mxu0 }
0x104d   : > { %9754 = vst.msk [vmem:[%s16234_s29 + $0x58] sm:$0xff] %vm2276_vm6, %v9713_v28  ;;  %v8916_v47 = vadd.f32 %v8915_v38, %v16123_v40  ;;  %v8917_v42 = vpop.f32.mrb[209].mxu0 }
0x104e   : > { %v8918_v16 = vpop.f32.mrb[210].mxu0  ;;  %v9536_v53 = vpop.f32.mrb[80].mxu1 }
0x104f   : > { %v8919_v60 = vadd.f32 %v8918_v16, %v16125_v51  ;;  %v9666_v30 = vadd.f32 %v9536_v53, %v8908_v29  ;;  %v8920_v1 = vpop.f32.mrb[211].mxu0  ;;  %v9538_v13 = vpop.f32.mrb[81].mxu1 }
0x1050   : > { %v9539_v8 = vpop.f32.mrb[82].mxu1 }
0x1051   : > { %v9714_v44 = vadd.f32 %v16228_v62, %v9666_v30  ;;  %v9667_v37 = vadd.f32 %v9539_v8, %v8911_v3  ;;  %v9541_v2 = vpop.f32.mrb[83].mxu1 }
0x1053   : > { %9755 = vst.msk [vmem:[%s16234_s29 + $0x60] sm:$0xff] %vm2276_vm6, %v9714_v44  ;;  %v9715_v55 = vadd.f32 %v16228_v62, %v9667_v37 }
0x1054   : > { %v8923_v41 = vpop.f32.mrb[212].mxu0 }
0x1055   : > { %9756 = vst.msk [vmem:[%s16234_s29 + $0x68] sm:$0xff] %vm2276_vm6, %v9715_v55  ;;  %v8924_v40 = vadd.f32 %v8923_v41, %v16133_v32  ;;  %v8925_v51 = vpop.f32.mrb[213].mxu0 }
0x1056   : > { %v8926_v58 = vpop.f32.mrb[214].mxu0  ;;  %v9544_v48 = vpop.f32.mrb[84].mxu1 }
0x1057   : > { %v8927_v11 = vadd.f32 %v8926_v58, %v16135_v52  ;;  %v9668_v7 = vadd.f32 %v9544_v48, %v8916_v47  ;;  %v8928_v12 = vpop.f32.mrb[215].mxu0  ;;  %v9546_v49 = vpop.f32.mrb[85].mxu1 }
0x1058   : > { %v9547_v35 = vpop.f32.mrb[86].mxu1 }
0x1059   : > { %v9716_v20 = vadd.f32 %v16228_v62, %v9668_v7  ;;  %v9669_v29 = vadd.f32 %v9547_v35, %v8919_v60  ;;  %v9549_v57 = vpop.f32.mrb[87].mxu1 }
0x105b   : > { %9757 = vst.msk [vmem:[%s16234_s29 + $0x70] sm:$0xff] %vm2276_vm6, %v9716_v20  ;;  %v9717_v6 = vadd.f32 %v16228_v62, %v9669_v29 }
0x105c   : > { %v8931_v56 = vpop.f32.mrb[216].mxu0 }
0x105d   : > { %9758 = vst.msk [vmem:[%s16234_s29 + $0x78] sm:$0xff] %vm2276_vm6, %v9717_v6  ;;  %v8932_v32 = vadd.f32 %v8931_v56, %v16143_v50  ;;  %v8933_v52 = vpop.f32.mrb[217].mxu0 }
0x105e   : > { %v8934_v3 = vpop.f32.mrb[218].mxu0  ;;  %v9552_v61 = vpop.f32.mrb[88].mxu1 }
0x105f   : > { %v8935_v15 = vadd.f32 %v8934_v3, %v16145_v46  ;;  %v9670_v5 = vadd.f32 %v9552_v61, %v8924_v40  ;;  %v8936_v45 = vpop.f32.mrb[219].mxu0  ;;  %v9554_v4 = vpop.f32.mrb[89].mxu1 }
0x1060   : > { %v9555_v22 = vpop.f32.mrb[90].mxu1 }
0x1061   : > { %v9718_v31 = vadd.f32 %v16228_v62, %v9670_v5  ;;  %v9671_v28 = vadd.f32 %v9555_v22, %v8927_v11  ;;  %v9557_v38 = vpop.f32.mrb[91].mxu1 }
0x1063   : > { %9759 = vst.msk [vmem:[%s16234_s29 + $0x80] sm:$0xff] %vm2276_vm6, %v9718_v31  ;;  %v9719_v47 = vadd.f32 %v16228_v62, %v9671_v28 }
0x1064   : > { %v8939_v42 = vpop.f32.mrb[220].mxu0 }
0x1065   : > { %9760 = vst.msk [vmem:[%s16234_s29 + $0x88] sm:$0xff] %vm2276_vm6, %v9719_v47  ;;  %v8940_v50 = vadd.f32 %v8939_v42, %v16153_v43  ;;  %v8941_v46 = vpop.f32.mrb[221].mxu0 }
0x1066   : > { %v8942_v16 = vpop.f32.mrb[222].mxu0  ;;  %v9560_v53 = vpop.f32.mrb[92].mxu1 }
0x1067   : > { %v8943_v60 = vadd.f32 %v8942_v16, %v16155_v59  ;;  %v9672_v30 = vadd.f32 %v9560_v53, %v8932_v32  ;;  %v8944_v1 = vpop.f32.mrb[223].mxu0  ;;  %v9562_v13 = vpop.f32.mrb[93].mxu1 }
0x1068   : > { %v9563_v8 = vpop.f32.mrb[94].mxu1 }
0x1069   : > { %v9720_v44 = vadd.f32 %v16228_v62, %v9672_v30  ;;  %v9673_v37 = vadd.f32 %v9563_v8, %v8935_v15  ;;  %v9565_v2 = vpop.f32.mrb[95].mxu1 }
0x106b   : > { %9761 = vst.msk [vmem:[%s16234_s29 + $0x90] sm:$0xff] %vm2276_vm6, %v9720_v44  ;;  %v9721_v55 = vadd.f32 %v16228_v62, %v9673_v37 }
0x106c   : > { %v8947_v41 = vpop.f32.mrb[224].mxu0 }
0x106d   : > { %9762 = vst.msk [vmem:[%s16234_s29 + $0x98] sm:$0xff] %vm2276_vm6, %v9721_v55  ;;  %v8948_v43 = vadd.f32 %v8947_v41, %v16163_v26  ;;  %v8949_v59 = vpop.f32.mrb[225].mxu0 }
0x106e   : > { %v8950_v40 = vpop.f32.mrb[226].mxu0  ;;  %v9568_v51 = vpop.f32.mrb[96].mxu1 }
0x106f   : > { %v8951_v58 = vadd.f32 %v8950_v40, %v16165_v36  ;;  %v9674_v48 = vadd.f32 %v9568_v51, %v8940_v50  ;;  %v8952_v11 = vpop.f32.mrb[227].mxu0  ;;  %v9570_v7 = vpop.f32.mrb[97].mxu1 }
0x1070   : > { %v9571_v12 = vpop.f32.mrb[98].mxu1 }
0x1071   : > { %v9722_v49 = vadd.f32 %v16228_v62, %v9674_v48  ;;  %v9675_v35 = vadd.f32 %v9571_v12, %v8943_v60  ;;  %v9573_v20 = vpop.f32.mrb[99].mxu1 }
0x1073   : > { %9763 = vst.msk [vmem:[%s16234_s29 + $0xa0] sm:$0xff] %vm2276_vm6, %v9722_v49  ;;  %v9723_v29 = vadd.f32 %v16228_v62, %v9675_v35 }
0x1074   : > { %v8955_v57 = vpop.f32.mrb[228].mxu0 }
0x1075   : > { %9764 = vst.msk [vmem:[%s16234_s29 + $0xa8] sm:$0xff] %vm2276_vm6, %v9723_v29  ;;  %v8956_v26 = vadd.f32 %v8955_v57, %v16176_v34  ;;  %v8957_v36 = vpop.f32.mrb[229].mxu0 }
0x1076   : > { %v8958_v6 = vpop.f32.mrb[230].mxu0  ;;  %v9576_v56 = vpop.f32.mrb[100].mxu1 }
0x1077   : > { %v8959_v32 = vadd.f32 %v8958_v6, %v16178_v54  ;;  %v9676_v52 = vadd.f32 %v9576_v56, %v8948_v43  ;;  %v8960_v3 = vpop.f32.mrb[231].mxu0  ;;  %v9578_v61 = vpop.f32.mrb[101].mxu1 }
0x1078   : > { %v9579_v15 = vpop.f32.mrb[102].mxu1 }
0x1079   : > { %v9724_v5 = vadd.f32 %v16228_v62, %v9676_v52  ;;  %v9677_v45 = vadd.f32 %v9579_v15, %v8951_v58  ;;  %v9581_v4 = vpop.f32.mrb[103].mxu1 }
0x107b   : > { %9765 = vst.msk [vmem:[%s16234_s29 + $0xb0] sm:$0xff] %vm2276_vm6, %v9724_v5  ;;  %v9725_v22 = vadd.f32 %v16228_v62, %v9677_v45 }
0x107c   : > { %v8963_v31 = vpop.f32.mrb[232].mxu0 }
0x107d   : > { %9766 = vst.msk [vmem:[%s16234_s29 + $0xb8] sm:$0xff] %vm2276_vm6, %v9725_v22  ;;  %v8964_v34 = vadd.f32 %v8963_v31, %v16188_v25  ;;  %v8965_v54 = vpop.f32.mrb[233].mxu0 }
0x107e   : > { %v8966_v28 = vpop.f32.mrb[234].mxu0  ;;  %v9584_v38 = vpop.f32.mrb[104].mxu1 }
0x107f   : > { %v8967_v47 = vadd.f32 %v8966_v28, %v16190_v63  ;;  %v9678_v42 = vadd.f32 %v9584_v38, %v8956_v26  ;;  %v8968_v50 = vpop.f32.mrb[235].mxu0  ;;  %v9586_v46 = vpop.f32.mrb[105].mxu1 }
0x1080   : > { %v9587_v16 = vpop.f32.mrb[106].mxu1 }
0x1081   : > { %v9726_v53 = vadd.f32 %v16228_v62, %v9678_v42  ;;  %v9679_v60 = vadd.f32 %v9587_v16, %v8959_v32  ;;  %v9589_v30 = vpop.f32.mrb[107].mxu1 }
0x1083   : > { %9767 = vst.msk [vmem:[%s16234_s29 + $0xc0] sm:$0xff] %vm2276_vm6, %v9726_v53  ;;  %v9727_v1 = vadd.f32 %v16228_v62, %v9679_v60 }
0x1084   : > { %v8971_v13 = vpop.f32.mrb[236].mxu0 }
0x1085   : > { %9768 = vst.msk [vmem:[%s16234_s29 + $0xc8] sm:$0xff] %vm2276_vm6, %v9727_v1  ;;  %v8972_v25 = vadd.f32 %v8971_v13, %v16195_v0  ;;  %v8973_v63 = vpop.f32.mrb[237].mxu0 }
0x1086   : > { %v8974_v8 = vpop.f32.mrb[238].mxu0  ;;  %v9592_v44 = vpop.f32.mrb[108].mxu1 }
0x1087   : > { %v8975_v37 = vadd.f32 %v8974_v8, %v16197_v27  ;;  %v9680_v2 = vadd.f32 %v9592_v44, %v8964_v34  ;;  %v8976_v55 = vpop.f32.mrb[239].mxu0  ;;  %v9594_v41 = vpop.f32.mrb[109].mxu1 }
0x1088   : > { %v9595_v43 = vpop.f32.mrb[110].mxu1 }
0x1089   : > { %v9728_v59 = vadd.f32 %v16228_v62, %v9680_v2  ;;  %v9681_v40 = vadd.f32 %v9595_v43, %v8967_v47  ;;  %v9597_v51 = vpop.f32.mrb[111].mxu1 }
0x108b   : > { %9769 = vst.msk [vmem:[%s16234_s29 + $0xd0] sm:$0xff] %vm2276_vm6, %v9728_v59  ;;  %v9729_v58 = vadd.f32 %v16228_v62, %v9681_v40 }
0x108c   : > { %v8979_v48 = vpop.f32.mrb[240].mxu0 }
0x108d   : > { %9770 = vst.msk [vmem:[%s16234_s29 + $0xd8] sm:$0xff] %vm2276_vm6, %v9729_v58  ;;  %v8980_v0 = vadd.f32 %v8979_v48, %v16199_v17  ;;  %v8981_v27 = vpop.f32.mrb[241].mxu0 }
0x108e   : > { %v8982_v11 = vpop.f32.mrb[242].mxu0  ;;  %v9600_v7 = vpop.f32.mrb[112].mxu1 }
0x108f   : > { %v8983_v12 = vadd.f32 %v8982_v11, %v16201_v19  ;;  %v9682_v49 = vadd.f32 %v9600_v7, %v8972_v25  ;;  %v8984_v35 = vpop.f32.mrb[243].mxu0  ;;  %v9602_v20 = vpop.f32.mrb[113].mxu1 }
0x1090   : > { %v9603_v29 = vpop.f32.mrb[114].mxu1 }
0x1091   : > { %v9730_v57 = vadd.f32 %v16228_v62, %v9682_v49  ;;  %v9683_v26 = vadd.f32 %v9603_v29, %v8975_v37  ;;  %v9605_v36 = vpop.f32.mrb[115].mxu1 }
0x1093   : > { %9771 = vst.msk [vmem:[%s16234_s29 + $0xe0] sm:$0xff] %vm2276_vm6, %v9730_v57  ;;  %v9731_v6 = vadd.f32 %v16228_v62, %v9683_v26 }
0x1094   : > { %v8987_v56 = vpop.f32.mrb[244].mxu0 }
0x1095   : > { %9772 = vst.msk [vmem:[%s16234_s29 + $0xe8] sm:$0xff] %vm2276_vm6, %v9731_v6  ;;  %v8988_v17 = vadd.f32 %v8987_v56, %v16203_v14  ;;  %v8989_v19 = vpop.f32.mrb[245].mxu0 }
0x1096   : > { %v8990_v32 = vpop.f32.mrb[246].mxu0  ;;  %v9608_v52 = vpop.f32.mrb[116].mxu1 }
0x1097   : > { %v8991_v3 = vadd.f32 %v8990_v32, %v16205_v9  ;;  %v9684_v61 = vadd.f32 %v9608_v52, %v8980_v0  ;;  %v8992_v15 = vpop.f32.mrb[247].mxu0  ;;  %v9610_v5 = vpop.f32.mrb[117].mxu1 }
0x1098   : > { %v9611_v45 = vpop.f32.mrb[118].mxu1 }
0x1099   : > { %v9732_v4 = vadd.f32 %v16228_v62, %v9684_v61  ;;  %v9685_v22 = vadd.f32 %v9611_v45, %v8983_v12  ;;  %v9613_v31 = vpop.f32.mrb[119].mxu1 }
0x109b   : > { %9773 = vst.msk [vmem:[%s16234_s29 + $0xf0] sm:$0xff] %vm2276_vm6, %v9732_v4  ;;  %v9733_v34 = vadd.f32 %v16228_v62, %v9685_v22 }
0x109c   : > { %v8995_v54 = vpop.f32.mrb[248].mxu0 }
0x109d   : > { %9774 = vst.msk [vmem:[%s16234_s29 + $0xf8] sm:$0xff] %vm2276_vm6, %v9733_v34  ;;  %v8996_v14 = vadd.f32 %v8995_v54, %v16207_v21  ;;  %v8997_v9 = vpop.f32.mrb[249].mxu0 }
0x109e   : > { %v8998_v28 = vpop.f32.mrb[250].mxu0  ;;  %v9616_v38 = vpop.f32.mrb[120].mxu1 }
0x109f   : > { %v8999_v47 = vadd.f32 %v8998_v28, %v16209_v23  ;;  %v9686_v42 = vadd.f32 %v9616_v38, %v8988_v17  ;;  %v9000_v50 = vpop.f32.mrb[251].mxu0  ;;  %v9618_v46 = vpop.f32.mrb[121].mxu1 }
0x10a0   : > { %v9619_v16 = vpop.f32.mrb[122].mxu1 }
0x10a1   : > { %v9734_v53 = vadd.f32 %v16228_v62, %v9686_v42  ;;  %v9687_v60 = vadd.f32 %v9619_v16, %v8991_v3  ;;  %v9621_v30 = vpop.f32.mrb[123].mxu1 }
0x10a3   : > { %9775 = vst.msk [vmem:[%s16234_s29 + $0x100] sm:$0xff] %vm2276_vm6, %v9734_v53  ;;  %v9735_v1 = vadd.f32 %v16228_v62, %v9687_v60 }
0x10a4   : > { %v9003_v13 = vpop.f32.mrb[252].mxu0 }
0x10a5   : > { %9776 = vst.msk [vmem:[%s16234_s29 + $0x108] sm:$0xff] %vm2276_vm6, %v9735_v1  ;;  %v9004_v21 = vadd.f32 %v9003_v13, %v16211_v39  ;;  %v9005_v23 = vpop.f32.mrb[253].mxu0 }
0x10a6   : > { %v9006_v25 = vpop.f32.mrb[254].mxu0  ;;  %v9624_v63 = vpop.f32.mrb[124].mxu1 }
0x10a7   : > { %v9007_v8 = vadd.f32 %v9006_v25, %v16213_v18  ;;  %v9688_v44 = vadd.f32 %v9624_v63, %v8996_v14  ;;  %v9008_v37 = vpop.f32.mrb[255].mxu0  ;;  %v9626_v2 = vpop.f32.mrb[125].mxu1 }
0x10a8   : > { %v9627_v55 = vpop.f32.mrb[126].mxu1 }
0x10a9   : > { %v9736_v41 = vadd.f32 %v16228_v62, %v9688_v44  ;;  %v9689_v43 = vadd.f32 %v9627_v55, %v8999_v47  ;;  %v9629_v59 = vpop.f32.mrb[127].mxu1 }
0x10ab   : > { %9777 = vst.msk [vmem:[%s16234_s29 + $0x110] sm:$0xff] %vm2276_vm6, %v9736_v41  ;;  %v9737_v40 = vadd.f32 %v16228_v62, %v9689_v43 }
0x10ac   : > { %v9011_v51 = vpop.f32.mrb[0].mxu0 }
0x10ad   : > { %9778 = vst.msk [vmem:[%s16234_s29 + $0x118] sm:$0xff] %vm2276_vm6, %v9737_v40  ;;  %v9012_v39 = vadd.f32 %v9011_v51, %v16215_v24  ;;  %v9013_v18 = vpop.f32.mrb[1].mxu0 }
0x10ae   : > { %v9014_v58 = vpop.f32.mrb[2].mxu0  ;;  %v9632_v48 = vpop.f32.mrb[128].mxu1 }
0x10af   : > { %v9015_v0 = vadd.f32 %v9014_v58, %v16217_v10  ;;  %v9690_v27 = vadd.f32 %v9632_v48, %v9004_v21  ;;  %v9016_v11 = vpop.f32.mrb[3].mxu0  ;;  %v9634_v7 = vpop.f32.mrb[129].mxu1 }
0x10b0   : > { %v9635_v12 = vpop.f32.mrb[130].mxu1 }
0x10b1   : > { %v9738_v49 = vadd.f32 %v16228_v62, %v9690_v27  ;;  %v9691_v35 = vadd.f32 %v9635_v12, %v9007_v8  ;;  %v9637_v20 = vpop.f32.mrb[131].mxu1 }
0x10b3   : > { %9779 = vst.msk [vmem:[%s16234_s29 + $0x120] sm:$0xff] %vm2276_vm6, %v9738_v49  ;;  %v9739_v29 = vadd.f32 %v16228_v62, %v9691_v35 }
0x10b4   : > { %v9019_v24 = vpop.f32.mrb[4].mxu0 }
0x10b5   : > { %9780 = vst.msk [vmem:[%s16234_s29 + $0x128] sm:$0xff] %vm2276_vm6, %v9739_v29  ;;  %v9020_v57 = vadd.f32 %v9019_v24, %v16220_v33  ;;  %v9021_v10 = vpop.f32.mrb[5].mxu0 }
0x10b6   : > { %v9022_v26 = vpop.f32.mrb[6].mxu0  ;;  %v9640_v36 = vpop.f32.mrb[132].mxu1 }
0x10b7   : > { %v9692_v6 = vadd.f32 %v9640_v36, %v9012_v39  ;;  %v9023_v56 = vpop.f32.mrb[7].mxu0  ;;  %v9642_v17 = vpop.f32.mrb[133].mxu1 }
0x10b8   : > { %v9643_v19 = vpop.f32.mrb[134].mxu1 }
0x10b9   : > { %v9740_v32 = vadd.f32 %v16228_v62, %v9692_v6  ;;  %v9693_v52 = vadd.f32 %v9643_v19, %v9015_v0  ;;  %v9645_v3 = vpop.f32.mrb[135].mxu1 }
0x10bb   : > { %9781 = vst.msk [vmem:[%s16234_s29 + $0x130] sm:$0xff] %vm2276_vm6, %v9740_v32  ;;  %v9741_v61 = vadd.f32 %v16228_v62, %v9693_v52 }
0x10bd   : > { %9782 = vst.msk [vmem:[%s16234_s29 + $0x138] sm:$0xff] %vm2276_vm6, %v9741_v61 }
0x10be   : > { %v9648_v15 = vpop.f32.mrb[136].mxu1 }
0x10bf   : > { %v9694_v33 = vadd.f32 %v9648_v15, %v9020_v57  ;;  %v9650_v5 = vpop.f32.mrb[137].mxu1 }
0x10c0   : > { %v9651_v45 = vpop.f32.mrb[138].mxu1 }
0x10c1   : > { %v9742_v4 = vadd.f32 %v16228_v62, %v9694_v33  ;;  %v9652_v22 = vpop.f32.mrb[139].mxu1 }
0x10c3   : > { %9783 = vst.msk [vmem:[%s16234_s29 + $0x140] sm:$0xf] %vm5361_vm10, %v9742_v4 }
0x10c4 PF: > { %s30_s1 = sadd.s32 1, %s12216_s1  }
0x10c5   : > { %p27_p4 = scmp.ge.s32.totalorder %s30_s1, 4  }
0x10c7   :  { %29 = sbr.rel (!%p27_p4) target bundleno = 6 (0x6), region = 142 }

</bundles_post_ra>
